<compile_context>
chip_gen: v6e
topology: v6e:2x2x1
jax: 0.10.0
libtpu: 0.0.40
codegen_flags: <defaults>
</compile_context>

<pallas_src>
import functools

import numpy as np

import jax
import jax.numpy as jnp
from jax.experimental import pallas as pl
from jax.experimental.pallas import tpu as pltpu

LANE = 128

# Everything here fits comfortably; 32 MiB scoped VMEM also stays well under
# v7x's 64 MiB per-TensorCore budget.
_CPARAMS = pltpu.CompilerParams(vmem_limit_bytes=32 * 1024 * 1024)


def _round_up(x, m):
    return (x + m - 1) // m * m


# ----------------------------- Pallas kernels ------------------------------

def _stem_kernel(a_ref, w_ref, b_ref, alpha_ref, o_ref):
    """o = PReLU(a @ w + b, alpha)   (stem conv im2col matmul + folded BN)."""
    z = jnp.dot(a_ref[...], w_ref[...], preferred_element_type=jnp.float32)
    z = z + b_ref[...]
    alpha = alpha_ref[0, 0]
    o_ref[...] = jnp.where(z > 0, z, alpha * z).astype(jnp.bfloat16)


def _maxpool_kernel(p00_ref, p01_ref, p10_ref, p11_ref, o_ref, *, ho, wo):
    # out(p, q) = max_{di,dj in 0..2} x_pad[2p+di, 2q+dj]
    # phase[r][c] = x_pad[r::2, c::2]; each tap is an unstrided offset slice.
    phases = {(0, 0): p00_ref[...], (0, 1): p01_ref[...],
              (1, 0): p10_ref[...], (1, 1): p11_ref[...]}
    acc = None
    for di in range(3):
        for dj in range(3):
            v = phases[(di % 2, dj % 2)][:, di // 2:di // 2 + ho,
                                            dj // 2:dj // 2 + wo, :]
            acc = v if acc is None else jnp.maximum(acc, v)
    o_ref[...] = acc


def _block_kernel(*refs, has_ds, use_se):
    """One whole BasicBlock (optionally with the preceding SE layer folded in).

        x -(SE gate)-> conv3x3(s)+BN+ReLU -> conv3x3(1)+BN --+--> ReLU -> out
             \\-------- identity / conv1x1(s)+BN -------------/

    Both 3x3 convs are computed per-tap as (G_t @ X) @ W_t on the MXU; the
    constant 0/1 matrices G_t implement the im2col row-gather (zero padding
    and stride) entirely in-kernel.  Intermediates stay in VMEM/vregs.
    """
    if use_se:
        (x_ref, p_ref, bc_ref, wse1_ref, wse2_ref, sea_ref,
         g1_ref, w1_ref, b1_ref, g2_ref, w2_ref, b2_ref, *rest) = refs
    else:
        (x_ref, g1_ref, w1_ref, b1_ref, g2_ref, w2_ref, b2_ref, *rest) = refs
    if has_ds:
        wd_ref, bd_ref, o_ref = rest
    else:
        (o_ref,) = rest

    if use_se:
        # SE: avgpool -> fc -> PReLU -> fc -> sigmoid -> channel gate, applied
        # to this block's input (both the conv path and the shortcut path).
        xf = x_ref[...].astype(jnp.float32)
        pooled = jnp.dot(p_ref[...], xf, preferred_element_type=jnp.float32)
        h = jnp.dot(pooled, wse1_ref[...], preferred_element_type=jnp.float32)
        a = sea_ref[0, 0]
        h = jnp.where(h > 0, h, a * h)                       # PReLU
        gate = jax.nn.sigmoid(
            jnp.dot(h, wse2_ref[...], preferred_element_type=jnp.float32))
        gate_rows = jnp.dot(bc_ref[...], gate,
                            preferred_element_type=jnp.float32)
        xb = (xf * gate_rows).astype(jnp.bfloat16)
    else:
        xb = x_ref[...]

    mp_out = o_ref.shape[0]

    # conv1 (3x3, stride s) + folded BN + ReLU -------------------------------
    acc1 = jnp.zeros((mp_out, LANE), jnp.float32)
    center = None
    for t in range(9):
        xt = jnp.dot(g1_ref[t], xb,
                     preferred_element_type=jnp.float32).astype(jnp.bfloat16)
        if t == 4:
            center = xt          # center tap == the 1x1 downsample's input
        acc1 = acc1 + jnp.dot(xt, w1_ref[t],
                              preferred_element_type=jnp.float32)
    y1 = jnp.maximum(acc1 + b1_ref[...], 0.0).astype(jnp.bfloat16)

    # shortcut branch --------------------------------------------------------
    if has_ds:
        res = jnp.dot(center, wd_ref[...],
                      preferred_element_type=jnp.float32) + bd_ref[...]
    else:
        res = xb.astype(jnp.float32)

    # conv2 (3x3, stride 1) + folded BN + residual + ReLU --------------------
    acc2 = jnp.zeros((mp_out, LANE), jnp.float32)
    for t in range(9):
        yt = jnp.dot(g2_ref[t], y1,
                     preferred_element_type=jnp.float32).astype(jnp.bfloat16)
        acc2 = acc2 + jnp.dot(yt, w2_ref[t],
                              preferred_element_type=jnp.float32)
    out = jnp.maximum(acc2 + b2_ref[...] + res, 0.0)
    o_ref[...] = out.astype(jnp.bfloat16)


def _tail_kernel(x_ref, pg_ref, w51_ref, b51_ref, w61_ref, b61_ref,
                 emb_ref, log_ref):
    """gap -> (Dropout = identity in eval) -> fc51 -> fc61, one launch."""
    pooled = jnp.dot(pg_ref[...], x_ref[...].astype(jnp.float32),
                     preferred_element_type=jnp.float32)
    emb = jnp.dot(pooled.astype(jnp.bfloat16), w51_ref[...],
                  preferred_element_type=jnp.float32) + b51_ref[...]
    emb_ref[...] = emb
    log_ref[...] = jnp.dot(emb.astype(jnp.bfloat16), w61_ref[...],
                           preferred_element_type=jnp.float32) + b61_ref[...]


# ------------------------- constant gather matrices -------------------------

def _conv_out_hw(h, w, stride):
    return (h + 2 - 3) // stride + 1, (w + 2 - 3) // stride + 1


@functools.lru_cache(maxsize=None)
def _gather_mats(n, h, w, stride, mp_out, mp_in):
    """0/1 matrices G[t] so that (G[t] @ X2d) is the (di,dj) tap of the im2col
    of a 3x3 / pad-1 / stride-s conv (zero rows where the tap hits padding)."""
    ho, wo = _conv_out_hw(h, w, stride)
    g = np.zeros((9, mp_out, mp_in), np.float32)
    for di in range(3):
        for dj in range(3):
            t = di * 3 + dj
            for nn in range(n):
                for p in range(ho):
                    for q in range(wo):
                        ii = stride * p + di - 1
                        jj = stride * q + dj - 1
                        if 0 <= ii < h and 0 <= jj < w:
                            g[t, (nn * ho + p) * wo + q,
                                 (nn * h + ii) * w + jj] = 1.0
    return jnp.asarray(g, jnp.bfloat16)


@functools.lru_cache(maxsize=None)
def _se_pool_bcast(n, h, w, mp_in):
    """Constant matrices for per-batch spatial mean and its row broadcast."""
    hw = h * w
    pool = np.zeros((8, mp_in), np.float32)
    bcast = np.zeros((mp_in, 8), np.float32)
    for nn in range(n):
        pool[nn, nn * hw:(nn + 1) * hw] = 1.0 / hw
        bcast[nn * hw:(nn + 1) * hw, nn] = 1.0
    return jnp.asarray(pool), jnp.asarray(bcast)


# ----------------------------- Pallas wrappers ------------------------------

def _im2col_stem(x_nhwc, kh, kw, stride, pad, k_pad):
    """Stem patch matrix [N*Ho*Wo, k_pad] in bf16 (cast once before concat)."""
    n, h, w, c = x_nhwc.shape
    ho = (h + 2 * pad - kh) // stride + 1
    wo = (w + 2 * pad - kw) // stride + 1
    xp = jnp.pad(x_nhwc, ((0, 0), (pad, pad), (pad, pad), (0, 0)))
    xp = xp.astype(jnp.bfloat16)
    cols = [xp[:, i:i + stride * (ho - 1) + 1:stride,
                  j:j + stride * (wo - 1) + 1:stride, :]
            for i in range(kh) for j in range(kw)]
    k = kh * kw * c
    if k_pad > k:
        cols.append(jnp.zeros((n, ho, wo, k_pad - k), jnp.bfloat16))
    a = jnp.concatenate(cols, axis=-1).reshape(n * ho * wo, k_pad)
    return a, ho, wo


def stem_forward(x_nhwc, p, alpha):
    n = x_nhwc.shape[0]
    a, ho, wo = _im2col_stem(x_nhwc, 7, 7, 2, 3, p['w'].shape[0])
    y = pl.pallas_call(
        _stem_kernel,
        out_shape=jax.ShapeDtypeStruct((n * ho * wo, LANE), jnp.bfloat16),
        compiler_params=_CPARAMS,
    )(a, p['w'], p['b'], alpha)
    return y.reshape(n, ho, wo, LANE)


def maxpool_3x3_s2_ceil(y_nhwc):
    """MaxPool2d(kernel=3, stride=2, padding=0, ceil_mode=True) on the
    lane-padded (C=128) bf16 activation; output stays lane-dense bf16."""
    n, h, w, c = y_nhwc.shape
    ho = -(-(h - 3) // 2) + 1
    wo = -(-(w - 3) // 2) + 1
    hp, wp = 2 * ho + 2, 2 * wo + 2
    xp = jnp.pad(y_nhwc, ((0, 0), (0, hp - h), (0, wp - w), (0, 0)),
                 constant_values=-jnp.inf)
    phases = [xp[:, r::2, s::2, :] for r in (0, 1) for s in (0, 1)]
    return pl.pallas_call(
        functools.partial(_maxpool_kernel, ho=ho, wo=wo),
        out_shape=jax.ShapeDtypeStruct((n, ho, wo, c), jnp.bfloat16),
        compiler_params=_CPARAMS,
    )(*phases)


def basic_block_forward(x2d, blk, n, h, w, se=None):
    """One fused pallas_call per BasicBlock (SE optionally folded in)."""
    stride = blk['stride']
    ho, wo = _conv_out_hw(h, w, stride)
    mp_in = x2d.shape[0]
    mp_out = _round_up(max(n * ho * wo, 8), 8)
    has_ds = blk['wd'] is not None
    use_se = se is not None
    if not has_ds:
        assert mp_in == mp_out, (mp_in, mp_out)

    g1 = _gather_mats(n, h, w, stride, mp_out, mp_in)
    g2 = _gather_mats(n, ho, wo, 1, mp_out, mp_out)

    args = [x2d]
    if use_se:
        pool, bcast = _se_pool_bcast(n, h, w, mp_in)
        args += [pool, bcast, se['w1'], se['w2'], se['alpha']]
    args += [g1, blk['w1'], blk['b1'], g2, blk['w2'], blk['b2']]
    if has_ds:
        args += [blk['wd'], blk['bd']]

    out = pl.pallas_call(
        functools.partial(_block_kernel, has_ds=has_ds, use_se=use_se),
        out_shape=jax.ShapeDtypeStruct((mp_out, LANE), jnp.bfloat16),
        compiler_params=_CPARAMS,
    )(*args)
    return out, ho, wo


def tail_forward(x2d, n, h, w, fc51, fc61):
    hw = h * w
    mp_in = x2d.shape[0]
    pg = np.zeros((8, mp_in), np.float32)
    for nn in range(n):
        pg[nn, nn * hw:(nn + 1) * hw] = 1.0 / hw
    pg = jnp.asarray(pg)
    emb_p, log_p = pl.pallas_call(
        _tail_kernel,
        out_shape=(jax.ShapeDtypeStruct((8, LANE), jnp.float32),
                   jax.ShapeDtypeStruct((8, LANE), jnp.float32)),
        compiler_params=_CPARAMS,
    )(x2d, pg, fc51['w'], fc51['b'], fc61['w'], fc61['b'])
    return emb_p[:n, :fc51['cout']], log_p[:n, :fc61['cout']]


# --------------------------- parameter init (synthetic) ---------------------

class _KeyGen:
    def __init__(self, seed):
        self._key = jax.random.PRNGKey(seed)

    def __call__(self):
        self._key, k = jax.random.split(self._key)
        return k


def _conv_init(kg, cout, cin, kh, kw):
    # kaiming_normal_, mode='fan_out', nonlinearity='relu'
    fan_out = cout * kh * kw
    std = (2.0 / fan_out) ** 0.5
    return jax.random.normal(kg(), (cout, cin, kh, kw), jnp.float32) * std


def _linear_init(kg, out_f, in_f, bias=True):
    bound = 1.0 / (in_f ** 0.5)
    w = jax.random.uniform(kg(), (out_f, in_f), jnp.float32, -bound, bound)
    b = (jax.random.uniform(kg(), (out_f,), jnp.float32, -bound, bound)
         if bias else None)
    return w, b


def _bn_init(c):
    # (gamma, beta, running_mean, running_var) per the module's __init__
    return (jnp.ones((c,), jnp.float32), jnp.zeros((c,), jnp.float32),
            jnp.zeros((c,), jnp.float32), jnp.ones((c,), jnp.float32))


def _fold_bn(w_oihw, bn, eps=1e-5):
    gamma, beta, mean, var = bn
    scale = gamma / jnp.sqrt(var + eps)
    shift = beta - mean * scale
    return w_oihw * scale[:, None, None, None], shift


def _pack_conv_taps(wf, shift):
    """Folded [cout,cin,kh,kw] weight -> per-tap [kh*kw, 128, 128] bf16 + bias."""
    cout, cin, kh, kw = wf.shape
    wt = jnp.transpose(wf, (2, 3, 1, 0)).reshape(kh * kw, cin, cout)
    wt = jnp.pad(wt, ((0, 0), (0, LANE - cin), (0, LANE - cout))
                 ).astype(jnp.bfloat16)
    b = jnp.pad(shift, (0, LANE - cout)).reshape(1, LANE).astype(jnp.float32)
    return wt, b


def _pack_conv_flat(wf, shift, k_pad):
    """Flat im2col layout [k_pad, 128] bf16 + bias (stem conv)."""
    cout, cin, kh, kw = wf.shape
    wm = jnp.transpose(wf, (2, 3, 1, 0)).reshape(kh * kw * cin, cout)
    wm = jnp.pad(wm, ((0, k_pad - kh * kw * cin), (0, LANE - cout))
                 ).astype(jnp.bfloat16)
    b = jnp.pad(shift, (0, LANE - cout)).reshape(1, LANE).astype(jnp.float32)
    return wm, b


def _conv_bn_taps(kg, cout, cin, kh, kw):
    return _pack_conv_taps(*_fold_bn(_conv_init(kg, cout, cin, kh, kw),
                                     _bn_init(cout)))


def _basic_block_init(kg, inplanes, planes, stride):
    blk = {'stride': stride}
    blk['w1'], blk['b1'] = _conv_bn_taps(kg, planes, inplanes, 3, 3)
    blk['w2'], blk['b2'] = _conv_bn_taps(kg, planes, planes, 3, 3)
    if stride != 1 or inplanes != planes:
        wd, bd = _fold_bn(_conv_init(kg, planes, inplanes, 1, 1),
                          _bn_init(planes))
        blk['wd'] = jnp.pad(wd[:, :, 0, 0].T,
                            ((0, LANE - inplanes), (0, LANE - planes))
                            ).astype(jnp.bfloat16)
        blk['bd'] = jnp.pad(bd, (0, LANE - planes)
                            ).reshape(1, LANE).astype(jnp.float32)
    else:
        blk['wd'] = None
        blk['bd'] = None
    return blk


def _prep_linear(w, b):
    out_f, in_f = w.shape
    wm = jnp.pad(w.T, ((0, LANE - in_f), (0, LANE - out_f))
                 ).astype(jnp.bfloat16)
    if b is None:
        b = jnp.zeros((out_f,), jnp.float32)
    bm = jnp.pad(b, (0, LANE - out_f)).reshape(1, LANE).astype(jnp.float32)
    return {'w': wm, 'b': bm, 'cout': out_f}


def init_resnet18_params(seed=0, in_plane=4, planes=(8, 16, 32, 64),
                         layers=(2, 2, 2, 2), embedding_size=32,
                         num_classes=2, se_reduction=4):
    kg = _KeyGen(seed)
    wf, shift = _fold_bn(_conv_init(kg, planes[0], in_plane, 7, 7),
                         _bn_init(planes[0]))
    w_stem, b_stem = _pack_conv_flat(wf, shift,
                                     _round_up(7 * 7 * in_plane, LANE))
    params = {
        'conv1': {'w': w_stem, 'b': b_stem},
        'prelu1': jnp.full((1, 1), 0.25, jnp.float32),  # nn.PReLU() default
    }
    inplanes = planes[0]

    def make_layer(planes_i, n_blocks, stride):
        nonlocal inplanes
        blocks = [_basic_block_init(kg, inplanes, planes_i, stride)]
        inplanes = planes_i
        for _ in range(1, n_blocks):
            blocks.append(_basic_block_init(kg, inplanes, planes_i, 1))
        return blocks

    params['layer1'] = make_layer(planes[0], layers[0], 1)
    params['layer2'] = make_layer(planes[1], layers[1], 2)
    c, cr = planes[1], planes[1] // se_reduction
    fc1_w, _ = _linear_init(kg, cr, c, bias=False)     # torch layout [Cr, C]
    fc2_w, _ = _linear_init(kg, c, cr, bias=False)     # torch layout [C, Cr]
    params['se'] = {
        'w1': jnp.pad(fc1_w.T, ((0, LANE - c), (0, LANE - cr))
                      ).astype(jnp.float32),
        'w2': jnp.pad(fc2_w.T, ((0, LANE - cr), (0, LANE - c))
                      ).astype(jnp.float32),
        'alpha': jnp.full((1, 1), 0.25, jnp.float32),
    }
    params['layer3'] = make_layer(planes[2], layers[2], 2)
    # TODO(synk): layer4 is built by the PyTorch __init__ but never used in
    # forward(); its parameters are omitted since they cannot affect outputs.
    params['fc51'] = _prep_linear(*_linear_init(kg, embedding_size, planes[2]))
    params['fc61'] = _prep_linear(*_linear_init(kg, num_classes,
                                                embedding_size))
    return params


# ------------------------------- forward pass -------------------------------

def resnet18_forward(params, x_nchw, use_se=True):
    n = x_nchw.shape[0]
    x = jnp.transpose(x_nchw.astype(jnp.float32), (0, 2, 3, 1))  # NCHW -> NHWC
    y = stem_forward(x, params['conv1'], params['prelu1'])       # conv+BN+PReLU
    y = maxpool_3x3_s2_ceil(y)                                   # [N,4,4,128]
    h, w = y.shape[1], y.shape[2]
    y = y.reshape(n * h * w, LANE)          # padded 2-D bf16 activation layout
    for blk in params['layer1']:
        y, h, w = basic_block_forward(y, blk, n, h, w)
    for blk in params['layer2']:
        y, h, w = basic_block_forward(y, blk, n, h, w)
    se = params['se'] if use_se else None   # SE gate folded into next block
    y, h, w = basic_block_forward(y, params['layer3'][0], n, h, w, se=se)
    y, h, w = basic_block_forward(y, params['layer3'][1], n, h, w)
    # TODO(synk): nn.Dropout is inference-mode identity inside the tail kernel.
    emb, logits = tail_forward(y, n, h, w, params['fc51'], params['fc61'])
    return emb, logits


# ---------------------------------- main -------------------------------------

if __name__ == "__main__":
    params = init_resnet18_params(seed=0)
    x = jax.random.normal(jax.random.PRNGKey(0), (2, 4, 16, 16), jnp.float32)

    fwd = jax.jit(functools.partial(resnet18_forward, params, use_se=True))
    emb, logits = fwd(x)
    jax.block_until_ready((emb, logits))

    assert emb.shape == (2, 32) and logits.shape == (2, 2)
    assert bool(jnp.all(jnp.isfinite(emb))) and bool(jnp.all(jnp.isfinite(logits)))
    print("KERNEL_OK")
</pallas_src>

<mosaic_0001>
module attributes {stable_mosaic.version = 11 : i64} {
  func.func @_stem_kernel(%arg0: memref<128x256xbf16, #tpu.memory_space<vmem>>, %arg1: memref<256x128xbf16, #tpu.memory_space<vmem>>, %arg2: memref<1x128xf32, #tpu.memory_space<vmem>>, %arg3: memref<1x1xf32, #tpu.memory_space<vmem>>, %arg4: memref<128x128xbf16, #tpu.memory_space<vmem>>) attributes {dimension_semantics = [], scalar_prefetch = 0 : i64, scratch_operands = 0 : i64, tpu.core_type = #tpu.core_type<tc>} {
    %c0 = arith.constant 0 : index
    %c0_0 = arith.constant 0 : index
    %0 = vector.load %arg0[%c0, %c0_0] : memref<128x256xbf16, #tpu.memory_space<vmem>>, vector<128x256xbf16>
    %c0_1 = arith.constant 0 : index
    %c0_2 = arith.constant 0 : index
    %1 = vector.load %arg1[%c0_1, %c0_2] : memref<256x128xbf16, #tpu.memory_space<vmem>>, vector<256x128xbf16>
    %cst = arith.constant dense<0.000000e+00> : vector<128x128xf32>
    %2 = tpu.matmul %0, %1, %cst {dimension_numbers = #tpu.dot_dimension_numbers<[1], [0], [0], [1], [0, 0, 1, 1], [], []>} : vector<128x256xbf16>, vector<256x128xbf16>, vector<128x128xf32> -> vector<128x128xf32>
    %c0_3 = arith.constant 0 : index
    %c0_4 = arith.constant 0 : index
    %3 = vector.load %arg2[%c0_3, %c0_4] : memref<1x128xf32, #tpu.memory_space<vmem>>, vector<1x128xf32>
    %4 = vector.broadcast %3 : vector<1x128xf32> to vector<128x128xf32>
    %5 = arith.addf %2, %4 : vector<128x128xf32>
    %c0_5 = arith.constant 0 : index
    %c0_6 = arith.constant 0 : index
    %6 = vector.load %arg3[%c0_5, %c0_6] : memref<1x1xf32, #tpu.memory_space<vmem>>, vector<1x1xf32>
    %7 = vector.extract %6[0, 0] : f32 from vector<1x1xf32>
    %cst_7 = arith.constant 0.000000e+00 : f32
    %8 = vector.broadcast %cst_7 : f32 to vector<128x128xf32>
    %9 = arith.cmpf ogt, %5, %8 : vector<128x128xf32>
    %10 = vector.broadcast %7 : f32 to vector<128x128xf32>
    %11 = arith.mulf %10, %5 : vector<128x128xf32>
    %12 = arith.select %9, %5, %11 : vector<128x128xi1>, vector<128x128xf32>
    %13 = arith.truncf %12 : vector<128x128xf32> to vector<128x128xbf16>
    %c0_8 = arith.constant 0 : index
    %c0_9 = arith.constant 0 : index
    %14 = vector.load %arg4[%c0_8, %c0_9] : memref<128x128xbf16, #tpu.memory_space<vmem>>, vector<128x128xbf16>
    tpu.vector_store %arg4[%c0_8, %c0_9], %13 {strides = array<i32>} : memref<128x128xbf16, #tpu.memory_space<vmem>>, vector<128x128xbf16>,
    return
  }
}

module attributes {stable_mosaic.version = 11 : i64} {
  func.func @_maxpool_kernel(%arg0: memref<2x5x5x128xbf16, #tpu.memory_space<vmem>>, %arg1: memref<2x5x5x128xbf16, #tpu.memory_space<vmem>>, %arg2: memref<2x5x5x128xbf16, #tpu.memory_space<vmem>>, %arg3: memref<2x5x5x128xbf16, #tpu.memory_space<vmem>>, %arg4: memref<2x4x4x128xbf16, #tpu.memory_space<vmem>>) attributes {dimension_semantics = [], scalar_prefetch = 0 : i64, scratch_operands = 0 : i64, tpu.core_type = #tpu.core_type<tc>} {
    %c0 = arith.constant 0 : index
    %c0_0 = arith.constant 0 : index
    %c0_1 = arith.constant 0 : index
    %c0_2 = arith.constant 0 : index
    %0 = vector.load %arg0[%c0, %c0_0, %c0_1, %c0_2] : memref<2x5x5x128xbf16, #tpu.memory_space<vmem>>, vector<2x5x5x128xbf16>
    %c0_3 = arith.constant 0 : index
    %c0_4 = arith.constant 0 : index
    %c0_5 = arith.constant 0 : index
    %c0_6 = arith.constant 0 : index
    %1 = vector.load %arg1[%c0_3, %c0_4, %c0_5, %c0_6] : memref<2x5x5x128xbf16, #tpu.memory_space<vmem>>, vector<2x5x5x128xbf16>
    %c0_7 = arith.constant 0 : index
    %c0_8 = arith.constant 0 : index
    %c0_9 = arith.constant 0 : index
    %c0_10 = arith.constant 0 : index
    %2 = vector.load %arg2[%c0_7, %c0_8, %c0_9, %c0_10] : memref<2x5x5x128xbf16, #tpu.memory_space<vmem>>, vector<2x5x5x128xbf16>
    %c0_11 = arith.constant 0 : index
    %c0_12 = arith.constant 0 : index
    %c0_13 = arith.constant 0 : index
    %c0_14 = arith.constant 0 : index
    %3 = vector.load %arg3[%c0_11, %c0_12, %c0_13, %c0_14] : memref<2x5x5x128xbf16, #tpu.memory_space<vmem>>, vector<2x5x5x128xbf16>
    %4 = vector.extract_strided_slice %0 {offsets = [0, 0, 0, 0], sizes = [2, 4, 4, 128], strides = [1, 1, 1, 1]} : vector<2x5x5x128xbf16> to vector<2x4x4x128xbf16>
    %5 = vector.extract_strided_slice %1 {offsets = [0, 0, 0, 0], sizes = [2, 4, 4, 128], strides = [1, 1, 1, 1]} : vector<2x5x5x128xbf16> to vector<2x4x4x128xbf16>
    %6 = arith.maximumf %4, %5 : vector<2x4x4x128xbf16>
    %7 = vector.extract_strided_slice %0 {offsets = [0, 0, 1, 0], sizes = [2, 4, 4, 128], strides = [1, 1, 1, 1]} : vector<2x5x5x128xbf16> to vector<2x4x4x128xbf16>
    %8 = arith.maximumf %6, %7 : vector<2x4x4x128xbf16>
    %9 = vector.extract_strided_slice %2 {offsets = [0, 0, 0, 0], sizes = [2, 4, 4, 128], strides = [1, 1, 1, 1]} : vector<2x5x5x128xbf16> to vector<2x4x4x128xbf16>
    %10 = arith.maximumf %8, %9 : vector<2x4x4x128xbf16>
    %11 = vector.extract_strided_slice %3 {offsets = [0, 0, 0, 0], sizes = [2, 4, 4, 128], strides = [1, 1, 1, 1]} : vector<2x5x5x128xbf16> to vector<2x4x4x128xbf16>
    %12 = arith.maximumf %10, %11 : vector<2x4x4x128xbf16>
    %13 = vector.extract_strided_slice %2 {offsets = [0, 0, 1, 0], sizes = [2, 4, 4, 128], strides = [1, 1, 1, 1]} : vector<2x5x5x128xbf16> to vector<2x4x4x128xbf16>
    %14 = arith.maximumf %12, %13 : vector<2x4x4x128xbf16>
    %15 = vector.extract_strided_slice %0 {offsets = [0, 1, 0, 0], sizes = [2, 4, 4, 128], strides = [1, 1, 1, 1]} : vector<2x5x5x128xbf16> to vector<2x4x4x128xbf16>
    %16 = arith.maximumf %14, %15 : vector<2x4x4x128xbf16>
    %17 = vector.extract_strided_slice %1 {offsets = [0, 1, 0, 0], sizes = [2, 4, 4, 128], strides = [1, 1, 1, 1]} : vector<2x5x5x128xbf16> to vector<2x4x4x128xbf16>
    %18 = arith.maximumf %16, %17 : vector<2x4x4x128xbf16>
    %19 = vector.extract_strided_slice %0 {offsets = [0, 1, 1, 0], sizes = [2, 4, 4, 128], strides = [1, 1, 1, 1]} : vector<2x5x5x128xbf16> to vector<2x4x4x128xbf16>
    %20 = arith.maximumf %18, %19 : vector<2x4x4x128xbf16>
    %c0_15 = arith.constant 0 : index
    %c0_16 = arith.constant 0 : index
    %c0_17 = arith.constant 0 : index
    %c0_18 = arith.constant 0 : index
    %21 = vector.load %arg4[%c0_15, %c0_16, %c0_17, %c0_18] : memref<2x4x4x128xbf16, #tpu.memory_space<vmem>>, vector<2x4x4x128xbf16>
    tpu.vector_store %arg4[%c0_15, %c0_16, %c0_17, %c0_18], %20 {strides = array<i32>} : memref<2x4x4x128xbf16, #tpu.memory_space<vmem>>, vector<2x4x4x128xbf16>,
    return
  }
}

module attributes {stable_mosaic.version = 11 : i64} {
  func.func @_block_kernel(%arg0: memref<32x128xbf16, #tpu.memory_space<vmem>>, %arg1: memref<9x32x32xbf16, #tpu.memory_space<vmem>>, %arg2: memref<9x128x128xbf16, #tpu.memory_space<vmem>>, %arg3: memref<1x128xf32, #tpu.memory_space<vmem>>, %arg4: memref<9x32x32xbf16, #tpu.memory_space<vmem>>, %arg5: memref<9x128x128xbf16, #tpu.memory_space<vmem>>, %arg6: memref<1x128xf32, #tpu.memory_space<vmem>>, %arg7: memref<32x128xbf16, #tpu.memory_space<vmem>>) attributes {dimension_semantics = [], scalar_prefetch = 0 : i64, scratch_operands = 0 : i64, tpu.core_type = #tpu.core_type<tc>} {
    %c0 = arith.constant 0 : index
    %c0_0 = arith.constant 0 : index
    %0 = vector.load %arg0[%c0, %c0_0] : memref<32x128xbf16, #tpu.memory_space<vmem>>, vector<32x128xbf16>
    %cst = arith.constant 0.000000e+00 : f32
    %1 = vector.broadcast %cst : f32 to vector<32x128xf32>
    %c0_1 = arith.constant 0 : index
    %c0_2 = arith.constant 0 : index
    %c0_3 = arith.constant 0 : index
    %2 = vector.load %arg1[%c0_1, %c0_2, %c0_3] : memref<9x32x32xbf16, #tpu.memory_space<vmem>>, vector<1x32x32xbf16>
    %3 = vector.shape_cast %2 : vector<1x32x32xbf16> to vector<32x32xbf16>
    %cst_4 = arith.constant dense<0.000000e+00> : vector<32x128xf32>
    %4 = tpu.matmul %3, %0, %cst_4 {dimension_numbers = #tpu.dot_dimension_numbers<[1], [0], [0], [1], [0, 0, 1, 1], [], []>} : vector<32x32xbf16>, vector<32x128xbf16>, vector<32x128xf32> -> vector<32x128xf32>
    %5 = arith.truncf %4 : vector<32x128xf32> to vector<32x128xbf16>
    %c0_5 = arith.constant 0 : index
    %c0_6 = arith.constant 0 : index
    %c0_7 = arith.constant 0 : index
    %6 = vector.load %arg2[%c0_5, %c0_6, %c0_7] : memref<9x128x128xbf16, #tpu.memory_space<vmem>>, vector<1x128x128xbf16>
    %7 = vector.shape_cast %6 : vector<1x128x128xbf16> to vector<128x128xbf16>
    %cst_8 = arith.constant dense<0.000000e+00> : vector<32x128xf32>
    %8 = tpu.matmul %5, %7, %cst_8 {dimension_numbers = #tpu.dot_dimension_numbers<[1], [0], [0], [1], [0, 0, 1, 1], [], []>} : vector<32x128xbf16>, vector<128x128xbf16>, vector<32x128xf32> -> vector<32x128xf32>
    %9 = arith.addf %1, %8 : vector<32x128xf32>
    %c1 = arith.constant 1 : index
    %c0_9 = arith.constant 0 : index
    %c0_10 = arith.constant 0 : index
    %10 = vector.load %arg1[%c1, %c0_9, %c0_10] : memref<9x32x32xbf16, #tpu.memory_space<vmem>>, vector<1x32x32xbf16>
    %11 = vector.shape_cast %10 : vector<1x32x32xbf16> to vector<32x32xbf16>
    %cst_11 = arith.constant dense<0.000000e+00> : vector<32x128xf32>
    %12 = tpu.matmul %11, %0, %cst_11 {dimension_numbers = #tpu.dot_dimension_numbers<[1], [0], [0], [1], [0, 0, 1, 1], [], []>} : vector<32x32xbf16>, vector<32x128xbf16>, vector<32x128xf32> -> vector<32x128xf32>
    %13 = arith.truncf %12 : vector<32x128xf32> to vector<32x128xbf16>
    %c1_12 = arith.constant 1 : index
    %c0_13 = arith.constant 0 : index
    %c0_14 = arith.constant 0 : index
    %14 = vector.load %arg2[%c1_12, %c0_13, %c0_14] : memref<9x128x128xbf16, #tpu.memory_space<vmem>>, vector<1x128x128xbf16>
    %15 = vector.shape_cast %14 : vector<1x128x128xbf16> to vector<128x128xbf16>
    %cst_15 = arith.constant dense<0.000000e+00> : vector<32x128xf32>
    %16 = tpu.matmul %13, %15, %cst_15 {dimension_numbers = #tpu.dot_dimension_numbers<[1], [0], [0], [1], [0, 0, 1, 1], [], []>} : vector<32x128xbf16>, vector<128x128xbf16>, vector<32x128xf32> -> vector<32x128xf32>
    %17 = arith.addf %9, %16 : vector<32x128xf32>
    %c2 = arith.constant 2 : index
    %c0_16 = arith.constant 0 : index
    %c0_17 = arith.constant 0 : index
    %18 = vector.load %arg1[%c2, %c0_16, %c0_17] : memref<9x32x32xbf16, #tpu.memory_space<vmem>>, vector<1x32x32xbf16>
    %19 = vector.shape_cast %18 : vector<1x32x32xbf16> to vector<32x32xbf16>
    %cst_18 = arith.constant dense<0.000000e+00> : vector<32x128xf32>
    %20 = tpu.matmul %19, %0, %cst_18 {dimension_numbers = #tpu.dot_dimension_numbers<[1], [0], [0], [1], [0, 0, 1, 1], [], []>} : vector<32x32xbf16>, vector<32x128xbf16>, vector<32x128xf32> -> vector<32x128xf32>
    %21 = arith.truncf %20 : vector<32x128xf32> to vector<32x128xbf16>
    %c2_19 = arith.constant 2 : index
    %c0_20 = arith.constant 0 : index
    %c0_21 = arith.constant 0 : index
    %22 = vector.load %arg2[%c2_19, %c0_20, %c0_21] : memref<9x128x128xbf16, #tpu.memory_space<vmem>>, vector<1x128x128xbf16>
    %23 = vector.shape_cast %22 : vector<1x128x128xbf16> to vector<128x128xbf16>
    %cst_22 = arith.constant dense<0.000000e+00> : vector<32x128xf32>
    %24 = tpu.matmul %21, %23, %cst_22 {dimension_numbers = #tpu.dot_dimension_numbers<[1], [0], [0], [1], [0, 0, 1, 1], [], []>} : vector<32x128xbf16>, vector<128x128xbf16>, vector<32x128xf32> -> vector<32x128xf32>
    %25 = arith.addf %17, %24 : vector<32x128xf32>
    %c3 = arith.constant 3 : index
    %c0_23 = arith.constant 0 : index
    %c0_24 = arith.constant 0 : index
    %26 = vector.load %arg1[%c3, %c0_23, %c0_24] : memref<9x32x32xbf16, #tpu.memory_space<vmem>>, vector<1x32x32xbf16>
    %27 = vector.shape_cast %26 : vector<1x32x32xbf16> to vector<32x32xbf16>
    %cst_25 = arith.constant dense<0.000000e+00> : vector<32x128xf32>
    %28 = tpu.matmul %27, %0, %cst_25 {dimension_numbers = #tpu.dot_dimension_numbers<[1], [0], [0], [1], [0, 0, 1, 1], [], []>} : vector<32x32xbf16>, vector<32x128xbf16>, vector<32x128xf32> -> vector<32x128xf32>
    %29 = arith.truncf %28 : vector<32x128xf32> to vector<32x128xbf16>
    %c3_26 = arith.constant 3 : index
    %c0_27 = arith.constant 0 : index
    %c0_28 = arith.constant 0 : index
    %30 = vector.load %arg2[%c3_26, %c0_27, %c0_28] : memref<9x128x128xbf16, #tpu.memory_space<vmem>>, vector<1x128x128xbf16>
    %31 = vector.shape_cast %30 : vector<1x128x128xbf16> to vector<128x128xbf16>
    %cst_29 = arith.constant dense<0.000000e+00> : vector<32x128xf32>
    %32 = tpu.matmul %29, %31, %cst_29 {dimension_numbers = #tpu.dot_dimension_numbers<[1], [0], [0], [1], [0, 0, 1, 1], [], []>} : vector<32x128xbf16>, vector<128x128xbf16>, vector<32x128xf32> -> vector<32x128xf32>
    %33 = arith.addf %25, %32 : vector<32x128xf32>
    %c4 = arith.constant 4 : index
    %c0_30 = arith.constant 0 : index
    %c0_31 = arith.constant 0 : index
    %34 = vector.load %arg1[%c4, %c0_30, %c0_31] : memref<9x32x32xbf16, #tpu.memory_space<vmem>>, vector<1x32x32xbf16>
    %35 = vector.shape_cast %34 : vector<1x32x32xbf16> to vector<32x32xbf16>
    %cst_32 = arith.constant dense<0.000000e+00> : vector<32x128xf32>
    %36 = tpu.matmul %35, %0, %cst_32 {dimension_numbers = #tpu.dot_dimension_numbers<[1], [0], [0], [1], [0, 0, 1, 1], [], []>} : vector<32x32xbf16>, vector<32x128xbf16>, vector<32x128xf32> -> vector<32x128xf32>
    %37 = arith.truncf %36 : vector<32x128xf32> to vector<32x128xbf16>
    %c4_33 = arith.constant 4 : index
    %c0_34 = arith.constant 0 : index
    %c0_35 = arith.constant 0 : index
    %38 = vector.load %arg2[%c4_33, %c0_34, %c0_35] : memref<9x128x128xbf16, #tpu.memory_space<vmem>>, vector<1x128x128xbf16>
    %39 = vector.shape_cast %38 : vector<1x128x128xbf16> to vector<128x128xbf16>
    %cst_36 = arith.constant dense<0.000000e+00> : vector<32x128xf32>
    %40 = tpu.matmul %37, %39, %cst_36 {dimension_numbers = #tpu.dot_dimension_numbers<[1], [0], [0], [1], [0, 0, 1, 1], [], []>} : vector<32x128xbf16>, vector<128x128xbf16>, vector<32x128xf32> -> vector<32x128xf32>
    %41 = arith.addf %33, %40 : vector<32x128xf32>
    %c5 = arith.constant 5 : index
    %c0_37 = arith.constant 0 : index
    %c0_38 = arith.constant 0 : index
    %42 = vector.load %arg1[%c5, %c0_37, %c0_38] : memref<9x32x32xbf16, #tpu.memory_space<vmem>>, vector<1x32x32xbf16>
    %43 = vector.shape_cast %42 : vector<1x32x32xbf16> to vector<32x32xbf16>
    %cst_39 = arith.constant dense<0.000000e+00> : vector<32x128xf32>
    %44 = tpu.matmul %43, %0, %cst_39 {dimension_numbers = #tpu.dot_dimension_numbers<[1], [0], [0], [1], [0, 0, 1, 1], [], []>} : vector<32x32xbf16>, vector<32x128xbf16>, vector<32x128xf32> -> vector<32x128xf32>
    %45 = arith.truncf %44 : vector<32x128xf32> to vector<32x128xbf16>
    %c5_40 = arith.constant 5 : index
    %c0_41 = arith.constant 0 : index
    %c0_42 = arith.constant 0 : index
    %46 = vector.load %arg2[%c5_40, %c0_41, %c0_42] : memref<9x128x128xbf16, #tpu.memory_space<vmem>>, vector<1x128x128xbf16>
    %47 = vector.shape_cast %46 : vector<1x128x128xbf16> to vector<128x128xbf16>
    %cst_43 = arith.constant dense<0.000000e+00> : vector<32x128xf32>
    %48 = tpu.matmul %45, %47, %cst_43 {dimension_numbers = #tpu.dot_dimension_numbers<[1], [0], [0], [1], [0, 0, 1, 1], [], []>} : vector<32x128xbf16>, vector<128x128xbf16>, vector<32x128xf32> -> vector<32x128xf32>
    %49 = arith.addf %41, %48 : vector<32x128xf32>
    %c6 = arith.constant 6 : index
    %c0_44 = arith.constant 0 : index
    %c0_45 = arith.constant 0 : index
    %50 = vector.load %arg1[%c6, %c0_44, %c0_45] : memref<9x32x32xbf16, #tpu.memory_space<vmem>>, vector<1x32x32xbf16>
    %51 = vector.shape_cast %50 : vector<1x32x32xbf16> to vector<32x32xbf16>
    %cst_46 = arith.constant dense<0.000000e+00> : vector<32x128xf32>
    %52 = tpu.matmul %51, %0, %cst_46 {dimension_numbers = #tpu.dot_dimension_numbers<[1], [0], [0], [1], [0, 0, 1, 1], [], []>} : vector<32x32xbf16>, vector<32x128xbf16>, vector<32x128xf32> -> vector<32x128xf32>
    %53 = arith.truncf %52 : vector<32x128xf32> to vector<32x128xbf16>
    %c6_47 = arith.constant 6 : index
    %c0_48 = arith.constant 0 : index
    %c0_49 = arith.constant 0 : index
    %54 = vector.load %arg2[%c6_47, %c0_48, %c0_49] : memref<9x128x128xbf16, #tpu.memory_space<vmem>>, vector<1x128x128xbf16>
    %55 = vector.shape_cast %54 : vector<1x128x128xbf16> to vector<128x128xbf16>
    %cst_50 = arith.constant dense<0.000000e+00> : vector<32x128xf32>
    %56 = tpu.matmul %53, %55, %cst_50 {dimension_numbers = #tpu.dot_dimension_numbers<[1], [0], [0], [1], [0, 0, 1, 1], [], []>} : vector<32x128xbf16>, vector<128x128xbf16>, vector<32x128xf32> -> vector<32x128xf32>
    %57 = arith.addf %49, %56 : vector<32x128xf32>
    %c7 = arith.constant 7 : index
    %c0_51 = arith.constant 0 : index
    %c0_52 = arith.constant 0 : index
    %58 = vector.load %arg1[%c7, %c0_51, %c0_52] : memref<9x32x32xbf16, #tpu.memory_space<vmem>>, vector<1x32x32xbf16>
    %59 = vector.shape_cast %58 : vector<1x32x32xbf16> to vector<32x32xbf16>
    %cst_53 = arith.constant dense<0.000000e+00> : vector<32x128xf32>
    %60 = tpu.matmul %59, %0, %cst_53 {dimension_numbers = #tpu.dot_dimension_numbers<[1], [0], [0], [1], [0, 0, 1, 1], [], []>} : vector<32x32xbf16>, vector<32x128xbf16>, vector<32x128xf32> -> vector<32x128xf32>
    %61 = arith.truncf %60 : vector<32x128xf32> to vector<32x128xbf16>
    %c7_54 = arith.constant 7 : index
    %c0_55 = arith.constant 0 : index
    %c0_56 = arith.constant 0 : index
    %62 = vector.load %arg2[%c7_54, %c0_55, %c0_56] : memref<9x128x128xbf16, #tpu.memory_space<vmem>>, vector<1x128x128xbf16>
    %63 = vector.shape_cast %62 : vector<1x128x128xbf16> to vector<128x128xbf16>
    %cst_57 = arith.constant dense<0.000000e+00> : vector<32x128xf32>
    %64 = tpu.matmul %61, %63, %cst_57 {dimension_numbers = #tpu.dot_dimension_numbers<[1], [0], [0], [1], [0, 0, 1, 1], [], []>} : vector<32x128xbf16>, vector<128x128xbf16>, vector<32x128xf32> -> vector<32x128xf32>
    %65 = arith.addf %57, %64 : vector<32x128xf32>
    %c8 = arith.constant 8 : index
    %c0_58 = arith.constant 0 : index
    %c0_59 = arith.constant 0 : index
    %66 = vector.load %arg1[%c8, %c0_58, %c0_59] : memref<9x32x32xbf16, #tpu.memory_space<vmem>>, vector<1x32x32xbf16>
    %67 = vector.shape_cast %66 : vector<1x32x32xbf16> to vector<32x32xbf16>
    %cst_60 = arith.constant dense<0.000000e+00> : vector<32x128xf32>
    %68 = tpu.matmul %67, %0, %cst_60 {dimension_numbers = #tpu.dot_dimension_numbers<[1], [0], [0], [1], [0, 0, 1, 1], [], []>} : vector<32x32xbf16>, vector<32x128xbf16>, vector<32x128xf32> -> vector<32x128xf32>
    %69 = arith.truncf %68 : vector<32x128xf32> to vector<32x128xbf16>
    %c8_61 = arith.constant 8 : index
    %c0_62 = arith.constant 0 : index
    %c0_63 = arith.constant 0 : index
    %70 = vector.load %arg2[%c8_61, %c0_62, %c0_63] : memref<9x128x128xbf16, #tpu.memory_space<vmem>>, vector<1x128x128xbf16>
    %71 = vector.shape_cast %70 : vector<1x128x128xbf16> to vector<128x128xbf16>
    %cst_64 = arith.constant dense<0.000000e+00> : vector<32x128xf32>
    %72 = tpu.matmul %69, %71, %cst_64 {dimension_numbers = #tpu.dot_dimension_numbers<[1], [0], [0], [1], [0, 0, 1, 1], [], []>} : vector<32x128xbf16>, vector<128x128xbf16>, vector<32x128xf32> -> vector<32x128xf32>
    %73 = arith.addf %65, %72 : vector<32x128xf32>
    %c0_65 = arith.constant 0 : index
    %c0_66 = arith.constant 0 : index
    %74 = vector.load %arg3[%c0_65, %c0_66] : memref<1x128xf32, #tpu.memory_space<vmem>>, vector<1x128xf32>
    %75 = vector.broadcast %74 : vector<1x128xf32> to vector<32x128xf32>
    %76 = arith.addf %73, %75 : vector<32x128xf32>
    %cst_67 = arith.constant 0.000000e+00 : f32
    %77 = vector.broadcast %cst_67 : f32 to vector<32x128xf32>
    %78 = arith.maximumf %76, %77 : vector<32x128xf32>
    %79 = arith.truncf %78 : vector<32x128xf32> to vector<32x128xbf16>
    %80 = arith.extf %0 : vector<32x128xbf16> to vector<32x128xf32>
    %cst_68 = arith.constant 0.000000e+00 : f32
    %81 = vector.broadcast %cst_68 : f32 to vector<32x128xf32>
    %c0_69 = arith.constant 0 : index
    %c0_70 = arith.constant 0 : index
    %c0_71 = arith.constant 0 : index
    %82 = vector.load %arg4[%c0_69, %c0_70, %c0_71] : memref<9x32x32xbf16, #tpu.memory_space<vmem>>, vector<1x32x32xbf16>
    %83 = vector.shape_cast %82 : vector<1x32x32xbf16> to vector<32x32xbf16>
    %cst_72 = arith.constant dense<0.000000e+00> : vector<32x128xf32>
    %84 = tpu.matmul %83, %79, %cst_72 {dimension_numbers = #tpu.dot_dimension_numbers<[1], [0], [0], [1], [0, 0, 1, 1], [], []>} : vector<32x32xbf16>, vector<32x128xbf16>, vector<32x128xf32> -> vector<32x128xf32>
    %85 = arith.truncf %84 : vector<32x128xf32> to vector<32x128xbf16>
    %c0_73 = arith.constant 0 : index
    %c0_74 = arith.constant 0 : index
    %c0_75 = arith.constant 0 : index
    %86 = vector.load %arg5[%c0_73, %c0_74, %c0_75] : memref<9x128x128xbf16, #tpu.memory_space<vmem>>, vector<1x128x128xbf16>
    %87 = vector.shape_cast %86 : vector<1x128x128xbf16> to vector<128x128xbf16>
    %cst_76 = arith.constant dense<0.000000e+00> : vector<32x128xf32>
    %88 = tpu.matmul %85, %87, %cst_76 {dimension_numbers = #tpu.dot_dimension_numbers<[1], [0], [0], [1], [0, 0, 1, 1], [], []>} : vector<32x128xbf16>, vector<128x128xbf16>, vector<32x128xf32> -> vector<32x128xf32>
    %89 = arith.addf %81, %88 : vector<32x128xf32>
    %c1_77 = arith.constant 1 : index
    %c0_78 = arith.constant 0 : index
    %c0_79 = arith.constant 0 : index
    %90 = vector.load %arg4[%c1_77, %c0_78, %c0_79] : memref<9x32x32xbf16, #tpu.memory_space<vmem>>, vector<1x32x32xbf16>
    %91 = vector.shape_cast %90 : vector<1x32x32xbf16> to vector<32x32xbf16>
    %cst_80 = arith.constant dense<0.000000e+00> : vector<32x128xf32>
    %92 = tpu.matmul %91, %79, %cst_80 {dimension_numbers = #tpu.dot_dimension_numbers<[1], [0], [0], [1], [0, 0, 1, 1], [], []>} : vector<32x32xbf16>, vector<32x128xbf16>, vector<32x128xf32> -> vector<32x128xf32>
    %93 = arith.truncf %92 : vector<32x128xf32> to vector<32x128xbf16>
    %c1_81 = arith.constant 1 : index
    %c0_82 = arith.constant 0 : index
    %c0_83 = arith.constant 0 : index
    %94 = vector.load %arg5[%c1_81, %c0_82, %c0_83] : memref<9x128x128xbf16, #tpu.memory_space<vmem>>, vector<1x128x128xbf16>
    %95 = vector.shape_cast %94 : vector<1x128x128xbf16> to vector<128x128xbf16>
    %cst_84 = arith.constant dense<0.000000e+00> : vector<32x128xf32>
    %96 = tpu.matmul %93, %95, %cst_84 {dimension_numbers = #tpu.dot_dimension_numbers<[1], [0], [0], [1], [0, 0, 1, 1], [], []>} : vector<32x128xbf16>, vector<128x128xbf16>, vector<32x128xf32> -> vector<32x128xf32>
    %97 = arith.addf %89, %96 : vector<32x128xf32>
    %c2_85 = arith.constant 2 : index
    %c0_86 = arith.constant 0 : index
    %c0_87 = arith.constant 0 : index
    %98 = vector.load %arg4[%c2_85, %c0_86, %c0_87] : memref<9x32x32xbf16, #tpu.memory_space<vmem>>, vector<1x32x32xbf16>
    %99 = vector.shape_cast %98 : vector<1x32x32xbf16> to vector<32x32xbf16>
    %cst_88 = arith.constant dense<0.000000e+00> : vector<32x128xf32>
    %100 = tpu.matmul %99, %79, %cst_88 {dimension_numbers = #tpu.dot_dimension_numbers<[1], [0], [0], [1], [0, 0, 1, 1], [], []>} : vector<32x32xbf16>, vector<32x128xbf16>, vector<32x128xf32> -> vector<32x128xf32>
    %101 = arith.truncf %100 : vector<32x128xf32> to vector<32x128xbf16>
    %c2_89 = arith.constant 2 : index
    %c0_90 = arith.constant 0 : index
    %c0_91 = arith.constant 0 : index
    %102 = vector.load %arg5[%c2_89, %c0_90, %c0_91] : memref<9x128x128xbf16, #tpu.memory_space<vmem>>, vector<1x128x128xbf16>
    %103 = vector.shape_cast %102 : vector<1x128x128xbf16> to vector<128x128xbf16>
    %cst_92 = arith.constant dense<0.000000e+00> : vector<32x128xf32>
    %104 = tpu.matmul %101, %103, %cst_92 {dimension_numbers = #tpu.dot_dimension_numbers<[1], [0], [0], [1], [0, 0, 1, 1], [], []>} : vector<32x128xbf16>, vector<128x128xbf16>, vector<32x128xf32> -> vector<32x128xf32>
    %105 = arith.addf %97, %104 : vector<32x128xf32>
    %c3_93 = arith.constant 3 : index
    %c0_94 = arith.constant 0 : index
    %c0_95 = arith.constant 0 : index
    %106 = vector.load %arg4[%c3_93, %c0_94, %c0_95] : memref<9x32x32xbf16, #tpu.memory_space<vmem>>, vector<1x32x32xbf16>
    %107 = vector.shape_cast %106 : vector<1x32x32xbf16> to vector<32x32xbf16>
    %cst_96 = arith.constant dense<0.000000e+00> : vector<32x128xf32>
    %108 = tpu.matmul %107, %79, %cst_96 {dimension_numbers = #tpu.dot_dimension_numbers<[1], [0], [0], [1], [0, 0, 1, 1], [], []>} : vector<32x32xbf16>, vector<32x128xbf16>, vector<32x128xf32> -> vector<32x128xf32>
    %109 = arith.truncf %108 : vector<32x128xf32> to vector<32x128xbf16>
    %c3_97 = arith.constant 3 : index
    %c0_98 = arith.constant 0 : index
    %c0_99 = arith.constant 0 : index
    %110 = vector.load %arg5[%c3_97, %c0_98, %c0_99] : memref<9x128x128xbf16, #tpu.memory_space<vmem>>, vector<1x128x128xbf16>
    %111 = vector.shape_cast %110 : vector<1x128x128xbf16> to vector<128x128xbf16>
    %cst_100 = arith.constant dense<0.000000e+00> : vector<32x128xf32>
    %112 = tpu.matmul %109, %111, %cst_100 {dimension_numbers = #tpu.dot_dimension_numbers<[1], [0], [0], [1], [0, 0, 1, 1], [], []>} : vector<32x128xbf16>, vector<128x128xbf16>, vector<32x128xf32> -> vector<32x128xf32>
    %113 = arith.addf %105, %112 : vector<32x128xf32>
    %c4_101 = arith.constant 4 : index
    %c0_102 = arith.constant 0 : index
    %c0_103 = arith.constant 0 : index
    %114 = vector.load %arg4[%c4_101, %c0_102, %c0_103] : memref<9x32x32xbf16, #tpu.memory_space<vmem>>, vector<1x32x32xbf16>
    %115 = vector.shape_cast %114 : vector<1x32x32xbf16> to vector<32x32xbf16>
    %cst_104 = arith.constant dense<0.000000e+00> : vector<32x128xf32>
    %116 = tpu.matmul %115, %79, %cst_104 {dimension_numbers = #tpu.dot_dimension_numbers<[1], [0], [0], [1], [0, 0, 1, 1], [], []>} : vector<32x32xbf16>, vector<32x128xbf16>, vector<32x128xf32> -> vector<32x128xf32>
    %117 = arith.truncf %116 : vector<32x128xf32> to vector<32x128xbf16>
    %c4_105 = arith.constant 4 : index
    %c0_106 = arith.constant 0 : index
    %c0_107 = arith.constant 0 : index
    %118 = vector.load %arg5[%c4_105, %c0_106, %c0_107] : memref<9x128x128xbf16, #tpu.memory_space<vmem>>, vector<1x128x128xbf16>
    %119 = vector.shape_cast %118 : vector<1x128x128xbf16> to vector<128x128xbf16>
    %cst_108 = arith.constant dense<0.000000e+00> : vector<32x128xf32>
    %120 = tpu.matmul %117, %119, %cst_108 {dimension_numbers = #tpu.dot_dimension_numbers<[1], [0], [0], [1], [0, 0, 1, 1], [], []>} : vector<32x128xbf16>, vector<128x128xbf16>, vector<32x128xf32> -> vector<32x128xf32>
    %121 = arith.addf %113, %120 : vector<32x128xf32>
    %c5_109 = arith.constant 5 : index
    %c0_110 = arith.constant 0 : index
    %c0_111 = arith.constant 0 : index
    %122 = vector.load %arg4[%c5_109, %c0_110, %c0_111] : memref<9x32x32xbf16, #tpu.memory_space<vmem>>, vector<1x32x32xbf16>
    %123 = vector.shape_cast %122 : vector<1x32x32xbf16> to vector<32x32xbf16>
    %cst_112 = arith.constant dense<0.000000e+00> : vector<32x128xf32>
    %124 = tpu.matmul %123, %79, %cst_112 {dimension_numbers = #tpu.dot_dimension_numbers<[1], [0], [0], [1], [0, 0, 1, 1], [], []>} : vector<32x32xbf16>, vector<32x128xbf16>, vector<32x128xf32> -> vector<32x128xf32>
    %125 = arith.truncf %124 : vector<32x128xf32> to vector<32x128xbf16>
    %c5_113 = arith.constant 5 : index
    %c0_114 = arith.constant 0 : index
    %c0_115 = arith.constant 0 : index
    %126 = vector.load %arg5[%c5_113, %c0_114, %c0_115] : memref<9x128x128xbf16, #tpu.memory_space<vmem>>, vector<1x128x128xbf16>
    %127 = vector.shape_cast %126 : vector<1x128x128xbf16> to vector<128x128xbf16>
    %cst_116 = arith.constant dense<0.000000e+00> : vector<32x128xf32>
    %128 = tpu.matmul %125, %127, %cst_116 {dimension_numbers = #tpu.dot_dimension_numbers<[1], [0], [0], [1], [0, 0, 1, 1], [], []>} : vector<32x128xbf16>, vector<128x128xbf16>, vector<32x128xf32> -> vector<32x128xf32>
    %129 = arith.addf %121, %128 : vector<32x128xf32>
    %c6_117 = arith.constant 6 : index
    %c0_118 = arith.constant 0 : index
    %c0_119 = arith.constant 0 : index
    %130 = vector.load %arg4[%c6_117, %c0_118, %c0_119] : memref<9x32x32xbf16, #tpu.memory_space<vmem>>, vector<1x32x32xbf16>
    %131 = vector.shape_cast %130 : vector<1x32x32xbf16> to vector<32x32xbf16>
    %cst_120 = arith.constant dense<0.000000e+00> : vector<32x128xf32>
    %132 = tpu.matmul %131, %79, %cst_120 {dimension_numbers = #tpu.dot_dimension_numbers<[1], [0], [0], [1], [0, 0, 1, 1], [], []>} : vector<32x32xbf16>, vector<32x128xbf16>, vector<32x128xf32> -> vector<32x128xf32>
    %133 = arith.truncf %132 : vector<32x128xf32> to vector<32x128xbf16>
    %c6_121 = arith.constant 6 : index
    %c0_122 = arith.constant 0 : index
    %c0_123 = arith.constant 0 : index
    %134 = vector.load %arg5[%c6_121, %c0_122, %c0_123] : memref<9x128x128xbf16, #tpu.memory_space<vmem>>, vector<1x128x128xbf16>
    %135 = vector.shape_cast %134 : vector<1x128x128xbf16> to vector<128x128xbf16>
    %cst_124 = arith.constant dense<0.000000e+00> : vector<32x128xf32>
    %136 = tpu.matmul %133, %135, %cst_124 {dimension_numbers = #tpu.dot_dimension_numbers<[1], [0], [0], [1], [0, 0, 1, 1], [], []>} : vector<32x128xbf16>, vector<128x128xbf16>, vector<32x128xf32> -> vector<32x128xf32>
    %137 = arith.addf %129, %136 : vector<32x128xf32>
    %c7_125 = arith.constant 7 : index
    %c0_126 = arith.constant 0 : index
    %c0_127 = arith.constant 0 : index
    %138 = vector.load %arg4[%c7_125, %c0_126, %c0_127] : memref<9x32x32xbf16, #tpu.memory_space<vmem>>, vector<1x32x32xbf16>
    %139 = vector.shape_cast %138 : vector<1x32x32xbf16> to vector<32x32xbf16>
    %cst_128 = arith.constant dense<0.000000e+00> : vector<32x128xf32>
    %140 = tpu.matmul %139, %79, %cst_128 {dimension_numbers = #tpu.dot_dimension_numbers<[1], [0], [0], [1], [0, 0, 1, 1], [], []>} : vector<32x32xbf16>, vector<32x128xbf16>, vector<32x128xf32> -> vector<32x128xf32>
    %141 = arith.truncf %140 : vector<32x128xf32> to vector<32x128xbf16>
    %c7_129 = arith.constant 7 : index
    %c0_130 = arith.constant 0 : index
    %c0_131 = arith.constant 0 : index
    %142 = vector.load %arg5[%c7_129, %c0_130, %c0_131] : memref<9x128x128xbf16, #tpu.memory_space<vmem>>, vector<1x128x128xbf16>
    %143 = vector.shape_cast %142 : vector<1x128x128xbf16> to vector<128x128xbf16>
    %cst_132 = arith.constant dense<0.000000e+00> : vector<32x128xf32>
    %144 = tpu.matmul %141, %143, %cst_132 {dimension_numbers = #tpu.dot_dimension_numbers<[1], [0], [0], [1], [0, 0, 1, 1], [], []>} : vector<32x128xbf16>, vector<128x128xbf16>, vector<32x128xf32> -> vector<32x128xf32>
    %145 = arith.addf %137, %144 : vector<32x128xf32>
    %c8_133 = arith.constant 8 : index
    %c0_134 = arith.constant 0 : index
    %c0_135 = arith.constant 0 : index
    %146 = vector.load %arg4[%c8_133, %c0_134, %c0_135] : memref<9x32x32xbf16, #tpu.memory_space<vmem>>, vector<1x32x32xbf16>
    %147 = vector.shape_cast %146 : vector<1x32x32xbf16> to vector<32x32xbf16>
    %cst_136 = arith.constant dense<0.000000e+00> : vector<32x128xf32>
    %148 = tpu.matmul %147, %79, %cst_136 {dimension_numbers = #tpu.dot_dimension_numbers<[1], [0], [0], [1], [0, 0, 1, 1], [], []>} : vector<32x32xbf16>, vector<32x128xbf16>, vector<32x128xf32> -> vector<32x128xf32>
    %149 = arith.truncf %148 : vector<32x128xf32> to vector<32x128xbf16>
    %c8_137 = arith.constant 8 : index
    %c0_138 = arith.constant 0 : index
    %c0_139 = arith.constant 0 : index
    %150 = vector.load %arg5[%c8_137, %c0_138, %c0_139] : memref<9x128x128xbf16, #tpu.memory_space<vmem>>, vector<1x128x128xbf16>
    %151 = vector.shape_cast %150 : vector<1x128x128xbf16> to vector<128x128xbf16>
    %cst_140 = arith.constant dense<0.000000e+00> : vector<32x128xf32>
    %152 = tpu.matmul %149, %151, %cst_140 {dimension_numbers = #tpu.dot_dimension_numbers<[1], [0], [0], [1], [0, 0, 1, 1], [], []>} : vector<32x128xbf16>, vector<128x128xbf16>, vector<32x128xf32> -> vector<32x128xf32>
    %153 = arith.addf %145, %152 : vector<32x128xf32>
    %c0_141 = arith.constant 0 : index
    %c0_142 = arith.constant 0 : index
    %154 = vector.load %arg6[%c0_141, %c0_142] : memref<1x128xf32, #tpu.memory_space<vmem>>, vector<1x128xf32>
    %155 = vector.broadcast %154 : vector<1x128xf32> to vector<32x128xf32>
    %156 = arith.addf %153, %155 : vector<32x128xf32>
    %157 = arith.addf %156, %80 : vector<32x128xf32>
    %cst_143 = arith.constant 0.000000e+00 : f32
    %158 = vector.broadcast %cst_143 : f32 to vector<32x128xf32>
    %159 = arith.maximumf %157, %158 : vector<32x128xf32>
    %160 = arith.truncf %159 : vector<32x128xf32> to vector<32x128xbf16>
    %c0_144 = arith.constant 0 : index
    %c0_145 = arith.constant 0 : index
    %161 = vector.load %arg7[%c0_144, %c0_145] : memref<32x128xbf16, #tpu.memory_space<vmem>>, vector<32x128xbf16>
    tpu.vector_store %arg7[%c0_144, %c0_145], %160 {strides = array<i32>} : memref<32x128xbf16, #tpu.memory_space<vmem>>, vector<32x128xbf16>,
    return
  }
}

module attributes {stable_mosaic.version = 11 : i64} {
  func.func @_block_kernel(%arg0: memref<32x128xbf16, #tpu.memory_space<vmem>>, %arg1: memref<9x8x32xbf16, #tpu.memory_space<vmem>>, %arg2: memref<9x128x128xbf16, #tpu.memory_space<vmem>>, %arg3: memref<1x128xf32, #tpu.memory_space<vmem>>, %arg4: memref<9x8x8xbf16, #tpu.memory_space<vmem>>, %arg5: memref<9x128x128xbf16, #tpu.memory_space<vmem>>, %arg6: memref<1x128xf32, #tpu.memory_space<vmem>>, %arg7: memref<128x128xbf16, #tpu.memory_space<vmem>>, %arg8: memref<1x128xf32, #tpu.memory_space<vmem>>, %arg9: memref<8x128xbf16, #tpu.memory_space<vmem>>) attributes {dimension_semantics = [], scalar_prefetch = 0 : i64, scratch_operands = 0 : i64, tpu.core_type = #tpu.core_type<tc>} {
    %c0 = arith.constant 0 : index
    %c0_0 = arith.constant 0 : index
    %0 = vector.load %arg0[%c0, %c0_0] : memref<32x128xbf16, #tpu.memory_space<vmem>>, vector<32x128xbf16>
    %cst = arith.constant 0.000000e+00 : f32
    %1 = vector.broadcast %cst : f32 to vector<8x128xf32>
    %c0_1 = arith.constant 0 : index
    %c0_2 = arith.constant 0 : index
    %c0_3 = arith.constant 0 : index
    %2 = vector.load %arg1[%c0_1, %c0_2, %c0_3] : memref<9x8x32xbf16, #tpu.memory_space<vmem>>, vector<1x8x32xbf16>
    %3 = vector.shape_cast %2 : vector<1x8x32xbf16> to vector<8x32xbf16>
    %cst_4 = arith.constant dense<0.000000e+00> : vector<8x128xf32>
    %4 = tpu.matmul %3, %0, %cst_4 {dimension_numbers = #tpu.dot_dimension_numbers<[1], [0], [0], [1], [0, 0, 1, 1], [], []>} : vector<8x32xbf16>, vector<32x128xbf16>, vector<8x128xf32> -> vector<8x128xf32>
    %5 = arith.truncf %4 : vector<8x128xf32> to vector<8x128xbf16>
    %c0_5 = arith.constant 0 : index
    %c0_6 = arith.constant 0 : index
    %c0_7 = arith.constant 0 : index
    %6 = vector.load %arg2[%c0_5, %c0_6, %c0_7] : memref<9x128x128xbf16, #tpu.memory_space<vmem>>, vector<1x128x128xbf16>
    %7 = vector.shape_cast %6 : vector<1x128x128xbf16> to vector<128x128xbf16>
    %cst_8 = arith.constant dense<0.000000e+00> : vector<8x128xf32>
    %8 = tpu.matmul %5, %7, %cst_8 {dimension_numbers = #tpu.dot_dimension_numbers<[1], [0], [0], [1], [0, 0, 1, 1], [], []>} : vector<8x128xbf16>, vector<128x128xbf16>, vector<8x128xf32> -> vector<8x128xf32>
    %9 = arith.addf %1, %8 : vector<8x128xf32>
    %c1 = arith.constant 1 : index
    %c0_9 = arith.constant 0 : index
    %c0_10 = arith.constant 0 : index
    %10 = vector.load %arg1[%c1, %c0_9, %c0_10] : memref<9x8x32xbf16, #tpu.memory_space<vmem>>, vector<1x8x32xbf16>
    %11 = vector.shape_cast %10 : vector<1x8x32xbf16> to vector<8x32xbf16>
    %cst_11 = arith.constant dense<0.000000e+00> : vector<8x128xf32>
    %12 = tpu.matmul %11, %0, %cst_11 {dimension_numbers = #tpu.dot_dimension_numbers<[1], [0], [0], [1], [0, 0, 1, 1], [], []>} : vector<8x32xbf16>, vector<32x128xbf16>, vector<8x128xf32> -> vector<8x128xf32>
    %13 = arith.truncf %12 : vector<8x128xf32> to vector<8x128xbf16>
    %c1_12 = arith.constant 1 : index
    %c0_13 = arith.constant 0 : index
    %c0_14 = arith.constant 0 : index
    %14 = vector.load %arg2[%c1_12, %c0_13, %c0_14] : memref<9x128x128xbf16, #tpu.memory_space<vmem>>, vector<1x128x128xbf16>
    %15 = vector.shape_cast %14 : vector<1x128x128xbf16> to vector<128x128xbf16>
    %cst_15 = arith.constant dense<0.000000e+00> : vector<8x128xf32>
    %16 = tpu.matmul %13, %15, %cst_15 {dimension_numbers = #tpu.dot_dimension_numbers<[1], [0], [0], [1], [0, 0, 1, 1], [], []>} : vector<8x128xbf16>, vector<128x128xbf16>, vector<8x128xf32> -> vector<8x128xf32>
    %17 = arith.addf %9, %16 : vector<8x128xf32>
    %c2 = arith.constant 2 : index
    %c0_16 = arith.constant 0 : index
    %c0_17 = arith.constant 0 : index
    %18 = vector.load %arg1[%c2, %c0_16, %c0_17] : memref<9x8x32xbf16, #tpu.memory_space<vmem>>, vector<1x8x32xbf16>
    %19 = vector.shape_cast %18 : vector<1x8x32xbf16> to vector<8x32xbf16>
    %cst_18 = arith.constant dense<0.000000e+00> : vector<8x128xf32>
    %20 = tpu.matmul %19, %0, %cst_18 {dimension_numbers = #tpu.dot_dimension_numbers<[1], [0], [0], [1], [0, 0, 1, 1], [], []>} : vector<8x32xbf16>, vector<32x128xbf16>, vector<8x128xf32> -> vector<8x128xf32>
    %21 = arith.truncf %20 : vector<8x128xf32> to vector<8x128xbf16>
    %c2_19 = arith.constant 2 : index
    %c0_20 = arith.constant 0 : index
    %c0_21 = arith.constant 0 : index
    %22 = vector.load %arg2[%c2_19, %c0_20, %c0_21] : memref<9x128x128xbf16, #tpu.memory_space<vmem>>, vector<1x128x128xbf16>
    %23 = vector.shape_cast %22 : vector<1x128x128xbf16> to vector<128x128xbf16>
    %cst_22 = arith.constant dense<0.000000e+00> : vector<8x128xf32>
    %24 = tpu.matmul %21, %23, %cst_22 {dimension_numbers = #tpu.dot_dimension_numbers<[1], [0], [0], [1], [0, 0, 1, 1], [], []>} : vector<8x128xbf16>, vector<128x128xbf16>, vector<8x128xf32> -> vector<8x128xf32>
    %25 = arith.addf %17, %24 : vector<8x128xf32>
    %c3 = arith.constant 3 : index
    %c0_23 = arith.constant 0 : index
    %c0_24 = arith.constant 0 : index
    %26 = vector.load %arg1[%c3, %c0_23, %c0_24] : memref<9x8x32xbf16, #tpu.memory_space<vmem>>, vector<1x8x32xbf16>
    %27 = vector.shape_cast %26 : vector<1x8x32xbf16> to vector<8x32xbf16>
    %cst_25 = arith.constant dense<0.000000e+00> : vector<8x128xf32>
    %28 = tpu.matmul %27, %0, %cst_25 {dimension_numbers = #tpu.dot_dimension_numbers<[1], [0], [0], [1], [0, 0, 1, 1], [], []>} : vector<8x32xbf16>, vector<32x128xbf16>, vector<8x128xf32> -> vector<8x128xf32>
    %29 = arith.truncf %28 : vector<8x128xf32> to vector<8x128xbf16>
    %c3_26 = arith.constant 3 : index
    %c0_27 = arith.constant 0 : index
    %c0_28 = arith.constant 0 : index
    %30 = vector.load %arg2[%c3_26, %c0_27, %c0_28] : memref<9x128x128xbf16, #tpu.memory_space<vmem>>, vector<1x128x128xbf16>
    %31 = vector.shape_cast %30 : vector<1x128x128xbf16> to vector<128x128xbf16>
    %cst_29 = arith.constant dense<0.000000e+00> : vector<8x128xf32>
    %32 = tpu.matmul %29, %31, %cst_29 {dimension_numbers = #tpu.dot_dimension_numbers<[1], [0], [0], [1], [0, 0, 1, 1], [], []>} : vector<8x128xbf16>, vector<128x128xbf16>, vector<8x128xf32> -> vector<8x128xf32>
    %33 = arith.addf %25, %32 : vector<8x128xf32>
    %c4 = arith.constant 4 : index
    %c0_30 = arith.constant 0 : index
    %c0_31 = arith.constant 0 : index
    %34 = vector.load %arg1[%c4, %c0_30, %c0_31] : memref<9x8x32xbf16, #tpu.memory_space<vmem>>, vector<1x8x32xbf16>
    %35 = vector.shape_cast %34 : vector<1x8x32xbf16> to vector<8x32xbf16>
    %cst_32 = arith.constant dense<0.000000e+00> : vector<8x128xf32>
    %36 = tpu.matmul %35, %0, %cst_32 {dimension_numbers = #tpu.dot_dimension_numbers<[1], [0], [0], [1], [0, 0, 1, 1], [], []>} : vector<8x32xbf16>, vector<32x128xbf16>, vector<8x128xf32> -> vector<8x128xf32>
    %37 = arith.truncf %36 : vector<8x128xf32> to vector<8x128xbf16>
    %c4_33 = arith.constant 4 : index
    %c0_34 = arith.constant 0 : index
    %c0_35 = arith.constant 0 : index
    %38 = vector.load %arg2[%c4_33, %c0_34, %c0_35] : memref<9x128x128xbf16, #tpu.memory_space<vmem>>, vector<1x128x128xbf16>
    %39 = vector.shape_cast %38 : vector<1x128x128xbf16> to vector<128x128xbf16>
    %cst_36 = arith.constant dense<0.000000e+00> : vector<8x128xf32>
    %40 = tpu.matmul %37, %39, %cst_36 {dimension_numbers = #tpu.dot_dimension_numbers<[1], [0], [0], [1], [0, 0, 1, 1], [], []>} : vector<8x128xbf16>, vector<128x128xbf16>, vector<8x128xf32> -> vector<8x128xf32>
    %41 = arith.addf %33, %40 : vector<8x128xf32>
    %c5 = arith.constant 5 : index
    %c0_37 = arith.constant 0 : index
    %c0_38 = arith.constant 0 : index
    %42 = vector.load %arg1[%c5, %c0_37, %c0_38] : memref<9x8x32xbf16, #tpu.memory_space<vmem>>, vector<1x8x32xbf16>
    %43 = vector.shape_cast %42 : vector<1x8x32xbf16> to vector<8x32xbf16>
    %cst_39 = arith.constant dense<0.000000e+00> : vector<8x128xf32>
    %44 = tpu.matmul %43, %0, %cst_39 {dimension_numbers = #tpu.dot_dimension_numbers<[1], [0], [0], [1], [0, 0, 1, 1], [], []>} : vector<8x32xbf16>, vector<32x128xbf16>, vector<8x128xf32> -> vector<8x128xf32>
    %45 = arith.truncf %44 : vector<8x128xf32> to vector<8x128xbf16>
    %c5_40 = arith.constant 5 : index
    %c0_41 = arith.constant 0 : index
    %c0_42 = arith.constant 0 : index
    %46 = vector.load %arg2[%c5_40, %c0_41, %c0_42] : memref<9x128x128xbf16, #tpu.memory_space<vmem>>, vector<1x128x128xbf16>
    %47 = vector.shape_cast %46 : vector<1x128x128xbf16> to vector<128x128xbf16>
    %cst_43 = arith.constant dense<0.000000e+00> : vector<8x128xf32>
    %48 = tpu.matmul %45, %47, %cst_43 {dimension_numbers = #tpu.dot_dimension_numbers<[1], [0], [0], [1], [0, 0, 1, 1], [], []>} : vector<8x128xbf16>, vector<128x128xbf16>, vector<8x128xf32> -> vector<8x128xf32>
    %49 = arith.addf %41, %48 : vector<8x128xf32>
    %c6 = arith.constant 6 : index
    %c0_44 = arith.constant 0 : index
    %c0_45 = arith.constant 0 : index
    %50 = vector.load %arg1[%c6, %c0_44, %c0_45] : memref<9x8x32xbf16, #tpu.memory_space<vmem>>, vector<1x8x32xbf16>
    %51 = vector.shape_cast %50 : vector<1x8x32xbf16> to vector<8x32xbf16>
    %cst_46 = arith.constant dense<0.000000e+00> : vector<8x128xf32>
    %52 = tpu.matmul %51, %0, %cst_46 {dimension_numbers = #tpu.dot_dimension_numbers<[1], [0], [0], [1], [0, 0, 1, 1], [], []>} : vector<8x32xbf16>, vector<32x128xbf16>, vector<8x128xf32> -> vector<8x128xf32>
    %53 = arith.truncf %52 : vector<8x128xf32> to vector<8x128xbf16>
    %c6_47 = arith.constant 6 : index
    %c0_48 = arith.constant 0 : index
    %c0_49 = arith.constant 0 : index
    %54 = vector.load %arg2[%c6_47, %c0_48, %c0_49] : memref<9x128x128xbf16, #tpu.memory_space<vmem>>, vector<1x128x128xbf16>
    %55 = vector.shape_cast %54 : vector<1x128x128xbf16> to vector<128x128xbf16>
    %cst_50 = arith.constant dense<0.000000e+00> : vector<8x128xf32>
    %56 = tpu.matmul %53, %55, %cst_50 {dimension_numbers = #tpu.dot_dimension_numbers<[1], [0], [0], [1], [0, 0, 1, 1], [], []>} : vector<8x128xbf16>, vector<128x128xbf16>, vector<8x128xf32> -> vector<8x128xf32>
    %57 = arith.addf %49, %56 : vector<8x128xf32>
    %c7 = arith.constant 7 : index
    %c0_51 = arith.constant 0 : index
    %c0_52 = arith.constant 0 : index
    %58 = vector.load %arg1[%c7, %c0_51, %c0_52] : memref<9x8x32xbf16, #tpu.memory_space<vmem>>, vector<1x8x32xbf16>
    %59 = vector.shape_cast %58 : vector<1x8x32xbf16> to vector<8x32xbf16>
    %cst_53 = arith.constant dense<0.000000e+00> : vector<8x128xf32>
    %60 = tpu.matmul %59, %0, %cst_53 {dimension_numbers = #tpu.dot_dimension_numbers<[1], [0], [0], [1], [0, 0, 1, 1], [], []>} : vector<8x32xbf16>, vector<32x128xbf16>, vector<8x128xf32> -> vector<8x128xf32>
    %61 = arith.truncf %60 : vector<8x128xf32> to vector<8x128xbf16>
    %c7_54 = arith.constant 7 : index
    %c0_55 = arith.constant 0 : index
    %c0_56 = arith.constant 0 : index
    %62 = vector.load %arg2[%c7_54, %c0_55, %c0_56] : memref<9x128x128xbf16, #tpu.memory_space<vmem>>, vector<1x128x128xbf16>
    %63 = vector.shape_cast %62 : vector<1x128x128xbf16> to vector<128x128xbf16>
    %cst_57 = arith.constant dense<0.000000e+00> : vector<8x128xf32>
    %64 = tpu.matmul %61, %63, %cst_57 {dimension_numbers = #tpu.dot_dimension_numbers<[1], [0], [0], [1], [0, 0, 1, 1], [], []>} : vector<8x128xbf16>, vector<128x128xbf16>, vector<8x128xf32> -> vector<8x128xf32>
    %65 = arith.addf %57, %64 : vector<8x128xf32>
    %c8 = arith.constant 8 : index
    %c0_58 = arith.constant 0 : index
    %c0_59 = arith.constant 0 : index
    %66 = vector.load %arg1[%c8, %c0_58, %c0_59] : memref<9x8x32xbf16, #tpu.memory_space<vmem>>, vector<1x8x32xbf16>
    %67 = vector.shape_cast %66 : vector<1x8x32xbf16> to vector<8x32xbf16>
    %cst_60 = arith.constant dense<0.000000e+00> : vector<8x128xf32>
    %68 = tpu.matmul %67, %0, %cst_60 {dimension_numbers = #tpu.dot_dimension_numbers<[1], [0], [0], [1], [0, 0, 1, 1], [], []>} : vector<8x32xbf16>, vector<32x128xbf16>, vector<8x128xf32> -> vector<8x128xf32>
    %69 = arith.truncf %68 : vector<8x128xf32> to vector<8x128xbf16>
    %c8_61 = arith.constant 8 : index
    %c0_62 = arith.constant 0 : index
    %c0_63 = arith.constant 0 : index
    %70 = vector.load %arg2[%c8_61, %c0_62, %c0_63] : memref<9x128x128xbf16, #tpu.memory_space<vmem>>, vector<1x128x128xbf16>
    %71 = vector.shape_cast %70 : vector<1x128x128xbf16> to vector<128x128xbf16>
    %cst_64 = arith.constant dense<0.000000e+00> : vector<8x128xf32>
    %72 = tpu.matmul %69, %71, %cst_64 {dimension_numbers = #tpu.dot_dimension_numbers<[1], [0], [0], [1], [0, 0, 1, 1], [], []>} : vector<8x128xbf16>, vector<128x128xbf16>, vector<8x128xf32> -> vector<8x128xf32>
    %73 = arith.addf %65, %72 : vector<8x128xf32>
    %c0_65 = arith.constant 0 : index
    %c0_66 = arith.constant 0 : index
    %74 = vector.load %arg3[%c0_65, %c0_66] : memref<1x128xf32, #tpu.memory_space<vmem>>, vector<1x128xf32>
    %75 = vector.broadcast %74 : vector<1x128xf32> to vector<8x128xf32>
    %76 = arith.addf %73, %75 : vector<8x128xf32>
    %cst_67 = arith.constant 0.000000e+00 : f32
    %77 = vector.broadcast %cst_67 : f32 to vector<8x128xf32>
    %78 = arith.maximumf %76, %77 : vector<8x128xf32>
    %79 = arith.truncf %78 : vector<8x128xf32> to vector<8x128xbf16>
    %c0_68 = arith.constant 0 : index
    %c0_69 = arith.constant 0 : index
    %80 = vector.load %arg7[%c0_68, %c0_69] : memref<128x128xbf16, #tpu.memory_space<vmem>>, vector<128x128xbf16>
    %cst_70 = arith.constant dense<0.000000e+00> : vector<8x128xf32>
    %81 = tpu.matmul %37, %80, %cst_70 {dimension_numbers = #tpu.dot_dimension_numbers<[1], [0], [0], [1], [0, 0, 1, 1], [], []>} : vector<8x128xbf16>, vector<128x128xbf16>, vector<8x128xf32> -> vector<8x128xf32>
    %c0_71 = arith.constant 0 : index
    %c0_72 = arith.constant 0 : index
    %82 = vector.load %arg8[%c0_71, %c0_72] : memref<1x128xf32, #tpu.memory_space<vmem>>, vector<1x128xf32>
    %83 = vector.broadcast %82 : vector<1x128xf32> to vector<8x128xf32>
    %84 = arith.addf %81, %83 : vector<8x128xf32>
    %cst_73 = arith.constant 0.000000e+00 : f32
    %85 = vector.broadcast %cst_73 : f32 to vector<8x128xf32>
    %c0_74 = arith.constant 0 : index
    %c0_75 = arith.constant 0 : index
    %c0_76 = arith.constant 0 : index
    %86 = vector.load %arg4[%c0_74, %c0_75, %c0_76] : memref<9x8x8xbf16, #tpu.memory_space<vmem>>, vector<1x8x8xbf16>
    %87 = vector.shape_cast %86 : vector<1x8x8xbf16> to vector<8x8xbf16>
    %cst_77 = arith.constant dense<0.000000e+00> : vector<8x128xf32>
    %88 = tpu.matmul %87, %79, %cst_77 {dimension_numbers = #tpu.dot_dimension_numbers<[1], [0], [0], [1], [0, 0, 1, 1], [], []>} : vector<8x8xbf16>, vector<8x128xbf16>, vector<8x128xf32> -> vector<8x128xf32>
    %89 = arith.truncf %88 : vector<8x128xf32> to vector<8x128xbf16>
    %c0_78 = arith.constant 0 : index
    %c0_79 = arith.constant 0 : index
    %c0_80 = arith.constant 0 : index
    %90 = vector.load %arg5[%c0_78, %c0_79, %c0_80] : memref<9x128x128xbf16, #tpu.memory_space<vmem>>, vector<1x128x128xbf16>
    %91 = vector.shape_cast %90 : vector<1x128x128xbf16> to vector<128x128xbf16>
    %cst_81 = arith.constant dense<0.000000e+00> : vector<8x128xf32>
    %92 = tpu.matmul %89, %91, %cst_81 {dimension_numbers = #tpu.dot_dimension_numbers<[1], [0], [0], [1], [0, 0, 1, 1], [], []>} : vector<8x128xbf16>, vector<128x128xbf16>, vector<8x128xf32> -> vector<8x128xf32>
    %93 = arith.addf %85, %92 : vector<8x128xf32>
    %c1_82 = arith.constant 1 : index
    %c0_83 = arith.constant 0 : index
    %c0_84 = arith.constant 0 : index
    %94 = vector.load %arg4[%c1_82, %c0_83, %c0_84] : memref<9x8x8xbf16, #tpu.memory_space<vmem>>, vector<1x8x8xbf16>
    %95 = vector.shape_cast %94 : vector<1x8x8xbf16> to vector<8x8xbf16>
    %cst_85 = arith.constant dense<0.000000e+00> : vector<8x128xf32>
    %96 = tpu.matmul %95, %79, %cst_85 {dimension_numbers = #tpu.dot_dimension_numbers<[1], [0], [0], [1], [0, 0, 1, 1], [], []>} : vector<8x8xbf16>, vector<8x128xbf16>, vector<8x128xf32> -> vector<8x128xf32>
    %97 = arith.truncf %96 : vector<8x128xf32> to vector<8x128xbf16>
    %c1_86 = arith.constant 1 : index
    %c0_87 = arith.constant 0 : index
    %c0_88 = arith.constant 0 : index
    %98 = vector.load %arg5[%c1_86, %c0_87, %c0_88] : memref<9x128x128xbf16, #tpu.memory_space<vmem>>, vector<1x128x128xbf16>
    %99 = vector.shape_cast %98 : vector<1x128x128xbf16> to vector<128x128xbf16>
    %cst_89 = arith.constant dense<0.000000e+00> : vector<8x128xf32>
    %100 = tpu.matmul %97, %99, %cst_89 {dimension_numbers = #tpu.dot_dimension_numbers<[1], [0], [0], [1], [0, 0, 1, 1], [], []>} : vector<8x128xbf16>, vector<128x128xbf16>, vector<8x128xf32> -> vector<8x128xf32>
    %101 = arith.addf %93, %100 : vector<8x128xf32>
    %c2_90 = arith.constant 2 : index
    %c0_91 = arith.constant 0 : index
    %c0_92 = arith.constant 0 : index
    %102 = vector.load %arg4[%c2_90, %c0_91, %c0_92] : memref<9x8x8xbf16, #tpu.memory_space<vmem>>, vector<1x8x8xbf16>
    %103 = vector.shape_cast %102 : vector<1x8x8xbf16> to vector<8x8xbf16>
    %cst_93 = arith.constant dense<0.000000e+00> : vector<8x128xf32>
    %104 = tpu.matmul %103, %79, %cst_93 {dimension_numbers = #tpu.dot_dimension_numbers<[1], [0], [0], [1], [0, 0, 1, 1], [], []>} : vector<8x8xbf16>, vector<8x128xbf16>, vector<8x128xf32> -> vector<8x128xf32>
    %105 = arith.truncf %104 : vector<8x128xf32> to vector<8x128xbf16>
    %c2_94 = arith.constant 2 : index
    %c0_95 = arith.constant 0 : index
    %c0_96 = arith.constant 0 : index
    %106 = vector.load %arg5[%c2_94, %c0_95, %c0_96] : memref<9x128x128xbf16, #tpu.memory_space<vmem>>, vector<1x128x128xbf16>
    %107 = vector.shape_cast %106 : vector<1x128x128xbf16> to vector<128x128xbf16>
    %cst_97 = arith.constant dense<0.000000e+00> : vector<8x128xf32>
    %108 = tpu.matmul %105, %107, %cst_97 {dimension_numbers = #tpu.dot_dimension_numbers<[1], [0], [0], [1], [0, 0, 1, 1], [], []>} : vector<8x128xbf16>, vector<128x128xbf16>, vector<8x128xf32> -> vector<8x128xf32>
    %109 = arith.addf %101, %108 : vector<8x128xf32>
    %c3_98 = arith.constant 3 : index
    %c0_99 = arith.constant 0 : index
    %c0_100 = arith.constant 0 : index
    %110 = vector.load %arg4[%c3_98, %c0_99, %c0_100] : memref<9x8x8xbf16, #tpu.memory_space<vmem>>, vector<1x8x8xbf16>
    %111 = vector.shape_cast %110 : vector<1x8x8xbf16> to vector<8x8xbf16>
    %cst_101 = arith.constant dense<0.000000e+00> : vector<8x128xf32>
    %112 = tpu.matmul %111, %79, %cst_101 {dimension_numbers = #tpu.dot_dimension_numbers<[1], [0], [0], [1], [0, 0, 1, 1], [], []>} : vector<8x8xbf16>, vector<8x128xbf16>, vector<8x128xf32> -> vector<8x128xf32>
    %113 = arith.truncf %112 : vector<8x128xf32> to vector<8x128xbf16>
    %c3_102 = arith.constant 3 : index
    %c0_103 = arith.constant 0 : index
    %c0_104 = arith.constant 0 : index
    %114 = vector.load %arg5[%c3_102, %c0_103, %c0_104] : memref<9x128x128xbf16, #tpu.memory_space<vmem>>, vector<1x128x128xbf16>
    %115 = vector.shape_cast %114 : vector<1x128x128xbf16> to vector<128x128xbf16>
    %cst_105 = arith.constant dense<0.000000e+00> : vector<8x128xf32>
    %116 = tpu.matmul %113, %115, %cst_105 {dimension_numbers = #tpu.dot_dimension_numbers<[1], [0], [0], [1], [0, 0, 1, 1], [], []>} : vector<8x128xbf16>, vector<128x128xbf16>, vector<8x128xf32> -> vector<8x128xf32>
    %117 = arith.addf %109, %116 : vector<8x128xf32>
    %c4_106 = arith.constant 4 : index
    %c0_107 = arith.constant 0 : index
    %c0_108 = arith.constant 0 : index
    %118 = vector.load %arg4[%c4_106, %c0_107, %c0_108] : memref<9x8x8xbf16, #tpu.memory_space<vmem>>, vector<1x8x8xbf16>
    %119 = vector.shape_cast %118 : vector<1x8x8xbf16> to vector<8x8xbf16>
    %cst_109 = arith.constant dense<0.000000e+00> : vector<8x128xf32>
    %120 = tpu.matmul %119, %79, %cst_109 {dimension_numbers = #tpu.dot_dimension_numbers<[1], [0], [0], [1], [0, 0, 1, 1], [], []>} : vector<8x8xbf16>, vector<8x128xbf16>, vector<8x128xf32> -> vector<8x128xf32>
    %121 = arith.truncf %120 : vector<8x128xf32> to vector<8x128xbf16>
    %c4_110 = arith.constant 4 : index
    %c0_111 = arith.constant 0 : index
    %c0_112 = arith.constant 0 : index
    %122 = vector.load %arg5[%c4_110, %c0_111, %c0_112] : memref<9x128x128xbf16, #tpu.memory_space<vmem>>, vector<1x128x128xbf16>
    %123 = vector.shape_cast %122 : vector<1x128x128xbf16> to vector<128x128xbf16>
    %cst_113 = arith.constant dense<0.000000e+00> : vector<8x128xf32>
    %124 = tpu.matmul %121, %123, %cst_113 {dimension_numbers = #tpu.dot_dimension_numbers<[1], [0], [0], [1], [0, 0, 1, 1], [], []>} : vector<8x128xbf16>, vector<128x128xbf16>, vector<8x128xf32> -> vector<8x128xf32>
    %125 = arith.addf %117, %124 : vector<8x128xf32>
    %c5_114 = arith.constant 5 : index
    %c0_115 = arith.constant 0 : index
    %c0_116 = arith.constant 0 : index
    %126 = vector.load %arg4[%c5_114, %c0_115, %c0_116] : memref<9x8x8xbf16, #tpu.memory_space<vmem>>, vector<1x8x8xbf16>
    %127 = vector.shape_cast %126 : vector<1x8x8xbf16> to vector<8x8xbf16>
    %cst_117 = arith.constant dense<0.000000e+00> : vector<8x128xf32>
    %128 = tpu.matmul %127, %79, %cst_117 {dimension_numbers = #tpu.dot_dimension_numbers<[1], [0], [0], [1], [0, 0, 1, 1], [], []>} : vector<8x8xbf16>, vector<8x128xbf16>, vector<8x128xf32> -> vector<8x128xf32>
    %129 = arith.truncf %128 : vector<8x128xf32> to vector<8x128xbf16>
    %c5_118 = arith.constant 5 : index
    %c0_119 = arith.constant 0 : index
    %c0_120 = arith.constant 0 : index
    %130 = vector.load %arg5[%c5_118, %c0_119, %c0_120] : memref<9x128x128xbf16, #tpu.memory_space<vmem>>, vector<1x128x128xbf16>
    %131 = vector.shape_cast %130 : vector<1x128x128xbf16> to vector<128x128xbf16>
    %cst_121 = arith.constant dense<0.000000e+00> : vector<8x128xf32>
    %132 = tpu.matmul %129, %131, %cst_121 {dimension_numbers = #tpu.dot_dimension_numbers<[1], [0], [0], [1], [0, 0, 1, 1], [], []>} : vector<8x128xbf16>, vector<128x128xbf16>, vector<8x128xf32> -> vector<8x128xf32>
    %133 = arith.addf %125, %132 : vector<8x128xf32>
    %c6_122 = arith.constant 6 : index
    %c0_123 = arith.constant 0 : index
    %c0_124 = arith.constant 0 : index
    %134 = vector.load %arg4[%c6_122, %c0_123, %c0_124] : memref<9x8x8xbf16, #tpu.memory_space<vmem>>, vector<1x8x8xbf16>
    %135 = vector.shape_cast %134 : vector<1x8x8xbf16> to vector<8x8xbf16>
    %cst_125 = arith.constant dense<0.000000e+00> : vector<8x128xf32>
    %136 = tpu.matmul %135, %79, %cst_125 {dimension_numbers = #tpu.dot_dimension_numbers<[1], [0], [0], [1], [0, 0, 1, 1], [], []>} : vector<8x8xbf16>, vector<8x128xbf16>, vector<8x128xf32> -> vector<8x128xf32>
    %137 = arith.truncf %136 : vector<8x128xf32> to vector<8x128xbf16>
    %c6_126 = arith.constant 6 : index
    %c0_127 = arith.constant 0 : index
    %c0_128 = arith.constant 0 : index
    %138 = vector.load %arg5[%c6_126, %c0_127, %c0_128] : memref<9x128x128xbf16, #tpu.memory_space<vmem>>, vector<1x128x128xbf16>
    %139 = vector.shape_cast %138 : vector<1x128x128xbf16> to vector<128x128xbf16>
    %cst_129 = arith.constant dense<0.000000e+00> : vector<8x128xf32>
    %140 = tpu.matmul %137, %139, %cst_129 {dimension_numbers = #tpu.dot_dimension_numbers<[1], [0], [0], [1], [0, 0, 1, 1], [], []>} : vector<8x128xbf16>, vector<128x128xbf16>, vector<8x128xf32> -> vector<8x128xf32>
    %141 = arith.addf %133, %140 : vector<8x128xf32>
    %c7_130 = arith.constant 7 : index
    %c0_131 = arith.constant 0 : index
    %c0_132 = arith.constant 0 : index
    %142 = vector.load %arg4[%c7_130, %c0_131, %c0_132] : memref<9x8x8xbf16, #tpu.memory_space<vmem>>, vector<1x8x8xbf16>
    %143 = vector.shape_cast %142 : vector<1x8x8xbf16> to vector<8x8xbf16>
    %cst_133 = arith.constant dense<0.000000e+00> : vector<8x128xf32>
    %144 = tpu.matmul %143, %79, %cst_133 {dimension_numbers = #tpu.dot_dimension_numbers<[1], [0], [0], [1], [0, 0, 1, 1], [], []>} : vector<8x8xbf16>, vector<8x128xbf16>, vector<8x128xf32> -> vector<8x128xf32>
    %145 = arith.truncf %144 : vector<8x128xf32> to vector<8x128xbf16>
    %c7_134 = arith.constant 7 : index
    %c0_135 = arith.constant 0 : index
    %c0_136 = arith.constant 0 : index
    %146 = vector.load %arg5[%c7_134, %c0_135, %c0_136] : memref<9x128x128xbf16, #tpu.memory_space<vmem>>, vector<1x128x128xbf16>
    %147 = vector.shape_cast %146 : vector<1x128x128xbf16> to vector<128x128xbf16>
    %cst_137 = arith.constant dense<0.000000e+00> : vector<8x128xf32>
    %148 = tpu.matmul %145, %147, %cst_137 {dimension_numbers = #tpu.dot_dimension_numbers<[1], [0], [0], [1], [0, 0, 1, 1], [], []>} : vector<8x128xbf16>, vector<128x128xbf16>, vector<8x128xf32> -> vector<8x128xf32>
    %149 = arith.addf %141, %148 : vector<8x128xf32>
    %c8_138 = arith.constant 8 : index
    %c0_139 = arith.constant 0 : index
    %c0_140 = arith.constant 0 : index
    %150 = vector.load %arg4[%c8_138, %c0_139, %c0_140] : memref<9x8x8xbf16, #tpu.memory_space<vmem>>, vector<1x8x8xbf16>
    %151 = vector.shape_cast %150 : vector<1x8x8xbf16> to vector<8x8xbf16>
    %cst_141 = arith.constant dense<0.000000e+00> : vector<8x128xf32>
    %152 = tpu.matmul %151, %79, %cst_141 {dimension_numbers = #tpu.dot_dimension_numbers<[1], [0], [0], [1], [0, 0, 1, 1], [], []>} : vector<8x8xbf16>, vector<8x128xbf16>, vector<8x128xf32> -> vector<8x128xf32>
    %153 = arith.truncf %152 : vector<8x128xf32> to vector<8x128xbf16>
    %c8_142 = arith.constant 8 : index
    %c0_143 = arith.constant 0 : index
    %c0_144 = arith.constant 0 : index
    %154 = vector.load %arg5[%c8_142, %c0_143, %c0_144] : memref<9x128x128xbf16, #tpu.memory_space<vmem>>, vector<1x128x128xbf16>
    %155 = vector.shape_cast %154 : vector<1x128x128xbf16> to vector<128x128xbf16>
    %cst_145 = arith.constant dense<0.000000e+00> : vector<8x128xf32>
    %156 = tpu.matmul %153, %155, %cst_145 {dimension_numbers = #tpu.dot_dimension_numbers<[1], [0], [0], [1], [0, 0, 1, 1], [], []>} : vector<8x128xbf16>, vector<128x128xbf16>, vector<8x128xf32> -> vector<8x128xf32>
    %157 = arith.addf %149, %156 : vector<8x128xf32>
    %c0_146 = arith.constant 0 : index
    %c0_147 = arith.constant 0 : index
    %158 = vector.load %arg6[%c0_146, %c0_147] : memref<1x128xf32, #tpu.memory_space<vmem>>, vector<1x128xf32>
    %159 = vector.broadcast %158 : vector<1x128xf32> to vector<8x128xf32>
    %160 = arith.addf %157, %159 : vector<8x128xf32>
    %161 = arith.addf %160, %84 : vector<8x128xf32>
    %cst_148 = arith.constant 0.000000e+00 : f32
    %162 = vector.broadcast %cst_148 : f32 to vector<8x128xf32>
    %163 = arith.maximumf %161, %162 : vector<8x128xf32>
    %164 = arith.truncf %163 : vector<8x128xf32> to vector<8x128xbf16>
    %c0_149 = arith.constant 0 : index
    %c0_150 = arith.constant 0 : index
    %165 = vector.load %arg9[%c0_149, %c0_150] : memref<8x128xbf16, #tpu.memory_space<vmem>>, vector<8x128xbf16>
    tpu.vector_store %arg9[%c0_149, %c0_150], %164 {strides = array<i32>} : memref<8x128xbf16, #tpu.memory_space<vmem>>, vector<8x128xbf16>,
    return
  }
}

module attributes {stable_mosaic.version = 11 : i64} {
  func.func @_block_kernel(%arg0: memref<8x128xbf16, #tpu.memory_space<vmem>>, %arg1: memref<9x8x8xbf16, #tpu.memory_space<vmem>>, %arg2: memref<9x128x128xbf16, #tpu.memory_space<vmem>>, %arg3: memref<1x128xf32, #tpu.memory_space<vmem>>, %arg4: memref<9x8x8xbf16, #tpu.memory_space<vmem>>, %arg5: memref<9x128x128xbf16, #tpu.memory_space<vmem>>, %arg6: memref<1x128xf32, #tpu.memory_space<vmem>>, %arg7: memref<8x128xbf16, #tpu.memory_space<vmem>>) attributes {dimension_semantics = [], scalar_prefetch = 0 : i64, scratch_operands = 0 : i64, tpu.core_type = #tpu.core_type<tc>} {
    %c0 = arith.constant 0 : index
    %c0_0 = arith.constant 0 : index
    %0 = vector.load %arg0[%c0, %c0_0] : memref<8x128xbf16, #tpu.memory_space<vmem>>, vector<8x128xbf16>
    %cst = arith.constant 0.000000e+00 : f32
    %1 = vector.broadcast %cst : f32 to vector<8x128xf32>
    %c0_1 = arith.constant 0 : index
    %c0_2 = arith.constant 0 : index
    %c0_3 = arith.constant 0 : index
    %2 = vector.load %arg1[%c0_1, %c0_2, %c0_3] : memref<9x8x8xbf16, #tpu.memory_space<vmem>>, vector<1x8x8xbf16>
    %3 = vector.shape_cast %2 : vector<1x8x8xbf16> to vector<8x8xbf16>
    %cst_4 = arith.constant dense<0.000000e+00> : vector<8x128xf32>
    %4 = tpu.matmul %3, %0, %cst_4 {dimension_numbers = #tpu.dot_dimension_numbers<[1], [0], [0], [1], [0, 0, 1, 1], [], []>} : vector<8x8xbf16>, vector<8x128xbf16>, vector<8x128xf32> -> vector<8x128xf32>
    %5 = arith.truncf %4 : vector<8x128xf32> to vector<8x128xbf16>
    %c0_5 = arith.constant 0 : index
    %c0_6 = arith.constant 0 : index
    %c0_7 = arith.constant 0 : index
    %6 = vector.load %arg2[%c0_5, %c0_6, %c0_7] : memref<9x128x128xbf16, #tpu.memory_space<vmem>>, vector<1x128x128xbf16>
    %7 = vector.shape_cast %6 : vector<1x128x128xbf16> to vector<128x128xbf16>
    %cst_8 = arith.constant dense<0.000000e+00> : vector<8x128xf32>
    %8 = tpu.matmul %5, %7, %cst_8 {dimension_numbers = #tpu.dot_dimension_numbers<[1], [0], [0], [1], [0, 0, 1, 1], [], []>} : vector<8x128xbf16>, vector<128x128xbf16>, vector<8x128xf32> -> vector<8x128xf32>
    %9 = arith.addf %1, %8 : vector<8x128xf32>
    %c1 = arith.constant 1 : index
    %c0_9 = arith.constant 0 : index
    %c0_10 = arith.constant 0 : index
    %10 = vector.load %arg1[%c1, %c0_9, %c0_10] : memref<9x8x8xbf16, #tpu.memory_space<vmem>>, vector<1x8x8xbf16>
    %11 = vector.shape_cast %10 : vector<1x8x8xbf16> to vector<8x8xbf16>
    %cst_11 = arith.constant dense<0.000000e+00> : vector<8x128xf32>
    %12 = tpu.matmul %11, %0, %cst_11 {dimension_numbers = #tpu.dot_dimension_numbers<[1], [0], [0], [1], [0, 0, 1, 1], [], []>} : vector<8x8xbf16>, vector<8x128xbf16>, vector<8x128xf32> -> vector<8x128xf32>
    %13 = arith.truncf %12 : vector<8x128xf32> to vector<8x128xbf16>
    %c1_12 = arith.constant 1 : index
    %c0_13 = arith.constant 0 : index
    %c0_14 = arith.constant 0 : index
    %14 = vector.load %arg2[%c1_12, %c0_13, %c0_14] : memref<9x128x128xbf16, #tpu.memory_space<vmem>>, vector<1x128x128xbf16>
    %15 = vector.shape_cast %14 : vector<1x128x128xbf16> to vector<128x128xbf16>
    %cst_15 = arith.constant dense<0.000000e+00> : vector<8x128xf32>
    %16 = tpu.matmul %13, %15, %cst_15 {dimension_numbers = #tpu.dot_dimension_numbers<[1], [0], [0], [1], [0, 0, 1, 1], [], []>} : vector<8x128xbf16>, vector<128x128xbf16>, vector<8x128xf32> -> vector<8x128xf32>
    %17 = arith.addf %9, %16 : vector<8x128xf32>
    %c2 = arith.constant 2 : index
    %c0_16 = arith.constant 0 : index
    %c0_17 = arith.constant 0 : index
    %18 = vector.load %arg1[%c2, %c0_16, %c0_17] : memref<9x8x8xbf16, #tpu.memory_space<vmem>>, vector<1x8x8xbf16>
    %19 = vector.shape_cast %18 : vector<1x8x8xbf16> to vector<8x8xbf16>
    %cst_18 = arith.constant dense<0.000000e+00> : vector<8x128xf32>
    %20 = tpu.matmul %19, %0, %cst_18 {dimension_numbers = #tpu.dot_dimension_numbers<[1], [0], [0], [1], [0, 0, 1, 1], [], []>} : vector<8x8xbf16>, vector<8x128xbf16>, vector<8x128xf32> -> vector<8x128xf32>
    %21 = arith.truncf %20 : vector<8x128xf32> to vector<8x128xbf16>
    %c2_19 = arith.constant 2 : index
    %c0_20 = arith.constant 0 : index
    %c0_21 = arith.constant 0 : index
    %22 = vector.load %arg2[%c2_19, %c0_20, %c0_21] : memref<9x128x128xbf16, #tpu.memory_space<vmem>>, vector<1x128x128xbf16>
    %23 = vector.shape_cast %22 : vector<1x128x128xbf16> to vector<128x128xbf16>
    %cst_22 = arith.constant dense<0.000000e+00> : vector<8x128xf32>
    %24 = tpu.matmul %21, %23, %cst_22 {dimension_numbers = #tpu.dot_dimension_numbers<[1], [0], [0], [1], [0, 0, 1, 1], [], []>} : vector<8x128xbf16>, vector<128x128xbf16>, vector<8x128xf32> -> vector<8x128xf32>
    %25 = arith.addf %17, %24 : vector<8x128xf32>
    %c3 = arith.constant 3 : index
    %c0_23 = arith.constant 0 : index
    %c0_24 = arith.constant 0 : index
    %26 = vector.load %arg1[%c3, %c0_23, %c0_24] : memref<9x8x8xbf16, #tpu.memory_space<vmem>>, vector<1x8x8xbf16>
    %27 = vector.shape_cast %26 : vector<1x8x8xbf16> to vector<8x8xbf16>
    %cst_25 = arith.constant dense<0.000000e+00> : vector<8x128xf32>
    %28 = tpu.matmul %27, %0, %cst_25 {dimension_numbers = #tpu.dot_dimension_numbers<[1], [0], [0], [1], [0, 0, 1, 1], [], []>} : vector<8x8xbf16>, vector<8x128xbf16>, vector<8x128xf32> -> vector<8x128xf32>
    %29 = arith.truncf %28 : vector<8x128xf32> to vector<8x128xbf16>
    %c3_26 = arith.constant 3 : index
    %c0_27 = arith.constant 0 : index
    %c0_28 = arith.constant 0 : index
    %30 = vector.load %arg2[%c3_26, %c0_27, %c0_28] : memref<9x128x128xbf16, #tpu.memory_space<vmem>>, vector<1x128x128xbf16>
    %31 = vector.shape_cast %30 : vector<1x128x128xbf16> to vector<128x128xbf16>
    %cst_29 = arith.constant dense<0.000000e+00> : vector<8x128xf32>
    %32 = tpu.matmul %29, %31, %cst_29 {dimension_numbers = #tpu.dot_dimension_numbers<[1], [0], [0], [1], [0, 0, 1, 1], [], []>} : vector<8x128xbf16>, vector<128x128xbf16>, vector<8x128xf32> -> vector<8x128xf32>
    %33 = arith.addf %25, %32 : vector<8x128xf32>
    %c4 = arith.constant 4 : index
    %c0_30 = arith.constant 0 : index
    %c0_31 = arith.constant 0 : index
    %34 = vector.load %arg1[%c4, %c0_30, %c0_31] : memref<9x8x8xbf16, #tpu.memory_space<vmem>>, vector<1x8x8xbf16>
    %35 = vector.shape_cast %34 : vector<1x8x8xbf16> to vector<8x8xbf16>
    %cst_32 = arith.constant dense<0.000000e+00> : vector<8x128xf32>
    %36 = tpu.matmul %35, %0, %cst_32 {dimension_numbers = #tpu.dot_dimension_numbers<[1], [0], [0], [1], [0, 0, 1, 1], [], []>} : vector<8x8xbf16>, vector<8x128xbf16>, vector<8x128xf32> -> vector<8x128xf32>
    %37 = arith.truncf %36 : vector<8x128xf32> to vector<8x128xbf16>
    %c4_33 = arith.constant 4 : index
    %c0_34 = arith.constant 0 : index
    %c0_35 = arith.constant 0 : index
    %38 = vector.load %arg2[%c4_33, %c0_34, %c0_35] : memref<9x128x128xbf16, #tpu.memory_space<vmem>>, vector<1x128x128xbf16>
    %39 = vector.shape_cast %38 : vector<1x128x128xbf16> to vector<128x128xbf16>
    %cst_36 = arith.constant dense<0.000000e+00> : vector<8x128xf32>
    %40 = tpu.matmul %37, %39, %cst_36 {dimension_numbers = #tpu.dot_dimension_numbers<[1], [0], [0], [1], [0, 0, 1, 1], [], []>} : vector<8x128xbf16>, vector<128x128xbf16>, vector<8x128xf32> -> vector<8x128xf32>
    %41 = arith.addf %33, %40 : vector<8x128xf32>
    %c5 = arith.constant 5 : index
    %c0_37 = arith.constant 0 : index
    %c0_38 = arith.constant 0 : index
    %42 = vector.load %arg1[%c5, %c0_37, %c0_38] : memref<9x8x8xbf16, #tpu.memory_space<vmem>>, vector<1x8x8xbf16>
    %43 = vector.shape_cast %42 : vector<1x8x8xbf16> to vector<8x8xbf16>
    %cst_39 = arith.constant dense<0.000000e+00> : vector<8x128xf32>
    %44 = tpu.matmul %43, %0, %cst_39 {dimension_numbers = #tpu.dot_dimension_numbers<[1], [0], [0], [1], [0, 0, 1, 1], [], []>} : vector<8x8xbf16>, vector<8x128xbf16>, vector<8x128xf32> -> vector<8x128xf32>
    %45 = arith.truncf %44 : vector<8x128xf32> to vector<8x128xbf16>
    %c5_40 = arith.constant 5 : index
    %c0_41 = arith.constant 0 : index
    %c0_42 = arith.constant 0 : index
    %46 = vector.load %arg2[%c5_40, %c0_41, %c0_42] : memref<9x128x128xbf16, #tpu.memory_space<vmem>>, vector<1x128x128xbf16>
    %47 = vector.shape_cast %46 : vector<1x128x128xbf16> to vector<128x128xbf16>
    %cst_43 = arith.constant dense<0.000000e+00> : vector<8x128xf32>
    %48 = tpu.matmul %45, %47, %cst_43 {dimension_numbers = #tpu.dot_dimension_numbers<[1], [0], [0], [1], [0, 0, 1, 1], [], []>} : vector<8x128xbf16>, vector<128x128xbf16>, vector<8x128xf32> -> vector<8x128xf32>
    %49 = arith.addf %41, %48 : vector<8x128xf32>
    %c6 = arith.constant 6 : index
    %c0_44 = arith.constant 0 : index
    %c0_45 = arith.constant 0 : index
    %50 = vector.load %arg1[%c6, %c0_44, %c0_45] : memref<9x8x8xbf16, #tpu.memory_space<vmem>>, vector<1x8x8xbf16>
    %51 = vector.shape_cast %50 : vector<1x8x8xbf16> to vector<8x8xbf16>
    %cst_46 = arith.constant dense<0.000000e+00> : vector<8x128xf32>
    %52 = tpu.matmul %51, %0, %cst_46 {dimension_numbers = #tpu.dot_dimension_numbers<[1], [0], [0], [1], [0, 0, 1, 1], [], []>} : vector<8x8xbf16>, vector<8x128xbf16>, vector<8x128xf32> -> vector<8x128xf32>
    %53 = arith.truncf %52 : vector<8x128xf32> to vector<8x128xbf16>
    %c6_47 = arith.constant 6 : index
    %c0_48 = arith.constant 0 : index
    %c0_49 = arith.constant 0 : index
    %54 = vector.load %arg2[%c6_47, %c0_48, %c0_49] : memref<9x128x128xbf16, #tpu.memory_space<vmem>>, vector<1x128x128xbf16>
    %55 = vector.shape_cast %54 : vector<1x128x128xbf16> to vector<128x128xbf16>
    %cst_50 = arith.constant dense<0.000000e+00> : vector<8x128xf32>
    %56 = tpu.matmul %53, %55, %cst_50 {dimension_numbers = #tpu.dot_dimension_numbers<[1], [0], [0], [1], [0, 0, 1, 1], [], []>} : vector<8x128xbf16>, vector<128x128xbf16>, vector<8x128xf32> -> vector<8x128xf32>
    %57 = arith.addf %49, %56 : vector<8x128xf32>
    %c7 = arith.constant 7 : index
    %c0_51 = arith.constant 0 : index
    %c0_52 = arith.constant 0 : index
    %58 = vector.load %arg1[%c7, %c0_51, %c0_52] : memref<9x8x8xbf16, #tpu.memory_space<vmem>>, vector<1x8x8xbf16>
    %59 = vector.shape_cast %58 : vector<1x8x8xbf16> to vector<8x8xbf16>
    %cst_53 = arith.constant dense<0.000000e+00> : vector<8x128xf32>
    %60 = tpu.matmul %59, %0, %cst_53 {dimension_numbers = #tpu.dot_dimension_numbers<[1], [0], [0], [1], [0, 0, 1, 1], [], []>} : vector<8x8xbf16>, vector<8x128xbf16>, vector<8x128xf32> -> vector<8x128xf32>
    %61 = arith.truncf %60 : vector<8x128xf32> to vector<8x128xbf16>
    %c7_54 = arith.constant 7 : index
    %c0_55 = arith.constant 0 : index
    %c0_56 = arith.constant 0 : index
    %62 = vector.load %arg2[%c7_54, %c0_55, %c0_56] : memref<9x128x128xbf16, #tpu.memory_space<vmem>>, vector<1x128x128xbf16>
    %63 = vector.shape_cast %62 : vector<1x128x128xbf16> to vector<128x128xbf16>
    %cst_57 = arith.constant dense<0.000000e+00> : vector<8x128xf32>
    %64 = tpu.matmul %61, %63, %cst_57 {dimension_numbers = #tpu.dot_dimension_numbers<[1], [0], [0], [1], [0, 0, 1, 1], [], []>} : vector<8x128xbf16>, vector<128x128xbf16>, vector<8x128xf32> -> vector<8x128xf32>
    %65 = arith.addf %57, %64 : vector<8x128xf32>
    %c8 = arith.constant 8 : index
    %c0_58 = arith.constant 0 : index
    %c0_59 = arith.constant 0 : index
    %66 = vector.load %arg1[%c8, %c0_58, %c0_59] : memref<9x8x8xbf16, #tpu.memory_space<vmem>>, vector<1x8x8xbf16>
    %67 = vector.shape_cast %66 : vector<1x8x8xbf16> to vector<8x8xbf16>
    %cst_60 = arith.constant dense<0.000000e+00> : vector<8x128xf32>
    %68 = tpu.matmul %67, %0, %cst_60 {dimension_numbers = #tpu.dot_dimension_numbers<[1], [0], [0], [1], [0, 0, 1, 1], [], []>} : vector<8x8xbf16>, vector<8x128xbf16>, vector<8x128xf32> -> vector<8x128xf32>
    %69 = arith.truncf %68 : vector<8x128xf32> to vector<8x128xbf16>
    %c8_61 = arith.constant 8 : index
    %c0_62 = arith.constant 0 : index
    %c0_63 = arith.constant 0 : index
    %70 = vector.load %arg2[%c8_61, %c0_62, %c0_63] : memref<9x128x128xbf16, #tpu.memory_space<vmem>>, vector<1x128x128xbf16>
    %71 = vector.shape_cast %70 : vector<1x128x128xbf16> to vector<128x128xbf16>
    %cst_64 = arith.constant dense<0.000000e+00> : vector<8x128xf32>
    %72 = tpu.matmul %69, %71, %cst_64 {dimension_numbers = #tpu.dot_dimension_numbers<[1], [0], [0], [1], [0, 0, 1, 1], [], []>} : vector<8x128xbf16>, vector<128x128xbf16>, vector<8x128xf32> -> vector<8x128xf32>
    %73 = arith.addf %65, %72 : vector<8x128xf32>
    %c0_65 = arith.constant 0 : index
    %c0_66 = arith.constant 0 : index
    %74 = vector.load %arg3[%c0_65, %c0_66] : memref<1x128xf32, #tpu.memory_space<vmem>>, vector<1x128xf32>
    %75 = vector.broadcast %74 : vector<1x128xf32> to vector<8x128xf32>
    %76 = arith.addf %73, %75 : vector<8x128xf32>
    %cst_67 = arith.constant 0.000000e+00 : f32
    %77 = vector.broadcast %cst_67 : f32 to vector<8x128xf32>
    %78 = arith.maximumf %76, %77 : vector<8x128xf32>
    %79 = arith.truncf %78 : vector<8x128xf32> to vector<8x128xbf16>
    %80 = arith.extf %0 : vector<8x128xbf16> to vector<8x128xf32>
    %cst_68 = arith.constant 0.000000e+00 : f32
    %81 = vector.broadcast %cst_68 : f32 to vector<8x128xf32>
    %c0_69 = arith.constant 0 : index
    %c0_70 = arith.constant 0 : index
    %c0_71 = arith.constant 0 : index
    %82 = vector.load %arg4[%c0_69, %c0_70, %c0_71] : memref<9x8x8xbf16, #tpu.memory_space<vmem>>, vector<1x8x8xbf16>
    %83 = vector.shape_cast %82 : vector<1x8x8xbf16> to vector<8x8xbf16>
    %cst_72 = arith.constant dense<0.000000e+00> : vector<8x128xf32>
    %84 = tpu.matmul %83, %79, %cst_72 {dimension_numbers = #tpu.dot_dimension_numbers<[1], [0], [0], [1], [0, 0, 1, 1], [], []>} : vector<8x8xbf16>, vector<8x128xbf16>, vector<8x128xf32> -> vector<8x128xf32>
    %85 = arith.truncf %84 : vector<8x128xf32> to vector<8x128xbf16>
    %c0_73 = arith.constant 0 : index
    %c0_74 = arith.constant 0 : index
    %c0_75 = arith.constant 0 : index
    %86 = vector.load %arg5[%c0_73, %c0_74, %c0_75] : memref<9x128x128xbf16, #tpu.memory_space<vmem>>, vector<1x128x128xbf16>
    %87 = vector.shape_cast %86 : vector<1x128x128xbf16> to vector<128x128xbf16>
    %cst_76 = arith.constant dense<0.000000e+00> : vector<8x128xf32>
    %88 = tpu.matmul %85, %87, %cst_76 {dimension_numbers = #tpu.dot_dimension_numbers<[1], [0], [0], [1], [0, 0, 1, 1], [], []>} : vector<8x128xbf16>, vector<128x128xbf16>, vector<8x128xf32> -> vector<8x128xf32>
    %89 = arith.addf %81, %88 : vector<8x128xf32>
    %c1_77 = arith.constant 1 : index
    %c0_78 = arith.constant 0 : index
    %c0_79 = arith.constant 0 : index
    %90 = vector.load %arg4[%c1_77, %c0_78, %c0_79] : memref<9x8x8xbf16, #tpu.memory_space<vmem>>, vector<1x8x8xbf16>
    %91 = vector.shape_cast %90 : vector<1x8x8xbf16> to vector<8x8xbf16>
    %cst_80 = arith.constant dense<0.000000e+00> : vector<8x128xf32>
    %92 = tpu.matmul %91, %79, %cst_80 {dimension_numbers = #tpu.dot_dimension_numbers<[1], [0], [0], [1], [0, 0, 1, 1], [], []>} : vector<8x8xbf16>, vector<8x128xbf16>, vector<8x128xf32> -> vector<8x128xf32>
    %93 = arith.truncf %92 : vector<8x128xf32> to vector<8x128xbf16>
    %c1_81 = arith.constant 1 : index
    %c0_82 = arith.constant 0 : index
    %c0_83 = arith.constant 0 : index
    %94 = vector.load %arg5[%c1_81, %c0_82, %c0_83] : memref<9x128x128xbf16, #tpu.memory_space<vmem>>, vector<1x128x128xbf16>
    %95 = vector.shape_cast %94 : vector<1x128x128xbf16> to vector<128x128xbf16>
    %cst_84 = arith.constant dense<0.000000e+00> : vector<8x128xf32>
    %96 = tpu.matmul %93, %95, %cst_84 {dimension_numbers = #tpu.dot_dimension_numbers<[1], [0], [0], [1], [0, 0, 1, 1], [], []>} : vector<8x128xbf16>, vector<128x128xbf16>, vector<8x128xf32> -> vector<8x128xf32>
    %97 = arith.addf %89, %96 : vector<8x128xf32>
    %c2_85 = arith.constant 2 : index
    %c0_86 = arith.constant 0 : index
    %c0_87 = arith.constant 0 : index
    %98 = vector.load %arg4[%c2_85, %c0_86, %c0_87] : memref<9x8x8xbf16, #tpu.memory_space<vmem>>, vector<1x8x8xbf16>
    %99 = vector.shape_cast %98 : vector<1x8x8xbf16> to vector<8x8xbf16>
    %cst_88 = arith.constant dense<0.000000e+00> : vector<8x128xf32>
    %100 = tpu.matmul %99, %79, %cst_88 {dimension_numbers = #tpu.dot_dimension_numbers<[1], [0], [0], [1], [0, 0, 1, 1], [], []>} : vector<8x8xbf16>, vector<8x128xbf16>, vector<8x128xf32> -> vector<8x128xf32>
    %101 = arith.truncf %100 : vector<8x128xf32> to vector<8x128xbf16>
    %c2_89 = arith.constant 2 : index
    %c0_90 = arith.constant 0 : index
    %c0_91 = arith.constant 0 : index
    %102 = vector.load %arg5[%c2_89, %c0_90, %c0_91] : memref<9x128x128xbf16, #tpu.memory_space<vmem>>, vector<1x128x128xbf16>
    %103 = vector.shape_cast %102 : vector<1x128x128xbf16> to vector<128x128xbf16>
    %cst_92 = arith.constant dense<0.000000e+00> : vector<8x128xf32>
    %104 = tpu.matmul %101, %103, %cst_92 {dimension_numbers = #tpu.dot_dimension_numbers<[1], [0], [0], [1], [0, 0, 1, 1], [], []>} : vector<8x128xbf16>, vector<128x128xbf16>, vector<8x128xf32> -> vector<8x128xf32>
    %105 = arith.addf %97, %104 : vector<8x128xf32>
    %c3_93 = arith.constant 3 : index
    %c0_94 = arith.constant 0 : index
    %c0_95 = arith.constant 0 : index
    %106 = vector.load %arg4[%c3_93, %c0_94, %c0_95] : memref<9x8x8xbf16, #tpu.memory_space<vmem>>, vector<1x8x8xbf16>
    %107 = vector.shape_cast %106 : vector<1x8x8xbf16> to vector<8x8xbf16>
    %cst_96 = arith.constant dense<0.000000e+00> : vector<8x128xf32>
    %108 = tpu.matmul %107, %79, %cst_96 {dimension_numbers = #tpu.dot_dimension_numbers<[1], [0], [0], [1], [0, 0, 1, 1], [], []>} : vector<8x8xbf16>, vector<8x128xbf16>, vector<8x128xf32> -> vector<8x128xf32>
    %109 = arith.truncf %108 : vector<8x128xf32> to vector<8x128xbf16>
    %c3_97 = arith.constant 3 : index
    %c0_98 = arith.constant 0 : index
    %c0_99 = arith.constant 0 : index
    %110 = vector.load %arg5[%c3_97, %c0_98, %c0_99] : memref<9x128x128xbf16, #tpu.memory_space<vmem>>, vector<1x128x128xbf16>
    %111 = vector.shape_cast %110 : vector<1x128x128xbf16> to vector<128x128xbf16>
    %cst_100 = arith.constant dense<0.000000e+00> : vector<8x128xf32>
    %112 = tpu.matmul %109, %111, %cst_100 {dimension_numbers = #tpu.dot_dimension_numbers<[1], [0], [0], [1], [0, 0, 1, 1], [], []>} : vector<8x128xbf16>, vector<128x128xbf16>, vector<8x128xf32> -> vector<8x128xf32>
    %113 = arith.addf %105, %112 : vector<8x128xf32>
    %c4_101 = arith.constant 4 : index
    %c0_102 = arith.constant 0 : index
    %c0_103 = arith.constant 0 : index
    %114 = vector.load %arg4[%c4_101, %c0_102, %c0_103] : memref<9x8x8xbf16, #tpu.memory_space<vmem>>, vector<1x8x8xbf16>
    %115 = vector.shape_cast %114 : vector<1x8x8xbf16> to vector<8x8xbf16>
    %cst_104 = arith.constant dense<0.000000e+00> : vector<8x128xf32>
    %116 = tpu.matmul %115, %79, %cst_104 {dimension_numbers = #tpu.dot_dimension_numbers<[1], [0], [0], [1], [0, 0, 1, 1], [], []>} : vector<8x8xbf16>, vector<8x128xbf16>, vector<8x128xf32> -> vector<8x128xf32>
    %117 = arith.truncf %116 : vector<8x128xf32> to vector<8x128xbf16>
    %c4_105 = arith.constant 4 : index
    %c0_106 = arith.constant 0 : index
    %c0_107 = arith.constant 0 : index
    %118 = vector.load %arg5[%c4_105, %c0_106, %c0_107] : memref<9x128x128xbf16, #tpu.memory_space<vmem>>, vector<1x128x128xbf16>
    %119 = vector.shape_cast %118 : vector<1x128x128xbf16> to vector<128x128xbf16>
    %cst_108 = arith.constant dense<0.000000e+00> : vector<8x128xf32>
    %120 = tpu.matmul %117, %119, %cst_108 {dimension_numbers = #tpu.dot_dimension_numbers<[1], [0], [0], [1], [0, 0, 1, 1], [], []>} : vector<8x128xbf16>, vector<128x128xbf16>, vector<8x128xf32> -> vector<8x128xf32>
    %121 = arith.addf %113, %120 : vector<8x128xf32>
    %c5_109 = arith.constant 5 : index
    %c0_110 = arith.constant 0 : index
    %c0_111 = arith.constant 0 : index
    %122 = vector.load %arg4[%c5_109, %c0_110, %c0_111] : memref<9x8x8xbf16, #tpu.memory_space<vmem>>, vector<1x8x8xbf16>
    %123 = vector.shape_cast %122 : vector<1x8x8xbf16> to vector<8x8xbf16>
    %cst_112 = arith.constant dense<0.000000e+00> : vector<8x128xf32>
    %124 = tpu.matmul %123, %79, %cst_112 {dimension_numbers = #tpu.dot_dimension_numbers<[1], [0], [0], [1], [0, 0, 1, 1], [], []>} : vector<8x8xbf16>, vector<8x128xbf16>, vector<8x128xf32> -> vector<8x128xf32>
    %125 = arith.truncf %124 : vector<8x128xf32> to vector<8x128xbf16>
    %c5_113 = arith.constant 5 : index
    %c0_114 = arith.constant 0 : index
    %c0_115 = arith.constant 0 : index
    %126 = vector.load %arg5[%c5_113, %c0_114, %c0_115] : memref<9x128x128xbf16, #tpu.memory_space<vmem>>, vector<1x128x128xbf16>
    %127 = vector.shape_cast %126 : vector<1x128x128xbf16> to vector<128x128xbf16>
    %cst_116 = arith.constant dense<0.000000e+00> : vector<8x128xf32>
    %128 = tpu.matmul %125, %127, %cst_116 {dimension_numbers = #tpu.dot_dimension_numbers<[1], [0], [0], [1], [0, 0, 1, 1], [], []>} : vector<8x128xbf16>, vector<128x128xbf16>, vector<8x128xf32> -> vector<8x128xf32>
    %129 = arith.addf %121, %128 : vector<8x128xf32>
    %c6_117 = arith.constant 6 : index
    %c0_118 = arith.constant 0 : index
    %c0_119 = arith.constant 0 : index
    %130 = vector.load %arg4[%c6_117, %c0_118, %c0_119] : memref<9x8x8xbf16, #tpu.memory_space<vmem>>, vector<1x8x8xbf16>
    %131 = vector.shape_cast %130 : vector<1x8x8xbf16> to vector<8x8xbf16>
    %cst_120 = arith.constant dense<0.000000e+00> : vector<8x128xf32>
    %132 = tpu.matmul %131, %79, %cst_120 {dimension_numbers = #tpu.dot_dimension_numbers<[1], [0], [0], [1], [0, 0, 1, 1], [], []>} : vector<8x8xbf16>, vector<8x128xbf16>, vector<8x128xf32> -> vector<8x128xf32>
    %133 = arith.truncf %132 : vector<8x128xf32> to vector<8x128xbf16>
    %c6_121 = arith.constant 6 : index
    %c0_122 = arith.constant 0 : index
    %c0_123 = arith.constant 0 : index
    %134 = vector.load %arg5[%c6_121, %c0_122, %c0_123] : memref<9x128x128xbf16, #tpu.memory_space<vmem>>, vector<1x128x128xbf16>
    %135 = vector.shape_cast %134 : vector<1x128x128xbf16> to vector<128x128xbf16>
    %cst_124 = arith.constant dense<0.000000e+00> : vector<8x128xf32>
    %136 = tpu.matmul %133, %135, %cst_124 {dimension_numbers = #tpu.dot_dimension_numbers<[1], [0], [0], [1], [0, 0, 1, 1], [], []>} : vector<8x128xbf16>, vector<128x128xbf16>, vector<8x128xf32> -> vector<8x128xf32>
    %137 = arith.addf %129, %136 : vector<8x128xf32>
    %c7_125 = arith.constant 7 : index
    %c0_126 = arith.constant 0 : index
    %c0_127 = arith.constant 0 : index
    %138 = vector.load %arg4[%c7_125, %c0_126, %c0_127] : memref<9x8x8xbf16, #tpu.memory_space<vmem>>, vector<1x8x8xbf16>
    %139 = vector.shape_cast %138 : vector<1x8x8xbf16> to vector<8x8xbf16>
    %cst_128 = arith.constant dense<0.000000e+00> : vector<8x128xf32>
    %140 = tpu.matmul %139, %79, %cst_128 {dimension_numbers = #tpu.dot_dimension_numbers<[1], [0], [0], [1], [0, 0, 1, 1], [], []>} : vector<8x8xbf16>, vector<8x128xbf16>, vector<8x128xf32> -> vector<8x128xf32>
    %141 = arith.truncf %140 : vector<8x128xf32> to vector<8x128xbf16>
    %c7_129 = arith.constant 7 : index
    %c0_130 = arith.constant 0 : index
    %c0_131 = arith.constant 0 : index
    %142 = vector.load %arg5[%c7_129, %c0_130, %c0_131] : memref<9x128x128xbf16, #tpu.memory_space<vmem>>, vector<1x128x128xbf16>
    %143 = vector.shape_cast %142 : vector<1x128x128xbf16> to vector<128x128xbf16>
    %cst_132 = arith.constant dense<0.000000e+00> : vector<8x128xf32>
    %144 = tpu.matmul %141, %143, %cst_132 {dimension_numbers = #tpu.dot_dimension_numbers<[1], [0], [0], [1], [0, 0, 1, 1], [], []>} : vector<8x128xbf16>, vector<128x128xbf16>, vector<8x128xf32> -> vector<8x128xf32>
    %145 = arith.addf %137, %144 : vector<8x128xf32>
    %c8_133 = arith.constant 8 : index
    %c0_134 = arith.constant 0 : index
    %c0_135 = arith.constant 0 : index
    %146 = vector.load %arg4[%c8_133, %c0_134, %c0_135] : memref<9x8x8xbf16, #tpu.memory_space<vmem>>, vector<1x8x8xbf16>
    %147 = vector.shape_cast %146 : vector<1x8x8xbf16> to vector<8x8xbf16>
    %cst_136 = arith.constant dense<0.000000e+00> : vector<8x128xf32>
    %148 = tpu.matmul %147, %79, %cst_136 {dimension_numbers = #tpu.dot_dimension_numbers<[1], [0], [0], [1], [0, 0, 1, 1], [], []>} : vector<8x8xbf16>, vector<8x128xbf16>, vector<8x128xf32> -> vector<8x128xf32>
    %149 = arith.truncf %148 : vector<8x128xf32> to vector<8x128xbf16>
    %c8_137 = arith.constant 8 : index
    %c0_138 = arith.constant 0 : index
    %c0_139 = arith.constant 0 : index
    %150 = vector.load %arg5[%c8_137, %c0_138, %c0_139] : memref<9x128x128xbf16, #tpu.memory_space<vmem>>, vector<1x128x128xbf16>
    %151 = vector.shape_cast %150 : vector<1x128x128xbf16> to vector<128x128xbf16>
    %cst_140 = arith.constant dense<0.000000e+00> : vector<8x128xf32>
    %152 = tpu.matmul %149, %151, %cst_140 {dimension_numbers = #tpu.dot_dimension_numbers<[1], [0], [0], [1], [0, 0, 1, 1], [], []>} : vector<8x128xbf16>, vector<128x128xbf16>, vector<8x128xf32> -> vector<8x128xf32>
    %153 = arith.addf %145, %152 : vector<8x128xf32>
    %c0_141 = arith.constant 0 : index
    %c0_142 = arith.constant 0 : index
    %154 = vector.load %arg6[%c0_141, %c0_142] : memref<1x128xf32, #tpu.memory_space<vmem>>, vector<1x128xf32>
    %155 = vector.broadcast %154 : vector<1x128xf32> to vector<8x128xf32>
    %156 = arith.addf %153, %155 : vector<8x128xf32>
    %157 = arith.addf %156, %80 : vector<8x128xf32>
    %cst_143 = arith.constant 0.000000e+00 : f32
    %158 = vector.broadcast %cst_143 : f32 to vector<8x128xf32>
    %159 = arith.maximumf %157, %158 : vector<8x128xf32>
    %160 = arith.truncf %159 : vector<8x128xf32> to vector<8x128xbf16>
    %c0_144 = arith.constant 0 : index
    %c0_145 = arith.constant 0 : index
    %161 = vector.load %arg7[%c0_144, %c0_145] : memref<8x128xbf16, #tpu.memory_space<vmem>>, vector<8x128xbf16>
    tpu.vector_store %arg7[%c0_144, %c0_145], %160 {strides = array<i32>} : memref<8x128xbf16, #tpu.memory_space<vmem>>, vector<8x128xbf16>,
    return
  }
}

module attributes {stable_mosaic.version = 11 : i64} {
  func.func @_block_kernel(%arg0: memref<8x128xbf16, #tpu.memory_space<vmem>>, %arg1: memref<8x8xf32, #tpu.memory_space<vmem>>, %arg2: memref<8x8xf32, #tpu.memory_space<vmem>>, %arg3: memref<128x128xf32, #tpu.memory_space<vmem>>, %arg4: memref<128x128xf32, #tpu.memory_space<vmem>>, %arg5: memref<1x1xf32, #tpu.memory_space<vmem>>, %arg6: memref<9x8x8xbf16, #tpu.memory_space<vmem>>, %arg7: memref<9x128x128xbf16, #tpu.memory_space<vmem>>, %arg8: memref<1x128xf32, #tpu.memory_space<vmem>>, %arg9: memref<9x8x8xbf16, #tpu.memory_space<vmem>>, %arg10: memref<9x128x128xbf16, #tpu.memory_space<vmem>>, %arg11: memref<1x128xf32, #tpu.memory_space<vmem>>, %arg12: memref<128x128xbf16, #tpu.memory_space<vmem>>, %arg13: memref<1x128xf32, #tpu.memory_space<vmem>>, %arg14: memref<8x128xbf16, #tpu.memory_space<vmem>>) attributes {dimension_semantics = [], scalar_prefetch = 0 : i64, scratch_operands = 0 : i64, tpu.core_type = #tpu.core_type<tc>} {
    %c0 = arith.constant 0 : index
    %c0_0 = arith.constant 0 : index
    %0 = vector.load %arg0[%c0, %c0_0] : memref<8x128xbf16, #tpu.memory_space<vmem>>, vector<8x128xbf16>
    %1 = arith.extf %0 : vector<8x128xbf16> to vector<8x128xf32>
    %c0_1 = arith.constant 0 : index
    %c0_2 = arith.constant 0 : index
    %2 = vector.load %arg1[%c0_1, %c0_2] : memref<8x8xf32, #tpu.memory_space<vmem>>, vector<8x8xf32>
    %cst = arith.constant dense<0.000000e+00> : vector<8x128xf32>
    %3 = tpu.matmul %2, %1, %cst {dimension_numbers = #tpu.dot_dimension_numbers<[1], [0], [0], [1], [0, 0, 1, 1], [], []>} : vector<8x8xf32>, vector<8x128xf32>, vector<8x128xf32> -> vector<8x128xf32>
    %c0_3 = arith.constant 0 : index
    %c0_4 = arith.constant 0 : index
    %4 = vector.load %arg3[%c0_3, %c0_4] : memref<128x128xf32, #tpu.memory_space<vmem>>, vector<128x128xf32>
    %cst_5 = arith.constant dense<0.000000e+00> : vector<8x128xf32>
    %5 = tpu.matmul %3, %4, %cst_5 {dimension_numbers = #tpu.dot_dimension_numbers<[1], [0], [0], [1], [0, 0, 1, 1], [], []>} : vector<8x128xf32>, vector<128x128xf32>, vector<8x128xf32> -> vector<8x128xf32>
    %c0_6 = arith.constant 0 : index
    %c0_7 = arith.constant 0 : index
    %6 = vector.load %arg5[%c0_6, %c0_7] : memref<1x1xf32, #tpu.memory_space<vmem>>, vector<1x1xf32>
    %7 = vector.extract %6[0, 0] : f32 from vector<1x1xf32>
    %cst_8 = arith.constant 0.000000e+00 : f32
    %8 = vector.broadcast %cst_8 : f32 to vector<8x128xf32>
    %9 = arith.cmpf ogt, %5, %8 : vector<8x128xf32>
    %10 = vector.broadcast %7 : f32 to vector<8x128xf32>
    %11 = arith.mulf %10, %5 : vector<8x128xf32>
    %12 = arith.select %9, %5, %11 : vector<8x128xi1>, vector<8x128xf32>
    %c0_9 = arith.constant 0 : index
    %c0_10 = arith.constant 0 : index
    %13 = vector.load %arg4[%c0_9, %c0_10] : memref<128x128xf32, #tpu.memory_space<vmem>>, vector<128x128xf32>
    %cst_11 = arith.constant dense<0.000000e+00> : vector<8x128xf32>
    %14 = tpu.matmul %12, %13, %cst_11 {dimension_numbers = #tpu.dot_dimension_numbers<[1], [0], [0], [1], [0, 0, 1, 1], [], []>} : vector<8x128xf32>, vector<128x128xf32>, vector<8x128xf32> -> vector<8x128xf32>
    %15 = arith.negf %14 : vector<8x128xf32>
    %16 = math.exp %15 : vector<8x128xf32>
    %cst_12 = arith.constant 1.000000e+00 : f32
    %17 = vector.broadcast %cst_12 : f32 to vector<8x128xf32>
    %18 = arith.addf %17, %16 : vector<8x128xf32>
    %19 = arith.divf %17, %18 : vector<8x128xf32>
    %c0_13 = arith.constant 0 : index
    %c0_14 = arith.constant 0 : index
    %20 = vector.load %arg2[%c0_13, %c0_14] : memref<8x8xf32, #tpu.memory_space<vmem>>, vector<8x8xf32>
    %cst_15 = arith.constant dense<0.000000e+00> : vector<8x128xf32>
    %21 = tpu.matmul %20, %19, %cst_15 {dimension_numbers = #tpu.dot_dimension_numbers<[1], [0], [0], [1], [0, 0, 1, 1], [], []>} : vector<8x8xf32>, vector<8x128xf32>, vector<8x128xf32> -> vector<8x128xf32>
    %22 = arith.mulf %1, %21 : vector<8x128xf32>
    %23 = arith.truncf %22 : vector<8x128xf32> to vector<8x128xbf16>
    %cst_16 = arith.constant 0.000000e+00 : f32
    %24 = vector.broadcast %cst_16 : f32 to vector<8x128xf32>
    %c0_17 = arith.constant 0 : index
    %c0_18 = arith.constant 0 : index
    %c0_19 = arith.constant 0 : index
    %25 = vector.load %arg6[%c0_17, %c0_18, %c0_19] : memref<9x8x8xbf16, #tpu.memory_space<vmem>>, vector<1x8x8xbf16>
    %26 = vector.shape_cast %25 : vector<1x8x8xbf16> to vector<8x8xbf16>
    %cst_20 = arith.constant dense<0.000000e+00> : vector<8x128xf32>
    %27 = tpu.matmul %26, %23, %cst_20 {dimension_numbers = #tpu.dot_dimension_numbers<[1], [0], [0], [1], [0, 0, 1, 1], [], []>} : vector<8x8xbf16>, vector<8x128xbf16>, vector<8x128xf32> -> vector<8x128xf32>
    %28 = arith.truncf %27 : vector<8x128xf32> to vector<8x128xbf16>
    %c0_21 = arith.constant 0 : index
    %c0_22 = arith.constant 0 : index
    %c0_23 = arith.constant 0 : index
    %29 = vector.load %arg7[%c0_21, %c0_22, %c0_23] : memref<9x128x128xbf16, #tpu.memory_space<vmem>>, vector<1x128x128xbf16>
    %30 = vector.shape_cast %29 : vector<1x128x128xbf16> to vector<128x128xbf16>
    %cst_24 = arith.constant dense<0.000000e+00> : vector<8x128xf32>
    %31 = tpu.matmul %28, %30, %cst_24 {dimension_numbers = #tpu.dot_dimension_numbers<[1], [0], [0], [1], [0, 0, 1, 1], [], []>} : vector<8x128xbf16>, vector<128x128xbf16>, vector<8x128xf32> -> vector<8x128xf32>
    %32 = arith.addf %24, %31 : vector<8x128xf32>
    %c1 = arith.constant 1 : index
    %c0_25 = arith.constant 0 : index
    %c0_26 = arith.constant 0 : index
    %33 = vector.load %arg6[%c1, %c0_25, %c0_26] : memref<9x8x8xbf16, #tpu.memory_space<vmem>>, vector<1x8x8xbf16>
    %34 = vector.shape_cast %33 : vector<1x8x8xbf16> to vector<8x8xbf16>
    %cst_27 = arith.constant dense<0.000000e+00> : vector<8x128xf32>
    %35 = tpu.matmul %34, %23, %cst_27 {dimension_numbers = #tpu.dot_dimension_numbers<[1], [0], [0], [1], [0, 0, 1, 1], [], []>} : vector<8x8xbf16>, vector<8x128xbf16>, vector<8x128xf32> -> vector<8x128xf32>
    %36 = arith.truncf %35 : vector<8x128xf32> to vector<8x128xbf16>
    %c1_28 = arith.constant 1 : index
    %c0_29 = arith.constant 0 : index
    %c0_30 = arith.constant 0 : index
    %37 = vector.load %arg7[%c1_28, %c0_29, %c0_30] : memref<9x128x128xbf16, #tpu.memory_space<vmem>>, vector<1x128x128xbf16>
    %38 = vector.shape_cast %37 : vector<1x128x128xbf16> to vector<128x128xbf16>
    %cst_31 = arith.constant dense<0.000000e+00> : vector<8x128xf32>
    %39 = tpu.matmul %36, %38, %cst_31 {dimension_numbers = #tpu.dot_dimension_numbers<[1], [0], [0], [1], [0, 0, 1, 1], [], []>} : vector<8x128xbf16>, vector<128x128xbf16>, vector<8x128xf32> -> vector<8x128xf32>
    %40 = arith.addf %32, %39 : vector<8x128xf32>
    %c2 = arith.constant 2 : index
    %c0_32 = arith.constant 0 : index
    %c0_33 = arith.constant 0 : index
    %41 = vector.load %arg6[%c2, %c0_32, %c0_33] : memref<9x8x8xbf16, #tpu.memory_space<vmem>>, vector<1x8x8xbf16>
    %42 = vector.shape_cast %41 : vector<1x8x8xbf16> to vector<8x8xbf16>
    %cst_34 = arith.constant dense<0.000000e+00> : vector<8x128xf32>
    %43 = tpu.matmul %42, %23, %cst_34 {dimension_numbers = #tpu.dot_dimension_numbers<[1], [0], [0], [1], [0, 0, 1, 1], [], []>} : vector<8x8xbf16>, vector<8x128xbf16>, vector<8x128xf32> -> vector<8x128xf32>
    %44 = arith.truncf %43 : vector<8x128xf32> to vector<8x128xbf16>
    %c2_35 = arith.constant 2 : index
    %c0_36 = arith.constant 0 : index
    %c0_37 = arith.constant 0 : index
    %45 = vector.load %arg7[%c2_35, %c0_36, %c0_37] : memref<9x128x128xbf16, #tpu.memory_space<vmem>>, vector<1x128x128xbf16>
    %46 = vector.shape_cast %45 : vector<1x128x128xbf16> to vector<128x128xbf16>
    %cst_38 = arith.constant dense<0.000000e+00> : vector<8x128xf32>
    %47 = tpu.matmul %44, %46, %cst_38 {dimension_numbers = #tpu.dot_dimension_numbers<[1], [0], [0], [1], [0, 0, 1, 1], [], []>} : vector<8x128xbf16>, vector<128x128xbf16>, vector<8x128xf32> -> vector<8x128xf32>
    %48 = arith.addf %40, %47 : vector<8x128xf32>
    %c3 = arith.constant 3 : index
    %c0_39 = arith.constant 0 : index
    %c0_40 = arith.constant 0 : index
    %49 = vector.load %arg6[%c3, %c0_39, %c0_40] : memref<9x8x8xbf16, #tpu.memory_space<vmem>>, vector<1x8x8xbf16>
    %50 = vector.shape_cast %49 : vector<1x8x8xbf16> to vector<8x8xbf16>
    %cst_41 = arith.constant dense<0.000000e+00> : vector<8x128xf32>
    %51 = tpu.matmul %50, %23, %cst_41 {dimension_numbers = #tpu.dot_dimension_numbers<[1], [0], [0], [1], [0, 0, 1, 1], [], []>} : vector<8x8xbf16>, vector<8x128xbf16>, vector<8x128xf32> -> vector<8x128xf32>
    %52 = arith.truncf %51 : vector<8x128xf32> to vector<8x128xbf16>
    %c3_42 = arith.constant 3 : index
    %c0_43 = arith.constant 0 : index
    %c0_44 = arith.constant 0 : index
    %53 = vector.load %arg7[%c3_42, %c0_43, %c0_44] : memref<9x128x128xbf16, #tpu.memory_space<vmem>>, vector<1x128x128xbf16>
    %54 = vector.shape_cast %53 : vector<1x128x128xbf16> to vector<128x128xbf16>
    %cst_45 = arith.constant dense<0.000000e+00> : vector<8x128xf32>
    %55 = tpu.matmul %52, %54, %cst_45 {dimension_numbers = #tpu.dot_dimension_numbers<[1], [0], [0], [1], [0, 0, 1, 1], [], []>} : vector<8x128xbf16>, vector<128x128xbf16>, vector<8x128xf32> -> vector<8x128xf32>
    %56 = arith.addf %48, %55 : vector<8x128xf32>
    %c4 = arith.constant 4 : index
    %c0_46 = arith.constant 0 : index
    %c0_47 = arith.constant 0 : index
    %57 = vector.load %arg6[%c4, %c0_46, %c0_47] : memref<9x8x8xbf16, #tpu.memory_space<vmem>>, vector<1x8x8xbf16>
    %58 = vector.shape_cast %57 : vector<1x8x8xbf16> to vector<8x8xbf16>
    %cst_48 = arith.constant dense<0.000000e+00> : vector<8x128xf32>
    %59 = tpu.matmul %58, %23, %cst_48 {dimension_numbers = #tpu.dot_dimension_numbers<[1], [0], [0], [1], [0, 0, 1, 1], [], []>} : vector<8x8xbf16>, vector<8x128xbf16>, vector<8x128xf32> -> vector<8x128xf32>
    %60 = arith.truncf %59 : vector<8x128xf32> to vector<8x128xbf16>
    %c4_49 = arith.constant 4 : index
    %c0_50 = arith.constant 0 : index
    %c0_51 = arith.constant 0 : index
    %61 = vector.load %arg7[%c4_49, %c0_50, %c0_51] : memref<9x128x128xbf16, #tpu.memory_space<vmem>>, vector<1x128x128xbf16>
    %62 = vector.shape_cast %61 : vector<1x128x128xbf16> to vector<128x128xbf16>
    %cst_52 = arith.constant dense<0.000000e+00> : vector<8x128xf32>
    %63 = tpu.matmul %60, %62, %cst_52 {dimension_numbers = #tpu.dot_dimension_numbers<[1], [0], [0], [1], [0, 0, 1, 1], [], []>} : vector<8x128xbf16>, vector<128x128xbf16>, vector<8x128xf32> -> vector<8x128xf32>
    %64 = arith.addf %56, %63 : vector<8x128xf32>
    %c5 = arith.constant 5 : index
    %c0_53 = arith.constant 0 : index
    %c0_54 = arith.constant 0 : index
    %65 = vector.load %arg6[%c5, %c0_53, %c0_54] : memref<9x8x8xbf16, #tpu.memory_space<vmem>>, vector<1x8x8xbf16>
    %66 = vector.shape_cast %65 : vector<1x8x8xbf16> to vector<8x8xbf16>
    %cst_55 = arith.constant dense<0.000000e+00> : vector<8x128xf32>
    %67 = tpu.matmul %66, %23, %cst_55 {dimension_numbers = #tpu.dot_dimension_numbers<[1], [0], [0], [1], [0, 0, 1, 1], [], []>} : vector<8x8xbf16>, vector<8x128xbf16>, vector<8x128xf32> -> vector<8x128xf32>
    %68 = arith.truncf %67 : vector<8x128xf32> to vector<8x128xbf16>
    %c5_56 = arith.constant 5 : index
    %c0_57 = arith.constant 0 : index
    %c0_58 = arith.constant 0 : index
    %69 = vector.load %arg7[%c5_56, %c0_57, %c0_58] : memref<9x128x128xbf16, #tpu.memory_space<vmem>>, vector<1x128x128xbf16>
    %70 = vector.shape_cast %69 : vector<1x128x128xbf16> to vector<128x128xbf16>
    %cst_59 = arith.constant dense<0.000000e+00> : vector<8x128xf32>
    %71 = tpu.matmul %68, %70, %cst_59 {dimension_numbers = #tpu.dot_dimension_numbers<[1], [0], [0], [1], [0, 0, 1, 1], [], []>} : vector<8x128xbf16>, vector<128x128xbf16>, vector<8x128xf32> -> vector<8x128xf32>
    %72 = arith.addf %64, %71 : vector<8x128xf32>
    %c6 = arith.constant 6 : index
    %c0_60 = arith.constant 0 : index
    %c0_61 = arith.constant 0 : index
    %73 = vector.load %arg6[%c6, %c0_60, %c0_61] : memref<9x8x8xbf16, #tpu.memory_space<vmem>>, vector<1x8x8xbf16>
    %74 = vector.shape_cast %73 : vector<1x8x8xbf16> to vector<8x8xbf16>
    %cst_62 = arith.constant dense<0.000000e+00> : vector<8x128xf32>
    %75 = tpu.matmul %74, %23, %cst_62 {dimension_numbers = #tpu.dot_dimension_numbers<[1], [0], [0], [1], [0, 0, 1, 1], [], []>} : vector<8x8xbf16>, vector<8x128xbf16>, vector<8x128xf32> -> vector<8x128xf32>
    %76 = arith.truncf %75 : vector<8x128xf32> to vector<8x128xbf16>
    %c6_63 = arith.constant 6 : index
    %c0_64 = arith.constant 0 : index
    %c0_65 = arith.constant 0 : index
    %77 = vector.load %arg7[%c6_63, %c0_64, %c0_65] : memref<9x128x128xbf16, #tpu.memory_space<vmem>>, vector<1x128x128xbf16>
    %78 = vector.shape_cast %77 : vector<1x128x128xbf16> to vector<128x128xbf16>
    %cst_66 = arith.constant dense<0.000000e+00> : vector<8x128xf32>
    %79 = tpu.matmul %76, %78, %cst_66 {dimension_numbers = #tpu.dot_dimension_numbers<[1], [0], [0], [1], [0, 0, 1, 1], [], []>} : vector<8x128xbf16>, vector<128x128xbf16>, vector<8x128xf32> -> vector<8x128xf32>
    %80 = arith.addf %72, %79 : vector<8x128xf32>
    %c7 = arith.constant 7 : index
    %c0_67 = arith.constant 0 : index
    %c0_68 = arith.constant 0 : index
    %81 = vector.load %arg6[%c7, %c0_67, %c0_68] : memref<9x8x8xbf16, #tpu.memory_space<vmem>>, vector<1x8x8xbf16>
    %82 = vector.shape_cast %81 : vector<1x8x8xbf16> to vector<8x8xbf16>
    %cst_69 = arith.constant dense<0.000000e+00> : vector<8x128xf32>
    %83 = tpu.matmul %82, %23, %cst_69 {dimension_numbers = #tpu.dot_dimension_numbers<[1], [0], [0], [1], [0, 0, 1, 1], [], []>} : vector<8x8xbf16>, vector<8x128xbf16>, vector<8x128xf32> -> vector<8x128xf32>
    %84 = arith.truncf %83 : vector<8x128xf32> to vector<8x128xbf16>
    %c7_70 = arith.constant 7 : index
    %c0_71 = arith.constant 0 : index
    %c0_72 = arith.constant 0 : index
    %85 = vector.load %arg7[%c7_70, %c0_71, %c0_72] : memref<9x128x128xbf16, #tpu.memory_space<vmem>>, vector<1x128x128xbf16>
    %86 = vector.shape_cast %85 : vector<1x128x128xbf16> to vector<128x128xbf16>
    %cst_73 = arith.constant dense<0.000000e+00> : vector<8x128xf32>
    %87 = tpu.matmul %84, %86, %cst_73 {dimension_numbers = #tpu.dot_dimension_numbers<[1], [0], [0], [1], [0, 0, 1, 1], [], []>} : vector<8x128xbf16>, vector<128x128xbf16>, vector<8x128xf32> -> vector<8x128xf32>
    %88 = arith.addf %80, %87 : vector<8x128xf32>
    %c8 = arith.constant 8 : index
    %c0_74 = arith.constant 0 : index
    %c0_75 = arith.constant 0 : index
    %89 = vector.load %arg6[%c8, %c0_74, %c0_75] : memref<9x8x8xbf16, #tpu.memory_space<vmem>>, vector<1x8x8xbf16>
    %90 = vector.shape_cast %89 : vector<1x8x8xbf16> to vector<8x8xbf16>
    %cst_76 = arith.constant dense<0.000000e+00> : vector<8x128xf32>
    %91 = tpu.matmul %90, %23, %cst_76 {dimension_numbers = #tpu.dot_dimension_numbers<[1], [0], [0], [1], [0, 0, 1, 1], [], []>} : vector<8x8xbf16>, vector<8x128xbf16>, vector<8x128xf32> -> vector<8x128xf32>
    %92 = arith.truncf %91 : vector<8x128xf32> to vector<8x128xbf16>
    %c8_77 = arith.constant 8 : index
    %c0_78 = arith.constant 0 : index
    %c0_79 = arith.constant 0 : index
    %93 = vector.load %arg7[%c8_77, %c0_78, %c0_79] : memref<9x128x128xbf16, #tpu.memory_space<vmem>>, vector<1x128x128xbf16>
    %94 = vector.shape_cast %93 : vector<1x128x128xbf16> to vector<128x128xbf16>
    %cst_80 = arith.constant dense<0.000000e+00> : vector<8x128xf32>
    %95 = tpu.matmul %92, %94, %cst_80 {dimension_numbers = #tpu.dot_dimension_numbers<[1], [0], [0], [1], [0, 0, 1, 1], [], []>} : vector<8x128xbf16>, vector<128x128xbf16>, vector<8x128xf32> -> vector<8x128xf32>
    %96 = arith.addf %88, %95 : vector<8x128xf32>
    %c0_81 = arith.constant 0 : index
    %c0_82 = arith.constant 0 : index
    %97 = vector.load %arg8[%c0_81, %c0_82] : memref<1x128xf32, #tpu.memory_space<vmem>>, vector<1x128xf32>
    %98 = vector.broadcast %97 : vector<1x128xf32> to vector<8x128xf32>
    %99 = arith.addf %96, %98 : vector<8x128xf32>
    %cst_83 = arith.constant 0.000000e+00 : f32
    %100 = vector.broadcast %cst_83 : f32 to vector<8x128xf32>
    %101 = arith.maximumf %99, %100 : vector<8x128xf32>
    %102 = arith.truncf %101 : vector<8x128xf32> to vector<8x128xbf16>
    %c0_84 = arith.constant 0 : index
    %c0_85 = arith.constant 0 : index
    %103 = vector.load %arg12[%c0_84, %c0_85] : memref<128x128xbf16, #tpu.memory_space<vmem>>, vector<128x128xbf16>
    %cst_86 = arith.constant dense<0.000000e+00> : vector<8x128xf32>
    %104 = tpu.matmul %60, %103, %cst_86 {dimension_numbers = #tpu.dot_dimension_numbers<[1], [0], [0], [1], [0, 0, 1, 1], [], []>} : vector<8x128xbf16>, vector<128x128xbf16>, vector<8x128xf32> -> vector<8x128xf32>
    %c0_87 = arith.constant 0 : index
    %c0_88 = arith.constant 0 : index
    %105 = vector.load %arg13[%c0_87, %c0_88] : memref<1x128xf32, #tpu.memory_space<vmem>>, vector<1x128xf32>
    %106 = vector.broadcast %105 : vector<1x128xf32> to vector<8x128xf32>
    %107 = arith.addf %104, %106 : vector<8x128xf32>
    %cst_89 = arith.constant 0.000000e+00 : f32
    %108 = vector.broadcast %cst_89 : f32 to vector<8x128xf32>
    %c0_90 = arith.constant 0 : index
    %c0_91 = arith.constant 0 : index
    %c0_92 = arith.constant 0 : index
    %109 = vector.load %arg9[%c0_90, %c0_91, %c0_92] : memref<9x8x8xbf16, #tpu.memory_space<vmem>>, vector<1x8x8xbf16>
    %110 = vector.shape_cast %109 : vector<1x8x8xbf16> to vector<8x8xbf16>
    %cst_93 = arith.constant dense<0.000000e+00> : vector<8x128xf32>
    %111 = tpu.matmul %110, %102, %cst_93 {dimension_numbers = #tpu.dot_dimension_numbers<[1], [0], [0], [1], [0, 0, 1, 1], [], []>} : vector<8x8xbf16>, vector<8x128xbf16>, vector<8x128xf32> -> vector<8x128xf32>
    %112 = arith.truncf %111 : vector<8x128xf32> to vector<8x128xbf16>
    %c0_94 = arith.constant 0 : index
    %c0_95 = arith.constant 0 : index
    %c0_96 = arith.constant 0 : index
    %113 = vector.load %arg10[%c0_94, %c0_95, %c0_96] : memref<9x128x128xbf16, #tpu.memory_space<vmem>>, vector<1x128x128xbf16>
    %114 = vector.shape_cast %113 : vector<1x128x128xbf16> to vector<128x128xbf16>
    %cst_97 = arith.constant dense<0.000000e+00> : vector<8x128xf32>
    %115 = tpu.matmul %112, %114, %cst_97 {dimension_numbers = #tpu.dot_dimension_numbers<[1], [0], [0], [1], [0, 0, 1, 1], [], []>} : vector<8x128xbf16>, vector<128x128xbf16>, vector<8x128xf32> -> vector<8x128xf32>
    %116 = arith.addf %108, %115 : vector<8x128xf32>
    %c1_98 = arith.constant 1 : index
    %c0_99 = arith.constant 0 : index
    %c0_100 = arith.constant 0 : index
    %117 = vector.load %arg9[%c1_98, %c0_99, %c0_100] : memref<9x8x8xbf16, #tpu.memory_space<vmem>>, vector<1x8x8xbf16>
    %118 = vector.shape_cast %117 : vector<1x8x8xbf16> to vector<8x8xbf16>
    %cst_101 = arith.constant dense<0.000000e+00> : vector<8x128xf32>
    %119 = tpu.matmul %118, %102, %cst_101 {dimension_numbers = #tpu.dot_dimension_numbers<[1], [0], [0], [1], [0, 0, 1, 1], [], []>} : vector<8x8xbf16>, vector<8x128xbf16>, vector<8x128xf32> -> vector<8x128xf32>
    %120 = arith.truncf %119 : vector<8x128xf32> to vector<8x128xbf16>
    %c1_102 = arith.constant 1 : index
    %c0_103 = arith.constant 0 : index
    %c0_104 = arith.constant 0 : index
    %121 = vector.load %arg10[%c1_102, %c0_103, %c0_104] : memref<9x128x128xbf16, #tpu.memory_space<vmem>>, vector<1x128x128xbf16>
    %122 = vector.shape_cast %121 : vector<1x128x128xbf16> to vector<128x128xbf16>
    %cst_105 = arith.constant dense<0.000000e+00> : vector<8x128xf32>
    %123 = tpu.matmul %120, %122, %cst_105 {dimension_numbers = #tpu.dot_dimension_numbers<[1], [0], [0], [1], [0, 0, 1, 1], [], []>} : vector<8x128xbf16>, vector<128x128xbf16>, vector<8x128xf32> -> vector<8x128xf32>
    %124 = arith.addf %116, %123 : vector<8x128xf32>
    %c2_106 = arith.constant 2 : index
    %c0_107 = arith.constant 0 : index
    %c0_108 = arith.constant 0 : index
    %125 = vector.load %arg9[%c2_106, %c0_107, %c0_108] : memref<9x8x8xbf16, #tpu.memory_space<vmem>>, vector<1x8x8xbf16>
    %126 = vector.shape_cast %125 : vector<1x8x8xbf16> to vector<8x8xbf16>
    %cst_109 = arith.constant dense<0.000000e+00> : vector<8x128xf32>
    %127 = tpu.matmul %126, %102, %cst_109 {dimension_numbers = #tpu.dot_dimension_numbers<[1], [0], [0], [1], [0, 0, 1, 1], [], []>} : vector<8x8xbf16>, vector<8x128xbf16>, vector<8x128xf32> -> vector<8x128xf32>
    %128 = arith.truncf %127 : vector<8x128xf32> to vector<8x128xbf16>
    %c2_110 = arith.constant 2 : index
    %c0_111 = arith.constant 0 : index
    %c0_112 = arith.constant 0 : index
    %129 = vector.load %arg10[%c2_110, %c0_111, %c0_112] : memref<9x128x128xbf16, #tpu.memory_space<vmem>>, vector<1x128x128xbf16>
    %130 = vector.shape_cast %129 : vector<1x128x128xbf16> to vector<128x128xbf16>
    %cst_113 = arith.constant dense<0.000000e+00> : vector<8x128xf32>
    %131 = tpu.matmul %128, %130, %cst_113 {dimension_numbers = #tpu.dot_dimension_numbers<[1], [0], [0], [1], [0, 0, 1, 1], [], []>} : vector<8x128xbf16>, vector<128x128xbf16>, vector<8x128xf32> -> vector<8x128xf32>
    %132 = arith.addf %124, %131 : vector<8x128xf32>
    %c3_114 = arith.constant 3 : index
    %c0_115 = arith.constant 0 : index
    %c0_116 = arith.constant 0 : index
    %133 = vector.load %arg9[%c3_114, %c0_115, %c0_116] : memref<9x8x8xbf16, #tpu.memory_space<vmem>>, vector<1x8x8xbf16>
    %134 = vector.shape_cast %133 : vector<1x8x8xbf16> to vector<8x8xbf16>
    %cst_117 = arith.constant dense<0.000000e+00> : vector<8x128xf32>
    %135 = tpu.matmul %134, %102, %cst_117 {dimension_numbers = #tpu.dot_dimension_numbers<[1], [0], [0], [1], [0, 0, 1, 1], [], []>} : vector<8x8xbf16>, vector<8x128xbf16>, vector<8x128xf32> -> vector<8x128xf32>
    %136 = arith.truncf %135 : vector<8x128xf32> to vector<8x128xbf16>
    %c3_118 = arith.constant 3 : index
    %c0_119 = arith.constant 0 : index
    %c0_120 = arith.constant 0 : index
    %137 = vector.load %arg10[%c3_118, %c0_119, %c0_120] : memref<9x128x128xbf16, #tpu.memory_space<vmem>>, vector<1x128x128xbf16>
    %138 = vector.shape_cast %137 : vector<1x128x128xbf16> to vector<128x128xbf16>
    %cst_121 = arith.constant dense<0.000000e+00> : vector<8x128xf32>
    %139 = tpu.matmul %136, %138, %cst_121 {dimension_numbers = #tpu.dot_dimension_numbers<[1], [0], [0], [1], [0, 0, 1, 1], [], []>} : vector<8x128xbf16>, vector<128x128xbf16>, vector<8x128xf32> -> vector<8x128xf32>
    %140 = arith.addf %132, %139 : vector<8x128xf32>
    %c4_122 = arith.constant 4 : index
    %c0_123 = arith.constant 0 : index
    %c0_124 = arith.constant 0 : index
    %141 = vector.load %arg9[%c4_122, %c0_123, %c0_124] : memref<9x8x8xbf16, #tpu.memory_space<vmem>>, vector<1x8x8xbf16>
    %142 = vector.shape_cast %141 : vector<1x8x8xbf16> to vector<8x8xbf16>
    %cst_125 = arith.constant dense<0.000000e+00> : vector<8x128xf32>
    %143 = tpu.matmul %142, %102, %cst_125 {dimension_numbers = #tpu.dot_dimension_numbers<[1], [0], [0], [1], [0, 0, 1, 1], [], []>} : vector<8x8xbf16>, vector<8x128xbf16>, vector<8x128xf32> -> vector<8x128xf32>
    %144 = arith.truncf %143 : vector<8x128xf32> to vector<8x128xbf16>
    %c4_126 = arith.constant 4 : index
    %c0_127 = arith.constant 0 : index
    %c0_128 = arith.constant 0 : index
    %145 = vector.load %arg10[%c4_126, %c0_127, %c0_128] : memref<9x128x128xbf16, #tpu.memory_space<vmem>>, vector<1x128x128xbf16>
    %146 = vector.shape_cast %145 : vector<1x128x128xbf16> to vector<128x128xbf16>
    %cst_129 = arith.constant dense<0.000000e+00> : vector<8x128xf32>
    %147 = tpu.matmul %144, %146, %cst_129 {dimension_numbers = #tpu.dot_dimension_numbers<[1], [0], [0], [1], [0, 0, 1, 1], [], []>} : vector<8x128xbf16>, vector<128x128xbf16>, vector<8x128xf32> -> vector<8x128xf32>
    %148 = arith.addf %140, %147 : vector<8x128xf32>
    %c5_130 = arith.constant 5 : index
    %c0_131 = arith.constant 0 : index
    %c0_132 = arith.constant 0 : index
    %149 = vector.load %arg9[%c5_130, %c0_131, %c0_132] : memref<9x8x8xbf16, #tpu.memory_space<vmem>>, vector<1x8x8xbf16>
    %150 = vector.shape_cast %149 : vector<1x8x8xbf16> to vector<8x8xbf16>
    %cst_133 = arith.constant dense<0.000000e+00> : vector<8x128xf32>
    %151 = tpu.matmul %150, %102, %cst_133 {dimension_numbers = #tpu.dot_dimension_numbers<[1], [0], [0], [1], [0, 0, 1, 1], [], []>} : vector<8x8xbf16>, vector<8x128xbf16>, vector<8x128xf32> -> vector<8x128xf32>
    %152 = arith.truncf %151 : vector<8x128xf32> to vector<8x128xbf16>
    %c5_134 = arith.constant 5 : index
    %c0_135 = arith.constant 0 : index
    %c0_136 = arith.constant 0 : index
    %153 = vector.load %arg10[%c5_134, %c0_135, %c0_136] : memref<9x128x128xbf16, #tpu.memory_space<vmem>>, vector<1x128x128xbf16>
    %154 = vector.shape_cast %153 : vector<1x128x128xbf16> to vector<128x128xbf16>
    %cst_137 = arith.constant dense<0.000000e+00> : vector<8x128xf32>
    %155 = tpu.matmul %152, %154, %cst_137 {dimension_numbers = #tpu.dot_dimension_numbers<[1], [0], [0], [1], [0, 0, 1, 1], [], []>} : vector<8x128xbf16>, vector<128x128xbf16>, vector<8x128xf32> -> vector<8x128xf32>
    %156 = arith.addf %148, %155 : vector<8x128xf32>
    %c6_138 = arith.constant 6 : index
    %c0_139 = arith.constant 0 : index
    %c0_140 = arith.constant 0 : index
    %157 = vector.load %arg9[%c6_138, %c0_139, %c0_140] : memref<9x8x8xbf16, #tpu.memory_space<vmem>>, vector<1x8x8xbf16>
    %158 = vector.shape_cast %157 : vector<1x8x8xbf16> to vector<8x8xbf16>
    %cst_141 = arith.constant dense<0.000000e+00> : vector<8x128xf32>
    %159 = tpu.matmul %158, %102, %cst_141 {dimension_numbers = #tpu.dot_dimension_numbers<[1], [0], [0], [1], [0, 0, 1, 1], [], []>} : vector<8x8xbf16>, vector<8x128xbf16>, vector<8x128xf32> -> vector<8x128xf32>
    %160 = arith.truncf %159 : vector<8x128xf32> to vector<8x128xbf16>
    %c6_142 = arith.constant 6 : index
    %c0_143 = arith.constant 0 : index
    %c0_144 = arith.constant 0 : index
    %161 = vector.load %arg10[%c6_142, %c0_143, %c0_144] : memref<9x128x128xbf16, #tpu.memory_space<vmem>>, vector<1x128x128xbf16>
    %162 = vector.shape_cast %161 : vector<1x128x128xbf16> to vector<128x128xbf16>
    %cst_145 = arith.constant dense<0.000000e+00> : vector<8x128xf32>
    %163 = tpu.matmul %160, %162, %cst_145 {dimension_numbers = #tpu.dot_dimension_numbers<[1], [0], [0], [1], [0, 0, 1, 1], [], []>} : vector<8x128xbf16>, vector<128x128xbf16>, vector<8x128xf32> -> vector<8x128xf32>
    %164 = arith.addf %156, %163 : vector<8x128xf32>
    %c7_146 = arith.constant 7 : index
    %c0_147 = arith.constant 0 : index
    %c0_148 = arith.constant 0 : index
    %165 = vector.load %arg9[%c7_146, %c0_147, %c0_148] : memref<9x8x8xbf16, #tpu.memory_space<vmem>>, vector<1x8x8xbf16>
    %166 = vector.shape_cast %165 : vector<1x8x8xbf16> to vector<8x8xbf16>
    %cst_149 = arith.constant dense<0.000000e+00> : vector<8x128xf32>
    %167 = tpu.matmul %166, %102, %cst_149 {dimension_numbers = #tpu.dot_dimension_numbers<[1], [0], [0], [1], [0, 0, 1, 1], [], []>} : vector<8x8xbf16>, vector<8x128xbf16>, vector<8x128xf32> -> vector<8x128xf32>
    %168 = arith.truncf %167 : vector<8x128xf32> to vector<8x128xbf16>
    %c7_150 = arith.constant 7 : index
    %c0_151 = arith.constant 0 : index
    %c0_152 = arith.constant 0 : index
    %169 = vector.load %arg10[%c7_150, %c0_151, %c0_152] : memref<9x128x128xbf16, #tpu.memory_space<vmem>>, vector<1x128x128xbf16>
    %170 = vector.shape_cast %169 : vector<1x128x128xbf16> to vector<128x128xbf16>
    %cst_153 = arith.constant dense<0.000000e+00> : vector<8x128xf32>
    %171 = tpu.matmul %168, %170, %cst_153 {dimension_numbers = #tpu.dot_dimension_numbers<[1], [0], [0], [1], [0, 0, 1, 1], [], []>} : vector<8x128xbf16>, vector<128x128xbf16>, vector<8x128xf32> -> vector<8x128xf32>
    %172 = arith.addf %164, %171 : vector<8x128xf32>
    %c8_154 = arith.constant 8 : index
    %c0_155 = arith.constant 0 : index
    %c0_156 = arith.constant 0 : index
    %173 = vector.load %arg9[%c8_154, %c0_155, %c0_156] : memref<9x8x8xbf16, #tpu.memory_space<vmem>>, vector<1x8x8xbf16>
    %174 = vector.shape_cast %173 : vector<1x8x8xbf16> to vector<8x8xbf16>
    %cst_157 = arith.constant dense<0.000000e+00> : vector<8x128xf32>
    %175 = tpu.matmul %174, %102, %cst_157 {dimension_numbers = #tpu.dot_dimension_numbers<[1], [0], [0], [1], [0, 0, 1, 1], [], []>} : vector<8x8xbf16>, vector<8x128xbf16>, vector<8x128xf32> -> vector<8x128xf32>
    %176 = arith.truncf %175 : vector<8x128xf32> to vector<8x128xbf16>
    %c8_158 = arith.constant 8 : index
    %c0_159 = arith.constant 0 : index
    %c0_160 = arith.constant 0 : index
    %177 = vector.load %arg10[%c8_158, %c0_159, %c0_160] : memref<9x128x128xbf16, #tpu.memory_space<vmem>>, vector<1x128x128xbf16>
    %178 = vector.shape_cast %177 : vector<1x128x128xbf16> to vector<128x128xbf16>
    %cst_161 = arith.constant dense<0.000000e+00> : vector<8x128xf32>
    %179 = tpu.matmul %176, %178, %cst_161 {dimension_numbers = #tpu.dot_dimension_numbers<[1], [0], [0], [1], [0, 0, 1, 1], [], []>} : vector<8x128xbf16>, vector<128x128xbf16>, vector<8x128xf32> -> vector<8x128xf32>
    %180 = arith.addf %172, %179 : vector<8x128xf32>
    %c0_162 = arith.constant 0 : index
    %c0_163 = arith.constant 0 : index
    %181 = vector.load %arg11[%c0_162, %c0_163] : memref<1x128xf32, #tpu.memory_space<vmem>>, vector<1x128xf32>
    %182 = vector.broadcast %181 : vector<1x128xf32> to vector<8x128xf32>
    %183 = arith.addf %180, %182 : vector<8x128xf32>
    %184 = arith.addf %183, %107 : vector<8x128xf32>
    %cst_164 = arith.constant 0.000000e+00 : f32
    %185 = vector.broadcast %cst_164 : f32 to vector<8x128xf32>
    %186 = arith.maximumf %184, %185 : vector<8x128xf32>
    %187 = arith.truncf %186 : vector<8x128xf32> to vector<8x128xbf16>
    %c0_165 = arith.constant 0 : index
    %c0_166 = arith.constant 0 : index
    %188 = vector.load %arg14[%c0_165, %c0_166] : memref<8x128xbf16, #tpu.memory_space<vmem>>, vector<8x128xbf16>
    tpu.vector_store %arg14[%c0_165, %c0_166], %187 {strides = array<i32>} : memref<8x128xbf16, #tpu.memory_space<vmem>>, vector<8x128xbf16>,
    return
  }
}

module attributes {stable_mosaic.version = 11 : i64} {
  func.func @_tail_kernel(%arg0: memref<8x128xbf16, #tpu.memory_space<vmem>>, %arg1: memref<8x8xf32, #tpu.memory_space<vmem>>, %arg2: memref<128x128xbf16, #tpu.memory_space<vmem>>, %arg3: memref<1x128xf32, #tpu.memory_space<vmem>>, %arg4: memref<128x128xbf16, #tpu.memory_space<vmem>>, %arg5: memref<1x128xf32, #tpu.memory_space<vmem>>, %arg6: memref<8x128xf32, #tpu.memory_space<vmem>>, %arg7: memref<8x128xf32, #tpu.memory_space<vmem>>) attributes {dimension_semantics = [], scalar_prefetch = 0 : i64, scratch_operands = 0 : i64, tpu.core_type = #tpu.core_type<tc>} {
    %c0 = arith.constant 0 : index
    %c0_0 = arith.constant 0 : index
    %0 = vector.load %arg1[%c0, %c0_0] : memref<8x8xf32, #tpu.memory_space<vmem>>, vector<8x8xf32>
    %c0_1 = arith.constant 0 : index
    %c0_2 = arith.constant 0 : index
    %1 = vector.load %arg0[%c0_1, %c0_2] : memref<8x128xbf16, #tpu.memory_space<vmem>>, vector<8x128xbf16>
    %2 = arith.extf %1 : vector<8x128xbf16> to vector<8x128xf32>
    %cst = arith.constant dense<0.000000e+00> : vector<8x128xf32>
    %3 = tpu.matmul %0, %2, %cst {dimension_numbers = #tpu.dot_dimension_numbers<[1], [0], [0], [1], [0, 0, 1, 1], [], []>} : vector<8x8xf32>, vector<8x128xf32>, vector<8x128xf32> -> vector<8x128xf32>
    %4 = arith.truncf %3 : vector<8x128xf32> to vector<8x128xbf16>
    %c0_3 = arith.constant 0 : index
    %c0_4 = arith.constant 0 : index
    %5 = vector.load %arg2[%c0_3, %c0_4] : memref<128x128xbf16, #tpu.memory_space<vmem>>, vector<128x128xbf16>
    %cst_5 = arith.constant dense<0.000000e+00> : vector<8x128xf32>
    %6 = tpu.matmul %4, %5, %cst_5 {dimension_numbers = #tpu.dot_dimension_numbers<[1], [0], [0], [1], [0, 0, 1, 1], [], []>} : vector<8x128xbf16>, vector<128x128xbf16>, vector<8x128xf32> -> vector<8x128xf32>
    %c0_6 = arith.constant 0 : index
    %c0_7 = arith.constant 0 : index
    %7 = vector.load %arg3[%c0_6, %c0_7] : memref<1x128xf32, #tpu.memory_space<vmem>>, vector<1x128xf32>
    %8 = vector.broadcast %7 : vector<1x128xf32> to vector<8x128xf32>
    %9 = arith.addf %6, %8 : vector<8x128xf32>
    %c0_8 = arith.constant 0 : index
    %c0_9 = arith.constant 0 : index
    %10 = vector.load %arg6[%c0_8, %c0_9] : memref<8x128xf32, #tpu.memory_space<vmem>>, vector<8x128xf32>
    tpu.vector_store %arg6[%c0_8, %c0_9], %9 {strides = array<i32>} : memref<8x128xf32, #tpu.memory_space<vmem>>, vector<8x128xf32>,
    %11 = arith.truncf %9 : vector<8x128xf32> to vector<8x128xbf16>
    %c0_10 = arith.constant 0 : index
    %c0_11 = arith.constant 0 : index
    %12 = vector.load %arg4[%c0_10, %c0_11] : memref<128x128xbf16, #tpu.memory_space<vmem>>, vector<128x128xbf16>
    %cst_12 = arith.constant dense<0.000000e+00> : vector<8x128xf32>
    %13 = tpu.matmul %11, %12, %cst_12 {dimension_numbers = #tpu.dot_dimension_numbers<[1], [0], [0], [1], [0, 0, 1, 1], [], []>} : vector<8x128xbf16>, vector<128x128xbf16>, vector<8x128xf32> -> vector<8x128xf32>
    %c0_13 = arith.constant 0 : index
    %c0_14 = arith.constant 0 : index
    %14 = vector.load %arg5[%c0_13, %c0_14] : memref<1x128xf32, #tpu.memory_space<vmem>>, vector<1x128xf32>
    %15 = vector.broadcast %14 : vector<1x128xf32> to vector<8x128xf32>
    %16 = arith.addf %13, %15 : vector<8x128xf32>
    %c0_15 = arith.constant 0 : index
    %c0_16 = arith.constant 0 : index
    %17 = vector.load %arg7[%c0_15, %c0_16] : memref<8x128xf32, #tpu.memory_space<vmem>>, vector<8x128xf32>
    tpu.vector_store %arg7[%c0_15, %c0_16], %16 {strides = array<i32>} : memref<8x128xf32, #tpu.memory_space<vmem>>, vector<8x128xf32>,
    return
  }
}

</mosaic_0001>

<bundles_post_ra>
// kernel: resnet18_forward.10
= control target key start
LH: loop header
LB: loop body
LE: loop exit
PB: predicated region body
PF: predicated region fallthrough
CT: control target
= control target key end

     0   :  { %s550_s0 = inlined_call_operand.vmem [shape: bf16[2,5,5,128], index: 0, kind: input, shape index: {}]   ;;  %s551_s1 = inlined_call_operand.vmem [shape: bf16[2,5,5,128], index: 1, kind: input, shape index: {}]   ;;  %s552_s2 = inlined_call_operand.vmem [shape: bf16[2,5,5,128], index: 2, kind: input, shape index: {}]   ;;  %s553_s3 = inlined_call_operand.vmem [shape: bf16[2,5,5,128], index: 3, kind: input, shape index: {}]   ;;  %s554_s4 = inlined_call_operand.vmem [shape: bf16[2,4,4,128], index: 4, kind: output, shape index: {}]  }
   0x1   :  { %v17_v0 = vld [vmem:[%s550_s0] sm:$0x7]  ;;  %v340_v1 = vld [vmem:[%s550_s0 + $0x4] sm:$0x7]  ;;  %v366_v15 = vld [vmem:[%s550_s0 + $0x8] sm:$0x7] }
   0x2   :  { %v27_v2 = vld [vmem:[%s551_s1] sm:$0x7]  ;;  %v348_v3 = vld [vmem:[%s551_s1 + $0x4] sm:$0x7]  ;;  %v62_v8 = vshrl.u32 %v17_v0, 16  ;;  %v65_v9 = vshll.u32 %v17_v0, 16 }
   0x3   :  { %v37_v4 = vld [vmem:[%s552_s2] sm:$0x7]  ;;  %v356_v5 = vld [vmem:[%s552_s2 + $0x4] sm:$0x7]  ;;  %v53_v6 = vmax.bf16 %v27_v2, %v17_v0  ;;  %v54_v7 = vmax.bf16 %v348_v3, %v340_v1  ;;  %v71_v10 = vshrl.u32 %v340_v1, 16  ;;  %v74_v11 = vshll.u32 %v340_v1, 16 }
   0x4   :  { %v166_v12 = vshrl.u32 %v37_v4, 16  ;;  %v169_v13 = vshll.u32 %v37_v4, 16  ;;  %v175_v14 = vshrl.u32 %v356_v5, 16  ;;  %v64_v16 = vrot.slane %v62_v8, 4  ;;  %v372_v20 = vld [vmem:[%s551_s1 + $0x8] sm:$0x7] }
   0x5   :  { %v67_v17 = vrot.slane %v65_v9, 5  ;;  %v73_v18 = vrot.slane %v71_v10, 4  ;;  %v178_v19 = vshll.u32 %v356_v5, 16  ;;  %v76_v21 = vrot.slane %v74_v11, 5  ;;  %v377_v24 = vld [vmem:[%s552_s2 + $0x8] sm:$0x7] }
   0x6   :  { %v168_v22 = vrot.slane %v166_v12, 4  ;;  %v171_v23 = vrot.slane %v169_v13, 5  ;;  %v55_v25 = vmax.bf16 %v372_v20, %v366_v15  ;;  %v80_v27 = vshrl.u32 %v366_v15, 16  ;;  %v387_v34 = vld [vmem:[%s550_s0 + $0xc] sm:$0x7] }
   0x7   :  { %v68_v26 = vor.u32 %v67_v17, %v64_v16  ;;  %v83_v28 = vshll.u32 %v366_v15, 16  ;;  %v177_v29 = vrot.slane %v175_v14, 4  ;;  %v77_v30 = vor.u32 %v76_v21, %v73_v18  ;;  %v392_v35 = vld [vmem:[%s551_s1 + $0xc] sm:$0x7]  ;;  %v45_v44 = vld [vmem:[%s553_s3] sm:$0x7] }
   0x8   :  { %v172_v31 = vor.u32 %v171_v23, %v168_v22  ;;  %v180_v32 = vrot.slane %v178_v19, 5  ;;  %v184_v33 = vshrl.u32 %v377_v24, 16  ;;  %v82_v37 = vrot.slane %v80_v27, 4  ;;  %v40_v47 = vld [vmem:[%s552_s2 + $0xc] sm:$0x7] }
   0x9   :  { %v69_v36 = vrot.slane %v68_v26, 4  ;;  %v85_v38 = vrot.slane %v83_v28, 5  ;;  %v187_v39 = vshll.u32 %v377_v24, 16  ;;  %v395_v40 = vrot.slane %v77_v30, 4  ;;  %v411_v54 = vld [vmem:[%s550_s0 + $0x10] sm:$0x7] }
   0xa   :  { %v173_v41 = vrot.slane %v172_v31, 4  ;;  %v181_v42 = vor.u32 %v180_v32, %v177_v29  ;;  %v56_v43 = vmax.bf16 %v392_v35, %v387_v34  ;;  %v89_v48 = vshrl.u32 %v387_v34, 16  ;;  %v46_v56 = vld [vmem:[%s553_s3 + $0x4] sm:$0x7]  ;;  %v424_v8 = vld [vmem:[%s551_s1 + $0x14] sm:$0x7] }
   0xb   :  { %v141_v45 = vmax.bf16 %v69_v36, %v53_v6  ;;  %v86_v46 = vor.u32 %v85_v38, %v82_v37  ;;  %v92_v49 = vshll.u32 %v387_v34, 16  ;;  %v142_v50 = vmax.bf16 %v395_v40, %v54_v7  ;;  %v47_v6 = vld [vmem:[%s553_s3 + $0x8] sm:$0x7]  ;;  %v429_v12 = vld [vmem:[%s551_s1 + $0x18] sm:$0x7] }
   0xc   :  { %v182_v51 = vrot.slane %v181_v42, 4  ;;  %v186_v52 = vrot.slane %v184_v33, 4  ;;  %v189_v53 = vrot.slane %v187_v39, 5  ;;  %v91_v58 = vrot.slane %v89_v48, 4  ;;  %v22_v18 = vld [vmem:[%s550_s0 + $0x14] sm:$0x7] }
   0xd   :  { %v149_v55 = vmax.bf16 %v141_v45, %v37_v4  ;;  %v87_v57 = vrot.slane %v86_v46, 4  ;;  %v94_v59 = vrot.slane %v92_v49, 5  ;;  %v150_v60 = vmax.bf16 %v142_v50, %v356_v5  ;;  %v439_v23 = vld [vmem:[%s550_s0 + $0x18] sm:$0x7]  ;;  %v48_v30 = vld [vmem:[%s553_s3 + $0xc] sm:$0x7] }
   0xe   :  { %v190_v61 = vor.u32 %v189_v53, %v186_v52  ;;  %v193_v62 = vshrl.u32 %v40_v47, 16  ;;  %v196_v63 = vshll.u32 %v40_v47, 16  ;;  %v270_v4 = vshrl.u32 %v411_v54, 16  ;;  %v41_v42 = vld [vmem:[%s552_s2 + $0x14] sm:$0x7] }
   0xf   :  { %v157_v0 = vmax.bf16 %v149_v55, %v45_v44  ;;  %v143_v2 = vmax.bf16 %v87_v57, %v55_v25  ;;  %v95_v7 = vor.u32 %v94_v59, %v91_v58  ;;  %v158_v9 = vmax.bf16 %v150_v60, %v46_v56  ;;  %v470_v53 = vld [vmem:[%s550_s0 + $0x1c] sm:$0x7] }
  0x10   :  { %v191_v10 = vrot.slane %v190_v61, 4  ;;  %v195_v5 = vrot.slane %v193_v62, 4  ;;  %v198_v11 = vrot.slane %v196_v63, 5  ;;  %v272_v17 = vrot.slane %v270_v4, 4  ;;  %v475_v55 = vld [vmem:[%s551_s1 + $0x1c] sm:$0x7] }
  0x11   :  { %v245_v13 = vmax.bf16 %v173_v41, %v157_v0  ;;  %v151_v14 = vmax.bf16 %v143_v2, %v377_v24  ;;  %v96_v16 = vrot.slane %v95_v7, 4  ;;  %v246_v19 = vmax.bf16 %v182_v51, %v158_v9 }
  0x12   :  { %v199_v21 = vor.u32 %v198_v11, %v195_v5  ;;  %v273_v22 = vshll.u32 %v411_v54, 16  ;;  %v57_v25 = vmax.bf16 %v424_v8, %v22_v18  ;;  %v58_v28 = vmax.bf16 %v429_v12, %v439_v23  ;;  %v25_v11 = vld [vmem:[%s550_s0 + $0x20] sm:$0x7] }
  0x13   :  { %v253_v26 = vmax.bf16 %v245_v13, %v340_v1  ;;  %v144_v24 = vmax.bf16 %v96_v16, %v56_v43  ;;  %v159_v27 = vmax.bf16 %v151_v14, %v47_v6  ;;  %v254_v29 = vmax.bf16 %v246_v19, %v366_v15  ;;  %v43_v6 = vld [vmem:[%s552_s2 + $0x1c] sm:$0x7] }
  0x14   :  { %v200_v31 = vrot.slane %v199_v21, 4  ;;  %v275_v32 = vrot.slane %v273_v22, 5  ;;  %v98_v33 = vshrl.u32 %v22_v18, 16  ;;  %v101_v39 = vshll.u32 %v22_v18, 16  ;;  %v505_v18 = vld [vmem:[%s551_s1 + $0x20] sm:$0x7] }
  0x15   :  { %v261_v36 = vmax.bf16 %v253_v26, %v348_v3  ;;  %v152_v37 = vmax.bf16 %v144_v24, %v40_v47  ;;  %v247_v38 = vmax.bf16 %v191_v10, %v159_v27  ;;  %v262_v1 = vmax.bf16 %v254_v29, %v372_v20  ;;  %v460_v3 = vld [vmem:[%s552_s2 + $0x18] sm:$0x7] }
  0x16   :  { %v276_v41 = vor.u32 %v275_v32, %v272_v17  ;;  %v100_v15 = vrot.slane %v98_v33, 4  ;;  %v107_v43 = vshrl.u32 %v439_v23, 16  ;;  %v103_v47 = vrot.slane %v101_v39, 5  ;;  %v44_v33 = vld [vmem:[%s552_s2 + $0x20] sm:$0x7] }
  0x17   :  { %v289_v44 = vmax.bf16 %v261_v36, %v395_v40  ;;  %v255_v45 = vmax.bf16 %v247_v38, %v387_v34  ;;  %v160_v46 = vmax.bf16 %v152_v37, %v48_v30  ;;  %v290_v20 = vmax.bf16 %v262_v1, %v87_v57 }
  0x18   :  { %v277_v48 = vrot.slane %v276_v41, 4  ;;  %v109_v49 = vrot.slane %v107_v43, 4  ;;  %v110_v50 = vshll.u32 %v439_v23, 16  ;;  %v104_v34 = vor.u32 %v103_v47, %v100_v15  ;;  %v26_v41 = vld [vmem:[%s550_s0 + $0x24] sm:$0x7] }
  0x19   :  { %297 = vst [vmem:[%s554_s4] sm:$0x3] %v289_v44  ;;  %v263_v40 = vmax.bf16 %v255_v45, %v392_v35  ;;  %v248_v51 = vmax.bf16 %v200_v31, %v160_v46  ;;  %v202_v52 = vshrl.u32 %v41_v42, 16  ;;  %298 = vst [vmem:[%s554_s4 + $0x2] sm:$0x3] %v290_v20  ;;  %v31_v35 = vld [vmem:[%s551_s1 + $0x10] sm:$0x7]  ;;  %v59_v7 = vmax.bf16 %v475_v55, %v470_v53 }
  0x1a   :  { %v112_v56 = vrot.slane %v110_v50, 5  ;;  %v205_v57 = vshll.u32 %v41_v42, 16  ;;  %v211_v58 = vshrl.u32 %v460_v3, 16  ;;  %v214_v59 = vshll.u32 %v460_v3, 16  ;;  %v50_v31 = vld [vmem:[%s553_s3 + $0x18] sm:$0x7] }
  0x1b   :  { %v291_v60 = vmax.bf16 %v263_v40, %v96_v16  ;;  %v256_v61 = vmax.bf16 %v248_v51, %v411_v54  ;;  %v105_v62 = vrot.slane %v104_v34, 4  ;;  %v204_v63 = vrot.slane %v202_v52, 4  ;;  %v49_v54 = vld [vmem:[%s553_s3 + $0x14] sm:$0x7]  ;;  %v51_v51 = vld [vmem:[%s553_s3 + $0x1c] sm:$0x7] }
  0x1c   :  { %v113_v0 = vor.u32 %v112_v56, %v109_v49  ;;  %v207_v2 = vrot.slane %v205_v57, 5  ;;  %v116_v4 = vshrl.u32 %v470_v53, 16  ;;  %v119_v10 = vshll.u32 %v470_v53, 16 }
  0x1d   :  { %299 = vst [vmem:[%s554_s4 + $0x4] sm:$0x3] %v291_v60  ;;  %v264_v8 = vmax.bf16 %v256_v61, %v31_v35  ;;  %v145_v9 = vmax.bf16 %v105_v62, %v57_v25  ;;  %v213_v5 = vrot.slane %v211_v58, 4  ;;  %v216_v17 = vrot.slane %v214_v59, 5 }
  0x1e   :  { %v114_v13 = vrot.slane %v113_v0, 4  ;;  %v208_v14 = vor.u32 %v207_v2, %v204_v63  ;;  %v118_v16 = vrot.slane %v116_v4, 4  ;;  %v121_v22 = vrot.slane %v119_v10, 5 }
  0x1f   :  { %v292_v19 = vmax.bf16 %v277_v48, %v264_v8  ;;  %v153_v21 = vmax.bf16 %v145_v9, %v41_v42  ;;  %v220_v25 = vshrl.u32 %v43_v6, 16  ;;  %v217_v27 = vor.u32 %v216_v17, %v213_v5 }
  0x20   :  { %v146_v26 = vmax.bf16 %v114_v13, %v58_v28  ;;  %v209_v24 = vrot.slane %v208_v14, 4  ;;  %v223_v29 = vshll.u32 %v43_v6, 16  ;;  %v122_v32 = vor.u32 %v121_v22, %v118_v16  ;;  %v36_v16 = vld [vmem:[%s551_s1 + $0x24] sm:$0x7] }
  0x21   :  { %300 = vst [vmem:[%s554_s4 + $0x6] sm:$0x3] %v292_v19  ;;  %v161_v30 = vmax.bf16 %v153_v21, %v49_v54  ;;  %v60_v36 = vmax.bf16 %v505_v18, %v25_v11  ;;  %v125_v28 = vshrl.u32 %v25_v11, 16  ;;  %v218_v38 = vrot.slane %v217_v27, 4 }
  0x22   :  { %v154_v37 = vmax.bf16 %v146_v26, %v460_v3  ;;  %v128_v39 = vshll.u32 %v25_v11, 16  ;;  %v222_v1 = vrot.slane %v220_v25, 4  ;;  %v123_v15 = vrot.slane %v122_v32, 4 }
  0x23   :  { %v249_v42 = vmax.bf16 %v209_v24, %v161_v30  ;;  %v127_v43 = vrot.slane %v125_v28, 4  ;;  %v225_v44 = vrot.slane %v223_v29, 5  ;;  %v229_v47 = vshrl.u32 %v44_v33, 16 }
  0x24   :  { %v162_v45 = vmax.bf16 %v154_v37, %v50_v31  ;;  %v130_v46 = vrot.slane %v128_v39, 5  ;;  %v232_v20 = vshll.u32 %v44_v33, 16  ;;  %v147_v49 = vmax.bf16 %v123_v15, %v59_v7 }
  0x25   :  { %v257_v48 = vmax.bf16 %v249_v42, %v439_v23  ;;  %v226_v50 = vor.u32 %v225_v44, %v222_v1  ;;  %v279_v3 = vshrl.u32 %v26_v41, 16  ;;  %v231_v52 = vrot.slane %v229_v47, 4 }
  0x26   :  { %v250_v40 = vmax.bf16 %v218_v38, %v162_v45  ;;  %v131_v34 = vor.u32 %v130_v46, %v127_v43  ;;  %v234_v35 = vrot.slane %v232_v20, 5  ;;  %v155_v57 = vmax.bf16 %v147_v49, %v43_v6 }
  0x27   :  { %v265_v56 = vmax.bf16 %v257_v48, %v429_v12  ;;  %v227_v58 = vrot.slane %v226_v50, 4  ;;  %v282_v23 = vshll.u32 %v26_v41, 16  ;;  %v281_v7 = vrot.slane %v279_v3, 4  ;;  %v52_v12 = vld [vmem:[%s553_s3 + $0x20] sm:$0x7] }
  0x28   :  { %v258_v59 = vmax.bf16 %v250_v40, %v470_v53  ;;  %v132_v60 = vrot.slane %v131_v34, 4  ;;  %v235_v61 = vor.u32 %v234_v35, %v231_v52  ;;  %v163_v63 = vmax.bf16 %v155_v57, %v51_v51 }
  0x29   :  { %v293_v62 = vmax.bf16 %v265_v56, %v114_v13  ;;  %v284_v4 = vrot.slane %v282_v23, 5 }
  0x2a   :  { %v266_v0 = vmax.bf16 %v258_v59, %v475_v55  ;;  %v148_v2 = vmax.bf16 %v132_v60, %v60_v36  ;;  %v251_v8 = vmax.bf16 %v227_v58, %v163_v63  ;;  %v236_v54 = vrot.slane %v235_v61, 4 }
  0x2b   :  { %301 = vst [vmem:[%s554_s4 + $0x8] sm:$0x3] %v293_v62  ;;  %v285_v10 = vor.u32 %v284_v4, %v281_v7 }
  0x2c   :  { %v294_v53 = vmax.bf16 %v266_v0, %v123_v15  ;;  %v156_v6 = vmax.bf16 %v148_v2, %v44_v33  ;;  %v259_v9 = vmax.bf16 %v251_v8, %v25_v11 }
  0x2d   :  { %v286_v19 = vrot.slane %v285_v10, 4 }
  0x2e   :  { %302 = vst [vmem:[%s554_s4 + $0xa] sm:$0x3] %v294_v53  ;;  %v164_v55 = vmax.bf16 %v156_v6, %v52_v12  ;;  %v267_v5 = vmax.bf16 %v259_v9, %v505_v18 }
  0x30   :  { %v252_v13 = vmax.bf16 %v236_v54, %v164_v55  ;;  %v295_v14 = vmax.bf16 %v267_v5, %v132_v60 }
  0x32   :  { %v260_v17 = vmax.bf16 %v252_v13, %v26_v41  ;;  %303 = vst [vmem:[%s554_s4 + $0xc] sm:$0x3] %v295_v14 }
  0x34   :  { %v268_v11 = vmax.bf16 %v260_v17, %v36_v16 }
  0x36   :  { %v296_v21 = vmax.bf16 %v286_v19, %v268_v11 }
  0x38   :  { %304 = vst [vmem:[%s554_s4 + $0xe] sm:$0x3] %v296_v21 }

// kernel: resnet18_forward.9
= control target key start
LH: loop header
LB: loop body
LE: loop exit
PB: predicated region body
PF: predicated region fallthrough
CT: control target
= control target key end

     0   :  { %s904_s1 = inlined_call_operand.vmem [shape: bf16[256,128], index: 1, kind: input, shape index: {}]   ;;  %s905_s3 = inlined_call_operand.<no memory space> [shape: f32[1,1], index: 3, kind: input, shape index: {}]   ;;  %s906_s0 = inlined_call_operand.vmem [shape: bf16[128,256], index: 0, kind: input, shape index: {}]   ;;  %s907_s2 = inlined_call_operand.vmem [shape: f32[1,128], index: 2, kind: input, shape index: {}]   ;;  %s908_s4 = inlined_call_operand.vmem [shape: bf16[128,128], index: 4, kind: output, shape index: {}]  }
   0x1   :  { %v677_v0 = vld [vmem:[%s904_s1 + $0x78] sm:$0xff]   ;;  %v9_v1 = vstv %s905_s3  ;;  %v679_v3 = vld [vmem:[%s904_s1 + $0x70] sm:$0xff]   ;;  %v681_v5 = vld [vmem:[%s904_s1 + $0x68] sm:$0xff]  }
   0x2   :  { %v678_v2 = vld [vmem:[%s904_s1 + $0x38] sm:$0xff]   ;;  %10 = vst [vmem:[#allocation2] sm:$0x1] %v9_v1  ;;  %595 = vmatprep.subr.bf16.mxu0 %v677_v0  ;;  %659 = vmatprep.subr.bf16.mxu1 %v677_v0  ;;  %v680_v4 = vld [vmem:[%s904_s1 + $0x30] sm:$0xff]   ;;  %v682_v6 = vld [vmem:[%s904_s1 + $0x28] sm:$0xff]  }
   0x3   :  { %596 = vmatpush3.bf16.msra.mxu0 %v678_v2  ;;  %667 = vmatpush3.bf16.msra.mxu1 %v678_v2  ;;  %v683_v7 = vld [vmem:[%s904_s1 + $0x60] sm:$0xff]   ;;  %v685_v9 = vld [vmem:[%s904_s1 + $0x58] sm:$0xff]   ;;  %v687_v11 = vld [vmem:[%s904_s1 + $0x50] sm:$0xff]  }
   0x4   :  { %597 = vmatprep.subr.bf16.mxu0 %v679_v3  ;;  %660 = vmatprep.subr.bf16.mxu1 %v679_v3  ;;  %v684_v8 = vld [vmem:[%s904_s1 + $0x20] sm:$0xff]   ;;  %v686_v10 = vld [vmem:[%s904_s1 + $0x18] sm:$0xff]   ;;  %v688_v14 = vld [vmem:[%s904_s1 + $0x10] sm:$0xff]  }
   0x5   :  { %v695_v12 = vld [vmem:[%s906_s0 + $0x4] ss:$8 sps:$4 sm:$0xff]   ;;  %v693_v20 = vld [vmem:[%s906_s0] ss:$8 sps:$4 sm:$0xff]   ;;  %v699_v22 = vld [vmem:[%s906_s0 + $0x14] ss:$8 sps:$4 sm:$0xff]  }
   0x6   :  { %v698_v13 = vld [vmem:[%s906_s0 + $0x44] ss:$8 sps:$4 sm:$0xff]   ;;  %283 = vmatprep.mubr.bf16.mxu0 %v695_v12  ;;  %v696_v21 = vld [vmem:[%s906_s0 + $0x40] ss:$8 sps:$4 sm:$0xff]   ;;  %v701_v23 = vld [vmem:[%s906_s0 + $0x54] ss:$8 sps:$4 sm:$0xff]  }
   0x7   :  { %598 = vmatpush3.bf16.msra.mxu0 %v680_v4  ;;  %668 = vmatpush3.bf16.msra.mxu1 %v680_v4  ;;  %v689_v15 = vld [vmem:[%s904_s1 + $0x48] sm:$0xff]   ;;  %v691_v17 = vld [vmem:[%s904_s1 + $0x40] sm:$0xff]   ;;  %v703_v24 = vld [vmem:[%s906_s0 + $0x10] ss:$8 sps:$4 sm:$0xff]  }
   0x8   :  { %599 = vmatprep.subr.bf16.mxu0 %v681_v5  ;;  %661 = vmatprep.subr.bf16.mxu1 %v681_v5  ;;  %v690_v16 = vld [vmem:[%s904_s1 + $0x8] sm:$0xff]   ;;  %v692_v19 = vld [vmem:[%s904_s1] sm:$0xff]   ;;  %v704_v25 = vld [vmem:[%s906_s0 + $0x50] ss:$8 sps:$4 sm:$0xff]  }
   0x9   :  { %315 = vmatprep.mubr.bf16.mxu1 %v698_v13  ;;  %v348_v18 = vld [vmem:[#allocation2] sm:$0x1]  ;;  %v705_v26 = vld [vmem:[%s906_s0 + $0x24] ss:$8 sps:$4 sm:$0xff]   ;;  %v711_v30 = vld [vmem:[%s906_s0 + $0x34] ss:$8 sps:$4 sm:$0xff]  }
   0xa   :  { %675 = vpush %v348_v18  ;;  %v707_v27 = vld [vmem:[%s906_s0 + $0x64] ss:$8 sps:$4 sm:$0xff]   ;;  %v709_v28 = vld [vmem:[%s906_s0 + $0x20] ss:$8 sps:$4 sm:$0xff]   ;;  %v713_v31 = vld [vmem:[%s906_s0 + $0x74] ss:$8 sps:$4 sm:$0xff]  }
   0xb   :  { %600 = vmatpush3.bf16.msra.mxu0 %v682_v6  ;;  %669 = vmatpush3.bf16.msra.mxu1 %v682_v6  ;;  %v710_v29 = vld [vmem:[%s906_s0 + $0x60] ss:$8 sps:$4 sm:$0xff]   ;;  %v715_v32 = vld [vmem:[%s906_s0 + $0x30] ss:$8 sps:$4 sm:$0xff]  }
   0xc   :  { %601 = vmatprep.subr.bf16.mxu0 %v683_v7  ;;  %662 = vmatprep.subr.bf16.mxu1 %v683_v7  ;;  %v716_v33 = vld [vmem:[%s906_s0 + $0x70] ss:$8 sps:$4 sm:$0xff]   ;;  %v844_v36 = vld [vmem:[%s907_s2] ss:$0 sm:$0xff] }
   0xf   :  { %602 = vmatpush3.bf16.msra.mxu0 %v684_v8  ;;  %670 = vmatpush3.bf16.msra.mxu1 %v684_v8 }
  0x10   :  { %603 = vmatprep.subr.bf16.mxu0 %v685_v9  ;;  %663 = vmatprep.subr.bf16.mxu1 %v685_v9 }
  0x13   :  { %604 = vmatpush3.bf16.msra.mxu0 %v686_v10  ;;  %671 = vmatpush3.bf16.msra.mxu1 %v686_v10 }
  0x14   :  { %605 = vmatprep.subr.bf16.mxu0 %v687_v11  ;;  %664 = vmatprep.subr.bf16.mxu1 %v687_v11 }
  0x17   :  { %606 = vmatpush3.bf16.msra.mxu0 %v688_v14  ;;  %672 = vmatpush3.bf16.msra.mxu1 %v688_v14 }
  0x18   :  { %607 = vmatprep.subr.bf16.mxu0 %v689_v15  ;;  %665 = vmatprep.subr.bf16.mxu1 %v689_v15 }
  0x1b   :  { %608 = vmatpush3.bf16.msra.mxu0 %v690_v16  ;;  %673 = vmatpush3.bf16.msra.mxu1 %v690_v16 }
  0x1c   :  { %609 = vmatprep.subr.bf16.mxu0 %v691_v17  ;;  %666 = vmatprep.subr.bf16.mxu1 %v691_v17 }
  0x1f   :  { %610 = vmatpush3.bf16.msra.mxu0 %v692_v19  ;;  %674 = vmatpush3.bf16.msra.mxu1 %v692_v19 }
  0x22   :  { %284 = vmatmul.mubr.bf16.vlgmr.msra.gmra.mxu0 %v693_v20  ;;  %316 = vmatmul.mubr.bf16.vlgmr.msra.gmra.mxu1 %v696_v21 }
  0x23   :  { %291 = vmatprep.mubr.bf16.mxu0 %v699_v22  ;;  %323 = vmatprep.mubr.bf16.mxu1 %v701_v23 }
  0x2a   :  { %292 = vmatmul.mubr.bf16.gmra.mxu0 %v703_v24  ;;  %324 = vmatmul.mubr.bf16.gmra.mxu1 %v704_v25 }
  0x2b   :  { %299 = vmatprep.mubr.bf16.mxu0 %v705_v26  ;;  %331 = vmatprep.mubr.bf16.mxu1 %v707_v27 }
  0x32   :  { %300 = vmatmul.mubr.bf16.gmra.mxu0 %v709_v28  ;;  %332 = vmatmul.mubr.bf16.gmra.mxu1 %v710_v29 }
  0x33   :  { %307 = vmatprep.mubr.bf16.mxu0 %v711_v30  ;;  %339 = vmatprep.mubr.bf16.mxu1 %v713_v31 }
  0x3a   :  { %308 = vmatmul.mubr.bf16.gmra.mxu0 %v715_v32  ;;  %340 = vmatmul.mubr.bf16.gmra.mxu1 %v716_v33 }
  0x3b   :  { %s676_s27 = spop %675 }
  0x3c   :  { %v848_v45 = vstv %s676_s27 }
  0xe2   :  { %v611_v34 = vpop.f32.mrf.mxu0  ;;  %v635_v35 = vpop.f32.mrf.mxu1 }
  0xe4   :  { %v612_v37 = vpop.f32.mrf.mxu0  ;;  %v636_v38 = vpop.f32.mrf.mxu1 }
  0xe5   :  { %v613_v39 = vadd.f32 %v612_v37, %v611_v34  ;;  %v637_v40 = vadd.f32 %v636_v38, %v635_v35 }
  0xe6   :  { %v614_v41 = vpop.f32.mrf.mxu0  ;;  %v638_v42 = vpop.f32.mrf.mxu1 }
  0xe7   :  { %v286_v43 = vadd.f32 %v613_v39, %v844_v36  ;;  %v318_v44 = vadd.f32 %v637_v40, %v844_v36 }
  0xe8   :  { %v615_v46 = vpop.f32.mrf.mxu0  ;;  %v639_v47 = vpop.f32.mrf.mxu1 }
  0xe9   :  { %v616_v48 = vadd.f32 %v615_v46, %v614_v41  ;;  %v640_v49 = vadd.f32 %v639_v47, %v638_v42  ;;  %v367_v53 = vmul.f32 %v848_v45, %v286_v43  ;;  %v375_v54 = vmul.f32 %v848_v45, %v318_v44 }
  0xea   :  { %v617_v50 = vpop.f32.mrf.mxu0  ;;  %v641_v51 = vpop.f32.mrf.mxu1  ;;  %vm350_vm0 = vcmp.gt.f32.partialorder %v286_v43, 0.0  ;;  %vm358_vm1 = vcmp.gt.f32.partialorder %v318_v44, 0.0 }
  0xeb   :  { %v289_v52 = vadd.f32 %v616_v48, %v844_v36  ;;  %v321_v55 = vadd.f32 %v640_v49, %v844_v36  ;;  %v383_v0 = vsel %vm350_vm0, %v286_v43, %v367_v53  ;;  %v391_v2 = vsel %vm358_vm1, %v318_v44, %v375_v54 }
  0xec   :  { %v618_v56 = vpop.f32.mrf.mxu0  ;;  %v642_v57 = vpop.f32.mrf.mxu1 }
  0xed   :  { %vm351_vm2 = vcmp.gt.f32.partialorder %v289_v52, 0.0  ;;  %v368_v58 = vmul.f32 %v848_v45, %v289_v52  ;;  %v619_v59 = vadd.f32 %v618_v56, %v617_v50  ;;  %v643_v60 = vadd.f32 %v642_v57, %v641_v51 }
  0xee   :  { %vm359_vm3 = vcmp.gt.f32.partialorder %v321_v55, 0.0  ;;  %v376_v61 = vmul.f32 %v848_v45, %v321_v55  ;;  %v620_v62 = vpop.f32.mrf.mxu0  ;;  %v644_v63 = vpop.f32.mrf.mxu1 }
  0xef   :  { %v384_v1 = vsel %vm351_vm2, %v289_v52, %v368_v58  ;;  %v294_v5 = vadd.f32 %v619_v59, %v844_v36  ;;  %v326_v6 = vadd.f32 %v643_v60, %v844_v36 }
  0xf0   :  { %v551_v3 = vpack.c.bf16 %v384_v1, %v383_v0  ;;  %v392_v4 = vsel %vm359_vm3, %v321_v55, %v376_v61  ;;  %v621_v7 = vpop.f32.mrf.mxu0  ;;  %v645_v8 = vpop.f32.mrf.mxu1 }
  0xf1   :  { %v571_v9 = vpack.c.bf16 %v392_v4, %v391_v2  ;;  %v622_v10 = vadd.f32 %v621_v7, %v620_v62  ;;  %v646_v11 = vadd.f32 %v645_v8, %v644_v63  ;;  %v369_v14 = vmul.f32 %v848_v45, %v294_v5 }
  0xf2   :  { %552 = vst [vmem:[%s908_s4] sm:$0xff] %v551_v3   ;;  %v623_v12 = vpop.f32.mrf.mxu0  ;;  %v647_v13 = vpop.f32.mrf.mxu1  ;;  %v377_v15 = vmul.f32 %v848_v45, %v326_v6  ;;  %vm352_vm4 = vcmp.gt.f32.partialorder %v294_v5, 0.0  ;;  %vm360_vm5 = vcmp.gt.f32.partialorder %v326_v6, 0.0 }
  0xf3   :  { %591 = vst [vmem:[%s908_s4 + $0x20] sm:$0xff] %v571_v9   ;;  %v297_v16 = vadd.f32 %v622_v10, %v844_v36  ;;  %v329_v17 = vadd.f32 %v646_v11, %v844_v36  ;;  %v385_v28 = vsel %vm352_vm4, %v294_v5, %v369_v14 }
  0xf4   :  { %v624_v18 = vpop.f32.mrf.mxu0  ;;  %v648_v19 = vpop.f32.mrf.mxu1  ;;  %v393_v29 = vsel %vm360_vm5, %v326_v6, %v377_v15 }
  0xf5   :  { %v625_v20 = vadd.f32 %v624_v18, %v623_v12  ;;  %v649_v21 = vadd.f32 %v648_v19, %v647_v13  ;;  %vm353_vm6 = vcmp.gt.f32.partialorder %v297_v16, 0.0  ;;  %v370_v22 = vmul.f32 %v848_v45, %v297_v16 }
  0xf6   :  { %vm361_vm7 = vcmp.gt.f32.partialorder %v329_v17, 0.0  ;;  %v378_v23 = vmul.f32 %v848_v45, %v329_v17  ;;  %v626_v24 = vpop.f32.mrf.mxu0  ;;  %v650_v25 = vpop.f32.mrf.mxu1 }
  0xf7   :  { %v302_v26 = vadd.f32 %v625_v20, %v844_v36  ;;  %v334_v27 = vadd.f32 %v649_v21, %v844_v36  ;;  %v386_v30 = vsel %vm353_vm6, %v297_v16, %v370_v22 }
  0xf8   :  { %v394_v31 = vsel %vm361_vm7, %v329_v17, %v378_v23  ;;  %v627_v32 = vpop.f32.mrf.mxu0  ;;  %v651_v33 = vpop.f32.mrf.mxu1  ;;  %v556_v34 = vpack.c.bf16 %v386_v30, %v385_v28 }
  0xf9   :  { %v576_v35 = vpack.c.bf16 %v394_v31, %v393_v29  ;;  %v628_v37 = vadd.f32 %v627_v32, %v626_v24  ;;  %v652_v38 = vadd.f32 %v651_v33, %v650_v25  ;;  %v371_v41 = vmul.f32 %v848_v45, %v302_v26 }
  0xfa   :  { %v629_v39 = vpop.f32.mrf.mxu0  ;;  %v653_v40 = vpop.f32.mrf.mxu1  ;;  %588 = vst [vmem:[%s908_s4 + $0x8] sm:$0xff] %v556_v34   ;;  %v379_v42 = vmul.f32 %v848_v45, %v334_v27  ;;  %vm354_vm8 = vcmp.gt.f32.partialorder %v302_v26, 0.0  ;;  %vm362_vm9 = vcmp.gt.f32.partialorder %v334_v27, 0.0 }
  0xfb   :  { %592 = vst [vmem:[%s908_s4 + $0x28] sm:$0xff] %v576_v35   ;;  %v305_v43 = vadd.f32 %v628_v37, %v844_v36  ;;  %v337_v44 = vadd.f32 %v652_v38, %v844_v36  ;;  %v387_v54 = vsel %vm354_vm8, %v302_v26, %v371_v41 }
  0xfc   :  { %v630_v46 = vpop.f32.mrf.mxu0  ;;  %v654_v47 = vpop.f32.mrf.mxu1  ;;  %v395_v55 = vsel %vm362_vm9, %v334_v27, %v379_v42 }
  0xfd   :  { %v631_v48 = vadd.f32 %v630_v46, %v629_v39  ;;  %v655_v49 = vadd.f32 %v654_v47, %v653_v40  ;;  %vm355_vm10 = vcmp.gt.f32.partialorder %v305_v43, 0.0  ;;  %v372_v50 = vmul.f32 %v848_v45, %v305_v43 }
  0xfe   :  { %vm363_vm11 = vcmp.gt.f32.partialorder %v337_v44, 0.0  ;;  %v380_v51 = vmul.f32 %v848_v45, %v337_v44  ;;  %v632_v52 = vpop.f32.mrf.mxu0  ;;  %v656_v53 = vpop.f32.mrf.mxu1 }
  0xff   :  { %v388_v56 = vsel %vm355_vm10, %v305_v43, %v372_v50  ;;  %v310_v58 = vadd.f32 %v631_v48, %v844_v36  ;;  %v342_v59 = vadd.f32 %v655_v49, %v844_v36 }
 0x100   :  { %v396_v57 = vsel %vm363_vm11, %v337_v44, %v380_v51  ;;  %v633_v60 = vpop.f32.mrf.mxu0  ;;  %v657_v61 = vpop.f32.mrf.mxu1  ;;  %v561_v62 = vpack.c.bf16 %v388_v56, %v387_v54 }
 0x101   :  { %v581_v63 = vpack.c.bf16 %v396_v57, %v395_v55  ;;  %v634_v0 = vadd.f32 %v633_v60, %v632_v52  ;;  %v658_v1 = vadd.f32 %v657_v61, %v656_v53  ;;  %v373_v2 = vmul.f32 %v848_v45, %v310_v58 }
 0x102   :  { %589 = vst [vmem:[%s908_s4 + $0x10] sm:$0xff] %v561_v62   ;;  %v381_v3 = vmul.f32 %v848_v45, %v342_v59  ;;  %vm356_vm12 = vcmp.gt.f32.partialorder %v310_v58, 0.0  ;;  %vm364_vm13 = vcmp.gt.f32.partialorder %v342_v59, 0.0 }
 0x103   :  { %593 = vst [vmem:[%s908_s4 + $0x30] sm:$0xff] %v581_v63   ;;  %v313_v4 = vadd.f32 %v634_v0, %v844_v36  ;;  %v345_v5 = vadd.f32 %v658_v1, %v844_v36  ;;  %v389_v8 = vsel %vm356_vm12, %v310_v58, %v373_v2 }
 0x104   :  { %v397_v9 = vsel %vm364_vm13, %v342_v59, %v381_v3 }
 0x105   :  { %vm357_vm14 = vcmp.gt.f32.partialorder %v313_v4, 0.0  ;;  %v374_v6 = vmul.f32 %v848_v45, %v313_v4  ;;  %vm365_vm15 = vcmp.gt.f32.partialorder %v345_v5, 0.0  ;;  %v382_v7 = vmul.f32 %v848_v45, %v345_v5 }
 0x107   :  { %v390_v10 = vsel %vm357_vm14, %v313_v4, %v374_v6  ;;  %v398_v11 = vsel %vm365_vm15, %v345_v5, %v382_v7 }
 0x108   :  { %v566_v12 = vpack.c.bf16 %v390_v10, %v389_v8  ;;  %v586_v13 = vpack.c.bf16 %v398_v11, %v397_v9 }
 0x10a   :  { %590 = vst [vmem:[%s908_s4 + $0x18] sm:$0xff] %v566_v12   ;;  %594 = vst [vmem:[%s908_s4 + $0x38] sm:$0xff] %v586_v13  }

// kernel: resnet18_forward.13
= control target key start
LH: loop header
LB: loop body
LE: loop exit
PB: predicated region body
PF: predicated region fallthrough
CT: control target
= control target key end

     0   :  { %v4245_v0 = vmov 0.0   ;;  %vm4246_vm0 = vmmov 0   ;;  %vm50_vm1 = vcmask 261120   ;;  %vm1540_vm2 = vcmask 1043456   ;;  %s5151_s0 = inlined_call_operand.vmem [shape: bf16[32,128], index: 0, kind: input, shape index: {}]   ;;  %s5152_s2 = inlined_call_operand.vmem [shape: bf16[9,128,128], index: 2, kind: input, shape index: {}]   ;;  %s5153_s1 = inlined_call_operand.vmem [shape: bf16[9,8,32], index: 1, kind: input, shape index: {}]   ;;  %s5154_s7 = inlined_call_operand.vmem [shape: bf16[128,128], index: 7, kind: input, shape index: {}]   ;;  %s5155_s5 = inlined_call_operand.vmem [shape: bf16[9,128,128], index: 5, kind: input, shape index: {}]   ;;  %s5156_s3 = inlined_call_operand.vmem [shape: f32[1,128], index: 3, kind: input, shape index: {}, may-alias: {3,6,8}]   ;;  %s5157_s4 = inlined_call_operand.vmem [shape: bf16[9,8,8], index: 4, kind: input, shape index: {}]   ;;  %s5158_s8 = inlined_call_operand.vmem [shape: f32[1,128], index: 8, kind: input, shape index: {}, may-alias: {3,6,8}]   ;;  %s5159_s6 = inlined_call_operand.vmem [shape: f32[1,128], index: 6, kind: input, shape index: {}, may-alias: {3,6,8}]   ;;  %s5160_s9 = inlined_call_operand.vmem [shape: bf16[8,128], index: 9, kind: output, shape index: {}]  }
   0x1   :  { %3583 = vmatprep.subr.bf16.mxu1 %v4245_v0  ;;  %v4301_v1 = vld [vmem:[%s5151_s0 + $0x8] sm:$0xff]   ;;  %3587 = vmatprep.mubr.msk.bf16.mxu1 %vm4246_vm0, %v4245_v0  ;;  %v4312_v2 = vld [vmem:[%s5151_s0] sm:$0xff]   ;;  %v4095_v3 = vld [vmem:[%s5152_s2 + $0x78] sm:$0xff]   ;;  %vm1536_vm3 = vcmask 64512  }
   0x2   :  { %3599 = vmatprep.subr.bf16.mxu0 %v4245_v0  ;;  %3615 = vmatprep.mubr.msk.bf16.mxu0 %vm4246_vm0, %v4245_v0  ;;  %v37_v4 = vld [vmem:[%s5153_s1] sm:$0xf]  ;;  %v4097_v5 = vld [vmem:[%s5152_s2 + $0x70] sm:$0xff]   ;;  %v4099_v6 = vld [vmem:[%s5152_s2 + $0x68] sm:$0xff]  }
   0x3   :  { %3584 = vmatpush3.bf16.msra.mxu1 %v4301_v1  ;;  %3600 = vmatpush3.bf16.msra.mxu0 %v4095_v3  ;;  %v2923_v7 = vld [vmem:[%s5153_s1 + $0x4] sm:$0xf]  ;;  %v4093_v8 = vld [vmem:[%s5152_s2 + $0x38] sm:$0xff]   ;;  %v4094_v10 = vld [vmem:[%s5152_s2 + $0x30] sm:$0xff]  }
   0x4   :  { %3585 = vmatprep.subr.bf16.mxu1 %v4245_v0  ;;  %3601 = vmatprep.subr.bf16.mxu0 %v4245_v0  ;;  %v4101_v9 = vld [vmem:[%s5152_s2 + $0x60] sm:$0xff]   ;;  %v4103_v11 = vld [vmem:[%s5152_s2 + $0x58] sm:$0xff]   ;;  %v4096_v12 = vld [vmem:[%s5152_s2 + $0x28] sm:$0xff]  }
   0x5   :  { %v4098_v13 = vld [vmem:[%s5152_s2 + $0x20] sm:$0xff]   ;;  %v4100_v14 = vld [vmem:[%s5152_s2 + $0x18] sm:$0xff]   ;;  %v4102_v15 = vld [vmem:[%s5152_s2 + $0x10] sm:$0xff]  }
   0x6   :  { %v4104_v16 = vld [vmem:[%s5152_s2 + $0x8] sm:$0xff]   ;;  %v4105_v17 = vld [vmem:[%s5152_s2 + $0x50] sm:$0xff]   ;;  %v4106_v18 = vld [vmem:[%s5152_s2] sm:$0xff]  }
   0x7   :  { %3586 = vmatpush3.bf16.msra.mxu1 %v4312_v2  ;;  %3602 = vmatpush3.bf16.msra.mxu0 %v4097_v5  ;;  %v4107_v19 = vld [vmem:[%s5152_s2 + $0x48] sm:$0xff]   ;;  %v4108_v20 = vld [vmem:[%s5152_s2 + $0x40] sm:$0xff]   ;;  %v4109_v29 = vld [vmem:[%s5152_s2 + $0xb8] sm:$0xff]  }
   0x8   :  { %3591 = vmatprep.subr.bf16.mxu1 %v4245_v0  ;;  %3603 = vmatprep.subr.bf16.mxu0 %v4245_v0  ;;  %v2957_v27 = vld [vmem:[%s5153_s1 + $0x8] sm:$0xf]  ;;  %v4110_v32 = vld [vmem:[%s5152_s2 + $0xb0] sm:$0xff]   ;;  %v2983_v34 = vld [vmem:[%s5153_s1 + $0xc] sm:$0xf] }
   0x9   :  { %v4112_v35 = vld [vmem:[%s5152_s2 + $0xf8] sm:$0xff]   ;;  %v4111_v36 = vld [vmem:[%s5152_s2 + $0xa8] sm:$0xff]   ;;  %v4114_v37 = vld [vmem:[%s5152_s2 + $0xf0] sm:$0xff]  }
   0xa   :  { %3588 = vmatmul.mubr.msk.bf16.vlgmr.msra.gmra.mxu1 %vm50_vm1, %v37_v4  ;;  %v4113_v38 = vld [vmem:[%s5152_s2 + $0xa0] sm:$0xff]   ;;  %v4116_v39 = vld [vmem:[%s5152_s2 + $0xe8] sm:$0xff]   ;;  %v4115_v40 = vld [vmem:[%s5152_s2 + $0x98] sm:$0xff]  }
   0xb   :  { %3592 = vmatpush3.bf16.msra.mxu1 %v4301_v1  ;;  %3595 = vmatprep.mubr.msk.bf16.mxu1 %vm4246_vm0, %v4245_v0  ;;  %v4117_v41 = vld [vmem:[%s5152_s2 + $0x90] sm:$0xff]   ;;  %v4118_v42 = vld [vmem:[%s5152_s2 + $0xe0] sm:$0xff]   ;;  %v4119_v43 = vld [vmem:[%s5152_s2 + $0x88] sm:$0xff]  }
   0xc   :  { %3593 = vmatprep.subr.bf16.mxu1 %v4245_v0  ;;  %3604 = vmatpush3.bf16.msra.mxu0 %v4099_v6  ;;  %v4120_v44 = vld [vmem:[%s5152_s2 + $0xd8] sm:$0xff]   ;;  %v4121_v45 = vld [vmem:[%s5152_s2 + $0x80] sm:$0xff]   ;;  %v4122_v46 = vld [vmem:[%s5152_s2 + $0xd0] sm:$0xff]  }
   0xd   :  { %3605 = vmatprep.subr.bf16.mxu0 %v4245_v0  ;;  %v4123_v47 = vld [vmem:[%s5152_s2 + $0xc8] sm:$0xff]   ;;  %v4124_v48 = vld [vmem:[%s5152_s2 + $0xc0] sm:$0xff]   ;;  %v3009_v3 = vld [vmem:[%s5153_s1 + $0x10] sm:$0xf] }
   0xe   :  { %v4125_v5 = vld [vmem:[%s5152_s2 + $0x138] sm:$0xff]  }
   0xf   :  { %3594 = vmatpush3.bf16.msra.mxu1 %v4312_v2 }
  0x10   :  { %3619 = vmatprep.subr.bf16.mxu1 %v4245_v0  ;;  %3606 = vmatpush3.bf16.msra.mxu0 %v4101_v9 }
  0x11   :  { %3607 = vmatprep.subr.bf16.mxu0 %v4245_v0 }
  0x12   :  { %3596 = vmatmul.mubr.msk.bf16.vlgmr.msra.gmra.mxu1 %vm50_vm1, %v2923_v7 }
  0x13   :  { %3620 = vmatpush3.bf16.msra.mxu1 %v4093_v8  ;;  %3635 = vmatprep.mubr.msk.bf16.mxu1 %vm4246_vm0, %v4245_v0  ;;  %v4126_v8 = vld [vmem:[%s5152_s2 + $0x130] sm:$0xff]  }
  0x14   :  { %3621 = vmatprep.subr.bf16.mxu1 %v4245_v0  ;;  %3608 = vmatpush3.bf16.msra.mxu0 %v4103_v11  ;;  %v4128_v11 = vld [vmem:[%s5152_s2 + $0x178] sm:$0xff]  }
  0x15   :  { %3609 = vmatprep.subr.bf16.mxu0 %v4245_v0 }
  0x17   :  { %3622 = vmatpush3.bf16.msra.mxu1 %v4094_v10  ;;  %v3035_v10 = vld [vmem:[%s5153_s1 + $0x14] sm:$0xf] }
  0x18   :  { %3623 = vmatprep.subr.bf16.mxu1 %v4245_v0  ;;  %3610 = vmatpush3.bf16.msra.mxu0 %v4105_v17  ;;  %v4133_v17 = vld [vmem:[%s5152_s2 + $0x110] sm:$0xff]  }
  0x19   :  { %3611 = vmatprep.subr.bf16.mxu0 %v4245_v0 }
  0x1b   :  { %3624 = vmatpush3.bf16.msra.mxu1 %v4096_v12  ;;  %v4127_v12 = vld [vmem:[%s5152_s2 + $0x128] sm:$0xff]  }
  0x1c   :  { %3625 = vmatprep.subr.bf16.mxu1 %v4245_v0  ;;  %3612 = vmatpush3.bf16.msra.mxu0 %v4107_v19  ;;  %v4135_v19 = vld [vmem:[%s5152_s2 + $0x108] sm:$0xff]  }
  0x1d   :  { %3613 = vmatprep.subr.bf16.mxu0 %v4245_v0 }
  0x1f   :  { %3626 = vmatpush3.bf16.msra.mxu1 %v4098_v13  ;;  %v4130_v13 = vld [vmem:[%s5152_s2 + $0x170] sm:$0xff]  }
  0x20   :  { %3627 = vmatprep.subr.bf16.mxu1 %v4245_v0  ;;  %3614 = vmatpush3.bf16.msra.mxu0 %v4108_v20  ;;  %v4136_v20 = vld [vmem:[%s5152_s2 + $0x158] sm:$0xff]  }
  0x21   :  { %3667 = vmatprep.subr.bf16.mxu0 %v4245_v0 }
  0x23   :  { %3628 = vmatpush3.bf16.msra.mxu1 %v4100_v14  ;;  %v4129_v14 = vld [vmem:[%s5152_s2 + $0x120] sm:$0xff]  }
  0x24   :  { %3629 = vmatprep.subr.bf16.mxu1 %v4245_v0 }
  0x27   :  { %3630 = vmatpush3.bf16.msra.mxu1 %v4102_v15  ;;  %v4132_v15 = vld [vmem:[%s5152_s2 + $0x168] sm:$0xff]  }
  0x28   :  { %3631 = vmatprep.subr.bf16.mxu1 %v4245_v0 }
  0x2b   :  { %3632 = vmatpush3.bf16.msra.mxu1 %v4104_v16  ;;  %v4131_v16 = vld [vmem:[%s5152_s2 + $0x118] sm:$0xff]  }
  0x2c   :  { %3633 = vmatprep.subr.bf16.mxu1 %v4245_v0 }
  0x2f   :  { %3634 = vmatpush3.bf16.msra.mxu1 %v4106_v18  ;;  %v4134_v18 = vld [vmem:[%s5152_s2 + $0x160] sm:$0xff]  }
  0x30   :  { %3639 = vmatprep.subr.bf16.mxu1 %v4245_v0 }
  0xca   :  { %v88_v21 = vpop.f32.mrf.mxu1 }
  0xcb   :  { %v94_v22 = vpack.c.bf16 %v88_v21, %v88_v21  ;;  %v4137_v21 = vld [vmem:[%s5152_s2 + $0x100] sm:$0xff]  }
  0xcc   :  { %v3589_v23 = vpop.f32.mrf.mxu1 }
  0xcd   :  { %3636 = vmatmul.mubr.bf16.vlgmr.msra.gmra.mxu1 %v94_v22  ;;  %v4138_v22 = vld [vmem:[%s5152_s2 + $0x150] sm:$0xff]   ;;  %v4139_v23 = vld [vmem:[%s5152_s2 + $0x148] sm:$0xff]  }
  0xce   :  { %v91_v24 = vpop.f32.mrf.mxu1  ;;  %3640 = vmatpush3.bf16.msra.mxu1 %v4301_v1  ;;  %3643 = vmatprep.mubr.msk.bf16.mxu1 %vm4246_vm0, %v4245_v0 }
  0xcf   :  { %3641 = vmatprep.subr.bf16.mxu1 %v4245_v0  ;;  %v4140_v24 = vld [vmem:[%s5152_s2 + $0x140] sm:$0xff]  }
  0xd0   :  { %v3590_v25 = vpop.f32.mrf.mxu1 }
  0xd2   :  { %v150_v26 = vpop.f32.mrf.mxu1  ;;  %3642 = vmatpush3.bf16.msra.mxu1 %v4312_v2 }
  0xd3   :  { %v156_v28 = vpack.c.bf16 %v150_v26, %v150_v26  ;;  %3647 = vmatprep.subr.bf16.mxu1 %v4245_v0 }
  0xd4   :  { %v3597_v30 = vpop.f32.mrf.mxu1 }
  0xd5   :  { %3616 = vmatmul.mubr.bf16.vlgmr.msra.gmra.mxu0 %v156_v28  ;;  %3644 = vmatmul.mubr.msk.bf16.vlgmr.msra.gmra.mxu1 %vm50_vm1, %v2957_v27 }
  0xd6   :  { %3668 = vmatpush3.bf16.msra.mxu0 %v4301_v1  ;;  %3671 = vmatprep.mubr.msk.bf16.mxu0 %vm4246_vm0, %v4245_v0  ;;  %v153_v31 = vpop.f32.mrf.mxu1 }
  0xd7   :  { %3669 = vmatprep.subr.bf16.mxu0 %v4245_v0  ;;  %3648 = vmatpush3.bf16.msra.mxu1 %v4109_v29 }
  0xd8   :  { %v3598_v33 = vpop.f32.mrf.mxu1  ;;  %3649 = vmatprep.subr.bf16.mxu1 %v4245_v0  ;;  %3663 = vmatprep.mubr.msk.bf16.mxu1 %vm4246_vm0, %v4245_v0 }
  0xda   :  { %3670 = vmatpush3.bf16.msra.mxu0 %v4312_v2 }
  0xdb   :  { %3650 = vmatpush3.bf16.msra.mxu1 %v4110_v32  ;;  %3675 = vmatprep.subr.bf16.mxu0 %v4245_v0 }
  0xdc   :  { %3651 = vmatprep.subr.bf16.mxu1 %v4245_v0 }
  0xdd   :  { %3672 = vmatmul.mubr.msk.bf16.vlgmr.msra.gmra.mxu0 %vm50_vm1, %v2983_v34 }
  0xde   :  { %3676 = vmatpush3.bf16.msra.mxu0 %v4112_v35  ;;  %3691 = vmatprep.mubr.msk.bf16.mxu0 %vm4246_vm0, %v4245_v0 }
  0xdf   :  { %3652 = vmatpush3.bf16.msra.mxu1 %v4111_v36  ;;  %3677 = vmatprep.subr.bf16.mxu0 %v4245_v0 }
  0xe0   :  { %3653 = vmatprep.subr.bf16.mxu1 %v4245_v0 }
  0xe2   :  { %3678 = vmatpush3.bf16.msra.mxu0 %v4114_v37 }
  0xe3   :  { %3654 = vmatpush3.bf16.msra.mxu1 %v4113_v38  ;;  %3679 = vmatprep.subr.bf16.mxu0 %v4245_v0 }
  0xe4   :  { %3655 = vmatprep.subr.bf16.mxu1 %v4245_v0 }
  0xe6   :  { %3680 = vmatpush3.bf16.msra.mxu0 %v4116_v39 }
  0xe7   :  { %3656 = vmatpush3.bf16.msra.mxu1 %v4115_v40  ;;  %3681 = vmatprep.subr.bf16.mxu0 %v4245_v0 }
  0xe8   :  { %3657 = vmatprep.subr.bf16.mxu1 %v4245_v0 }
  0xea   :  { %3682 = vmatpush3.bf16.msra.mxu0 %v4118_v42 }
  0xeb   :  { %3658 = vmatpush3.bf16.msra.mxu1 %v4117_v41  ;;  %3683 = vmatprep.subr.bf16.mxu0 %v4245_v0  ;;  %v3061_v41 = vld [vmem:[%s5153_s1 + $0x18] sm:$0xf] }
  0xec   :  { %3659 = vmatprep.subr.bf16.mxu1 %v4245_v0 }
  0xee   :  { %3684 = vmatpush3.bf16.msra.mxu0 %v4120_v44 }
  0xef   :  { %3660 = vmatpush3.bf16.msra.mxu1 %v4119_v43  ;;  %3685 = vmatprep.subr.bf16.mxu0 %v4245_v0  ;;  %v4141_v43 = vld [vmem:[%s5152_s2 + $0x1b8] sm:$0xff]  }
  0xf0   :  { %3661 = vmatprep.subr.bf16.mxu1 %v4245_v0 }
  0xf2   :  { %3686 = vmatpush3.bf16.msra.mxu0 %v4122_v46  ;;  %v4142_v46 = vld [vmem:[%s5152_s2 + $0x1b0] sm:$0xff]  }
  0xf3   :  { %3662 = vmatpush3.bf16.msra.mxu1 %v4121_v45  ;;  %3687 = vmatprep.subr.bf16.mxu0 %v4245_v0 }
  0xf4   :  { %3695 = vmatprep.subr.bf16.mxu1 %v4245_v0 }
  0xf6   :  { %3688 = vmatpush3.bf16.msra.mxu0 %v4123_v47 }
  0xf7   :  { %3689 = vmatprep.subr.bf16.mxu0 %v4245_v0 }
  0xfa   :  { %3690 = vmatpush3.bf16.msra.mxu0 %v4124_v48  ;;  %v3087_v48 = vld [vmem:[%s5153_s1 + $0x1c] sm:$0xf] }
  0xfb   :  { %3723 = vmatprep.subr.bf16.mxu0 %v4245_v0 }
 0x18d   :  { %v344_v49 = vpop.f32.mrf.mxu1 }
 0x18f   :  { %v3637_v50 = vpop.f32.mrf.mxu1 }
 0x190   :  { %v4144_v50 = vld [vmem:[%s5152_s2 + $0x1a8] sm:$0xff]  }
 0x191   :  { %v347_v51 = vpop.f32.mrf.mxu1 }
 0x192   :  { %v4145_v51 = vld [vmem:[%s5152_s2 + $0x1f0] sm:$0xff]  }
 0x193   :  { %v3638_v52 = vpop.f32.mrf.mxu1 }
 0x194   :  { %v4146_v52 = vld [vmem:[%s5152_s2 + $0x1a0] sm:$0xff]  }
 0x195   :  { %v256_v53 = vpop.f32.mrf.mxu0  ;;  %v389_v54 = vpop.f32.mrf.mxu1 }
 0x196   :  { %v4485_v55 = vadd.f32 %v344_v49, %v256_v53  ;;  %v395_v56 = vpack.c.bf16 %v389_v54, %v389_v54  ;;  %v4143_v49 = vld [vmem:[%s5152_s2 + $0x1f8] sm:$0xff]   ;;  %v4147_v53 = vld [vmem:[%s5152_s2 + $0x1e8] sm:$0xff]  }
 0x197   :  { %v3617_v57 = vpop.f32.mrf.mxu0  ;;  %v3645_v58 = vpop.f32.mrf.mxu1  ;;  %v4148_v54 = vld [vmem:[%s5152_s2 + $0x198] sm:$0xff]  }
 0x198   :  { %3664 = vmatmul.mubr.bf16.vlgmr.msra.gmra.mxu1 %v395_v56  ;;  %v4150_v56 = vld [vmem:[%s5152_s2 + $0x190] sm:$0xff]   ;;  %v4151_v57 = vld [vmem:[%s5152_s2 + $0x1d8] sm:$0xff]   ;;  %v4152_v58 = vld [vmem:[%s5152_s2 + $0x188] sm:$0xff]  }
 0x199   :  { %v259_v59 = vpop.f32.mrf.mxu0  ;;  %v392_v60 = vpop.f32.mrf.mxu1  ;;  %3696 = vmatpush3.bf16.msra.mxu1 %v4301_v1  ;;  %3699 = vmatprep.mubr.msk.bf16.mxu1 %vm4246_vm0, %v4245_v0 }
 0x19a   :  { %3697 = vmatprep.subr.bf16.mxu1 %v4245_v0  ;;  %v4153_v59 = vld [vmem:[%s5152_s2 + $0x1d0] sm:$0xff]   ;;  %v4154_v60 = vld [vmem:[%s5152_s2 + $0x180] sm:$0xff]  }
 0x19b   :  { %v3618_v61 = vpop.f32.mrf.mxu0  ;;  %v3646_v62 = vpop.f32.mrf.mxu1 }
 0x19c   :  { %v4155_v61 = vld [vmem:[%s5152_s2 + $0x1c8] sm:$0xff]   ;;  %v4156_v62 = vld [vmem:[%s5152_s2 + $0x1c0] sm:$0xff]  }
 0x19d   :  { %v541_v63 = vpop.f32.mrf.mxu0  ;;  %3698 = vmatpush3.bf16.msra.mxu1 %v4312_v2 }
 0x19e   :  { %v547_v4 = vpack.c.bf16 %v541_v63, %v541_v63  ;;  %3703 = vmatprep.subr.bf16.mxu1 %v4245_v0 }
 0x19f   :  { %v3673_v6 = vpop.f32.mrf.mxu0 }
 0x1a0   :  { %3692 = vmatmul.mubr.bf16.vlgmr.msra.gmra.mxu0 %v547_v4  ;;  %3700 = vmatmul.mubr.msk.bf16.vlgmr.msra.gmra.mxu1 %vm50_vm1, %v3009_v3 }
 0x1a1   :  { %3724 = vmatpush3.bf16.msra.mxu0 %v4301_v1  ;;  %3727 = vmatprep.mubr.msk.bf16.mxu0 %vm4246_vm0, %v4245_v0  ;;  %v544_v7 = vpop.f32.mrf.mxu0 }
 0x1a2   :  { %3725 = vmatprep.subr.bf16.mxu0 %v4245_v0  ;;  %3704 = vmatpush3.bf16.msra.mxu1 %v4125_v5 }
 0x1a3   :  { %3705 = vmatprep.subr.bf16.mxu1 %v4245_v0  ;;  %v3674_v9 = vpop.f32.mrf.mxu0  ;;  %3719 = vmatprep.mubr.msk.bf16.mxu1 %vm4246_vm0, %v4245_v0 }
 0x1a5   :  { %3726 = vmatpush3.bf16.msra.mxu0 %v4312_v2 }
 0x1a6   :  { %3706 = vmatpush3.bf16.msra.mxu1 %v4126_v8  ;;  %3731 = vmatprep.subr.bf16.mxu0 %v4245_v0 }
 0x1a7   :  { %3707 = vmatprep.subr.bf16.mxu1 %v4245_v0 }
 0x1a8   :  { %3728 = vmatmul.mubr.msk.bf16.vlgmr.msra.gmra.mxu0 %vm50_vm1, %v3035_v10 }
 0x1a9   :  { %3732 = vmatpush3.bf16.msra.mxu0 %v4128_v11  ;;  %3747 = vmatprep.mubr.msk.bf16.mxu0 %vm4246_vm0, %v4245_v0 }
 0x1aa   :  { %3708 = vmatpush3.bf16.msra.mxu1 %v4127_v12  ;;  %3733 = vmatprep.subr.bf16.mxu0 %v4245_v0 }
 0x1ab   :  { %3709 = vmatprep.subr.bf16.mxu1 %v4245_v0 }
 0x1ad   :  { %3734 = vmatpush3.bf16.msra.mxu0 %v4130_v13 }
 0x1ae   :  { %3710 = vmatpush3.bf16.msra.mxu1 %v4129_v14  ;;  %3735 = vmatprep.subr.bf16.mxu0 %v4245_v0 }
 0x1af   :  { %3711 = vmatprep.subr.bf16.mxu1 %v4245_v0 }
 0x1b1   :  { %3736 = vmatpush3.bf16.msra.mxu0 %v4132_v15 }
 0x1b2   :  { %3712 = vmatpush3.bf16.msra.mxu1 %v4131_v16  ;;  %3737 = vmatprep.subr.bf16.mxu0 %v4245_v0 }
 0x1b3   :  { %3713 = vmatprep.subr.bf16.mxu1 %v4245_v0 }
 0x1b5   :  { %3738 = vmatpush3.bf16.msra.mxu0 %v4134_v18  ;;  %v3113_v18 = vld [vmem:[%s5153_s1 + $0x20] sm:$0xf] }
 0x1b6   :  { %3714 = vmatpush3.bf16.msra.mxu1 %v4133_v17  ;;  %3739 = vmatprep.subr.bf16.mxu0 %v4245_v0 }
 0x1b7   :  { %3715 = vmatprep.subr.bf16.mxu1 %v4245_v0 }
 0x1b9   :  { %3740 = vmatpush3.bf16.msra.mxu0 %v4136_v20 }
 0x1ba   :  { %3716 = vmatpush3.bf16.msra.mxu1 %v4135_v19  ;;  %3741 = vmatprep.subr.bf16.mxu0 %v4245_v0  ;;  %v4157_v19 = vld [vmem:[%s5154_s7 + $0x38] sm:$0xff]  }
 0x1bb   :  { %3717 = vmatprep.subr.bf16.mxu1 %v4245_v0 }
 0x1bd   :  { %3742 = vmatpush3.bf16.msra.mxu0 %v4138_v22 }
 0x1be   :  { %3718 = vmatpush3.bf16.msra.mxu1 %v4137_v21  ;;  %3743 = vmatprep.subr.bf16.mxu0 %v4245_v0 }
 0x1bf   :  { %3751 = vmatprep.subr.bf16.mxu1 %v4245_v0 }
 0x1c1   :  { %3744 = vmatpush3.bf16.msra.mxu0 %v4139_v23  ;;  %v4166_v23 = vld [vmem:[%s5152_s2 + $0x230] sm:$0xff]  }
 0x1c2   :  { %3745 = vmatprep.subr.bf16.mxu0 %v4245_v0 }
 0x1c5   :  { %3746 = vmatpush3.bf16.msra.mxu0 %v4140_v24 }
 0x1c6   :  { %3779 = vmatprep.subr.bf16.mxu0 %v4245_v0 }
 0x258   :  { %v495_v25 = vpop.f32.mrf.mxu1 }
 0x259   :  { %v501_v26 = vadd.f32 %v495_v25, %v4485_v55  ;;  %v4149_v55 = vld [vmem:[%s5152_s2 + $0x1e0] sm:$0xff]   ;;  %v4159_v25 = vld [vmem:[%s5154_s7 + $0x28] sm:$0xff]  }
 0x25a   :  { %v3665_v27 = vpop.f32.mrf.mxu1 }
 0x25b   :  { %v4160_v27 = vld [vmem:[%s5154_s7 + $0x20] sm:$0xff]  }
 0x25c   :  { %v498_v28 = vpop.f32.mrf.mxu1 }
 0x25d   :  { %v4168_v28 = vld [vmem:[%s5152_s2 + $0x220] sm:$0xff]  }
 0x25e   :  { %v3666_v29 = vpop.f32.mrf.mxu1 }
 0x25f   :  { %v4161_v29 = vld [vmem:[%s5154_s7 + $0x18] sm:$0xff]  }
 0x260   :  { %v647_v30 = vpop.f32.mrf.mxu0  ;;  %v693_v31 = vpop.f32.mrf.mxu1 }
 0x261   :  { %v4576_v32 = vadd.f32 %v647_v30, %v501_v26  ;;  %v4578_v33 = vpack.c.bf16 %v693_v31, %v693_v31  ;;  %v4167_v26 = vld [vmem:[%s5152_s2 + $0x228] sm:$0xff]   ;;  %v4169_v30 = vld [vmem:[%s5152_s2 + $0x218] sm:$0xff]   ;;  %v4162_v31 = vld [vmem:[%s5154_s7 + $0x10] sm:$0xff]  }
 0x262   :  { %v3693_v34 = vpop.f32.mrf.mxu0  ;;  %v3701_v35 = vpop.f32.mrf.mxu1 }
 0x263   :  { %3720 = vmatmul.mubr.bf16.vlgmr.msra.gmra.mxu1 %v4578_v33  ;;  %v4164_v34 = vld [vmem:[%s5154_s7] sm:$0xff]   ;;  %v4170_v35 = vld [vmem:[%s5152_s2 + $0x210] sm:$0xff]  }
 0x264   :  { %v650_v36 = vpop.f32.mrf.mxu0  ;;  %v696_v37 = vpop.f32.mrf.mxu1  ;;  %3752 = vmatpush3.bf16.msra.mxu1 %v4301_v1  ;;  %3755 = vmatprep.mubr.msk.bf16.mxu1 %vm4246_vm0, %v4245_v0 }
 0x265   :  { %3753 = vmatprep.subr.bf16.mxu1 %v4245_v0  ;;  %v4171_v36 = vld [vmem:[%s5152_s2 + $0x208] sm:$0xff]  }
 0x266   :  { %v3694_v38 = vpop.f32.mrf.mxu0  ;;  %v3702_v39 = vpop.f32.mrf.mxu1 }
 0x268   :  { %v845_v40 = vpop.f32.mrf.mxu0  ;;  %3754 = vmatpush3.bf16.msra.mxu1 %v4312_v2 }
 0x269   :  { %v851_v42 = vpack.c.bf16 %v845_v40, %v845_v40  ;;  %3759 = vmatprep.subr.bf16.mxu1 %v4245_v0 }
 0x26a   :  { %v3729_v44 = vpop.f32.mrf.mxu0 }
 0x26b   :  { %3748 = vmatmul.mubr.bf16.vlgmr.msra.gmra.mxu0 %v851_v42  ;;  %3756 = vmatmul.mubr.msk.bf16.vlgmr.msra.gmra.mxu1 %vm50_vm1, %v3061_v41 }
 0x26c   :  { %3780 = vmatpush3.bf16.msra.mxu0 %v4301_v1  ;;  %3783 = vmatprep.mubr.msk.bf16.mxu0 %vm4246_vm0, %v4245_v0  ;;  %v848_v45 = vpop.f32.mrf.mxu0 }
 0x26d   :  { %3781 = vmatprep.subr.bf16.mxu0 %v4245_v0  ;;  %3760 = vmatpush3.bf16.msra.mxu1 %v4141_v43 }
 0x26e   :  { %3761 = vmatprep.subr.bf16.mxu1 %v4245_v0  ;;  %v3730_v47 = vpop.f32.mrf.mxu0  ;;  %3775 = vmatprep.mubr.msk.bf16.mxu1 %vm4246_vm0, %v4245_v0 }
 0x270   :  { %3782 = vmatpush3.bf16.msra.mxu0 %v4312_v2 }
 0x271   :  { %3762 = vmatpush3.bf16.msra.mxu1 %v4142_v46  ;;  %3787 = vmatprep.subr.bf16.mxu0 %v4245_v0 }
 0x272   :  { %3763 = vmatprep.subr.bf16.mxu1 %v4245_v0 }
 0x273   :  { %3784 = vmatmul.mubr.msk.bf16.vlgmr.msra.gmra.mxu0 %vm50_vm1, %v3087_v48 }
 0x274   :  { %3788 = vmatpush3.bf16.msra.mxu0 %v4143_v49  ;;  %3803 = vmatprep.mubr.msk.bf16.mxu0 %vm4246_vm0, %v4245_v0 }
 0x275   :  { %3764 = vmatpush3.bf16.msra.mxu1 %v4144_v50  ;;  %3789 = vmatprep.subr.bf16.mxu0 %v4245_v0 }
 0x276   :  { %3765 = vmatprep.subr.bf16.mxu1 %v4245_v0 }
 0x278   :  { %3790 = vmatpush3.bf16.msra.mxu0 %v4145_v51 }
 0x279   :  { %3766 = vmatpush3.bf16.msra.mxu1 %v4146_v52  ;;  %3791 = vmatprep.subr.bf16.mxu0 %v4245_v0 }
 0x27a   :  { %3767 = vmatprep.subr.bf16.mxu1 %v4245_v0 }
 0x27c   :  { %3792 = vmatpush3.bf16.msra.mxu0 %v4147_v53 }
 0x27d   :  { %3768 = vmatpush3.bf16.msra.mxu1 %v4148_v54  ;;  %3793 = vmatprep.subr.bf16.mxu0 %v4245_v0 }
 0x27e   :  { %3769 = vmatprep.subr.bf16.mxu1 %v4245_v0 }
 0x280   :  { %3794 = vmatpush3.bf16.msra.mxu0 %v4149_v55 }
 0x281   :  { %3795 = vmatprep.subr.bf16.mxu0 %v4245_v0  ;;  %3770 = vmatpush3.bf16.msra.mxu1 %v4150_v56 }
 0x282   :  { %3771 = vmatprep.subr.bf16.mxu1 %v4245_v0 }
 0x284   :  { %3796 = vmatpush3.bf16.msra.mxu0 %v4151_v57  ;;  %v3139_v57 = vld [vmem:[%s5156_s3] ss:$0 sm:$0xff] }
 0x285   :  { %3772 = vmatpush3.bf16.msra.mxu1 %v4152_v58  ;;  %3797 = vmatprep.subr.bf16.mxu0 %v4245_v0 }
 0x286   :  { %3773 = vmatprep.subr.bf16.mxu1 %v4245_v0 }
 0x288   :  { %3798 = vmatpush3.bf16.msra.mxu0 %v4153_v59 }
 0x289   :  { %3774 = vmatpush3.bf16.msra.mxu1 %v4154_v60  ;;  %3799 = vmatprep.subr.bf16.mxu0 %v4245_v0 }
 0x28a   :  { %3807 = vmatprep.subr.bf16.mxu1 %v4245_v0 }
 0x28c   :  { %3800 = vmatpush3.bf16.msra.mxu0 %v4155_v61 }
 0x28d   :  { %3801 = vmatprep.subr.bf16.mxu0 %v4245_v0 }
 0x290   :  { %3802 = vmatpush3.bf16.msra.mxu0 %v4156_v62 }
 0x291   :  { %3835 = vmatprep.subr.bf16.mxu0 %v4245_v0 }
 0x323   :  { %v799_v63 = vpop.f32.mrf.mxu1 }
 0x324   :  { %v805_v3 = vadd.f32 %v799_v63, %v4576_v32  ;;  %v4163_v32 = vld [vmem:[%s5154_s7 + $0x8] sm:$0xff]  }
 0x325   :  { %v3721_v4 = vpop.f32.mrf.mxu1 }
 0x327   :  { %v802_v5 = vpop.f32.mrf.mxu1 }
 0x328   :  { %v3150_v5 = vld [vmem:[%s5157_s4 + $0x4] sm:$0xf] }
 0x329   :  { %v3722_v6 = vpop.f32.mrf.mxu1 }
 0x32a   :  { %v1535_v6 = vld [vmem:[%s5157_s4] sm:$0xf] }
 0x32b   :  { %v951_v7 = vpop.f32.mrf.mxu0  ;;  %v997_v8 = vpop.f32.mrf.mxu1 }
 0x32c   :  { %v4670_v9 = vadd.f32 %v951_v7, %v805_v3  ;;  %v1003_v10 = vpack.c.bf16 %v997_v8, %v997_v8  ;;  %v4173_v7 = vld [vmem:[%s5155_s5 + $0x78] sm:$0xff]  }
 0x32d   :  { %v3749_v11 = vpop.f32.mrf.mxu0  ;;  %v3757_v12 = vpop.f32.mrf.mxu1  ;;  %v4175_v8 = vld [vmem:[%s5155_s5 + $0x38] sm:$0xff]  }
 0x32e   :  { %3776 = vmatmul.mubr.bf16.vlgmr.msra.gmra.mxu1 %v1003_v10  ;;  %v4177_v10 = vld [vmem:[%s5155_s5 + $0x30] sm:$0xff]   ;;  %v4176_v11 = vld [vmem:[%s5155_s5 + $0x68] sm:$0xff]  }
 0x32f   :  { %v954_v13 = vpop.f32.mrf.mxu0  ;;  %v1000_v14 = vpop.f32.mrf.mxu1  ;;  %3808 = vmatpush3.bf16.msra.mxu1 %v4301_v1  ;;  %3811 = vmatprep.mubr.msk.bf16.mxu1 %vm4246_vm0, %v4245_v0  ;;  %v4165_v1 = vld [vmem:[%s5152_s2 + $0x238] sm:$0xff]   ;;  %v4179_v12 = vld [vmem:[%s5155_s5 + $0x28] sm:$0xff]  }
 0x330   :  { %3809 = vmatprep.subr.bf16.mxu1 %v4245_v0  ;;  %v4178_v13 = vld [vmem:[%s5155_s5 + $0x60] sm:$0xff]  }
 0x331   :  { %v3750_v15 = vpop.f32.mrf.mxu0  ;;  %v3758_v16 = vpop.f32.mrf.mxu1  ;;  %v4181_v14 = vld [vmem:[%s5155_s5 + $0x20] sm:$0xff]  }
 0x332   :  { %v4180_v15 = vld [vmem:[%s5155_s5 + $0x58] sm:$0xff]  }
 0x333   :  { %v1149_v17 = vpop.f32.mrf.mxu0  ;;  %3810 = vmatpush3.bf16.msra.mxu1 %v4312_v2  ;;  %v4158_v2 = vld [vmem:[%s5154_s7 + $0x30] sm:$0xff]   ;;  %v4183_v16 = vld [vmem:[%s5155_s5 + $0x18] sm:$0xff]  }
 0x334   :  { %v1155_v20 = vpack.c.bf16 %v1149_v17, %v1149_v17  ;;  %3815 = vmatprep.subr.bf16.mxu1 %v4245_v0  ;;  %v4182_v17 = vld [vmem:[%s5155_s5 + $0x50] sm:$0xff]  }
 0x335   :  { %v3785_v21 = vpop.f32.mrf.mxu0 }
 0x336   :  { %3804 = vmatmul.mubr.bf16.vlgmr.msra.gmra.mxu0 %v1155_v20  ;;  %3812 = vmatmul.mubr.msk.bf16.vlgmr.msra.gmra.mxu1 %vm50_vm1, %v3113_v18  ;;  %v4185_v18 = vld [vmem:[%s5155_s5 + $0x10] sm:$0xff]   ;;  %v4186_v20 = vld [vmem:[%s5155_s5 + $0x40] sm:$0xff]  }
 0x337   :  { %3836 = vmatpush3.bf16.msra.mxu0 %v4157_v19  ;;  %3851 = vmatprep.mubr.msk.bf16.mxu0 %vm4246_vm0, %v4245_v0  ;;  %v1152_v22 = vpop.f32.mrf.mxu0  ;;  %v4184_v19 = vld [vmem:[%s5155_s5 + $0x48] sm:$0xff]   ;;  %v4188_v21 = vld [vmem:[%s5155_s5] sm:$0xff]  }
 0x338   :  { %3837 = vmatprep.subr.bf16.mxu0 %v4245_v0  ;;  %3816 = vmatpush3.bf16.msra.mxu1 %v4165_v1  ;;  %v4187_v1 = vld [vmem:[%s5155_s5 + $0x8] sm:$0xff]  }
 0x339   :  { %3817 = vmatprep.subr.bf16.mxu1 %v4245_v0  ;;  %v3786_v24 = vpop.f32.mrf.mxu0  ;;  %3831 = vmatprep.mubr.msk.bf16.mxu1 %vm4246_vm0, %v4245_v0 }
 0x33b   :  { %3838 = vmatpush3.bf16.msra.mxu0 %v4158_v2 }
 0x33c   :  { %3839 = vmatprep.subr.bf16.mxu0 %v4245_v0  ;;  %3818 = vmatpush3.bf16.msra.mxu1 %v4166_v23 }
 0x33d   :  { %3819 = vmatprep.subr.bf16.mxu1 %v4245_v0 }
 0x33f   :  { %3840 = vmatpush3.bf16.msra.mxu0 %v4159_v25  ;;  %v4189_v25 = vld [vmem:[%s5155_s5 + $0xb8] sm:$0xff]  }
 0x340   :  { %3841 = vmatprep.subr.bf16.mxu0 %v4245_v0  ;;  %3820 = vmatpush3.bf16.msra.mxu1 %v4167_v26 }
 0x341   :  { %3821 = vmatprep.subr.bf16.mxu1 %v4245_v0 }
 0x343   :  { %3842 = vmatpush3.bf16.msra.mxu0 %v4160_v27 }
 0x344   :  { %3843 = vmatprep.subr.bf16.mxu0 %v4245_v0  ;;  %3822 = vmatpush3.bf16.msra.mxu1 %v4168_v28 }
 0x345   :  { %3823 = vmatprep.subr.bf16.mxu1 %v4245_v0 }
 0x347   :  { %3844 = vmatpush3.bf16.msra.mxu0 %v4161_v29 }
 0x348   :  { %3845 = vmatprep.subr.bf16.mxu0 %v4245_v0  ;;  %3824 = vmatpush3.bf16.msra.mxu1 %v4169_v30  ;;  %v4190_v30 = vld [vmem:[%s5155_s5 + $0xb0] sm:$0xff]  }
 0x349   :  { %3825 = vmatprep.subr.bf16.mxu1 %v4245_v0 }
 0x34b   :  { %3846 = vmatpush3.bf16.msra.mxu0 %v4162_v31 }
 0x34c   :  { %3847 = vmatprep.subr.bf16.mxu0 %v4245_v0  ;;  %3826 = vmatpush3.bf16.msra.mxu1 %v4170_v35  ;;  %v4191_v35 = vld [vmem:[%s5155_s5 + $0xa8] sm:$0xff]  }
 0x34d   :  { %3827 = vmatprep.subr.bf16.mxu1 %v4245_v0 }
 0x34f   :  { %3848 = vmatpush3.bf16.msra.mxu0 %v4163_v32 }
 0x350   :  { %3849 = vmatprep.subr.bf16.mxu0 %v4245_v0  ;;  %3828 = vmatpush3.bf16.msra.mxu1 %v4171_v36  ;;  %v4193_v36 = vld [vmem:[%s5155_s5 + $0xa0] sm:$0xff]  }
 0x351   :  { %3829 = vmatprep.subr.bf16.mxu1 %v4245_v0 }
 0x353   :  { %3850 = vmatpush3.bf16.msra.mxu0 %v4164_v34  ;;  %v3184_v34 = vld [vmem:[%s5157_s4 + $0x8] sm:$0xf] }
 0x354   :  { %3861 = vmatprep.subr.bf16.mxu0 %v4245_v0 }
 0x356   :  { %3852 = vmatmul.mubr.bf16.vlgmr.msra.gmra.mxu0 %v4578_v33  ;;  %v4172_v33 = vld [vmem:[%s5152_s2 + $0x200] sm:$0xff]  }
 0x357   :  { %3863 = vmatprep.mubr.msk.bf16.mxu0 %vm4246_vm0, %v4245_v0  ;;  %3830 = vmatpush3.bf16.msra.mxu1 %v4172_v33  ;;  %v3210_v33 = vld [vmem:[%s5157_s4 + $0xc] sm:$0xf] }
 0x358   :  { %3855 = vmatprep.subr.bf16.mxu1 %v4245_v0 }
 0x3ee   :  { %v1103_v37 = vpop.f32.mrf.mxu1 }
 0x3ef   :  { %v1109_v38 = vadd.f32 %v1103_v37, %v4670_v9  ;;  %v4174_v9 = vld [vmem:[%s5155_s5 + $0x70] sm:$0xff]   ;;  %v4192_v37 = vld [vmem:[%s5155_s5 + $0xf8] sm:$0xff]  }
 0x3f0   :  { %v3777_v39 = vpop.f32.mrf.mxu1 }
 0x3f1   :  { %v4194_v39 = vld [vmem:[%s5155_s5 + $0xf0] sm:$0xff]  }
 0x3f2   :  { %v1106_v40 = vpop.f32.mrf.mxu1 }
 0x3f3   :  { %v4197_v40 = vld [vmem:[%s5155_s5 + $0x90] sm:$0xff]  }
 0x3f4   :  { %v3778_v41 = vpop.f32.mrf.mxu1 }
 0x3f5   :  { %v4196_v41 = vld [vmem:[%s5155_s5 + $0xe8] sm:$0xff]  }
 0x3f6   :  { %v1255_v42 = vpop.f32.mrf.mxu0  ;;  %v1301_v43 = vpop.f32.mrf.mxu1 }
 0x3f7   :  { %v1261_v44 = vadd.f32 %v1255_v42, %v1109_v38  ;;  %v1307_v45 = vpack.c.bf16 %v1301_v43, %v1301_v43  ;;  %v4195_v38 = vld [vmem:[%s5155_s5 + $0x98] sm:$0xff]   ;;  %v4198_v42 = vld [vmem:[%s5155_s5 + $0xe0] sm:$0xff]   ;;  %v4199_v43 = vld [vmem:[%s5155_s5 + $0x88] sm:$0xff]  }
 0x3f8   :  { %v3813_v46 = vpop.f32.mrf.mxu1  ;;  %v3805_v47 = vpop.f32.mrf.mxu0 }
 0x3f9   :  { %3832 = vmatmul.mubr.bf16.vlgmr.msra.gmra.mxu1 %v1307_v45  ;;  %v4201_v45 = vld [vmem:[%s5155_s5 + $0x80] sm:$0xff]   ;;  %v4202_v46 = vld [vmem:[%s5155_s5 + $0xd0] sm:$0xff]   ;;  %v4203_v47 = vld [vmem:[%s5155_s5 + $0xc8] sm:$0xff]  }
 0x3fa   :  { %v1304_v48 = vpop.f32.mrf.mxu1  ;;  %v1258_v49 = vpop.f32.mrf.mxu0  ;;  %3857 = vmatprep.mubr.msk.bf16.mxu1 %vm4246_vm0, %v4245_v0 }
 0x3fb   :  { %v4204_v48 = vld [vmem:[%s5155_s5 + $0xc0] sm:$0xff]  }
 0x3fc   :  { %v3814_v50 = vpop.f32.mrf.mxu1  ;;  %v3806_v51 = vpop.f32.mrf.mxu0 }
 0x416   :  { %v4756_v52 = vpop.f32.mrf.mxu0 }
 0x418   :  { %v3853_v53 = vpop.f32.mrf.mxu0 }
 0x41a   :  { %v1532_v54 = vpop.f32.mrf.mxu0 }
 0x41c   :  { %v3854_v55 = vpop.f32.mrf.mxu0 }
 0x4b9   :  { %v1407_v56 = vpop.f32.mrf.mxu1 }
 0x4ba   :  { %v1413_v58 = vadd.f32 %v1407_v56, %v1261_v44  ;;  %v4200_v44 = vld [vmem:[%s5155_s5 + $0xd8] sm:$0xff]  }
 0x4bb   :  { %v3833_v59 = vpop.f32.mrf.mxu1 }
 0x4bc   :  { %v1421_v60 = vadd.f32 %v3139_v57, %v1413_v58 }
 0x4bd   :  { %v1410_v61 = vpop.f32.mrf.mxu1 }
 0x4be   :  { %v1422_v62 = vmax.f32 %v1421_v60, 0.0 }
 0x4bf   :  { %v3834_v63 = vpop.f32.mrf.mxu1 }
 0x4c0   :  { %v1423_v3 = vpack.c.bf16 %v1422_v62, %v1422_v62 }
 0x4c2   :  { %v4761_v4 = vsel %vm1540_vm2, %v1423_v3, 0 }
 0x4c3   :  { %3856 = vmatpush3.bf16.msra.mxu1 %v4761_v4  ;;  %3862 = vmatpush3.bf16.msra.mxu0 %v4761_v4 }
 0x4c4   :  { %3867 = vmatprep.subr.bf16.mxu1 %v4245_v0  ;;  %3887 = vmatprep.subr.bf16.mxu0 %v4245_v0 }
 0x4c6   :  { %3864 = vmatmul.mubr.msk.bf16.vlgmr.msra.gmra.mxu0 %vm1536_vm3, %v3150_v5  ;;  %3858 = vmatmul.mubr.msk.bf16.vlgmr.msra.gmra.mxu1 %vm1536_vm3, %v1535_v6  ;;  %v3236_v5 = vld [vmem:[%s5157_s4 + $0x10] sm:$0xf] }
 0x4c7   :  { %3868 = vmatpush3.bf16.msra.mxu1 %v4173_v7  ;;  %3888 = vmatpush3.bf16.msra.mxu0 %v4175_v8  ;;  %v4205_v7 = vld [vmem:[%s5155_s5 + $0x138] sm:$0xff]  }
 0x4c8   :  { %3869 = vmatprep.subr.bf16.mxu1 %v4245_v0  ;;  %3889 = vmatprep.subr.bf16.mxu0 %v4245_v0 }
 0x4c9   :  { %3883 = vmatprep.mubr.msk.bf16.mxu1 %vm4246_vm0, %v4245_v0  ;;  %3903 = vmatprep.mubr.msk.bf16.mxu0 %vm4246_vm0, %v4245_v0 }
 0x4cb   :  { %3870 = vmatpush3.bf16.msra.mxu1 %v4174_v9  ;;  %3890 = vmatpush3.bf16.msra.mxu0 %v4177_v10  ;;  %v4206_v10 = vld [vmem:[%s5155_s5 + $0x130] sm:$0xff]  }
 0x4cc   :  { %3871 = vmatprep.subr.bf16.mxu1 %v4245_v0  ;;  %3891 = vmatprep.subr.bf16.mxu0 %v4245_v0 }
 0x4cf   :  { %3872 = vmatpush3.bf16.msra.mxu1 %v4176_v11  ;;  %3892 = vmatpush3.bf16.msra.mxu0 %v4179_v12  ;;  %v3262_v12 = vld [vmem:[%s5157_s4 + $0x14] sm:$0xf] }
 0x4d0   :  { %3873 = vmatprep.subr.bf16.mxu1 %v4245_v0  ;;  %3893 = vmatprep.subr.bf16.mxu0 %v4245_v0 }
 0x4d3   :  { %3874 = vmatpush3.bf16.msra.mxu1 %v4178_v13  ;;  %3894 = vmatpush3.bf16.msra.mxu0 %v4181_v14  ;;  %v4208_v13 = vld [vmem:[%s5155_s5 + $0x178] sm:$0xff]   ;;  %v4207_v14 = vld [vmem:[%s5155_s5 + $0x128] sm:$0xff]  }
 0x4d4   :  { %3875 = vmatprep.subr.bf16.mxu1 %v4245_v0  ;;  %3895 = vmatprep.subr.bf16.mxu0 %v4245_v0 }
 0x4d7   :  { %3876 = vmatpush3.bf16.msra.mxu1 %v4180_v15  ;;  %3896 = vmatpush3.bf16.msra.mxu0 %v4183_v16  ;;  %v4210_v15 = vld [vmem:[%s5155_s5 + $0x170] sm:$0xff]   ;;  %v4209_v16 = vld [vmem:[%s5155_s5 + $0x120] sm:$0xff]  }
 0x4d8   :  { %3877 = vmatprep.subr.bf16.mxu1 %v4245_v0  ;;  %3897 = vmatprep.subr.bf16.mxu0 %v4245_v0 }
 0x4db   :  { %3878 = vmatpush3.bf16.msra.mxu1 %v4182_v17  ;;  %3898 = vmatpush3.bf16.msra.mxu0 %v4185_v18  ;;  %v4212_v17 = vld [vmem:[%s5155_s5 + $0x168] sm:$0xff]   ;;  %v4211_v18 = vld [vmem:[%s5155_s5 + $0x118] sm:$0xff]  }
 0x4dc   :  { %3879 = vmatprep.subr.bf16.mxu1 %v4245_v0  ;;  %3899 = vmatprep.subr.bf16.mxu0 %v4245_v0 }
 0x4df   :  { %3880 = vmatpush3.bf16.msra.mxu1 %v4184_v19  ;;  %3900 = vmatpush3.bf16.msra.mxu0 %v4187_v1  ;;  %v4214_v19 = vld [vmem:[%s5155_s5 + $0x160] sm:$0xff]   ;;  %v4215_v1 = vld [vmem:[%s5155_s5 + $0x108] sm:$0xff]  }
 0x4e0   :  { %3881 = vmatprep.subr.bf16.mxu1 %v4245_v0  ;;  %3901 = vmatprep.subr.bf16.mxu0 %v4245_v0 }
 0x4e3   :  { %3882 = vmatpush3.bf16.msra.mxu1 %v4186_v20  ;;  %3902 = vmatpush3.bf16.msra.mxu0 %v4188_v21  ;;  %v4213_v20 = vld [vmem:[%s5155_s5 + $0x110] sm:$0xff]   ;;  %v4216_v21 = vld [vmem:[%s5155_s5 + $0x158] sm:$0xff]  }
 0x4e4   :  { %3907 = vmatprep.subr.bf16.mxu1 %v4245_v0  ;;  %3913 = vmatprep.subr.bf16.mxu0 %v4245_v0 }
 0x586   :  { %v1640_v2 = vpop.f32.mrf.mxu0  ;;  %v1578_v22 = vpop.f32.mrf.mxu1 }
 0x587   :  { %v1646_v23 = vpack.c.bf16 %v1640_v2, %v1640_v2  ;;  %v1584_v24 = vpack.c.bf16 %v1578_v22, %v1578_v22  ;;  %v4217_v2 = vld [vmem:[%s5155_s5 + $0x100] sm:$0xff]   ;;  %v4218_v22 = vld [vmem:[%s5155_s5 + $0x150] sm:$0xff]  }
 0x588   :  { %v3865_v26 = vpop.f32.mrf.mxu0  ;;  %v3859_v27 = vpop.f32.mrf.mxu1 }
 0x589   :  { %3884 = vmatmul.mubr.bf16.vlgmr.msra.gmra.mxu1 %v1646_v23  ;;  %3904 = vmatmul.mubr.bf16.vlgmr.msra.gmra.mxu0 %v1584_v24  ;;  %v4219_v23 = vld [vmem:[%s5155_s5 + $0x148] sm:$0xff]   ;;  %v4220_v24 = vld [vmem:[%s5155_s5 + $0x140] sm:$0xff]  }
 0x58a   :  { %3908 = vmatpush3.bf16.msra.mxu1 %v4761_v4  ;;  %v1643_v28 = vpop.f32.mrf.mxu0  ;;  %3909 = vmatprep.mubr.msk.bf16.mxu1 %vm4246_vm0, %v4245_v0  ;;  %v1581_v29 = vpop.f32.mrf.mxu1 }
 0x58b   :  { %3933 = vmatprep.subr.bf16.mxu1 %v4245_v0  ;;  %3914 = vmatpush3.bf16.msra.mxu0 %v4189_v25 }
 0x58c   :  { %v3866_v31 = vpop.f32.mrf.mxu0  ;;  %v3860_v32 = vpop.f32.mrf.mxu1  ;;  %3915 = vmatprep.subr.bf16.mxu0 %v4245_v0  ;;  %3929 = vmatprep.mubr.msk.bf16.mxu0 %vm4246_vm0, %v4245_v0 }
 0x58f   :  { %3916 = vmatpush3.bf16.msra.mxu0 %v4190_v30 }
 0x590   :  { %3917 = vmatprep.subr.bf16.mxu0 %v4245_v0 }
 0x591   :  { %3910 = vmatmul.mubr.msk.bf16.vlgmr.msra.gmra.mxu1 %vm1536_vm3, %v3184_v34 }
 0x592   :  { %3934 = vmatpush3.bf16.msra.mxu1 %v4761_v4  ;;  %3935 = vmatprep.mubr.msk.bf16.mxu1 %vm4246_vm0, %v4245_v0 }
 0x593   :  { %3939 = vmatprep.subr.bf16.mxu1 %v4245_v0  ;;  %3918 = vmatpush3.bf16.msra.mxu0 %v4191_v35 }
 0x594   :  { %3919 = vmatprep.subr.bf16.mxu0 %v4245_v0 }
 0x597   :  { %3920 = vmatpush3.bf16.msra.mxu0 %v4193_v36 }
 0x598   :  { %3921 = vmatprep.subr.bf16.mxu0 %v4245_v0 }
 0x599   :  { %3936 = vmatmul.mubr.msk.bf16.vlgmr.msra.gmra.mxu1 %vm1536_vm3, %v3210_v33 }
 0x59a   :  { %3940 = vmatpush3.bf16.msra.mxu1 %v4192_v37  ;;  %3955 = vmatprep.mubr.msk.bf16.mxu1 %vm4246_vm0, %v4245_v0 }
 0x59b   :  { %3941 = vmatprep.subr.bf16.mxu1 %v4245_v0  ;;  %3922 = vmatpush3.bf16.msra.mxu0 %v4195_v38 }
 0x59c   :  { %3923 = vmatprep.subr.bf16.mxu0 %v4245_v0 }
 0x59e   :  { %3942 = vmatpush3.bf16.msra.mxu1 %v4194_v39 }
 0x59f   :  { %3943 = vmatprep.subr.bf16.mxu1 %v4245_v0  ;;  %3924 = vmatpush3.bf16.msra.mxu0 %v4197_v40 }
 0x5a0   :  { %3925 = vmatprep.subr.bf16.mxu0 %v4245_v0 }
 0x5a2   :  { %3944 = vmatpush3.bf16.msra.mxu1 %v4196_v41  ;;  %v3288_v41 = vld [vmem:[%s5157_s4 + $0x18] sm:$0xf] }
 0x5a3   :  { %3945 = vmatprep.subr.bf16.mxu1 %v4245_v0  ;;  %3926 = vmatpush3.bf16.msra.mxu0 %v4199_v43  ;;  %v4221_v43 = vld [vmem:[%s5155_s5 + $0x1b8] sm:$0xff]  }
 0x5a4   :  { %3927 = vmatprep.subr.bf16.mxu0 %v4245_v0 }
 0x5a6   :  { %3946 = vmatpush3.bf16.msra.mxu1 %v4198_v42 }
 0x5a7   :  { %3947 = vmatprep.subr.bf16.mxu1 %v4245_v0  ;;  %3928 = vmatpush3.bf16.msra.mxu0 %v4201_v45 }
 0x5a8   :  { %3959 = vmatprep.subr.bf16.mxu0 %v4245_v0 }
 0x5aa   :  { %3948 = vmatpush3.bf16.msra.mxu1 %v4200_v44 }
 0x5ab   :  { %3949 = vmatprep.subr.bf16.mxu1 %v4245_v0 }
 0x5ae   :  { %3950 = vmatpush3.bf16.msra.mxu1 %v4202_v46  ;;  %v4222_v46 = vld [vmem:[%s5155_s5 + $0x1b0] sm:$0xff]  }
 0x5af   :  { %3951 = vmatprep.subr.bf16.mxu1 %v4245_v0 }
 0x5b2   :  { %3952 = vmatpush3.bf16.msra.mxu1 %v4203_v47 }
 0x5b3   :  { %3953 = vmatprep.subr.bf16.mxu1 %v4245_v0 }
 0x5b6   :  { %3954 = vmatpush3.bf16.msra.mxu1 %v4204_v48  ;;  %v3314_v48 = vld [vmem:[%s5157_s4 + $0x1c] sm:$0xf] }
 0x5b7   :  { %3985 = vmatprep.subr.bf16.mxu1 %v4245_v0 }
 0x649   :  { %v1746_v49 = vpop.f32.mrf.mxu1  ;;  %v1834_v50 = vpop.f32.mrf.mxu0 }
 0x64a   :  { %v4927_v51 = vadd.f32 %v1834_v50, %v1746_v49  ;;  %v4224_v49 = vld [vmem:[%s5155_s5 + $0x1f8] sm:$0xff]   ;;  %v4223_v50 = vld [vmem:[%s5155_s5 + $0x1a8] sm:$0xff]  }
 0x64b   :  { %v3885_v53 = vpop.f32.mrf.mxu1  ;;  %v3905_v54 = vpop.f32.mrf.mxu0 }
 0x64c   :  { %v4225_v53 = vld [vmem:[%s5155_s5 + $0x1a0] sm:$0xff]   ;;  %v4228_v54 = vld [vmem:[%s5155_s5 + $0x1e8] sm:$0xff]  }
 0x64d   :  { %v1749_v55 = vpop.f32.mrf.mxu1  ;;  %v1837_v56 = vpop.f32.mrf.mxu0 }
 0x64e   :  { %v4227_v55 = vld [vmem:[%s5155_s5 + $0x198] sm:$0xff]   ;;  %v4229_v56 = vld [vmem:[%s5155_s5 + $0x190] sm:$0xff]  }
 0x64f   :  { %v3886_v57 = vpop.f32.mrf.mxu1  ;;  %v3906_v58 = vpop.f32.mrf.mxu0 }
 0x650   :  { %v4230_v57 = vld [vmem:[%s5155_s5 + $0x1e0] sm:$0xff]   ;;  %v4231_v58 = vld [vmem:[%s5155_s5 + $0x188] sm:$0xff]  }
 0x651   :  { %v1879_v59 = vpop.f32.mrf.mxu1 }
 0x652   :  { %v1885_v60 = vpack.c.bf16 %v1879_v59, %v1879_v59  ;;  %v4232_v59 = vld [vmem:[%s5155_s5 + $0x1d8] sm:$0xff]  }
 0x653   :  { %v3911_v61 = vpop.f32.mrf.mxu1 }
 0x654   :  { %3930 = vmatmul.mubr.bf16.vlgmr.msra.gmra.mxu0 %v1885_v60  ;;  %v4233_v60 = vld [vmem:[%s5155_s5 + $0x180] sm:$0xff]   ;;  %v4234_v61 = vld [vmem:[%s5155_s5 + $0x1d0] sm:$0xff]  }
 0x655   :  { %3960 = vmatpush3.bf16.msra.mxu0 %v4761_v4  ;;  %v1882_v62 = vpop.f32.mrf.mxu1  ;;  %3961 = vmatprep.mubr.msk.bf16.mxu0 %vm4246_vm0, %v4245_v0 }
 0x656   :  { %3965 = vmatprep.subr.bf16.mxu0 %v4245_v0  ;;  %v4235_v62 = vld [vmem:[%s5155_s5 + $0x1c8] sm:$0xff]  }
 0x657   :  { %v3912_v63 = vpop.f32.mrf.mxu1 }
 0x658   :  { %v4236_v63 = vld [vmem:[%s5155_s5 + $0x1c0] sm:$0xff]  }
 0x659   :  { %v2031_v3 = vpop.f32.mrf.mxu1 }
 0x65a   :  { %v2037_v6 = vpack.c.bf16 %v2031_v3, %v2031_v3 }
 0x65b   :  { %v3937_v8 = vpop.f32.mrf.mxu1 }
 0x65c   :  { %3956 = vmatmul.mubr.bf16.vlgmr.msra.gmra.mxu1 %v2037_v6  ;;  %3962 = vmatmul.mubr.msk.bf16.vlgmr.msra.gmra.mxu0 %vm1536_vm3, %v3236_v5 }
 0x65d   :  { %3986 = vmatpush3.bf16.msra.mxu1 %v4761_v4  ;;  %3987 = vmatprep.mubr.msk.bf16.mxu1 %vm4246_vm0, %v4245_v0  ;;  %v2034_v9 = vpop.f32.mrf.mxu1 }
 0x65e   :  { %3966 = vmatpush3.bf16.msra.mxu0 %v4205_v7  ;;  %3991 = vmatprep.subr.bf16.mxu1 %v4245_v0 }
 0x65f   :  { %3967 = vmatprep.subr.bf16.mxu0 %v4245_v0  ;;  %v3938_v11 = vpop.f32.mrf.mxu1  ;;  %3981 = vmatprep.mubr.msk.bf16.mxu0 %vm4246_vm0, %v4245_v0 }
 0x662   :  { %3968 = vmatpush3.bf16.msra.mxu0 %v4206_v10 }
 0x663   :  { %3969 = vmatprep.subr.bf16.mxu0 %v4245_v0 }
 0x664   :  { %3988 = vmatmul.mubr.msk.bf16.vlgmr.msra.gmra.mxu1 %vm1536_vm3, %v3262_v12 }
 0x665   :  { %3992 = vmatpush3.bf16.msra.mxu1 %v4208_v13  ;;  %4007 = vmatprep.mubr.msk.bf16.mxu1 %vm4246_vm0, %v4245_v0 }
 0x666   :  { %3970 = vmatpush3.bf16.msra.mxu0 %v4207_v14  ;;  %3993 = vmatprep.subr.bf16.mxu1 %v4245_v0 }
 0x667   :  { %3971 = vmatprep.subr.bf16.mxu0 %v4245_v0 }
 0x669   :  { %3994 = vmatpush3.bf16.msra.mxu1 %v4210_v15 }
 0x66a   :  { %3972 = vmatpush3.bf16.msra.mxu0 %v4209_v16  ;;  %3995 = vmatprep.subr.bf16.mxu1 %v4245_v0 }
 0x66b   :  { %3973 = vmatprep.subr.bf16.mxu0 %v4245_v0 }
 0x66d   :  { %3996 = vmatpush3.bf16.msra.mxu1 %v4212_v17 }
 0x66e   :  { %3974 = vmatpush3.bf16.msra.mxu0 %v4211_v18  ;;  %3997 = vmatprep.subr.bf16.mxu1 %v4245_v0 }
 0x66f   :  { %3975 = vmatprep.subr.bf16.mxu0 %v4245_v0 }
 0x671   :  { %3998 = vmatpush3.bf16.msra.mxu1 %v4214_v19 }
 0x672   :  { %3976 = vmatpush3.bf16.msra.mxu0 %v4213_v20  ;;  %3999 = vmatprep.subr.bf16.mxu1 %v4245_v0  ;;  %v3340_v20 = vld [vmem:[%s5157_s4 + $0x20] sm:$0xf] }
 0x673   :  { %3977 = vmatprep.subr.bf16.mxu0 %v4245_v0 }
 0x675   :  { %4000 = vmatpush3.bf16.msra.mxu1 %v4216_v21 }
 0x676   :  { %3978 = vmatpush3.bf16.msra.mxu0 %v4215_v1  ;;  %4001 = vmatprep.subr.bf16.mxu1 %v4245_v0  ;;  %v4237_v1 = vld [vmem:[%s5155_s5 + $0x238] sm:$0xff]  }
 0x677   :  { %3979 = vmatprep.subr.bf16.mxu0 %v4245_v0 }
 0x679   :  { %4002 = vmatpush3.bf16.msra.mxu1 %v4218_v22 }
 0x67a   :  { %3980 = vmatpush3.bf16.msra.mxu0 %v4217_v2  ;;  %4003 = vmatprep.subr.bf16.mxu1 %v4245_v0  ;;  %v4238_v2 = vld [vmem:[%s5155_s5 + $0x230] sm:$0xff]  }
 0x67b   :  { %4011 = vmatprep.subr.bf16.mxu0 %v4245_v0 }
 0x67d   :  { %4004 = vmatpush3.bf16.msra.mxu1 %v4219_v23 }
 0x67e   :  { %4005 = vmatprep.subr.bf16.mxu1 %v4245_v0 }
 0x681   :  { %4006 = vmatpush3.bf16.msra.mxu1 %v4220_v24  ;;  %v4239_v24 = vld [vmem:[%s5155_s5 + $0x228] sm:$0xff]  }
 0x682   :  { %4037 = vmatprep.subr.bf16.mxu1 %v4245_v0 }
 0x714   :  { %v1985_v25 = vpop.f32.mrf.mxu0 }
 0x715   :  { %v1991_v26 = vadd.f32 %v1985_v25, %v4927_v51  ;;  %v4226_v51 = vld [vmem:[%s5155_s5 + $0x1f0] sm:$0xff]   ;;  %v4240_v25 = vld [vmem:[%s5155_s5 + $0x220] sm:$0xff]  }
 0x716   :  { %v3931_v27 = vpop.f32.mrf.mxu0 }
 0x717   :  { %v4242_v27 = vld [vmem:[%s5155_s5 + $0x210] sm:$0xff]  }
 0x718   :  { %v1988_v28 = vpop.f32.mrf.mxu0 }
 0x719   :  { %v4243_v28 = vld [vmem:[%s5155_s5 + $0x208] sm:$0xff]  }
 0x71a   :  { %v3932_v29 = vpop.f32.mrf.mxu0 }
 0x71b   :  { %v4244_v29 = vld [vmem:[%s5155_s5 + $0x200] sm:$0xff]  }
 0x71c   :  { %v2137_v30 = vpop.f32.mrf.mxu1  ;;  %v2183_v31 = vpop.f32.mrf.mxu0 }
 0x71d   :  { %v5014_v32 = vadd.f32 %v2137_v30, %v1991_v26  ;;  %v2189_v34 = vpack.c.bf16 %v2183_v31, %v2183_v31  ;;  %v4241_v26 = vld [vmem:[%s5155_s5 + $0x218] sm:$0xff]  }
 0x71e   :  { %v3957_v35 = vpop.f32.mrf.mxu1  ;;  %v3963_v36 = vpop.f32.mrf.mxu0 }
 0x71f   :  { %3982 = vmatmul.mubr.bf16.vlgmr.msra.gmra.mxu0 %v2189_v34 }
 0x720   :  { %4012 = vmatpush3.bf16.msra.mxu0 %v4761_v4  ;;  %v2140_v33 = vpop.f32.mrf.mxu1  ;;  %v2186_v37 = vpop.f32.mrf.mxu0  ;;  %4013 = vmatprep.mubr.msk.bf16.mxu0 %vm4246_vm0, %v4245_v0 }
 0x721   :  { %4017 = vmatprep.subr.bf16.mxu0 %v4245_v0 }
 0x722   :  { %v3958_v38 = vpop.f32.mrf.mxu1  ;;  %v3964_v39 = vpop.f32.mrf.mxu0 }
 0x724   :  { %v2335_v40 = vpop.f32.mrf.mxu1 }
 0x725   :  { %v2341_v42 = vpack.c.bf16 %v2335_v40, %v2335_v40 }
 0x726   :  { %v3989_v44 = vpop.f32.mrf.mxu1 }
 0x727   :  { %4008 = vmatmul.mubr.bf16.vlgmr.msra.gmra.mxu1 %v2341_v42  ;;  %4014 = vmatmul.mubr.msk.bf16.vlgmr.msra.gmra.mxu0 %vm1536_vm3, %v3288_v41  ;;  %v3140_v44 = vld [vmem:[%s5158_s8] ss:$0 sm:$0xff] }
 0x728   :  { %4038 = vmatpush3.bf16.msra.mxu1 %v4761_v4  ;;  %4039 = vmatprep.mubr.msk.bf16.mxu1 %vm4246_vm0, %v4245_v0  ;;  %v2338_v45 = vpop.f32.mrf.mxu1 }
 0x729   :  { %4018 = vmatpush3.bf16.msra.mxu0 %v4221_v43  ;;  %4043 = vmatprep.subr.bf16.mxu1 %v4245_v0 }
 0x72a   :  { %4019 = vmatprep.subr.bf16.mxu0 %v4245_v0  ;;  %v3990_v47 = vpop.f32.mrf.mxu1  ;;  %4033 = vmatprep.mubr.msk.bf16.mxu0 %vm4246_vm0, %v4245_v0 }
 0x72d   :  { %4020 = vmatpush3.bf16.msra.mxu0 %v4222_v46  ;;  %v3366_v46 = vld [vmem:[%s5159_s6] ss:$0 sm:$0xff] }
 0x72e   :  { %4021 = vmatprep.subr.bf16.mxu0 %v4245_v0 }
 0x72f   :  { %4040 = vmatmul.mubr.msk.bf16.vlgmr.msra.gmra.mxu1 %vm1536_vm3, %v3314_v48 }
 0x730   :  { %4044 = vmatpush3.bf16.msra.mxu1 %v4224_v49  ;;  %4059 = vmatprep.mubr.msk.bf16.mxu1 %vm4246_vm0, %v4245_v0  ;;  %v1530_v49 = vadd.f32 %v3140_v44, %v4756_v52 }
 0x731   :  { %4022 = vmatpush3.bf16.msra.mxu0 %v4223_v50  ;;  %4045 = vmatprep.subr.bf16.mxu1 %v4245_v0 }
 0x732   :  { %4023 = vmatprep.subr.bf16.mxu0 %v4245_v0 }
 0x734   :  { %4046 = vmatpush3.bf16.msra.mxu1 %v4226_v51 }
 0x735   :  { %4024 = vmatpush3.bf16.msra.mxu0 %v4225_v53  ;;  %4047 = vmatprep.subr.bf16.mxu1 %v4245_v0 }
 0x736   :  { %4025 = vmatprep.subr.bf16.mxu0 %v4245_v0 }
 0x738   :  { %4048 = vmatpush3.bf16.msra.mxu1 %v4228_v54 }
 0x739   :  { %4026 = vmatpush3.bf16.msra.mxu0 %v4227_v55  ;;  %4049 = vmatprep.subr.bf16.mxu1 %v4245_v0 }
 0x73a   :  { %4027 = vmatprep.subr.bf16.mxu0 %v4245_v0 }
 0x73c   :  { %4050 = vmatpush3.bf16.msra.mxu1 %v4230_v57 }
 0x73d   :  { %4028 = vmatpush3.bf16.msra.mxu0 %v4229_v56  ;;  %4051 = vmatprep.subr.bf16.mxu1 %v4245_v0 }
 0x73e   :  { %4029 = vmatprep.subr.bf16.mxu0 %v4245_v0 }
 0x740   :  { %4052 = vmatpush3.bf16.msra.mxu1 %v4232_v59 }
 0x741   :  { %4030 = vmatpush3.bf16.msra.mxu0 %v4231_v58  ;;  %4053 = vmatprep.subr.bf16.mxu1 %v4245_v0 }
 0x742   :  { %4031 = vmatprep.subr.bf16.mxu0 %v4245_v0 }
 0x744   :  { %4054 = vmatpush3.bf16.msra.mxu1 %v4234_v61 }
 0x745   :  { %4032 = vmatpush3.bf16.msra.mxu0 %v4233_v60  ;;  %4055 = vmatprep.subr.bf16.mxu1 %v4245_v0 }
 0x746   :  { %4063 = vmatprep.subr.bf16.mxu0 %v4245_v0 }
 0x748   :  { %4056 = vmatpush3.bf16.msra.mxu1 %v4235_v62 }
 0x749   :  { %4057 = vmatprep.subr.bf16.mxu1 %v4245_v0 }
 0x74c   :  { %4058 = vmatpush3.bf16.msra.mxu1 %v4236_v63 }
 0x7df   :  { %v2289_v3 = vpop.f32.mrf.mxu0 }
 0x7e0   :  { %v2295_v5 = vadd.f32 %v2289_v3, %v5014_v32 }
 0x7e1   :  { %v3983_v6 = vpop.f32.mrf.mxu0 }
 0x7e3   :  { %v2292_v7 = vpop.f32.mrf.mxu0 }
 0x7e5   :  { %v3984_v8 = vpop.f32.mrf.mxu0 }
 0x7e7   :  { %v2441_v9 = vpop.f32.mrf.mxu1  ;;  %v2487_v10 = vpop.f32.mrf.mxu0 }
 0x7e8   :  { %v2447_v11 = vadd.f32 %v2441_v9, %v2295_v5  ;;  %v2493_v12 = vpack.c.bf16 %v2487_v10, %v2487_v10 }
 0x7e9   :  { %v4009_v13 = vpop.f32.mrf.mxu1  ;;  %v4015_v14 = vpop.f32.mrf.mxu0 }
 0x7ea   :  { %4034 = vmatmul.mubr.bf16.vlgmr.msra.gmra.mxu0 %v2493_v12 }
 0x7eb   :  { %4064 = vmatpush3.bf16.msra.mxu0 %v4761_v4  ;;  %v2444_v15 = vpop.f32.mrf.mxu1  ;;  %v2490_v16 = vpop.f32.mrf.mxu0  ;;  %4065 = vmatprep.mubr.msk.bf16.mxu0 %vm4246_vm0, %v4245_v0 }
 0x7ec   :  { %4069 = vmatprep.subr.bf16.mxu0 %v4245_v0 }
 0x7ed   :  { %v4010_v17 = vpop.f32.mrf.mxu1  ;;  %v4016_v18 = vpop.f32.mrf.mxu0 }
 0x7ef   :  { %v2639_v19 = vpop.f32.mrf.mxu1 }
 0x7f0   :  { %v2645_v21 = vpack.c.bf16 %v2639_v19, %v2639_v19 }
 0x7f1   :  { %v4041_v4 = vpop.f32.mrf.mxu1 }
 0x7f2   :  { %4060 = vmatmul.mubr.bf16.vlgmr.msra.gmra.mxu1 %v2645_v21  ;;  %4066 = vmatmul.mubr.msk.bf16.vlgmr.msra.gmra.mxu0 %vm1536_vm3, %v3340_v20 }
 0x7f3   :  { %4070 = vmatpush3.bf16.msra.mxu0 %v4237_v1  ;;  %v2642_v22 = vpop.f32.mrf.mxu1  ;;  %4085 = vmatprep.mubr.msk.bf16.mxu0 %vm4246_vm0, %v4245_v0 }
 0x7f4   :  { %4071 = vmatprep.subr.bf16.mxu0 %v4245_v0 }
 0x7f5   :  { %v4042_v23 = vpop.f32.mrf.mxu1 }
 0x7f7   :  { %4072 = vmatpush3.bf16.msra.mxu0 %v4238_v2 }
 0x7f8   :  { %4073 = vmatprep.subr.bf16.mxu0 %v4245_v0 }
 0x7fb   :  { %4074 = vmatpush3.bf16.msra.mxu0 %v4239_v24 }
 0x7fc   :  { %4075 = vmatprep.subr.bf16.mxu0 %v4245_v0 }
 0x7ff   :  { %4076 = vmatpush3.bf16.msra.mxu0 %v4240_v25 }
 0x800   :  { %4077 = vmatprep.subr.bf16.mxu0 %v4245_v0 }
 0x803   :  { %4078 = vmatpush3.bf16.msra.mxu0 %v4241_v26 }
 0x804   :  { %4079 = vmatprep.subr.bf16.mxu0 %v4245_v0 }
 0x807   :  { %4080 = vmatpush3.bf16.msra.mxu0 %v4242_v27 }
 0x808   :  { %4081 = vmatprep.subr.bf16.mxu0 %v4245_v0 }
 0x80b   :  { %4082 = vmatpush3.bf16.msra.mxu0 %v4243_v28 }
 0x80c   :  { %4083 = vmatprep.subr.bf16.mxu0 %v4245_v0 }
 0x80f   :  { %4084 = vmatpush3.bf16.msra.mxu0 %v4244_v29 }
 0x8aa   :  { %v2593_v30 = vpop.f32.mrf.mxu0 }
 0x8ab   :  { %v2599_v31 = vadd.f32 %v2593_v30, %v2447_v11 }
 0x8ac   :  { %v4035_v32 = vpop.f32.mrf.mxu0 }
 0x8ae   :  { %v2596_v34 = vpop.f32.mrf.mxu0 }
 0x8b0   :  { %v4036_v35 = vpop.f32.mrf.mxu0 }
 0x8b2   :  { %v2745_v36 = vpop.f32.mrf.mxu1  ;;  %v2791_v33 = vpop.f32.mrf.mxu0 }
 0x8b3   :  { %v2751_v37 = vadd.f32 %v2745_v36, %v2599_v31  ;;  %v2797_v38 = vpack.c.bf16 %v2791_v33, %v2791_v33 }
 0x8b4   :  { %v4067_v39 = vpop.f32.mrf.mxu0  ;;  %v4061_v40 = vpop.f32.mrf.mxu1 }
 0x8b5   :  { %4086 = vmatmul.mubr.bf16.vlgmr.msra.gmra.mxu0 %v2797_v38 }
 0x8b6   :  { %v2794_v41 = vpop.f32.mrf.mxu0  ;;  %v2748_v42 = vpop.f32.mrf.mxu1 }
 0x8b8   :  { %v4068_v0 = vpop.f32.mrf.mxu0  ;;  %v4062_v43 = vpop.f32.mrf.mxu1 }
 0x975   :  { %v2897_v45 = vpop.f32.mrf.mxu0 }
 0x976   :  { %v2903_v47 = vadd.f32 %v2897_v45, %v2751_v37 }
 0x977   :  { %v4087_v48 = vpop.f32.mrf.mxu0 }
 0x978   :  { %v2911_v50 = vadd.f32 %v3366_v46, %v2903_v47 }
 0x979   :  { %v2900_v51 = vpop.f32.mrf.mxu0 }
 0x97a   :  { %v2912_v53 = vadd.f32 %v2911_v50, %v1530_v49 }
 0x97b   :  { %v4088_v54 = vpop.f32.mrf.mxu0 }
 0x97c   :  { %v2913_v55 = vmax.f32 %v2912_v53, 0.0 }
 0x97e   :  { %v2914_v56 = vpack.c.bf16 %v2913_v55, %v2913_v55 }
 0x980   :  { %2915 = vst [vmem:[%s5160_s9] sm:$0xf] %v2914_v56 }

// kernel: resnet18_forward.11
= control target key start
LH: loop header
LB: loop body
LE: loop exit
PB: predicated region body
PF: predicated region fallthrough
CT: control target
= control target key end

     0   :  { %vm57_vm0 = vcmask 261120   ;;  %s5777_s0 = inlined_call_operand.vmem [shape: bf16[32,128], index: 0, kind: input, shape index: {}]   ;;  %s5778_s1 = inlined_call_operand.vmem [shape: bf16[9,32,32], index: 1, kind: input, shape index: {}, may-alias: {1,4}]   ;;  %s5779_s2 = inlined_call_operand.vmem [shape: bf16[9,128,128], index: 2, kind: input, shape index: {}]   ;;  %s5780_s5 = inlined_call_operand.vmem [shape: bf16[9,128,128], index: 5, kind: input, shape index: {}]   ;;  %s5781_s4 = inlined_call_operand.vmem [shape: bf16[9,32,32], index: 4, kind: input, shape index: {}, may-alias: {1,4}]   ;;  %s5782_s3 = inlined_call_operand.vmem [shape: f32[1,128], index: 3, kind: input, shape index: {}, may-alias: {3,6}]   ;;  %s5783_s6 = inlined_call_operand.vmem [shape: f32[1,128], index: 6, kind: input, shape index: {}, may-alias: {3,6}]   ;;  %s5784_s7 = inlined_call_operand.vmem [shape: bf16[32,128], index: 7, kind: output, shape index: {}]  }
   0x1   :  { %v5052_v0 = vld [vmem:[%s5777_s0 + $0x8] sm:$0xff]   ;;  %v5057_v1 = vld [vmem:[%s5777_s0] sm:$0xff]   ;;  %v4831_v4 = vld [vmem:[%s5779_s2 + $0x78] sm:$0xff]  }
   0x2   :  { %v4825_v2 = vld [vmem:[%s5778_s1] sm:$0xff]   ;;  %4319 = vmatprep.subr.bf16.mxu1 %v5052_v0  ;;  %v4826_v3 = vld [vmem:[%s5778_s1 + $0x8] sm:$0xff]   ;;  %v4827_v5 = vld [vmem:[%s5778_s1 + $0x10] sm:$0xff]   ;;  %4335 = vmatprep.subr.bf16.mxu0 %v4831_v4 }
   0x3   :  { %4323 = vmatprep.mubr.msk.bf16.mxu1 %vm57_vm0, %v4825_v2  ;;  %4320 = vmatpush3.bf16.msra.mxu1 %v5052_v0  ;;  %v4833_v6 = vld [vmem:[%s5779_s2 + $0x70] sm:$0xff]   ;;  %v4835_v7 = vld [vmem:[%s5779_s2 + $0x68] sm:$0xff]   ;;  %v4828_v8 = vld [vmem:[%s5778_s1 + $0x18] sm:$0xff]  }
   0x4   :  { %4321 = vmatprep.subr.bf16.mxu1 %v5057_v1  ;;  %4336 = vmatpush3.bf16.msra.mxu0 %v4831_v4  ;;  %v4829_v9 = vld [vmem:[%s5779_s2 + $0x38] sm:$0xff]   ;;  %v4837_v10 = vld [vmem:[%s5779_s2 + $0x60] sm:$0xff]   ;;  %v4830_v11 = vld [vmem:[%s5779_s2 + $0x30] sm:$0xff]  }
   0x5   :  { %4337 = vmatprep.subr.bf16.mxu0 %v4833_v6  ;;  %v4832_v12 = vld [vmem:[%s5779_s2 + $0x28] sm:$0xff]   ;;  %v4834_v13 = vld [vmem:[%s5779_s2 + $0x20] sm:$0xff]   ;;  %v4836_v14 = vld [vmem:[%s5779_s2 + $0x18] sm:$0xff]  }
   0x6   :  { %v4838_v15 = vld [vmem:[%s5779_s2 + $0x10] sm:$0xff]   ;;  %v4839_v16 = vld [vmem:[%s5779_s2 + $0x58] sm:$0xff]   ;;  %v4840_v17 = vld [vmem:[%s5779_s2 + $0x8] sm:$0xff]  }
   0x7   :  { %4322 = vmatpush3.bf16.msra.mxu1 %v5057_v1  ;;  %v4841_v18 = vld [vmem:[%s5779_s2 + $0x50] sm:$0xff]   ;;  %v4842_v19 = vld [vmem:[%s5779_s2] sm:$0xff]   ;;  %v4843_v20 = vld [vmem:[%s5779_s2 + $0x48] sm:$0xff]  }
   0x8   :  { %4327 = vmatprep.subr.bf16.mxu1 %v5052_v0  ;;  %4338 = vmatpush3.bf16.msra.mxu0 %v4833_v6  ;;  %v4844_v21 = vld [vmem:[%s5779_s2 + $0x40] sm:$0xff]   ;;  %v4849_v32 = vld [vmem:[%s5779_s2 + $0xb8] sm:$0xff]   ;;  %v4846_v35 = vld [vmem:[%s5778_s1 + $0x28] sm:$0xff]  }
   0x9   :  { %4339 = vmatprep.subr.bf16.mxu0 %v4835_v7  ;;  %v4845_v27 = vld [vmem:[%s5778_s1 + $0x20] sm:$0xff]   ;;  %v4847_v37 = vld [vmem:[%s5778_s1 + $0x30] sm:$0xff]   ;;  %v4852_v39 = vld [vmem:[%s5779_s2 + $0xf8] sm:$0xff]  }
   0xa   :  { %4324 = vmatmul.mubr.msk.bf16.vlgmr.msra.gmra.mxu1 %vm57_vm0, %v4826_v3  ;;  %v4850_v38 = vld [vmem:[%s5779_s2 + $0xb0] sm:$0xff]   ;;  %v4851_v40 = vld [vmem:[%s5779_s2 + $0xa8] sm:$0xff]   ;;  %v4848_v41 = vld [vmem:[%s5778_s1 + $0x38] sm:$0xff]  }
   0xb   :  { %4328 = vmatpush3.bf16.msra.mxu1 %v5052_v0  ;;  %4331 = vmatprep.mubr.msk.bf16.mxu1 %vm57_vm0, %v4827_v5  ;;  %v4854_v42 = vld [vmem:[%s5779_s2 + $0xf0] sm:$0xff]   ;;  %v4853_v43 = vld [vmem:[%s5779_s2 + $0xa0] sm:$0xff]   ;;  %v4855_v44 = vld [vmem:[%s5779_s2 + $0x98] sm:$0xff]  }
   0xc   :  { %4329 = vmatprep.subr.bf16.mxu1 %v5057_v1  ;;  %4340 = vmatpush3.bf16.msra.mxu0 %v4835_v7  ;;  %v4856_v45 = vld [vmem:[%s5779_s2 + $0xe8] sm:$0xff]   ;;  %v4857_v46 = vld [vmem:[%s5779_s2 + $0x90] sm:$0xff]   ;;  %v4858_v47 = vld [vmem:[%s5779_s2 + $0xe0] sm:$0xff]  }
   0xd   :  { %4341 = vmatprep.subr.bf16.mxu0 %v4837_v10  ;;  %v4859_v48 = vld [vmem:[%s5779_s2 + $0x88] sm:$0xff]   ;;  %v4860_v49 = vld [vmem:[%s5779_s2 + $0xd8] sm:$0xff]   ;;  %v4861_v50 = vld [vmem:[%s5779_s2 + $0x80] sm:$0xff]  }
   0xe   :  { %v4862_v51 = vld [vmem:[%s5779_s2 + $0xd0] sm:$0xff]   ;;  %v4863_v52 = vld [vmem:[%s5779_s2 + $0xc8] sm:$0xff]   ;;  %v4864_v53 = vld [vmem:[%s5779_s2 + $0xc0] sm:$0xff]  }
   0xf   :  { %4330 = vmatpush3.bf16.msra.mxu1 %v5057_v1 }
  0x10   :  { %4355 = vmatprep.subr.bf16.mxu1 %v4829_v9  ;;  %4342 = vmatpush3.bf16.msra.mxu0 %v4837_v10 }
  0x11   :  { %4343 = vmatprep.subr.bf16.mxu0 %v4839_v16 }
  0x12   :  { %4332 = vmatmul.mubr.msk.bf16.vlgmr.msra.gmra.mxu1 %vm57_vm0, %v4828_v8 }
  0x13   :  { %4356 = vmatpush3.bf16.msra.mxu1 %v4829_v9  ;;  %v4865_v9 = vld [vmem:[%s5778_s1 + $0x40] sm:$0xff]  }
  0x14   :  { %4357 = vmatprep.subr.bf16.mxu1 %v4830_v11  ;;  %4344 = vmatpush3.bf16.msra.mxu0 %v4839_v16 }
  0x15   :  { %4345 = vmatprep.subr.bf16.mxu0 %v4841_v18 }
  0x17   :  { %4358 = vmatpush3.bf16.msra.mxu1 %v4830_v11 }
  0x18   :  { %4359 = vmatprep.subr.bf16.mxu1 %v4832_v12  ;;  %4346 = vmatpush3.bf16.msra.mxu0 %v4841_v18 }
  0x19   :  { %4347 = vmatprep.subr.bf16.mxu0 %v4843_v20 }
  0x1b   :  { %4360 = vmatpush3.bf16.msra.mxu1 %v4832_v12 }
  0x1c   :  { %4361 = vmatprep.subr.bf16.mxu1 %v4834_v13  ;;  %4348 = vmatpush3.bf16.msra.mxu0 %v4843_v20  ;;  %v4870_v20 = vld [vmem:[%s5779_s2 + $0x130] sm:$0xff]  }
  0x1d   :  { %4349 = vmatprep.subr.bf16.mxu0 %v4844_v21 }
  0x1f   :  { %4362 = vmatpush3.bf16.msra.mxu1 %v4834_v13 }
  0x20   :  { %4363 = vmatprep.subr.bf16.mxu1 %v4836_v14  ;;  %4350 = vmatpush3.bf16.msra.mxu0 %v4844_v21  ;;  %v4872_v21 = vld [vmem:[%s5779_s2 + $0x178] sm:$0xff]  }
  0x21   :  { %4403 = vmatprep.subr.bf16.mxu0 %v5052_v0 }
  0x23   :  { %4364 = vmatpush3.bf16.msra.mxu1 %v4836_v14  ;;  %v4869_v14 = vld [vmem:[%s5779_s2 + $0x138] sm:$0xff]  }
  0x24   :  { %4365 = vmatprep.subr.bf16.mxu1 %v4838_v15 }
  0x27   :  { %4366 = vmatpush3.bf16.msra.mxu1 %v4838_v15 }
  0x28   :  { %4367 = vmatprep.subr.bf16.mxu1 %v4840_v17 }
  0x2b   :  { %4368 = vmatpush3.bf16.msra.mxu1 %v4840_v17  ;;  %v4866_v17 = vld [vmem:[%s5778_s1 + $0x48] sm:$0xff]  }
  0x2c   :  { %4369 = vmatprep.subr.bf16.mxu1 %v4842_v19 }
  0x2f   :  { %4370 = vmatpush3.bf16.msra.mxu1 %v4842_v19  ;;  %v4867_v19 = vld [vmem:[%s5778_s1 + $0x50] sm:$0xff]  }
  0x30   :  { %4375 = vmatprep.subr.bf16.mxu1 %v5052_v0 }
  0xca   :  { %v4325_v22 = vpop.f32.mrf.mxu1 }
  0xcc   :  { %v98_v23 = vpop.f32.mrf.mxu1 }
  0xce   :  { %v4326_v24 = vpop.f32.mrf.mxu1 }
  0xcf   :  { %v114_v28 = vpack.c.bf16 %v4326_v24, %v4325_v22  ;;  %v4871_v22 = vld [vmem:[%s5779_s2 + $0x128] sm:$0xff]   ;;  %v4874_v24 = vld [vmem:[%s5779_s2 + $0x170] sm:$0xff]  }
  0xd0   :  { %v101_v25 = vpop.f32.mrf.mxu1 }
  0xd1   :  { %v113_v26 = vpack.c.bf16 %v101_v25, %v98_v23  ;;  %v4868_v23 = vld [vmem:[%s5778_s1 + $0x58] sm:$0xff]   ;;  %v4873_v25 = vld [vmem:[%s5779_s2 + $0x120] sm:$0xff]  }
  0xd2   :  { %v4333_v29 = vpop.f32.mrf.mxu1 }
  0xd3   :  { %4371 = vmatprep.mubr.bf16.mxu1 %v113_v26  ;;  %v4875_v26 = vld [vmem:[%s5779_s2 + $0x118] sm:$0xff]  }
  0xd4   :  { %v186_v30 = vpop.f32.mrf.mxu1  ;;  %4372 = vmatmul.mubr.bf16.vlgmr.msra.gmra.mxu1 %v114_v28  ;;  %v4877_v28 = vld [vmem:[%s5779_s2 + $0x110] sm:$0xff]  }
  0xd5   :  { %4376 = vmatpush3.bf16.msra.mxu1 %v5052_v0  ;;  %4379 = vmatprep.mubr.msk.bf16.mxu1 %vm57_vm0, %v4845_v27  ;;  %v4876_v27 = vld [vmem:[%s5779_s2 + $0x168] sm:$0xff]  }
  0xd6   :  { %v4334_v31 = vpop.f32.mrf.mxu1  ;;  %4377 = vmatprep.subr.bf16.mxu1 %v5057_v1 }
  0xd7   :  { %v202_v33 = vpack.c.bf16 %v4334_v31, %v4333_v29  ;;  %v4878_v29 = vld [vmem:[%s5779_s2 + $0x160] sm:$0xff]   ;;  %v4880_v31 = vld [vmem:[%s5779_s2 + $0x158] sm:$0xff]  }
  0xd8   :  { %v189_v34 = vpop.f32.mrf.mxu1 }
  0xd9   :  { %4378 = vmatpush3.bf16.msra.mxu1 %v5057_v1  ;;  %v201_v36 = vpack.c.bf16 %v189_v34, %v186_v30  ;;  %v4879_v30 = vld [vmem:[%s5779_s2 + $0x108] sm:$0xff]  }
  0xda   :  { %4383 = vmatprep.subr.bf16.mxu1 %v4849_v32  ;;  %v4883_v34 = vld [vmem:[%s5779_s2 + $0x148] sm:$0xff]  }
  0xdb   :  { %4351 = vmatprep.mubr.bf16.mxu0 %v201_v36 }
  0xdc   :  { %4352 = vmatmul.mubr.bf16.vlgmr.msra.gmra.mxu0 %v202_v33  ;;  %4380 = vmatmul.mubr.msk.bf16.vlgmr.msra.gmra.mxu1 %vm57_vm0, %v4846_v35  ;;  %v4882_v33 = vld [vmem:[%s5779_s2 + $0x150] sm:$0xff]   ;;  %v4884_v35 = vld [vmem:[%s5779_s2 + $0x140] sm:$0xff]  }
  0xdd   :  { %4404 = vmatpush3.bf16.msra.mxu0 %v5052_v0  ;;  %4407 = vmatprep.mubr.msk.bf16.mxu0 %vm57_vm0, %v4847_v37 }
  0xde   :  { %4405 = vmatprep.subr.bf16.mxu0 %v5057_v1  ;;  %4384 = vmatpush3.bf16.msra.mxu1 %v4849_v32  ;;  %v4881_v32 = vld [vmem:[%s5779_s2 + $0x100] sm:$0xff]  }
  0xdf   :  { %4385 = vmatprep.subr.bf16.mxu1 %v4850_v38 }
  0xe1   :  { %4406 = vmatpush3.bf16.msra.mxu0 %v5057_v1 }
  0xe2   :  { %4386 = vmatpush3.bf16.msra.mxu1 %v4850_v38  ;;  %4411 = vmatprep.subr.bf16.mxu0 %v4852_v39 }
  0xe3   :  { %4387 = vmatprep.subr.bf16.mxu1 %v4851_v40 }
  0xe4   :  { %4408 = vmatmul.mubr.msk.bf16.vlgmr.msra.gmra.mxu0 %vm57_vm0, %v4848_v41 }
  0xe5   :  { %4412 = vmatpush3.bf16.msra.mxu0 %v4852_v39 }
  0xe6   :  { %4388 = vmatpush3.bf16.msra.mxu1 %v4851_v40  ;;  %4413 = vmatprep.subr.bf16.mxu0 %v4854_v42 }
  0xe7   :  { %4389 = vmatprep.subr.bf16.mxu1 %v4853_v43 }
  0xe9   :  { %4414 = vmatpush3.bf16.msra.mxu0 %v4854_v42 }
  0xea   :  { %4390 = vmatpush3.bf16.msra.mxu1 %v4853_v43  ;;  %4415 = vmatprep.subr.bf16.mxu0 %v4856_v45 }
  0xeb   :  { %4391 = vmatprep.subr.bf16.mxu1 %v4855_v44 }
  0xed   :  { %4416 = vmatpush3.bf16.msra.mxu0 %v4856_v45 }
  0xee   :  { %4392 = vmatpush3.bf16.msra.mxu1 %v4855_v44  ;;  %4417 = vmatprep.subr.bf16.mxu0 %v4858_v47 }
  0xef   :  { %4393 = vmatprep.subr.bf16.mxu1 %v4857_v46 }
  0xf1   :  { %4418 = vmatpush3.bf16.msra.mxu0 %v4858_v47 }
  0xf2   :  { %4394 = vmatpush3.bf16.msra.mxu1 %v4857_v46  ;;  %4419 = vmatprep.subr.bf16.mxu0 %v4860_v49 }
  0xf3   :  { %4395 = vmatprep.subr.bf16.mxu1 %v4859_v48 }
  0xf5   :  { %4420 = vmatpush3.bf16.msra.mxu0 %v4860_v49 }
  0xf6   :  { %4396 = vmatpush3.bf16.msra.mxu1 %v4859_v48  ;;  %4421 = vmatprep.subr.bf16.mxu0 %v4862_v51 }
  0xf7   :  { %4397 = vmatprep.subr.bf16.mxu1 %v4861_v50 }
  0xf9   :  { %4422 = vmatpush3.bf16.msra.mxu0 %v4862_v51 }
  0xfa   :  { %4398 = vmatpush3.bf16.msra.mxu1 %v4861_v50  ;;  %4423 = vmatprep.subr.bf16.mxu0 %v4863_v52 }
  0xfb   :  { %4431 = vmatprep.subr.bf16.mxu1 %v5052_v0 }
  0xfd   :  { %4424 = vmatpush3.bf16.msra.mxu0 %v4863_v52 }
  0xfe   :  { %4425 = vmatprep.subr.bf16.mxu0 %v4864_v53 }
 0x101   :  { %4426 = vmatpush3.bf16.msra.mxu0 %v4864_v53 }
 0x102   :  { %4459 = vmatprep.subr.bf16.mxu0 %v5052_v0 }
 0x194   :  { %v4373_v54 = vpop.f32.mrf.mxu1 }
 0x196   :  { %v399_v55 = vpop.f32.mrf.mxu1 }
 0x198   :  { %v4374_v56 = vpop.f32.mrf.mxu1 }
 0x19a   :  { %v402_v57 = vpop.f32.mrf.mxu1 }
 0x19c   :  { %v4353_v58 = vpop.f32.mrf.mxu0  ;;  %v4381_v59 = vpop.f32.mrf.mxu1 }
 0x19d   :  { %v5205_v60 = vadd.f32 %v4373_v54, %v4353_v58 }
 0x19e   :  { %v302_v61 = vpop.f32.mrf.mxu0  ;;  %v469_v62 = vpop.f32.mrf.mxu1 }
 0x19f   :  { %v5207_v63 = vadd.f32 %v399_v55, %v302_v61 }
 0x1a0   :  { %v4354_v2 = vpop.f32.mrf.mxu0  ;;  %v4382_v3 = vpop.f32.mrf.mxu1 }
 0x1a1   :  { %v5209_v4 = vadd.f32 %v4374_v56, %v4354_v2  ;;  %v485_v10 = vpack.c.bf16 %v4382_v3, %v4381_v59  ;;  %v4886_v3 = vld [vmem:[%s5778_s1 + $0x68] sm:$0xff]  }
 0x1a2   :  { %v305_v5 = vpop.f32.mrf.mxu0  ;;  %v472_v6 = vpop.f32.mrf.mxu1 }
 0x1a3   :  { %v5211_v7 = vadd.f32 %v402_v57, %v305_v5  ;;  %v484_v8 = vpack.c.bf16 %v472_v6, %v469_v62  ;;  %v4885_v57 = vld [vmem:[%s5778_s1 + $0x60] sm:$0xff]   ;;  %v4889_v62 = vld [vmem:[%s5779_s2 + $0x1b8] sm:$0xff]   ;;  %v4887_v5 = vld [vmem:[%s5778_s1 + $0x70] sm:$0xff]  }
 0x1a4   :  { %v4409_v11 = vpop.f32.mrf.mxu0  ;;  %v4890_v6 = vld [vmem:[%s5779_s2 + $0x1b0] sm:$0xff]  }
 0x1a5   :  { %4399 = vmatprep.mubr.bf16.mxu1 %v484_v8  ;;  %v4891_v8 = vld [vmem:[%s5779_s2 + $0x1a8] sm:$0xff]  }
 0x1a6   :  { %4400 = vmatmul.mubr.bf16.vlgmr.msra.gmra.mxu1 %v485_v10  ;;  %v659_v12 = vpop.f32.mrf.mxu0  ;;  %v4894_v10 = vld [vmem:[%s5779_s2 + $0x1f0] sm:$0xff]  }
 0x1a7   :  { %4432 = vmatpush3.bf16.msra.mxu1 %v5052_v0  ;;  %4435 = vmatprep.mubr.msk.bf16.mxu1 %vm57_vm0, %v4865_v9  ;;  %v4888_v9 = vld [vmem:[%s5778_s1 + $0x78] sm:$0xff]  }
 0x1a8   :  { %v4410_v13 = vpop.f32.mrf.mxu0  ;;  %4433 = vmatprep.subr.bf16.mxu1 %v5057_v1 }
 0x1a9   :  { %v675_v15 = vpack.c.bf16 %v4410_v13, %v4409_v11  ;;  %v4893_v11 = vld [vmem:[%s5779_s2 + $0x1a0] sm:$0xff]   ;;  %v4896_v13 = vld [vmem:[%s5779_s2 + $0x1e8] sm:$0xff]  }
 0x1aa   :  { %v662_v16 = vpop.f32.mrf.mxu0 }
 0x1ab   :  { %v674_v18 = vpack.c.bf16 %v662_v16, %v659_v12  ;;  %4434 = vmatpush3.bf16.msra.mxu1 %v5057_v1  ;;  %v4895_v12 = vld [vmem:[%s5779_s2 + $0x198] sm:$0xff]   ;;  %v4899_v16 = vld [vmem:[%s5779_s2 + $0x188] sm:$0xff]  }
 0x1ac   :  { %4439 = vmatprep.subr.bf16.mxu1 %v4869_v14 }
 0x1ad   :  { %4427 = vmatprep.mubr.bf16.mxu0 %v674_v18  ;;  %v4901_v18 = vld [vmem:[%s5779_s2 + $0x180] sm:$0xff]  }
 0x1ae   :  { %4428 = vmatmul.mubr.bf16.vlgmr.msra.gmra.mxu0 %v675_v15  ;;  %4436 = vmatmul.mubr.msk.bf16.vlgmr.msra.gmra.mxu1 %vm57_vm0, %v4866_v17  ;;  %v4898_v15 = vld [vmem:[%s5779_s2 + $0x1e0] sm:$0xff]   ;;  %v4900_v17 = vld [vmem:[%s5779_s2 + $0x1d8] sm:$0xff]  }
 0x1af   :  { %4460 = vmatpush3.bf16.msra.mxu0 %v5052_v0  ;;  %4463 = vmatprep.mubr.msk.bf16.mxu0 %vm57_vm0, %v4867_v19  ;;  %v4902_v19 = vld [vmem:[%s5779_s2 + $0x1d0] sm:$0xff]  }
 0x1b0   :  { %4461 = vmatprep.subr.bf16.mxu0 %v5057_v1  ;;  %4440 = vmatpush3.bf16.msra.mxu1 %v4869_v14  ;;  %v4897_v14 = vld [vmem:[%s5779_s2 + $0x190] sm:$0xff]  }
 0x1b1   :  { %4441 = vmatprep.subr.bf16.mxu1 %v4870_v20 }
 0x1b3   :  { %4462 = vmatpush3.bf16.msra.mxu0 %v5057_v1 }
 0x1b4   :  { %4442 = vmatpush3.bf16.msra.mxu1 %v4870_v20  ;;  %4467 = vmatprep.subr.bf16.mxu0 %v4872_v21  ;;  %v4903_v20 = vld [vmem:[%s5779_s2 + $0x1c8] sm:$0xff]  }
 0x1b5   :  { %4443 = vmatprep.subr.bf16.mxu1 %v4871_v22 }
 0x1b6   :  { %4464 = vmatmul.mubr.msk.bf16.vlgmr.msra.gmra.mxu0 %vm57_vm0, %v4868_v23 }
 0x1b7   :  { %4468 = vmatpush3.bf16.msra.mxu0 %v4872_v21  ;;  %v4904_v21 = vld [vmem:[%s5779_s2 + $0x1c0] sm:$0xff]  }
 0x1b8   :  { %4444 = vmatpush3.bf16.msra.mxu1 %v4871_v22  ;;  %4469 = vmatprep.subr.bf16.mxu0 %v4874_v24 }
 0x1b9   :  { %4445 = vmatprep.subr.bf16.mxu1 %v4873_v25 }
 0x1bb   :  { %4470 = vmatpush3.bf16.msra.mxu0 %v4874_v24 }
 0x1bc   :  { %4446 = vmatpush3.bf16.msra.mxu1 %v4873_v25  ;;  %4471 = vmatprep.subr.bf16.mxu0 %v4876_v27 }
 0x1bd   :  { %4447 = vmatprep.subr.bf16.mxu1 %v4875_v26 }
 0x1bf   :  { %4472 = vmatpush3.bf16.msra.mxu0 %v4876_v27 }
 0x1c0   :  { %4448 = vmatpush3.bf16.msra.mxu1 %v4875_v26  ;;  %4473 = vmatprep.subr.bf16.mxu0 %v4878_v29 }
 0x1c1   :  { %4449 = vmatprep.subr.bf16.mxu1 %v4877_v28 }
 0x1c3   :  { %4474 = vmatpush3.bf16.msra.mxu0 %v4878_v29 }
 0x1c4   :  { %4450 = vmatpush3.bf16.msra.mxu1 %v4877_v28  ;;  %4475 = vmatprep.subr.bf16.mxu0 %v4880_v31 }
 0x1c5   :  { %4451 = vmatprep.subr.bf16.mxu1 %v4879_v30 }
 0x1c7   :  { %4476 = vmatpush3.bf16.msra.mxu0 %v4880_v31 }
 0x1c8   :  { %4452 = vmatpush3.bf16.msra.mxu1 %v4879_v30  ;;  %4477 = vmatprep.subr.bf16.mxu0 %v4882_v33 }
 0x1c9   :  { %4453 = vmatprep.subr.bf16.mxu1 %v4881_v32 }
 0x1cb   :  { %4478 = vmatpush3.bf16.msra.mxu0 %v4882_v33 }
 0x1cc   :  { %4454 = vmatpush3.bf16.msra.mxu1 %v4881_v32  ;;  %4479 = vmatprep.subr.bf16.mxu0 %v4883_v34 }
 0x1cd   :  { %4487 = vmatprep.subr.bf16.mxu1 %v5052_v0 }
 0x1cf   :  { %4480 = vmatpush3.bf16.msra.mxu0 %v4883_v34 }
 0x1d0   :  { %4481 = vmatprep.subr.bf16.mxu0 %v4884_v35 }
 0x1d3   :  { %4482 = vmatpush3.bf16.msra.mxu0 %v4884_v35 }
 0x1d4   :  { %4515 = vmatprep.subr.bf16.mxu0 %v5052_v0 }
 0x266   :  { %v4401_v36 = vpop.f32.mrf.mxu1 }
 0x267   :  { %v602_v37 = vadd.f32 %v4401_v36, %v5205_v60 }
 0x268   :  { %v585_v38 = vpop.f32.mrf.mxu1 }
 0x269   :  { %v600_v39 = vadd.f32 %v585_v38, %v5207_v63 }
 0x26a   :  { %v4402_v40 = vpop.f32.mrf.mxu1 }
 0x26b   :  { %v603_v41 = vadd.f32 %v4402_v40, %v5209_v4 }
 0x26c   :  { %v588_v42 = vpop.f32.mrf.mxu1 }
 0x26d   :  { %v601_v43 = vadd.f32 %v588_v42, %v5211_v7  ;;  %v4892_v7 = vld [vmem:[%s5779_s2 + $0x1f8] sm:$0xff]  }
 0x26e   :  { %v4429_v44 = vpop.f32.mrf.mxu0  ;;  %v4437_v45 = vpop.f32.mrf.mxu1 }
 0x26f   :  { %v5289_v46 = vadd.f32 %v4429_v44, %v602_v37 }
 0x270   :  { %v775_v47 = vpop.f32.mrf.mxu0  ;;  %v849_v48 = vpop.f32.mrf.mxu1 }
 0x271   :  { %v5291_v49 = vadd.f32 %v775_v47, %v600_v39 }
 0x272   :  { %v4430_v50 = vpop.f32.mrf.mxu0  ;;  %v4438_v51 = vpop.f32.mrf.mxu1 }
 0x273   :  { %v5293_v52 = vadd.f32 %v4430_v50, %v603_v41  ;;  %v865_v58 = vpack.c.bf16 %v4438_v51, %v4437_v45  ;;  %v4906_v51 = vld [vmem:[%s5778_s1 + $0x88] sm:$0xff]  }
 0x274   :  { %v778_v53 = vpop.f32.mrf.mxu0  ;;  %v852_v54 = vpop.f32.mrf.mxu1 }
 0x275   :  { %v5295_v55 = vadd.f32 %v778_v53, %v601_v43  ;;  %v864_v56 = vpack.c.bf16 %v852_v54, %v849_v48  ;;  %v4905_v43 = vld [vmem:[%s5778_s1 + $0x80] sm:$0xff]   ;;  %v4907_v48 = vld [vmem:[%s5779_s2 + $0x238] sm:$0xff]   ;;  %v4909_v53 = vld [vmem:[%s5779_s2 + $0x228] sm:$0xff]  }
 0x276   :  { %v4465_v59 = vpop.f32.mrf.mxu0  ;;  %v4911_v54 = vld [vmem:[%s5779_s2 + $0x218] sm:$0xff]  }
 0x277   :  { %4455 = vmatprep.mubr.bf16.mxu1 %v864_v56  ;;  %v4913_v56 = vld [vmem:[%s5779_s2 + $0x208] sm:$0xff]  }
 0x278   :  { %4456 = vmatmul.mubr.bf16.vlgmr.msra.gmra.mxu1 %v865_v58  ;;  %v1039_v60 = vpop.f32.mrf.mxu0  ;;  %v4915_v58 = vld [vmem:[%s5780_s5 + $0x38] sm:$0xff]  }
 0x279   :  { %4488 = vmatpush3.bf16.msra.mxu1 %v5052_v0  ;;  %4491 = vmatprep.mubr.msk.bf16.mxu1 %vm57_vm0, %v4885_v57  ;;  %v4914_v57 = vld [vmem:[%s5779_s2 + $0x200] sm:$0xff]  }
 0x27a   :  { %v4466_v61 = vpop.f32.mrf.mxu0  ;;  %4489 = vmatprep.subr.bf16.mxu1 %v5057_v1 }
 0x27b   :  { %v1055_v63 = vpack.c.bf16 %v4466_v61, %v4465_v59 }
 0x27c   :  { %v1042_v2 = vpop.f32.mrf.mxu0 }
 0x27d   :  { %v1054_v4 = vpack.c.bf16 %v1042_v2, %v1039_v60  ;;  %4490 = vmatpush3.bf16.msra.mxu1 %v5057_v1 }
 0x27e   :  { %4495 = vmatprep.subr.bf16.mxu1 %v4889_v62 }
 0x27f   :  { %4483 = vmatprep.mubr.bf16.mxu0 %v1054_v4 }
 0x280   :  { %4484 = vmatmul.mubr.bf16.vlgmr.msra.gmra.mxu0 %v1055_v63  ;;  %4492 = vmatmul.mubr.msk.bf16.vlgmr.msra.gmra.mxu1 %vm57_vm0, %v4886_v3 }
 0x281   :  { %4516 = vmatpush3.bf16.msra.mxu0 %v5052_v0  ;;  %4519 = vmatprep.mubr.msk.bf16.mxu0 %vm57_vm0, %v4887_v5 }
 0x282   :  { %4517 = vmatprep.subr.bf16.mxu0 %v5057_v1  ;;  %4496 = vmatpush3.bf16.msra.mxu1 %v4889_v62 }
 0x283   :  { %4497 = vmatprep.subr.bf16.mxu1 %v4890_v6 }
 0x285   :  { %4518 = vmatpush3.bf16.msra.mxu0 %v5057_v1 }
 0x286   :  { %4498 = vmatpush3.bf16.msra.mxu1 %v4890_v6  ;;  %4523 = vmatprep.subr.bf16.mxu0 %v4892_v7 }
 0x287   :  { %4499 = vmatprep.subr.bf16.mxu1 %v4891_v8 }
 0x288   :  { %4520 = vmatmul.mubr.msk.bf16.vlgmr.msra.gmra.mxu0 %vm57_vm0, %v4888_v9 }
 0x289   :  { %4524 = vmatpush3.bf16.msra.mxu0 %v4892_v7 }
 0x28a   :  { %4500 = vmatpush3.bf16.msra.mxu1 %v4891_v8  ;;  %4525 = vmatprep.subr.bf16.mxu0 %v4894_v10 }
 0x28b   :  { %4501 = vmatprep.subr.bf16.mxu1 %v4893_v11 }
 0x28d   :  { %4526 = vmatpush3.bf16.msra.mxu0 %v4894_v10 }
 0x28e   :  { %4502 = vmatpush3.bf16.msra.mxu1 %v4893_v11  ;;  %4527 = vmatprep.subr.bf16.mxu0 %v4896_v13  ;;  %v4916_v11 = vld [vmem:[%s5780_s5 + $0x30] sm:$0xff]  }
 0x28f   :  { %4503 = vmatprep.subr.bf16.mxu1 %v4895_v12 }
 0x291   :  { %4528 = vmatpush3.bf16.msra.mxu0 %v4896_v13  ;;  %v4918_v13 = vld [vmem:[%s5780_s5 + $0x20] sm:$0xff]  }
 0x292   :  { %4504 = vmatpush3.bf16.msra.mxu1 %v4895_v12  ;;  %4529 = vmatprep.subr.bf16.mxu0 %v4898_v15  ;;  %v4917_v12 = vld [vmem:[%s5780_s5 + $0x28] sm:$0xff]  }
 0x293   :  { %4505 = vmatprep.subr.bf16.mxu1 %v4897_v14 }
 0x295   :  { %4530 = vmatpush3.bf16.msra.mxu0 %v4898_v15  ;;  %v4920_v15 = vld [vmem:[%s5780_s5 + $0x10] sm:$0xff]  }
 0x296   :  { %4506 = vmatpush3.bf16.msra.mxu1 %v4897_v14  ;;  %4531 = vmatprep.subr.bf16.mxu0 %v4900_v17  ;;  %v4919_v14 = vld [vmem:[%s5780_s5 + $0x18] sm:$0xff]  }
 0x297   :  { %4507 = vmatprep.subr.bf16.mxu1 %v4899_v16 }
 0x299   :  { %4532 = vmatpush3.bf16.msra.mxu0 %v4900_v17  ;;  %v4922_v17 = vld [vmem:[%s5780_s5] sm:$0xff]  }
 0x29a   :  { %4508 = vmatpush3.bf16.msra.mxu1 %v4899_v16  ;;  %4533 = vmatprep.subr.bf16.mxu0 %v4902_v19  ;;  %v4921_v16 = vld [vmem:[%s5780_s5 + $0x8] sm:$0xff]  }
 0x29b   :  { %4509 = vmatprep.subr.bf16.mxu1 %v4901_v18 }
 0x29d   :  { %4534 = vmatpush3.bf16.msra.mxu0 %v4902_v19 }
 0x29e   :  { %4510 = vmatpush3.bf16.msra.mxu1 %v4901_v18  ;;  %4535 = vmatprep.subr.bf16.mxu0 %v4903_v20  ;;  %v4923_v18 = vld [vmem:[%s5781_s4] sm:$0xff]  }
 0x29f   :  { %4543 = vmatprep.subr.bf16.mxu1 %v5052_v0 }
 0x2a1   :  { %4536 = vmatpush3.bf16.msra.mxu0 %v4903_v20 }
 0x2a2   :  { %4537 = vmatprep.subr.bf16.mxu0 %v4904_v21 }
 0x2a5   :  { %4538 = vmatpush3.bf16.msra.mxu0 %v4904_v21 }
 0x338   :  { %v4457_v22 = vpop.f32.mrf.mxu1 }
 0x339   :  { %v982_v23 = vadd.f32 %v4457_v22, %v5289_v46 }
 0x33a   :  { %v965_v24 = vpop.f32.mrf.mxu1 }
 0x33b   :  { %v980_v25 = vadd.f32 %v965_v24, %v5291_v49 }
 0x33c   :  { %v4458_v26 = vpop.f32.mrf.mxu1 }
 0x33d   :  { %v983_v27 = vadd.f32 %v4458_v26, %v5293_v52 }
 0x33e   :  { %v968_v28 = vpop.f32.mrf.mxu1 }
 0x33f   :  { %v981_v29 = vadd.f32 %v968_v28, %v5295_v55  ;;  %v4912_v55 = vld [vmem:[%s5779_s2 + $0x210] sm:$0xff]  }
 0x340   :  { %v4485_v30 = vpop.f32.mrf.mxu0  ;;  %v4493_v31 = vpop.f32.mrf.mxu1 }
 0x341   :  { %v1172_v32 = vadd.f32 %v4485_v30, %v982_v23 }
 0x342   :  { %v1155_v33 = vpop.f32.mrf.mxu0  ;;  %v1229_v34 = vpop.f32.mrf.mxu1 }
 0x343   :  { %v1170_v35 = vadd.f32 %v1155_v33, %v980_v25 }
 0x344   :  { %v4486_v36 = vpop.f32.mrf.mxu0  ;;  %v4494_v37 = vpop.f32.mrf.mxu1 }
 0x345   :  { %v1173_v38 = vadd.f32 %v4486_v36, %v983_v27  ;;  %v1245_v44 = vpack.c.bf16 %v4494_v37, %v4493_v31  ;;  %v3778_v27 = vld [vmem:[%s5782_s3] ss:$0 sm:$0xff] }
 0x346   :  { %v1158_v39 = vpop.f32.mrf.mxu0  ;;  %v1232_v40 = vpop.f32.mrf.mxu1 }
 0x347   :  { %v1171_v41 = vadd.f32 %v1158_v39, %v981_v29  ;;  %v1244_v42 = vpack.c.bf16 %v1232_v40, %v1229_v34 }
 0x348   :  { %v4521_v45 = vpop.f32.mrf.mxu0 }
 0x349   :  { %4511 = vmatprep.mubr.bf16.mxu1 %v1244_v42 }
 0x34a   :  { %4512 = vmatmul.mubr.bf16.vlgmr.msra.gmra.mxu1 %v1245_v44  ;;  %v1419_v46 = vpop.f32.mrf.mxu0 }
 0x34b   :  { %4544 = vmatpush3.bf16.msra.mxu1 %v5052_v0  ;;  %4547 = vmatprep.mubr.msk.bf16.mxu1 %vm57_vm0, %v4905_v43  ;;  %v4908_v0 = vld [vmem:[%s5779_s2 + $0x230] sm:$0xff]  }
 0x34c   :  { %v4522_v47 = vpop.f32.mrf.mxu0  ;;  %4545 = vmatprep.subr.bf16.mxu1 %v5057_v1 }
 0x34d   :  { %v1435_v49 = vpack.c.bf16 %v4522_v47, %v4521_v45  ;;  %v4925_v47 = vld [vmem:[%s5781_s4 + $0x10] sm:$0xff]  }
 0x34e   :  { %v1422_v50 = vpop.f32.mrf.mxu0 }
 0x34f   :  { %v1434_v52 = vpack.c.bf16 %v1422_v50, %v1419_v46  ;;  %4546 = vmatpush3.bf16.msra.mxu1 %v5057_v1  ;;  %v4910_v1 = vld [vmem:[%s5779_s2 + $0x220] sm:$0xff]   ;;  %v4924_v46 = vld [vmem:[%s5781_s4 + $0x8] sm:$0xff]   ;;  %v4928_v50 = vld [vmem:[%s5780_s5 + $0x70] sm:$0xff]  }
 0x350   :  { %4551 = vmatprep.subr.bf16.mxu1 %v4907_v48 }
 0x351   :  { %4539 = vmatprep.mubr.bf16.mxu0 %v1434_v52  ;;  %v4930_v52 = vld [vmem:[%s5780_s5 + $0x60] sm:$0xff]  }
 0x352   :  { %4540 = vmatmul.mubr.bf16.vlgmr.msra.gmra.mxu0 %v1435_v49  ;;  %4548 = vmatmul.mubr.msk.bf16.vlgmr.msra.gmra.mxu1 %vm57_vm0, %v4906_v51  ;;  %v4926_v49 = vld [vmem:[%s5781_s4 + $0x18] sm:$0xff]   ;;  %v4929_v51 = vld [vmem:[%s5780_s5 + $0x68] sm:$0xff]  }
 0x353   :  { %4552 = vmatpush3.bf16.msra.mxu1 %v4907_v48  ;;  %4575 = vmatprep.mubr.msk.bf16.mxu0 %vm57_vm0, %v4923_v18  ;;  %v4927_v48 = vld [vmem:[%s5780_s5 + $0x78] sm:$0xff]   ;;  %v4948_v18 = vld [vmem:[%s5780_s5 + $0xd0] sm:$0xff]  }
 0x354   :  { %4553 = vmatprep.subr.bf16.mxu1 %v4908_v0 }
 0x357   :  { %4554 = vmatpush3.bf16.msra.mxu1 %v4908_v0  ;;  %v4931_v0 = vld [vmem:[%s5780_s5 + $0x58] sm:$0xff]  }
 0x358   :  { %4555 = vmatprep.subr.bf16.mxu1 %v4909_v53 }
 0x35b   :  { %4556 = vmatpush3.bf16.msra.mxu1 %v4909_v53  ;;  %v4932_v53 = vld [vmem:[%s5780_s5 + $0x50] sm:$0xff]  }
 0x35c   :  { %4557 = vmatprep.subr.bf16.mxu1 %v4910_v1 }
 0x35f   :  { %4558 = vmatpush3.bf16.msra.mxu1 %v4910_v1  ;;  %v4933_v1 = vld [vmem:[%s5780_s5 + $0x48] sm:$0xff]  }
 0x360   :  { %4559 = vmatprep.subr.bf16.mxu1 %v4911_v54 }
 0x363   :  { %4560 = vmatpush3.bf16.msra.mxu1 %v4911_v54  ;;  %v4934_v54 = vld [vmem:[%s5780_s5 + $0x40] sm:$0xff]  }
 0x364   :  { %4561 = vmatprep.subr.bf16.mxu1 %v4912_v55 }
 0x367   :  { %4562 = vmatpush3.bf16.msra.mxu1 %v4912_v55 }
 0x368   :  { %4563 = vmatprep.subr.bf16.mxu1 %v4913_v56 }
 0x36b   :  { %4564 = vmatpush3.bf16.msra.mxu1 %v4913_v56 }
 0x36c   :  { %4565 = vmatprep.subr.bf16.mxu1 %v4914_v57 }
 0x36f   :  { %4566 = vmatpush3.bf16.msra.mxu1 %v4914_v57 }
 0x370   :  { %4607 = vmatprep.subr.bf16.mxu1 %v4915_v58 }
 0x40a   :  { %v4513_v59 = vpop.f32.mrf.mxu1 }
 0x40b   :  { %v1362_v60 = vadd.f32 %v4513_v59, %v1172_v32 }
 0x40c   :  { %v1345_v61 = vpop.f32.mrf.mxu1 }
 0x40d   :  { %v1360_v62 = vadd.f32 %v1345_v61, %v1170_v35 }
 0x40e   :  { %v4514_v63 = vpop.f32.mrf.mxu1 }
 0x40f   :  { %v1363_v2 = vadd.f32 %v4514_v63, %v1173_v38 }
 0x410   :  { %v1348_v3 = vpop.f32.mrf.mxu1 }
 0x411   :  { %v1361_v4 = vadd.f32 %v1348_v3, %v1171_v41  ;;  %v4936_v3 = vld [vmem:[%s5780_s5 + $0xf8] sm:$0xff]  }
 0x412   :  { %v4549_v5 = vpop.f32.mrf.mxu1  ;;  %v4541_v19 = vpop.f32.mrf.mxu0 }
 0x413   :  { %v1552_v22 = vadd.f32 %v4541_v19, %v1362_v60  ;;  %v4935_v60 = vld [vmem:[%s5781_s4 + $0x30] sm:$0xff]   ;;  %v4949_v19 = vld [vmem:[%s5780_s5 + $0x98] sm:$0xff]  }
 0x414   :  { %v1609_v6 = vpop.f32.mrf.mxu1  ;;  %v1535_v20 = vpop.f32.mrf.mxu0 }
 0x415   :  { %v1550_v24 = vadd.f32 %v1535_v20, %v1360_v62  ;;  %v4950_v20 = vld [vmem:[%s5780_s5 + $0xc8] sm:$0xff]  }
 0x416   :  { %v4550_v7 = vpop.f32.mrf.mxu1  ;;  %v4542_v21 = vpop.f32.mrf.mxu0 }
 0x417   :  { %v1625_v10 = vpack.c.bf16 %v4550_v7, %v4549_v5  ;;  %v1553_v29 = vadd.f32 %v4542_v21, %v1363_v2  ;;  %v4937_v5 = vld [vmem:[%s5781_s4 + $0x38] sm:$0xff]   ;;  %v4951_v21 = vld [vmem:[%s5780_s5 + $0x90] sm:$0xff]  }
 0x418   :  { %v1612_v8 = vpop.f32.mrf.mxu1  ;;  %v1538_v26 = vpop.f32.mrf.mxu0 }
 0x419   :  { %v1624_v9 = vpack.c.bf16 %v1612_v8, %v1609_v6  ;;  %v1551_v32 = vadd.f32 %v1538_v26, %v1361_v4  ;;  %v4938_v8 = vld [vmem:[%s5780_s5 + $0xf0] sm:$0xff]  }
 0x41b   :  { %4567 = vmatprep.mubr.bf16.mxu1 %v1624_v9  ;;  %v4939_v9 = vld [vmem:[%s5781_s4 + $0x20] sm:$0xff]  }
 0x41c   :  { %4568 = vmatmul.mubr.bf16.vlgmr.msra.gmra.mxu1 %v1625_v10  ;;  %v4940_v10 = vld [vmem:[%s5780_s5 + $0xb8] sm:$0xff]  }
 0x41d   :  { %4608 = vmatpush3.bf16.msra.mxu1 %v4915_v58 }
 0x41e   :  { %4609 = vmatprep.subr.bf16.mxu1 %v4916_v11 }
 0x421   :  { %4610 = vmatpush3.bf16.msra.mxu1 %v4916_v11  ;;  %v4941_v11 = vld [vmem:[%s5780_s5 + $0xe8] sm:$0xff]  }
 0x422   :  { %4611 = vmatprep.subr.bf16.mxu1 %v4917_v12 }
 0x425   :  { %4612 = vmatpush3.bf16.msra.mxu1 %v4917_v12  ;;  %v4942_v12 = vld [vmem:[%s5781_s4 + $0x28] sm:$0xff]  }
 0x426   :  { %4613 = vmatprep.subr.bf16.mxu1 %v4918_v13 }
 0x429   :  { %4614 = vmatpush3.bf16.msra.mxu1 %v4918_v13  ;;  %v4943_v13 = vld [vmem:[%s5780_s5 + $0xb0] sm:$0xff]  }
 0x42a   :  { %4615 = vmatprep.subr.bf16.mxu1 %v4919_v14 }
 0x42d   :  { %4616 = vmatpush3.bf16.msra.mxu1 %v4919_v14  ;;  %v4944_v14 = vld [vmem:[%s5780_s5 + $0xe0] sm:$0xff]  }
 0x42e   :  { %4617 = vmatprep.subr.bf16.mxu1 %v4920_v15 }
 0x431   :  { %4618 = vmatpush3.bf16.msra.mxu1 %v4920_v15  ;;  %v4945_v15 = vld [vmem:[%s5780_s5 + $0xa8] sm:$0xff]  }
 0x432   :  { %4619 = vmatprep.subr.bf16.mxu1 %v4921_v16 }
 0x435   :  { %4620 = vmatpush3.bf16.msra.mxu1 %v4921_v16  ;;  %v4946_v16 = vld [vmem:[%s5780_s5 + $0xd8] sm:$0xff]  }
 0x436   :  { %4621 = vmatprep.subr.bf16.mxu1 %v4922_v17 }
 0x439   :  { %4622 = vmatpush3.bf16.msra.mxu1 %v4922_v17  ;;  %v4947_v17 = vld [vmem:[%s5780_s5 + $0xa0] sm:$0xff]  }
 0x4dc   :  { %v4569_v23 = vpop.f32.mrf.mxu1 }
 0x4dd   :  { %v1742_v25 = vadd.f32 %v4569_v23, %v1552_v22  ;;  %v4952_v22 = vld [vmem:[%s5780_s5 + $0xc0] sm:$0xff]   ;;  %v4953_v23 = vld [vmem:[%s5780_s5 + $0x88] sm:$0xff]  }
 0x4de   :  { %v1725_v28 = vpop.f32.mrf.mxu1 }
 0x4df   :  { %v1740_v30 = vadd.f32 %v1725_v28, %v1550_v24  ;;  %v1753_v33 = vadd.f32 %v3778_v27, %v1742_v25  ;;  %v4954_v24 = vld [vmem:[%s5780_s5 + $0x80] sm:$0xff]  }
 0x4e0   :  { %v4570_v31 = vpop.f32.mrf.mxu1 }
 0x4e1   :  { %v1743_v34 = vadd.f32 %v4570_v31, %v1553_v29  ;;  %v1751_v36 = vadd.f32 %v3778_v27, %v1740_v30  ;;  %v1757_v39 = vmax.f32 %v1753_v33, 0.0 }
 0x4e2   :  { %v1728_v35 = vpop.f32.mrf.mxu1 }
 0x4e3   :  { %v1754_v37 = vadd.f32 %v3778_v27, %v1743_v34  ;;  %v1741_v38 = vadd.f32 %v1728_v35, %v1551_v32  ;;  %v1755_v42 = vmax.f32 %v1751_v36, 0.0 }
 0x4e5   :  { %v1758_v40 = vmax.f32 %v1754_v37, 0.0  ;;  %v1752_v41 = vadd.f32 %v3778_v27, %v1741_v38 }
 0x4e7   :  { %v5438_v43 = vpack.c.bf16 %v1758_v40, %v1757_v39  ;;  %v1756_v44 = vmax.f32 %v1752_v41, 0.0 }
 0x4e9   :  { %v5440_v45 = vpack.c.bf16 %v1756_v44, %v1755_v42  ;;  %4571 = vmatprep.subr.bf16.mxu0 %v5438_v43  ;;  %4655 = vmatprep.subr.bf16.mxu1 %v5438_v43  ;;  %v4955_v44 = vld [vmem:[%s5781_s4 + $0x50] sm:$0xff]  }
 0x4ea   :  { %4572 = vmatpush3.bf16.msra.mxu0 %v5438_v43 }
 0x4eb   :  { %4573 = vmatprep.subr.bf16.mxu0 %v5440_v45 }
 0x4ee   :  { %4574 = vmatpush3.bf16.msra.mxu0 %v5440_v45 }
 0x4ef   :  { %4579 = vmatprep.subr.bf16.mxu0 %v5438_v43 }
 0x4f1   :  { %4576 = vmatmul.mubr.msk.bf16.vlgmr.msra.gmra.mxu0 %vm57_vm0, %v4924_v46 }
 0x4f2   :  { %4580 = vmatpush3.bf16.msra.mxu0 %v5438_v43  ;;  %4583 = vmatprep.mubr.msk.bf16.mxu0 %vm57_vm0, %v4925_v47 }
 0x4f3   :  { %4581 = vmatprep.subr.bf16.mxu0 %v5440_v45 }
 0x4f6   :  { %4582 = vmatpush3.bf16.msra.mxu0 %v5440_v45 }
 0x4f7   :  { %4587 = vmatprep.subr.bf16.mxu0 %v4927_v48 }
 0x4f9   :  { %4584 = vmatmul.mubr.msk.bf16.vlgmr.msra.gmra.mxu0 %vm57_vm0, %v4926_v49  ;;  %v4956_v49 = vld [vmem:[%s5780_s5 + $0x178] sm:$0xff]  }
 0x4fa   :  { %4588 = vmatpush3.bf16.msra.mxu0 %v4927_v48 }
 0x4fb   :  { %4589 = vmatprep.subr.bf16.mxu0 %v4928_v50 }
 0x4fe   :  { %4590 = vmatpush3.bf16.msra.mxu0 %v4928_v50 }
 0x4ff   :  { %4591 = vmatprep.subr.bf16.mxu0 %v4929_v51 }
 0x502   :  { %4592 = vmatpush3.bf16.msra.mxu0 %v4929_v51  ;;  %v4957_v51 = vld [vmem:[%s5781_s4 + $0x58] sm:$0xff]  }
 0x503   :  { %4593 = vmatprep.subr.bf16.mxu0 %v4930_v52 }
 0x506   :  { %4594 = vmatpush3.bf16.msra.mxu0 %v4930_v52 }
 0x507   :  { %4595 = vmatprep.subr.bf16.mxu0 %v4931_v0 }
 0x50a   :  { %4596 = vmatpush3.bf16.msra.mxu0 %v4931_v0 }
 0x50b   :  { %4597 = vmatprep.subr.bf16.mxu0 %v4932_v53 }
 0x50e   :  { %4598 = vmatpush3.bf16.msra.mxu0 %v4932_v53  ;;  %v4958_v53 = vld [vmem:[%s5780_s5 + $0x170] sm:$0xff]  }
 0x50f   :  { %4599 = vmatprep.subr.bf16.mxu0 %v4933_v1 }
 0x512   :  { %4600 = vmatpush3.bf16.msra.mxu0 %v4933_v1  ;;  %v4959_v1 = vld [vmem:[%s5781_s4 + $0x40] sm:$0xff]  }
 0x513   :  { %4601 = vmatprep.subr.bf16.mxu0 %v4934_v54 }
 0x516   :  { %4602 = vmatpush3.bf16.msra.mxu0 %v4934_v54  ;;  %v4960_v54 = vld [vmem:[%s5780_s5 + $0x138] sm:$0xff]  }
 0x517   :  { %4627 = vmatprep.subr.bf16.mxu0 %v5438_v43 }
 0x5b1   :  { %v4577_v55 = vpop.f32.mrf.mxu0 }
 0x5b3   :  { %v1819_v56 = vpop.f32.mrf.mxu0 }
 0x5b5   :  { %v4578_v57 = vpop.f32.mrf.mxu0 }
 0x5b6   :  { %v1835_v61 = vpack.c.bf16 %v4578_v57, %v4577_v55  ;;  %v4961_v55 = vld [vmem:[%s5780_s5 + $0x168] sm:$0xff]   ;;  %v4963_v57 = vld [vmem:[%s5780_s5 + $0x130] sm:$0xff]  }
 0x5b7   :  { %v1822_v58 = vpop.f32.mrf.mxu0 }
 0x5b8   :  { %v1834_v59 = vpack.c.bf16 %v1822_v58, %v1819_v56  ;;  %v4962_v56 = vld [vmem:[%s5781_s4 + $0x48] sm:$0xff]   ;;  %v4964_v58 = vld [vmem:[%s5780_s5 + $0x160] sm:$0xff]  }
 0x5b9   :  { %v4585_v62 = vpop.f32.mrf.mxu0 }
 0x5ba   :  { %4623 = vmatprep.mubr.bf16.mxu1 %v1834_v59  ;;  %v4965_v59 = vld [vmem:[%s5780_s5 + $0x128] sm:$0xff]  }
 0x5bb   :  { %v1907_v63 = vpop.f32.mrf.mxu0  ;;  %4624 = vmatmul.mubr.bf16.vlgmr.msra.gmra.mxu1 %v1835_v61  ;;  %v4967_v61 = vld [vmem:[%s5780_s5 + $0x120] sm:$0xff]  }
 0x5bc   :  { %4656 = vmatpush3.bf16.msra.mxu1 %v5438_v43  ;;  %4659 = vmatprep.mubr.msk.bf16.mxu1 %vm57_vm0, %v4935_v60  ;;  %v4966_v60 = vld [vmem:[%s5780_s5 + $0x158] sm:$0xff]  }
 0x5bd   :  { %4657 = vmatprep.subr.bf16.mxu1 %v5440_v45  ;;  %v4586_v2 = vpop.f32.mrf.mxu0 }
 0x5be   :  { %v1923_v7 = vpack.c.bf16 %v4586_v2, %v4585_v62  ;;  %v4968_v62 = vld [vmem:[%s5780_s5 + $0x150] sm:$0xff]   ;;  %v4970_v2 = vld [vmem:[%s5780_s5 + $0x148] sm:$0xff]  }
 0x5bf   :  { %v1910_v4 = vpop.f32.mrf.mxu0 }
 0x5c0   :  { %v1922_v6 = vpack.c.bf16 %v1910_v4, %v1907_v63  ;;  %4658 = vmatpush3.bf16.msra.mxu1 %v5440_v45  ;;  %v4969_v63 = vld [vmem:[%s5780_s5 + $0x118] sm:$0xff]   ;;  %v4972_v4 = vld [vmem:[%s5780_s5 + $0x140] sm:$0xff]  }
 0x5c1   :  { %4663 = vmatprep.subr.bf16.mxu1 %v4936_v3 }
 0x5c2   :  { %4603 = vmatprep.mubr.bf16.mxu0 %v1922_v6  ;;  %v4974_v6 = vld [vmem:[%s5780_s5 + $0x100] sm:$0xff]  }
 0x5c3   :  { %4604 = vmatmul.mubr.bf16.vlgmr.msra.gmra.mxu0 %v1923_v7  ;;  %4660 = vmatmul.mubr.msk.bf16.vlgmr.msra.gmra.mxu1 %vm57_vm0, %v4937_v5  ;;  %v4973_v5 = vld [vmem:[%s5780_s5 + $0x108] sm:$0xff]  }
 0x5c4   :  { %4628 = vmatpush3.bf16.msra.mxu0 %v5438_v43  ;;  %4664 = vmatpush3.bf16.msra.mxu1 %v4936_v3  ;;  %v4971_v3 = vld [vmem:[%s5780_s5 + $0x110] sm:$0xff]  }
 0x5c5   :  { %4629 = vmatprep.subr.bf16.mxu0 %v5440_v45  ;;  %4665 = vmatprep.subr.bf16.mxu1 %v4938_v8 }
 0x5c6   :  { %4631 = vmatprep.mubr.msk.bf16.mxu0 %vm57_vm0, %v4939_v9 }
 0x5c8   :  { %4630 = vmatpush3.bf16.msra.mxu0 %v5440_v45  ;;  %4666 = vmatpush3.bf16.msra.mxu1 %v4938_v8 }
 0x5c9   :  { %4635 = vmatprep.subr.bf16.mxu0 %v4940_v10  ;;  %4667 = vmatprep.subr.bf16.mxu1 %v4941_v11 }
 0x5cb   :  { %4632 = vmatmul.mubr.msk.bf16.vlgmr.msra.gmra.mxu0 %vm57_vm0, %v4942_v12 }
 0x5cc   :  { %4636 = vmatpush3.bf16.msra.mxu0 %v4940_v10  ;;  %4668 = vmatpush3.bf16.msra.mxu1 %v4941_v11 }
 0x5cd   :  { %4637 = vmatprep.subr.bf16.mxu0 %v4943_v13  ;;  %4669 = vmatprep.subr.bf16.mxu1 %v4944_v14 }
 0x5d0   :  { %4638 = vmatpush3.bf16.msra.mxu0 %v4943_v13  ;;  %4670 = vmatpush3.bf16.msra.mxu1 %v4944_v14 }
 0x5d1   :  { %4639 = vmatprep.subr.bf16.mxu0 %v4945_v15  ;;  %4671 = vmatprep.subr.bf16.mxu1 %v4946_v16 }
 0x5d4   :  { %4640 = vmatpush3.bf16.msra.mxu0 %v4945_v15  ;;  %4672 = vmatpush3.bf16.msra.mxu1 %v4946_v16 }
 0x5d5   :  { %4641 = vmatprep.subr.bf16.mxu0 %v4947_v17  ;;  %4673 = vmatprep.subr.bf16.mxu1 %v4948_v18 }
 0x5d8   :  { %4642 = vmatpush3.bf16.msra.mxu0 %v4947_v17  ;;  %4674 = vmatpush3.bf16.msra.mxu1 %v4948_v18 }
 0x5d9   :  { %4643 = vmatprep.subr.bf16.mxu0 %v4949_v19  ;;  %4675 = vmatprep.subr.bf16.mxu1 %v4950_v20 }
 0x5dc   :  { %4644 = vmatpush3.bf16.msra.mxu0 %v4949_v19  ;;  %4676 = vmatpush3.bf16.msra.mxu1 %v4950_v20 }
 0x5dd   :  { %4645 = vmatprep.subr.bf16.mxu0 %v4951_v21  ;;  %4677 = vmatprep.subr.bf16.mxu1 %v4952_v22 }
 0x5e0   :  { %4646 = vmatpush3.bf16.msra.mxu0 %v4951_v21  ;;  %4678 = vmatpush3.bf16.msra.mxu1 %v4952_v22 }
 0x5e1   :  { %4711 = vmatprep.subr.bf16.mxu1 %v5438_v43  ;;  %4647 = vmatprep.subr.bf16.mxu0 %v4953_v23 }
 0x5e4   :  { %4648 = vmatpush3.bf16.msra.mxu0 %v4953_v23 }
 0x5e5   :  { %4649 = vmatprep.subr.bf16.mxu0 %v4954_v24 }
 0x5e8   :  { %4650 = vmatpush3.bf16.msra.mxu0 %v4954_v24 }
 0x5e9   :  { %4683 = vmatprep.subr.bf16.mxu0 %v5438_v43 }
 0x67b   :  { %v4625_v25 = vpop.f32.mrf.mxu1 }
 0x67d   :  { %v2120_v26 = vpop.f32.mrf.mxu1 }
 0x67f   :  { %v4626_v27 = vpop.f32.mrf.mxu1 }
 0x681   :  { %v2123_v28 = vpop.f32.mrf.mxu1 }
 0x683   :  { %v4605_v29 = vpop.f32.mrf.mxu0  ;;  %v4661_v30 = vpop.f32.mrf.mxu1 }
 0x684   :  { %v5560_v31 = vadd.f32 %v4625_v25, %v4605_v29 }
 0x685   :  { %v2023_v32 = vpop.f32.mrf.mxu0  ;;  %v2380_v33 = vpop.f32.mrf.mxu1 }
 0x686   :  { %v5562_v34 = vadd.f32 %v2120_v26, %v2023_v32 }
 0x687   :  { %v4606_v35 = vpop.f32.mrf.mxu0  ;;  %v4662_v36 = vpop.f32.mrf.mxu1 }
 0x688   :  { %v5564_v37 = vadd.f32 %v4626_v27, %v4606_v35  ;;  %v2396_v38 = vpack.c.bf16 %v4662_v36, %v4661_v30  ;;  %v4978_v27 = vld [vmem:[%s5781_s4 + $0x70] sm:$0xff]   ;;  %v4979_v35 = vld [vmem:[%s5781_s4 + $0x78] sm:$0xff]  }
 0x689   :  { %v2026_v39 = vpop.f32.mrf.mxu0  ;;  %v2383_v40 = vpop.f32.mrf.mxu1 }
 0x68a   :  { %v5566_v41 = vadd.f32 %v2123_v28, %v2026_v39  ;;  %v2395_v42 = vpack.c.bf16 %v2383_v40, %v2380_v33  ;;  %v4987_v33 = vld [vmem:[%s5780_s5 + $0x1f8] sm:$0xff]   ;;  %v4988_v39 = vld [vmem:[%s5780_s5 + $0x1f0] sm:$0xff]  }
 0x68b   :  { %v4633_v46 = vpop.f32.mrf.mxu0  ;;  %v4976_v40 = vld [vmem:[%s5780_s5 + $0x1b8] sm:$0xff]  }
 0x68c   :  { %4679 = vmatprep.mubr.bf16.mxu1 %v2395_v42  ;;  %v4977_v42 = vld [vmem:[%s5781_s4 + $0x68] sm:$0xff]  }
 0x68d   :  { %v2190_v47 = vpop.f32.mrf.mxu0  ;;  %4680 = vmatmul.mubr.bf16.vlgmr.msra.gmra.mxu1 %v2396_v38 }
 0x68e   :  { %4712 = vmatpush3.bf16.msra.mxu1 %v5438_v43  ;;  %4715 = vmatprep.mubr.msk.bf16.mxu1 %vm57_vm0, %v4955_v44  ;;  %v4980_v44 = vld [vmem:[%s5780_s5 + $0x1b0] sm:$0xff]  }
 0x68f   :  { %4713 = vmatprep.subr.bf16.mxu1 %v5440_v45  ;;  %v4634_v48 = vpop.f32.mrf.mxu0 }
 0x690   :  { %v2206_v0 = vpack.c.bf16 %v4634_v48, %v4633_v46  ;;  %v4981_v46 = vld [vmem:[%s5780_s5 + $0x1a8] sm:$0xff]   ;;  %v4983_v48 = vld [vmem:[%s5780_s5 + $0x198] sm:$0xff]  }
 0x691   :  { %v2193_v50 = vpop.f32.mrf.mxu0 }
 0x692   :  { %v2205_v52 = vpack.c.bf16 %v2193_v50, %v2190_v47  ;;  %4714 = vmatpush3.bf16.msra.mxu1 %v5440_v45  ;;  %v4982_v47 = vld [vmem:[%s5780_s5 + $0x1a0] sm:$0xff]   ;;  %v4985_v50 = vld [vmem:[%s5780_s5 + $0x188] sm:$0xff]  }
 0x693   :  { %4719 = vmatprep.subr.bf16.mxu1 %v4956_v49 }
 0x694   :  { %4651 = vmatprep.mubr.bf16.mxu0 %v2205_v52  ;;  %v4990_v52 = vld [vmem:[%s5780_s5 + $0x1e0] sm:$0xff]  }
 0x695   :  { %4652 = vmatmul.mubr.bf16.vlgmr.msra.gmra.mxu0 %v2206_v0  ;;  %4716 = vmatmul.mubr.msk.bf16.vlgmr.msra.gmra.mxu1 %vm57_vm0, %v4957_v51  ;;  %v4986_v51 = vld [vmem:[%s5780_s5 + $0x180] sm:$0xff]   ;;  %v4991_v0 = vld [vmem:[%s5780_s5 + $0x1d8] sm:$0xff]  }
 0x696   :  { %4684 = vmatpush3.bf16.msra.mxu0 %v5438_v43  ;;  %4720 = vmatpush3.bf16.msra.mxu1 %v4956_v49  ;;  %v4984_v49 = vld [vmem:[%s5780_s5 + $0x190] sm:$0xff]  }
 0x697   :  { %4685 = vmatprep.subr.bf16.mxu0 %v5440_v45  ;;  %4721 = vmatprep.subr.bf16.mxu1 %v4958_v53 }
 0x698   :  { %4687 = vmatprep.mubr.msk.bf16.mxu0 %vm57_vm0, %v4959_v1  ;;  %v4993_v1 = vld [vmem:[%s5780_s5 + $0x1c8] sm:$0xff]  }
 0x69a   :  { %4686 = vmatpush3.bf16.msra.mxu0 %v5440_v45  ;;  %4722 = vmatpush3.bf16.msra.mxu1 %v4958_v53  ;;  %v4992_v53 = vld [vmem:[%s5780_s5 + $0x1d0] sm:$0xff]  }
 0x69b   :  { %4691 = vmatprep.subr.bf16.mxu0 %v4960_v54  ;;  %4723 = vmatprep.subr.bf16.mxu1 %v4961_v55 }
 0x69d   :  { %4688 = vmatmul.mubr.msk.bf16.vlgmr.msra.gmra.mxu0 %vm57_vm0, %v4962_v56 }
 0x69e   :  { %4692 = vmatpush3.bf16.msra.mxu0 %v4960_v54  ;;  %4724 = vmatpush3.bf16.msra.mxu1 %v4961_v55  ;;  %v4994_v54 = vld [vmem:[%s5780_s5 + $0x1c0] sm:$0xff]  }
 0x69f   :  { %4693 = vmatprep.subr.bf16.mxu0 %v4963_v57  ;;  %4725 = vmatprep.subr.bf16.mxu1 %v4964_v58 }
 0x6a2   :  { %4694 = vmatpush3.bf16.msra.mxu0 %v4963_v57  ;;  %4726 = vmatpush3.bf16.msra.mxu1 %v4964_v58 }
 0x6a3   :  { %4695 = vmatprep.subr.bf16.mxu0 %v4965_v59  ;;  %4727 = vmatprep.subr.bf16.mxu1 %v4966_v60 }
 0x6a6   :  { %4696 = vmatpush3.bf16.msra.mxu0 %v4965_v59  ;;  %4728 = vmatpush3.bf16.msra.mxu1 %v4966_v60 }
 0x6a7   :  { %4697 = vmatprep.subr.bf16.mxu0 %v4967_v61  ;;  %4729 = vmatprep.subr.bf16.mxu1 %v4968_v62 }
 0x6aa   :  { %4698 = vmatpush3.bf16.msra.mxu0 %v4967_v61  ;;  %4730 = vmatpush3.bf16.msra.mxu1 %v4968_v62 }
 0x6ab   :  { %4699 = vmatprep.subr.bf16.mxu0 %v4969_v63  ;;  %4731 = vmatprep.subr.bf16.mxu1 %v4970_v2 }
 0x6ae   :  { %4700 = vmatpush3.bf16.msra.mxu0 %v4969_v63  ;;  %4732 = vmatpush3.bf16.msra.mxu1 %v4970_v2 }
 0x6af   :  { %4701 = vmatprep.subr.bf16.mxu0 %v4971_v3  ;;  %4733 = vmatprep.subr.bf16.mxu1 %v4972_v4 }
 0x6b2   :  { %4702 = vmatpush3.bf16.msra.mxu0 %v4971_v3  ;;  %4734 = vmatpush3.bf16.msra.mxu1 %v4972_v4 }
 0x6b3   :  { %4767 = vmatprep.subr.bf16.mxu1 %v5438_v43  ;;  %4703 = vmatprep.subr.bf16.mxu0 %v4973_v5 }
 0x6b6   :  { %4704 = vmatpush3.bf16.msra.mxu0 %v4973_v5 }
 0x6b7   :  { %4705 = vmatprep.subr.bf16.mxu0 %v4974_v6 }
 0x6ba   :  { %4706 = vmatpush3.bf16.msra.mxu0 %v4974_v6 }
 0x6bb   :  { %4739 = vmatprep.subr.bf16.mxu0 %v5438_v43 }
 0x74d   :  { %v4681_v7 = vpop.f32.mrf.mxu1 }
 0x74f   :  { %v2496_v8 = vpop.f32.mrf.mxu1 }
 0x751   :  { %v4682_v9 = vpop.f32.mrf.mxu1 }
 0x753   :  { %v2499_v10 = vpop.f32.mrf.mxu1 }
 0x755   :  { %v4653_v11 = vpop.f32.mrf.mxu0  ;;  %v4717_v12 = vpop.f32.mrf.mxu1 }
 0x756   :  { %v2323_v13 = vadd.f32 %v4653_v11, %v5560_v31 }
 0x757   :  { %v2306_v14 = vpop.f32.mrf.mxu0  ;;  %v2760_v15 = vpop.f32.mrf.mxu1 }
 0x758   :  { %v2321_v16 = vadd.f32 %v2306_v14, %v5562_v34  ;;  %v5642_v17 = vadd.f32 %v4681_v7, %v2323_v13 }
 0x759   :  { %v4654_v18 = vpop.f32.mrf.mxu0  ;;  %v4718_v19 = vpop.f32.mrf.mxu1 }
 0x75a   :  { %v2324_v20 = vadd.f32 %v4654_v18, %v5564_v37  ;;  %v5645_v21 = vadd.f32 %v2496_v8, %v2321_v16  ;;  %v2776_v22 = vpack.c.bf16 %v4718_v19, %v4717_v12  ;;  %v4975_v37 = vld [vmem:[%s5781_s4 + $0x60] sm:$0xff]  }
 0x75b   :  { %v2309_v23 = vpop.f32.mrf.mxu0  ;;  %v2763_v24 = vpop.f32.mrf.mxu1 }
 0x75c   :  { %v2322_v25 = vadd.f32 %v2309_v23, %v5566_v41  ;;  %v2775_v26 = vpack.c.bf16 %v2763_v24, %v2760_v15  ;;  %v5651_v28 = vadd.f32 %v4682_v9, %v2324_v20  ;;  %v4989_v41 = vld [vmem:[%s5780_s5 + $0x1e8] sm:$0xff]   ;;  %v4995_v20 = vld [vmem:[%s5781_s4 + $0x80] sm:$0xff]   ;;  %v4998_v24 = vld [vmem:[%s5780_s5 + $0x230] sm:$0xff]  }
 0x75d   :  { %v4689_v29 = vpop.f32.mrf.mxu0  ;;  %v4996_v23 = vld [vmem:[%s5781_s4 + $0x88] sm:$0xff]  }
 0x75e   :  { %4735 = vmatprep.mubr.bf16.mxu1 %v2775_v26  ;;  %v5653_v30 = vadd.f32 %v2499_v10, %v2322_v25  ;;  %v5000_v25 = vld [vmem:[%s5780_s5 + $0x220] sm:$0xff]   ;;  %v5002_v26 = vld [vmem:[%s5780_s5 + $0x210] sm:$0xff]  }
 0x75f   :  { %v2570_v31 = vpop.f32.mrf.mxu0  ;;  %4736 = vmatmul.mubr.bf16.vlgmr.msra.gmra.mxu1 %v2776_v22  ;;  %v4997_v22 = vld [vmem:[%s5780_s5 + $0x238] sm:$0xff]  }
 0x760   :  { %4768 = vmatpush3.bf16.msra.mxu1 %v5438_v43  ;;  %4771 = vmatprep.mubr.msk.bf16.mxu1 %vm57_vm0, %v4978_v27  ;;  %v5003_v27 = vld [vmem:[%s5780_s5 + $0x208] sm:$0xff]  }
 0x761   :  { %4769 = vmatprep.subr.bf16.mxu1 %v5440_v45  ;;  %v4690_v32 = vpop.f32.mrf.mxu0 }
 0x762   :  { %v2586_v38 = vpack.c.bf16 %v4690_v32, %v4689_v29 }
 0x763   :  { %v2573_v34 = vpop.f32.mrf.mxu0 }
 0x764   :  { %v2585_v36 = vpack.c.bf16 %v2573_v34, %v2570_v31  ;;  %4770 = vmatpush3.bf16.msra.mxu1 %v5440_v45 }
 0x765   :  { %4775 = vmatprep.subr.bf16.mxu1 %v4987_v33 }
 0x766   :  { %4707 = vmatprep.mubr.bf16.mxu0 %v2585_v36 }
 0x767   :  { %4708 = vmatmul.mubr.bf16.vlgmr.msra.gmra.mxu0 %v2586_v38  ;;  %4772 = vmatmul.mubr.msk.bf16.vlgmr.msra.gmra.mxu1 %vm57_vm0, %v4979_v35 }
 0x768   :  { %4740 = vmatpush3.bf16.msra.mxu0 %v5438_v43  ;;  %4743 = vmatprep.mubr.msk.bf16.mxu0 %vm57_vm0, %v4975_v37 }
 0x769   :  { %4741 = vmatprep.subr.bf16.mxu0 %v5440_v45  ;;  %4776 = vmatpush3.bf16.msra.mxu1 %v4987_v33 }
 0x76a   :  { %4777 = vmatprep.subr.bf16.mxu1 %v4988_v39 }
 0x76c   :  { %4742 = vmatpush3.bf16.msra.mxu0 %v5440_v45 }
 0x76d   :  { %4747 = vmatprep.subr.bf16.mxu0 %v4976_v40  ;;  %4778 = vmatpush3.bf16.msra.mxu1 %v4988_v39 }
 0x76e   :  { %4779 = vmatprep.subr.bf16.mxu1 %v4989_v41 }
 0x76f   :  { %4744 = vmatmul.mubr.msk.bf16.vlgmr.msra.gmra.mxu0 %vm57_vm0, %v4977_v42 }
 0x770   :  { %4748 = vmatpush3.bf16.msra.mxu0 %v4976_v40 }
 0x771   :  { %4749 = vmatprep.subr.bf16.mxu0 %v4980_v44  ;;  %4780 = vmatpush3.bf16.msra.mxu1 %v4989_v41 }
 0x772   :  { %4781 = vmatprep.subr.bf16.mxu1 %v4990_v52 }
 0x774   :  { %4750 = vmatpush3.bf16.msra.mxu0 %v4980_v44 }
 0x775   :  { %4751 = vmatprep.subr.bf16.mxu0 %v4981_v46  ;;  %4782 = vmatpush3.bf16.msra.mxu1 %v4990_v52 }
 0x776   :  { %4783 = vmatprep.subr.bf16.mxu1 %v4991_v0 }
 0x778   :  { %4752 = vmatpush3.bf16.msra.mxu0 %v4981_v46 }
 0x779   :  { %4753 = vmatprep.subr.bf16.mxu0 %v4982_v47  ;;  %4784 = vmatpush3.bf16.msra.mxu1 %v4991_v0 }
 0x77a   :  { %4785 = vmatprep.subr.bf16.mxu1 %v4992_v53 }
 0x77c   :  { %4754 = vmatpush3.bf16.msra.mxu0 %v4982_v47 }
 0x77d   :  { %4755 = vmatprep.subr.bf16.mxu0 %v4983_v48  ;;  %4786 = vmatpush3.bf16.msra.mxu1 %v4992_v53 }
 0x77e   :  { %4787 = vmatprep.subr.bf16.mxu1 %v4993_v1 }
 0x780   :  { %4756 = vmatpush3.bf16.msra.mxu0 %v4983_v48 }
 0x781   :  { %4757 = vmatprep.subr.bf16.mxu0 %v4984_v49  ;;  %4788 = vmatpush3.bf16.msra.mxu1 %v4993_v1 }
 0x782   :  { %4789 = vmatprep.subr.bf16.mxu1 %v4994_v54 }
 0x784   :  { %4758 = vmatpush3.bf16.msra.mxu0 %v4984_v49 }
 0x785   :  { %4759 = vmatprep.subr.bf16.mxu0 %v4985_v50  ;;  %4790 = vmatpush3.bf16.msra.mxu1 %v4994_v54  ;;  %v5007_v54 = vld [vmem:[%s5777_s0 + $0x8] sm:$0xff]  }
 0x788   :  { %4760 = vmatpush3.bf16.msra.mxu0 %v4985_v50  ;;  %v4047_v50 = vld [vmem:[%s5783_s6] ss:$0 sm:$0xff] }
 0x789   :  { %4761 = vmatprep.subr.bf16.mxu0 %v4986_v51 }
 0x78c   :  { %4762 = vmatpush3.bf16.msra.mxu0 %v4986_v51 }
 0x78d   :  { %4795 = vmatprep.subr.bf16.mxu0 %v5438_v43 }
 0x81f   :  { %v4737_v55 = vpop.f32.mrf.mxu1 }
 0x821   :  { %v2876_v56 = vpop.f32.mrf.mxu1 }
 0x823   :  { %v4738_v57 = vpop.f32.mrf.mxu1 }
 0x825   :  { %v2879_v58 = vpop.f32.mrf.mxu1 }
 0x827   :  { %v4709_v59 = vpop.f32.mrf.mxu0  ;;  %v4773_v60 = vpop.f32.mrf.mxu1 }
 0x828   :  { %v2703_v61 = vadd.f32 %v4709_v59, %v5642_v17 }
 0x829   :  { %v2686_v62 = vpop.f32.mrf.mxu0  ;;  %v3140_v63 = vpop.f32.mrf.mxu1 }
 0x82a   :  { %v2701_v2 = vadd.f32 %v2686_v62, %v5645_v21  ;;  %v2893_v3 = vadd.f32 %v4737_v55, %v2703_v61  ;;  %v1763_v55 = vunpack.c.l.bf16 %v5007_v54 }
 0x82b   :  { %v4710_v4 = vpop.f32.mrf.mxu0  ;;  %v4774_v5 = vpop.f32.mrf.mxu1 }
 0x82c   :  { %v2704_v6 = vadd.f32 %v4710_v4, %v5651_v28  ;;  %v2891_v7 = vadd.f32 %v2876_v56, %v2701_v2  ;;  %v3156_v9 = vpack.c.bf16 %v4774_v5, %v4773_v60  ;;  %v5004_v28 = vld [vmem:[%s5780_s5 + $0x200] sm:$0xff]  }
 0x82d   :  { %v2689_v8 = vpop.f32.mrf.mxu0  ;;  %v3143_v10 = vpop.f32.mrf.mxu1  ;;  %v5008_v60 = vld [vmem:[%s5777_s0] sm:$0xff]  }
 0x82e   :  { %v2702_v11 = vadd.f32 %v2689_v8, %v5653_v30  ;;  %v2894_v12 = vadd.f32 %v4738_v57, %v2704_v6  ;;  %v3155_v13 = vpack.c.bf16 %v3143_v10, %v3140_v63  ;;  %v1761_v61 = vunpack.c.l.bf16 %v5008_v60 }
 0x82f   :  { %v4745_v14 = vpop.f32.mrf.mxu0  ;;  %v1764_v63 = vunpack.c.h.bf16 %v5007_v54  ;;  %v1762_v6 = vunpack.c.h.bf16 %v5008_v60 }
 0x830   :  { %v2892_v15 = vadd.f32 %v2879_v58, %v2702_v11  ;;  %4791 = vmatprep.mubr.bf16.mxu1 %v3155_v13 }
 0x831   :  { %v2950_v16 = vpop.f32.mrf.mxu0  ;;  %4792 = vmatmul.mubr.bf16.vlgmr.msra.gmra.mxu1 %v3156_v9 }
 0x833   :  { %v4746_v17 = vpop.f32.mrf.mxu0 }
 0x834   :  { %v2966_v21 = vpack.c.bf16 %v4746_v17, %v4745_v14 }
 0x835   :  { %v2953_v18 = vpop.f32.mrf.mxu0 }
 0x836   :  { %v2965_v19 = vpack.c.bf16 %v2953_v18, %v2950_v16 }
 0x838   :  { %4763 = vmatprep.mubr.bf16.mxu0 %v2965_v19 }
 0x839   :  { %4764 = vmatmul.mubr.bf16.vlgmr.msra.gmra.mxu0 %v2966_v21 }
 0x83a   :  { %4796 = vmatpush3.bf16.msra.mxu0 %v5438_v43  ;;  %4799 = vmatprep.mubr.msk.bf16.mxu0 %vm57_vm0, %v4995_v20  ;;  %v4999_v43 = vld [vmem:[%s5780_s5 + $0x228] sm:$0xff]  }
 0x83b   :  { %4797 = vmatprep.subr.bf16.mxu0 %v5440_v45 }
 0x83e   :  { %4798 = vmatpush3.bf16.msra.mxu0 %v5440_v45  ;;  %v5001_v45 = vld [vmem:[%s5780_s5 + $0x218] sm:$0xff]  }
 0x83f   :  { %4803 = vmatprep.subr.bf16.mxu0 %v4997_v22 }
 0x841   :  { %4800 = vmatmul.mubr.msk.bf16.vlgmr.msra.gmra.mxu0 %vm57_vm0, %v4996_v23 }
 0x842   :  { %4804 = vmatpush3.bf16.msra.mxu0 %v4997_v22 }
 0x843   :  { %4805 = vmatprep.subr.bf16.mxu0 %v4998_v24 }
 0x846   :  { %4806 = vmatpush3.bf16.msra.mxu0 %v4998_v24 }
 0x847   :  { %4807 = vmatprep.subr.bf16.mxu0 %v4999_v43 }
 0x84a   :  { %4808 = vmatpush3.bf16.msra.mxu0 %v4999_v43 }
 0x84b   :  { %4809 = vmatprep.subr.bf16.mxu0 %v5000_v25 }
 0x84e   :  { %4810 = vmatpush3.bf16.msra.mxu0 %v5000_v25 }
 0x84f   :  { %4811 = vmatprep.subr.bf16.mxu0 %v5001_v45 }
 0x852   :  { %4812 = vmatpush3.bf16.msra.mxu0 %v5001_v45 }
 0x853   :  { %4813 = vmatprep.subr.bf16.mxu0 %v5002_v26 }
 0x856   :  { %4814 = vmatpush3.bf16.msra.mxu0 %v5002_v26 }
 0x857   :  { %4815 = vmatprep.subr.bf16.mxu0 %v5003_v27 }
 0x85a   :  { %4816 = vmatpush3.bf16.msra.mxu0 %v5003_v27 }
 0x85b   :  { %4817 = vmatprep.subr.bf16.mxu0 %v5004_v28 }
 0x85e   :  { %4818 = vmatpush3.bf16.msra.mxu0 %v5004_v28 }
 0x8f1   :  { %v4793_v44 = vpop.f32.mrf.mxu1 }
 0x8f3   :  { %v3256_v46 = vpop.f32.mrf.mxu1 }
 0x8f5   :  { %v4794_v47 = vpop.f32.mrf.mxu1 }
 0x8f7   :  { %v3259_v52 = vpop.f32.mrf.mxu1 }
 0x8f9   :  { %v4765_v29 = vpop.f32.mrf.mxu0 }
 0x8fa   :  { %v3083_v30 = vadd.f32 %v4765_v29, %v2893_v3 }
 0x8fb   :  { %v3066_v31 = vpop.f32.mrf.mxu0 }
 0x8fc   :  { %v3081_v32 = vadd.f32 %v3066_v31, %v2891_v7  ;;  %v3273_v48 = vadd.f32 %v4793_v44, %v3083_v30 }
 0x8fd   :  { %v4766_v33 = vpop.f32.mrf.mxu0 }
 0x8fe   :  { %v3084_v34 = vadd.f32 %v4766_v33, %v2894_v12  ;;  %v3271_v51 = vadd.f32 %v3256_v46, %v3081_v32 }
 0x8ff   :  { %v3069_v35 = vpop.f32.mrf.mxu0 }
 0x900   :  { %v3082_v36 = vadd.f32 %v3069_v35, %v2892_v15  ;;  %v3274_v1 = vadd.f32 %v4794_v47, %v3084_v34 }
 0x901   :  { %v4801_v37 = vpop.f32.mrf.mxu0 }
 0x902   :  { %v3272_v58 = vadd.f32 %v3259_v52, %v3082_v36 }
 0x903   :  { %v3330_v38 = vpop.f32.mrf.mxu0 }
 0x905   :  { %v4802_v39 = vpop.f32.mrf.mxu0 }
 0x906   :  { %v3346_v42 = vpack.c.bf16 %v4802_v39, %v4801_v37 }
 0x907   :  { %v3333_v40 = vpop.f32.mrf.mxu0 }
 0x908   :  { %v3345_v41 = vpack.c.bf16 %v3333_v40, %v3330_v38 }
 0x90a   :  { %4819 = vmatprep.mubr.bf16.mxu0 %v3345_v41 }
 0x90b   :  { %4820 = vmatmul.mubr.bf16.vlgmr.msra.gmra.mxu0 %v3346_v42 }
 0x9cb   :  { %v4821_v49 = vpop.f32.mrf.mxu0 }
 0x9cc   :  { %v3463_v0 = vadd.f32 %v4821_v49, %v3273_v48 }
 0x9cd   :  { %v3446_v53 = vpop.f32.mrf.mxu0 }
 0x9ce   :  { %v3474_v56 = vadd.f32 %v4047_v50, %v3463_v0  ;;  %v3461_v57 = vadd.f32 %v3446_v53, %v3271_v51 }
 0x9cf   :  { %v4822_v59 = vpop.f32.mrf.mxu0 }
 0x9d0   :  { %v3472_v62 = vadd.f32 %v4047_v50, %v3461_v57  ;;  %v3464_v2 = vadd.f32 %v4822_v59, %v3274_v1  ;;  %v3478_v4 = vadd.f32 %v3474_v56, %v1763_v55 }
 0x9d1   :  { %v3449_v3 = vpop.f32.mrf.mxu0 }
 0x9d2   :  { %v3475_v5 = vadd.f32 %v4047_v50, %v3464_v2  ;;  %v3462_v7 = vadd.f32 %v3449_v3, %v3272_v58  ;;  %v3476_v8 = vadd.f32 %v3472_v62, %v1761_v61  ;;  %v3482_v11 = vmax.f32 %v3478_v4, 0.0 }
 0x9d4   :  { %v3479_v9 = vadd.f32 %v3475_v5, %v1764_v63  ;;  %v3473_v10 = vadd.f32 %v4047_v50, %v3462_v7  ;;  %v3480_v14 = vmax.f32 %v3476_v8, 0.0 }
 0x9d6   :  { %v3483_v12 = vmax.f32 %v3479_v9, 0.0  ;;  %v3477_v13 = vadd.f32 %v3473_v10, %v1762_v6 }
 0x9d8   :  { %v4064_v15 = vpack.c.bf16 %v3483_v12, %v3482_v11  ;;  %v3481_v16 = vmax.f32 %v3477_v13, 0.0 }
 0x9da   :  { %4066 = vst [vmem:[%s5784_s7 + $0x8] sm:$0xff] %v4064_v15   ;;  %v4059_v17 = vpack.c.bf16 %v3481_v16, %v3480_v14 }
 0x9dc   :  { %4060 = vst [vmem:[%s5784_s7] sm:$0xff] %v4059_v17  }

// kernel: resnet18_forward.14
= control target key start
LH: loop header
LB: loop body
LE: loop exit
PB: predicated region body
PF: predicated region fallthrough
CT: control target
= control target key end

     0   :  { %vm33_vm0 = vcmask 1043456   ;;  %v4040_v0 = vmov 0.0   ;;  %vm4041_vm1 = vmmov 0   ;;  %vm29_vm2 = vcmask 64512   ;;  %s4871_s0 = inlined_call_operand.vmem [shape: bf16[8,128], index: 0, kind: input, shape index: {}]   ;;  %s4872_s1 = inlined_call_operand.vmem [shape: bf16[9,8,8], index: 1, kind: input, shape index: {}, may-alias: {1,4}]   ;;  %s4873_s2 = inlined_call_operand.vmem [shape: bf16[9,128,128], index: 2, kind: input, shape index: {}]   ;;  %s4874_s5 = inlined_call_operand.vmem [shape: bf16[9,128,128], index: 5, kind: input, shape index: {}]   ;;  %s4875_s3 = inlined_call_operand.vmem [shape: f32[1,128], index: 3, kind: input, shape index: {}, may-alias: {3,6}]   ;;  %s4876_s4 = inlined_call_operand.vmem [shape: bf16[9,8,8], index: 4, kind: input, shape index: {}, may-alias: {1,4}]   ;;  %s4877_s6 = inlined_call_operand.vmem [shape: f32[1,128], index: 6, kind: input, shape index: {}, may-alias: {3,6}]   ;;  %s4878_s7 = inlined_call_operand.vmem [shape: bf16[8,128], index: 7, kind: output, shape index: {}]  }
   0x1   :  { %3425 = vmatprep.subr.bf16.mxu0 %v4040_v0  ;;  %3431 = vmatprep.subr.bf16.mxu1 %v4040_v0  ;;  %v27_v1 = vld [vmem:[%s4871_s0] sm:$0xf]  ;;  %v2792_v3 = vld [vmem:[%s4872_s1 + $0x4] sm:$0xf]  ;;  %v3895_v5 = vld [vmem:[%s4873_s2 + $0x78] sm:$0xff]  }
   0x2   :  { %v28_v2 = vld [vmem:[%s4872_s1] sm:$0xf]  ;;  %v4094_v4 = vsel %vm33_vm0, %v27_v1, 0  ;;  %3427 = vmatprep.mubr.msk.bf16.mxu0 %vm4041_vm1, %v4040_v0  ;;  %3433 = vmatprep.mubr.msk.bf16.mxu1 %vm4041_vm1, %v4040_v0  ;;  %v3896_v6 = vld [vmem:[%s4873_s2 + $0x38] sm:$0xff]   ;;  %v3897_v7 = vld [vmem:[%s4873_s2 + $0x70] sm:$0xff]  }
   0x3   :  { %3426 = vmatpush3.bf16.msra.mxu0 %v4094_v4  ;;  %3432 = vmatpush3.bf16.msra.mxu1 %v4094_v4  ;;  %v3898_v8 = vld [vmem:[%s4873_s2 + $0x30] sm:$0xff]   ;;  %v3899_v9 = vld [vmem:[%s4873_s2 + $0x68] sm:$0xff]   ;;  %v3901_v11 = vld [vmem:[%s4873_s2 + $0x60] sm:$0xff]  }
   0x4   :  { %3437 = vmatprep.subr.bf16.mxu0 %v4040_v0  ;;  %3457 = vmatprep.subr.bf16.mxu1 %v4040_v0  ;;  %v3900_v10 = vld [vmem:[%s4873_s2 + $0x28] sm:$0xff]   ;;  %v3902_v12 = vld [vmem:[%s4873_s2 + $0x20] sm:$0xff]   ;;  %v3903_v13 = vld [vmem:[%s4873_s2 + $0x58] sm:$0xff]  }
   0x5   :  { %v3904_v14 = vld [vmem:[%s4873_s2 + $0x18] sm:$0xff]   ;;  %v3905_v15 = vld [vmem:[%s4873_s2 + $0x50] sm:$0xff]   ;;  %v3907_v17 = vld [vmem:[%s4873_s2 + $0x48] sm:$0xff]  }
   0x6   :  { %3428 = vmatmul.mubr.msk.bf16.vlgmr.msra.gmra.mxu0 %vm29_vm2, %v28_v2  ;;  %3434 = vmatmul.mubr.msk.bf16.vlgmr.msra.gmra.mxu1 %vm29_vm2, %v2792_v3  ;;  %v3906_v16 = vld [vmem:[%s4873_s2 + $0x10] sm:$0xff]   ;;  %v3908_v18 = vld [vmem:[%s4873_s2 + $0x8] sm:$0xff]   ;;  %v3909_v19 = vld [vmem:[%s4873_s2 + $0x40] sm:$0xff]  }
   0x7   :  { %3438 = vmatpush3.bf16.msra.mxu0 %v3895_v5  ;;  %3458 = vmatpush3.bf16.msra.mxu1 %v3896_v6  ;;  %v3910_v20 = vld [vmem:[%s4873_s2] sm:$0xff]   ;;  %v2826_v31 = vld [vmem:[%s4872_s1 + $0x8] sm:$0xf]  ;;  %v3911_v32 = vld [vmem:[%s4873_s2 + $0xb8] sm:$0xff]  }
   0x8   :  { %3439 = vmatprep.subr.bf16.mxu0 %v4040_v0  ;;  %3459 = vmatprep.subr.bf16.mxu1 %v4040_v0  ;;  %v3912_v33 = vld [vmem:[%s4873_s2 + $0xb0] sm:$0xff]   ;;  %v3913_v34 = vld [vmem:[%s4873_s2 + $0xa8] sm:$0xff]   ;;  %v3914_v35 = vld [vmem:[%s4873_s2 + $0xa0] sm:$0xff]  }
   0x9   :  { %3453 = vmatprep.mubr.msk.bf16.mxu0 %vm4041_vm1, %v4040_v0  ;;  %3473 = vmatprep.mubr.msk.bf16.mxu1 %vm4041_vm1, %v4040_v0  ;;  %v3915_v36 = vld [vmem:[%s4873_s2 + $0x98] sm:$0xff]   ;;  %v3916_v37 = vld [vmem:[%s4873_s2 + $0x90] sm:$0xff]   ;;  %v3917_v38 = vld [vmem:[%s4873_s2 + $0x88] sm:$0xff]  }
   0xa   :  { %v3918_v39 = vld [vmem:[%s4873_s2 + $0x80] sm:$0xff]   ;;  %v3919_v40 = vld [vmem:[%s4873_s2 + $0xf8] sm:$0xff]   ;;  %v3920_v41 = vld [vmem:[%s4873_s2 + $0xf0] sm:$0xff]  }
   0xb   :  { %3440 = vmatpush3.bf16.msra.mxu0 %v3897_v7  ;;  %3460 = vmatpush3.bf16.msra.mxu1 %v3898_v8  ;;  %v3921_v42 = vld [vmem:[%s4873_s2 + $0xe8] sm:$0xff]   ;;  %v3923_v43 = vld [vmem:[%s4873_s2 + $0xe0] sm:$0xff]   ;;  %v3925_v44 = vld [vmem:[%s4873_s2 + $0xd8] sm:$0xff]  }
   0xc   :  { %3441 = vmatprep.subr.bf16.mxu0 %v4040_v0  ;;  %3461 = vmatprep.subr.bf16.mxu1 %v4040_v0  ;;  %v2852_v59 = vld [vmem:[%s4872_s1 + $0xc] sm:$0xf]  ;;  %v2878_v60 = vld [vmem:[%s4872_s1 + $0x10] sm:$0xf]  ;;  %v3922_v61 = vld [vmem:[%s4873_s2 + $0x138] sm:$0xff]  }
   0xd   :  { %v3924_v62 = vld [vmem:[%s4873_s2 + $0x130] sm:$0xff]   ;;  %v3926_v63 = vld [vmem:[%s4873_s2 + $0x128] sm:$0xff]   ;;  %v3928_v2 = vld [vmem:[%s4873_s2 + $0x120] sm:$0xff]  }
   0xe   :  { %v3927_v1 = vld [vmem:[%s4873_s2 + $0xd0] sm:$0xff]   ;;  %v3929_v3 = vld [vmem:[%s4873_s2 + $0xc8] sm:$0xff]   ;;  %v3930_v5 = vld [vmem:[%s4873_s2 + $0x118] sm:$0xff]  }
   0xf   :  { %3442 = vmatpush3.bf16.msra.mxu0 %v3899_v9  ;;  %3462 = vmatpush3.bf16.msra.mxu1 %v3900_v10  ;;  %v3931_v6 = vld [vmem:[%s4873_s2 + $0xc0] sm:$0xff]   ;;  %v3932_v7 = vld [vmem:[%s4873_s2 + $0x110] sm:$0xff]   ;;  %v3933_v8 = vld [vmem:[%s4873_s2 + $0x108] sm:$0xff]  }
  0x10   :  { %3443 = vmatprep.subr.bf16.mxu0 %v4040_v0  ;;  %3463 = vmatprep.subr.bf16.mxu1 %v4040_v0  ;;  %v3934_v9 = vld [vmem:[%s4873_s2 + $0x100] sm:$0xff]  }
  0x13   :  { %3444 = vmatpush3.bf16.msra.mxu0 %v3901_v11  ;;  %3464 = vmatpush3.bf16.msra.mxu1 %v3902_v12 }
  0x14   :  { %3445 = vmatprep.subr.bf16.mxu0 %v4040_v0  ;;  %3465 = vmatprep.subr.bf16.mxu1 %v4040_v0 }
  0x17   :  { %3446 = vmatpush3.bf16.msra.mxu0 %v3903_v13  ;;  %3466 = vmatpush3.bf16.msra.mxu1 %v3904_v14 }
  0x18   :  { %3447 = vmatprep.subr.bf16.mxu0 %v4040_v0  ;;  %3467 = vmatprep.subr.bf16.mxu1 %v4040_v0 }
  0x1b   :  { %3448 = vmatpush3.bf16.msra.mxu0 %v3905_v15  ;;  %3468 = vmatpush3.bf16.msra.mxu1 %v3906_v16 }
  0x1c   :  { %3449 = vmatprep.subr.bf16.mxu0 %v4040_v0  ;;  %3469 = vmatprep.subr.bf16.mxu1 %v4040_v0 }
  0x1f   :  { %3450 = vmatpush3.bf16.msra.mxu0 %v3907_v17  ;;  %3470 = vmatpush3.bf16.msra.mxu1 %v3908_v18 }
  0x20   :  { %3451 = vmatprep.subr.bf16.mxu0 %v4040_v0  ;;  %3471 = vmatprep.subr.bf16.mxu1 %v4040_v0 }
  0x23   :  { %3452 = vmatpush3.bf16.msra.mxu0 %v3909_v19  ;;  %3472 = vmatpush3.bf16.msra.mxu1 %v3910_v20 }
  0x24   :  { %3477 = vmatprep.subr.bf16.mxu1 %v4040_v0  ;;  %3509 = vmatprep.subr.bf16.mxu0 %v4040_v0 }
  0xc6   :  { %v71_v21 = vpop.f32.mrf.mxu0  ;;  %v133_v22 = vpop.f32.mrf.mxu1 }
  0xc7   :  { %v77_v23 = vpack.c.bf16 %v71_v21, %v71_v21  ;;  %v139_v24 = vpack.c.bf16 %v133_v22, %v133_v22  ;;  %v2904_v21 = vld [vmem:[%s4872_s1 + $0x14] sm:$0xf] }
  0xc8   :  { %v3429_v25 = vpop.f32.mrf.mxu0  ;;  %v3435_v26 = vpop.f32.mrf.mxu1 }
  0xc9   :  { %3454 = vmatmul.mubr.bf16.vlgmr.msra.gmra.mxu0 %v139_v24  ;;  %3474 = vmatmul.mubr.bf16.vlgmr.msra.gmra.mxu1 %v77_v23  ;;  %v3935_v23 = vld [vmem:[%s4873_s2 + $0x178] sm:$0xff]   ;;  %v3936_v26 = vld [vmem:[%s4873_s2 + $0x170] sm:$0xff]  }
  0xca   :  { %v74_v27 = vpop.f32.mrf.mxu0  ;;  %3478 = vmatpush3.bf16.msra.mxu1 %v4094_v4  ;;  %3479 = vmatprep.mubr.msk.bf16.mxu1 %vm4041_vm1, %v4040_v0  ;;  %v136_v28 = vpop.f32.mrf.mxu1 }
  0xcb   :  { %3483 = vmatprep.subr.bf16.mxu1 %v4040_v0  ;;  %3525 = vmatprep.mubr.msk.bf16.mxu0 %vm4041_vm1, %v4040_v0  ;;  %v2930_v28 = vld [vmem:[%s4872_s1 + $0x18] sm:$0xf] }
  0xcc   :  { %v3430_v29 = vpop.f32.mrf.mxu0  ;;  %v3436_v30 = vpop.f32.mrf.mxu1  ;;  %3510 = vmatpush3.bf16.msra.mxu0 %v3919_v40  ;;  %v3948_v40 = vld [vmem:[%s4873_s2 + $0x190] sm:$0xff]  }
  0xcd   :  { %3511 = vmatprep.subr.bf16.mxu0 %v4040_v0  ;;  %v3938_v29 = vld [vmem:[%s4873_s2 + $0x1b8] sm:$0xff]   ;;  %v3937_v30 = vld [vmem:[%s4873_s2 + $0x168] sm:$0xff]  }
  0xd0   :  { %3512 = vmatpush3.bf16.msra.mxu0 %v3920_v41  ;;  %v3949_v41 = vld [vmem:[%s4873_s2 + $0x188] sm:$0xff]  }
  0xd1   :  { %3480 = vmatmul.mubr.msk.bf16.vlgmr.msra.gmra.mxu1 %vm29_vm2, %v2826_v31  ;;  %3513 = vmatprep.subr.bf16.mxu0 %v4040_v0  ;;  %v3940_v31 = vld [vmem:[%s4873_s2 + $0x1b0] sm:$0xff]  }
  0xd2   :  { %3484 = vmatpush3.bf16.msra.mxu1 %v3911_v32  ;;  %3499 = vmatprep.mubr.msk.bf16.mxu1 %vm4041_vm1, %v4040_v0  ;;  %v3939_v32 = vld [vmem:[%s4873_s2 + $0x160] sm:$0xff]  }
  0xd3   :  { %3485 = vmatprep.subr.bf16.mxu1 %v4040_v0 }
  0xd4   :  { %3514 = vmatpush3.bf16.msra.mxu0 %v3921_v42  ;;  %v3950_v42 = vld [vmem:[%s4873_s2 + $0x180] sm:$0xff]  }
  0xd5   :  { %3515 = vmatprep.subr.bf16.mxu0 %v4040_v0 }
  0xd6   :  { %3486 = vmatpush3.bf16.msra.mxu1 %v3912_v33  ;;  %v3942_v33 = vld [vmem:[%s4873_s2 + $0x1a8] sm:$0xff]  }
  0xd7   :  { %3487 = vmatprep.subr.bf16.mxu1 %v4040_v0 }
  0xd8   :  { %3516 = vmatpush3.bf16.msra.mxu0 %v3923_v43 }
  0xd9   :  { %3517 = vmatprep.subr.bf16.mxu0 %v4040_v0 }
  0xda   :  { %3488 = vmatpush3.bf16.msra.mxu1 %v3913_v34  ;;  %v3941_v34 = vld [vmem:[%s4873_s2 + $0x158] sm:$0xff]  }
  0xdb   :  { %3489 = vmatprep.subr.bf16.mxu1 %v4040_v0 }
  0xdc   :  { %3518 = vmatpush3.bf16.msra.mxu0 %v3925_v44 }
  0xdd   :  { %3519 = vmatprep.subr.bf16.mxu0 %v4040_v0 }
  0xde   :  { %3490 = vmatpush3.bf16.msra.mxu1 %v3914_v35  ;;  %v3943_v35 = vld [vmem:[%s4873_s2 + $0x150] sm:$0xff]  }
  0xdf   :  { %3491 = vmatprep.subr.bf16.mxu1 %v4040_v0 }
  0xe0   :  { %3520 = vmatpush3.bf16.msra.mxu0 %v3927_v1  ;;  %v3952_v1 = vld [vmem:[%s4873_s2 + $0x1f0] sm:$0xff]  }
  0xe1   :  { %3521 = vmatprep.subr.bf16.mxu0 %v4040_v0 }
  0xe2   :  { %3492 = vmatpush3.bf16.msra.mxu1 %v3915_v36  ;;  %v3944_v36 = vld [vmem:[%s4873_s2 + $0x1a0] sm:$0xff]  }
  0xe3   :  { %3493 = vmatprep.subr.bf16.mxu1 %v4040_v0 }
  0xe4   :  { %3522 = vmatpush3.bf16.msra.mxu0 %v3929_v3  ;;  %v3954_v3 = vld [vmem:[%s4873_s2 + $0x238] sm:$0xff]  }
  0xe5   :  { %3523 = vmatprep.subr.bf16.mxu0 %v4040_v0 }
  0xe6   :  { %3494 = vmatpush3.bf16.msra.mxu1 %v3916_v37  ;;  %v3945_v37 = vld [vmem:[%s4873_s2 + $0x148] sm:$0xff]  }
  0xe7   :  { %3495 = vmatprep.subr.bf16.mxu1 %v4040_v0 }
  0xe8   :  { %3524 = vmatpush3.bf16.msra.mxu0 %v3931_v6  ;;  %v3956_v6 = vld [vmem:[%s4873_s2 + $0x230] sm:$0xff]  }
  0xe9   :  { %3555 = vmatprep.subr.bf16.mxu0 %v4040_v0 }
  0xea   :  { %3496 = vmatpush3.bf16.msra.mxu1 %v3917_v38  ;;  %v3946_v38 = vld [vmem:[%s4873_s2 + $0x198] sm:$0xff]  }
  0xeb   :  { %3497 = vmatprep.subr.bf16.mxu1 %v4040_v0 }
  0xee   :  { %3498 = vmatpush3.bf16.msra.mxu1 %v3918_v39  ;;  %v3947_v39 = vld [vmem:[%s4873_s2 + $0x140] sm:$0xff]  }
  0xef   :  { %3503 = vmatprep.subr.bf16.mxu1 %v4040_v0 }
 0x189   :  { %v239_v45 = vpop.f32.mrf.mxu0  ;;  %v327_v46 = vpop.f32.mrf.mxu1 }
 0x18a   :  { %v328_v47 = vadd.f32 %v327_v46, %v239_v45 }
 0x18b   :  { %v3475_v48 = vpop.f32.mrf.mxu1  ;;  %v3455_v49 = vpop.f32.mrf.mxu0 }
 0x18d   :  { %v330_v50 = vpop.f32.mrf.mxu1  ;;  %v242_v51 = vpop.f32.mrf.mxu0 }
 0x18f   :  { %v3476_v52 = vpop.f32.mrf.mxu1  ;;  %v3456_v53 = vpop.f32.mrf.mxu0 }
 0x191   :  { %v372_v54 = vpop.f32.mrf.mxu1 }
 0x192   :  { %v378_v55 = vpack.c.bf16 %v372_v54, %v372_v54 }
 0x193   :  { %v3481_v56 = vpop.f32.mrf.mxu1 }
 0x194   :  { %3500 = vmatmul.mubr.bf16.vlgmr.msra.gmra.mxu1 %v378_v55 }
 0x195   :  { %v375_v57 = vpop.f32.mrf.mxu1  ;;  %3504 = vmatpush3.bf16.msra.mxu1 %v4094_v4  ;;  %3505 = vmatprep.mubr.msk.bf16.mxu1 %vm4041_vm1, %v4040_v0 }
 0x196   :  { %3529 = vmatprep.subr.bf16.mxu1 %v4040_v0 }
 0x197   :  { %v3482_v58 = vpop.f32.mrf.mxu1 }
 0x19c   :  { %3506 = vmatmul.mubr.msk.bf16.vlgmr.msra.gmra.mxu1 %vm29_vm2, %v2852_v59  ;;  %v2956_v59 = vld [vmem:[%s4872_s1 + $0x1c] sm:$0xf] }
 0x19d   :  { %3530 = vmatpush3.bf16.msra.mxu1 %v4094_v4  ;;  %3531 = vmatprep.mubr.msk.bf16.mxu1 %vm4041_vm1, %v4040_v0 }
 0x19e   :  { %3535 = vmatprep.subr.bf16.mxu1 %v4040_v0 }
 0x1a4   :  { %3532 = vmatmul.mubr.msk.bf16.vlgmr.msra.gmra.mxu1 %vm29_vm2, %v2878_v60 }
 0x1a5   :  { %3536 = vmatpush3.bf16.msra.mxu1 %v3922_v61  ;;  %3551 = vmatprep.mubr.msk.bf16.mxu1 %vm4041_vm1, %v4040_v0  ;;  %v3951_v61 = vld [vmem:[%s4873_s2 + $0x1f8] sm:$0xff]  }
 0x1a6   :  { %3537 = vmatprep.subr.bf16.mxu1 %v4040_v0 }
 0x1a9   :  { %3538 = vmatpush3.bf16.msra.mxu1 %v3924_v62 }
 0x1aa   :  { %3539 = vmatprep.subr.bf16.mxu1 %v4040_v0 }
 0x1ad   :  { %3540 = vmatpush3.bf16.msra.mxu1 %v3926_v63 }
 0x1ae   :  { %3541 = vmatprep.subr.bf16.mxu1 %v4040_v0 }
 0x1b1   :  { %3542 = vmatpush3.bf16.msra.mxu1 %v3928_v2 }
 0x1b2   :  { %3543 = vmatprep.subr.bf16.mxu1 %v4040_v0 }
 0x1b5   :  { %3544 = vmatpush3.bf16.msra.mxu1 %v3930_v5  ;;  %v3953_v5 = vld [vmem:[%s4873_s2 + $0x1e8] sm:$0xff]  }
 0x1b6   :  { %3545 = vmatprep.subr.bf16.mxu1 %v4040_v0 }
 0x1b9   :  { %3546 = vmatpush3.bf16.msra.mxu1 %v3932_v7  ;;  %v3955_v7 = vld [vmem:[%s4873_s2 + $0x1e0] sm:$0xff]  }
 0x1ba   :  { %3547 = vmatprep.subr.bf16.mxu1 %v4040_v0 }
 0x1bd   :  { %3548 = vmatpush3.bf16.msra.mxu1 %v3933_v8  ;;  %v3958_v8 = vld [vmem:[%s4873_s2 + $0x228] sm:$0xff]  }
 0x1be   :  { %3549 = vmatprep.subr.bf16.mxu1 %v4040_v0 }
 0x1c1   :  { %3550 = vmatpush3.bf16.msra.mxu1 %v3934_v9  ;;  %v3957_v9 = vld [vmem:[%s4873_s2 + $0x1d8] sm:$0xff]  }
 0x1c2   :  { %3581 = vmatprep.subr.bf16.mxu1 %v4040_v0 }
 0x254   :  { %v478_v10 = vpop.f32.mrf.mxu1 }
 0x255   :  { %v4300_v11 = vadd.f32 %v478_v10, %v328_v47  ;;  %v3959_v10 = vld [vmem:[%s4873_s2 + $0x1d0] sm:$0xff]  }
 0x256   :  { %v3501_v12 = vpop.f32.mrf.mxu1 }
 0x257   :  { %v3961_v12 = vld [vmem:[%s4873_s2 + $0x1c8] sm:$0xff]  }
 0x258   :  { %v481_v13 = vpop.f32.mrf.mxu1 }
 0x259   :  { %v3962_v13 = vld [vmem:[%s4873_s2 + $0x218] sm:$0xff]  }
 0x25a   :  { %v3502_v14 = vpop.f32.mrf.mxu1 }
 0x25b   :  { %v3963_v14 = vld [vmem:[%s4873_s2 + $0x1c0] sm:$0xff]  }
 0x25c   :  { %v524_v15 = vpop.f32.mrf.mxu1 }
 0x25d   :  { %v530_v16 = vpack.c.bf16 %v524_v15, %v524_v15  ;;  %v3964_v15 = vld [vmem:[%s4873_s2 + $0x210] sm:$0xff]  }
 0x25e   :  { %v3507_v17 = vpop.f32.mrf.mxu1 }
 0x25f   :  { %3526 = vmatmul.mubr.bf16.vlgmr.msra.gmra.mxu0 %v530_v16  ;;  %v3965_v16 = vld [vmem:[%s4873_s2 + $0x208] sm:$0xff]   ;;  %v3966_v17 = vld [vmem:[%s4873_s2 + $0x200] sm:$0xff]  }
 0x260   :  { %v527_v18 = vpop.f32.mrf.mxu1  ;;  %3556 = vmatpush3.bf16.msra.mxu0 %v4094_v4  ;;  %3557 = vmatprep.mubr.msk.bf16.mxu0 %vm4041_vm1, %v4040_v0 }
 0x261   :  { %3561 = vmatprep.subr.bf16.mxu0 %v4040_v0 }
 0x262   :  { %v3508_v19 = vpop.f32.mrf.mxu1 }
 0x264   :  { %v676_v20 = vpop.f32.mrf.mxu1 }
 0x265   :  { %v682_v22 = vpack.c.bf16 %v676_v20, %v676_v20 }
 0x266   :  { %v3533_v24 = vpop.f32.mrf.mxu1 }
 0x267   :  { %3552 = vmatmul.mubr.bf16.vlgmr.msra.gmra.mxu1 %v682_v22  ;;  %3558 = vmatmul.mubr.msk.bf16.vlgmr.msra.gmra.mxu0 %vm29_vm2, %v2904_v21 }
 0x268   :  { %v679_v25 = vpop.f32.mrf.mxu1  ;;  %3582 = vmatpush3.bf16.msra.mxu1 %v4094_v4  ;;  %3583 = vmatprep.mubr.msk.bf16.mxu1 %vm4041_vm1, %v4040_v0 }
 0x269   :  { %3562 = vmatpush3.bf16.msra.mxu0 %v3935_v23  ;;  %3587 = vmatprep.subr.bf16.mxu1 %v4040_v0 }
 0x26a   :  { %v3534_v27 = vpop.f32.mrf.mxu1  ;;  %3563 = vmatprep.subr.bf16.mxu0 %v4040_v0  ;;  %3577 = vmatprep.mubr.msk.bf16.mxu0 %vm4041_vm1, %v4040_v0 }
 0x26d   :  { %3564 = vmatpush3.bf16.msra.mxu0 %v3936_v26 }
 0x26e   :  { %3565 = vmatprep.subr.bf16.mxu0 %v4040_v0 }
 0x26f   :  { %3584 = vmatmul.mubr.msk.bf16.vlgmr.msra.gmra.mxu1 %vm29_vm2, %v2930_v28 }
 0x270   :  { %3588 = vmatpush3.bf16.msra.mxu1 %v3938_v29  ;;  %3603 = vmatprep.mubr.msk.bf16.mxu1 %vm4041_vm1, %v4040_v0 }
 0x271   :  { %3566 = vmatpush3.bf16.msra.mxu0 %v3937_v30  ;;  %3589 = vmatprep.subr.bf16.mxu1 %v4040_v0 }
 0x272   :  { %3567 = vmatprep.subr.bf16.mxu0 %v4040_v0 }
 0x274   :  { %3590 = vmatpush3.bf16.msra.mxu1 %v3940_v31 }
 0x275   :  { %3568 = vmatpush3.bf16.msra.mxu0 %v3939_v32  ;;  %3591 = vmatprep.subr.bf16.mxu1 %v4040_v0 }
 0x276   :  { %3569 = vmatprep.subr.bf16.mxu0 %v4040_v0 }
 0x278   :  { %3592 = vmatpush3.bf16.msra.mxu1 %v3942_v33 }
 0x279   :  { %3570 = vmatpush3.bf16.msra.mxu0 %v3941_v34  ;;  %3593 = vmatprep.subr.bf16.mxu1 %v4040_v0 }
 0x27a   :  { %3571 = vmatprep.subr.bf16.mxu0 %v4040_v0 }
 0x27c   :  { %3594 = vmatpush3.bf16.msra.mxu1 %v3944_v36 }
 0x27d   :  { %3572 = vmatpush3.bf16.msra.mxu0 %v3943_v35  ;;  %3595 = vmatprep.subr.bf16.mxu1 %v4040_v0 }
 0x27e   :  { %3573 = vmatprep.subr.bf16.mxu0 %v4040_v0 }
 0x280   :  { %3596 = vmatpush3.bf16.msra.mxu1 %v3946_v38  ;;  %v3967_v38 = vld [vmem:[%s4874_s5 + $0x38] sm:$0xff]  }
 0x281   :  { %3574 = vmatpush3.bf16.msra.mxu0 %v3945_v37  ;;  %3597 = vmatprep.subr.bf16.mxu1 %v4040_v0 }
 0x282   :  { %3575 = vmatprep.subr.bf16.mxu0 %v4040_v0 }
 0x284   :  { %3598 = vmatpush3.bf16.msra.mxu1 %v3948_v40  ;;  %v3970_v40 = vld [vmem:[%s4874_s5 + $0x28] sm:$0xff]  }
 0x285   :  { %3576 = vmatpush3.bf16.msra.mxu0 %v3947_v39  ;;  %3599 = vmatprep.subr.bf16.mxu1 %v4040_v0  ;;  %v3968_v39 = vld [vmem:[%s4874_s5 + $0x30] sm:$0xff]  }
 0x286   :  { %3607 = vmatprep.subr.bf16.mxu0 %v4040_v0 }
 0x288   :  { %3600 = vmatpush3.bf16.msra.mxu1 %v3949_v41  ;;  %v3972_v41 = vld [vmem:[%s4874_s5 + $0x20] sm:$0xff]  }
 0x289   :  { %3601 = vmatprep.subr.bf16.mxu1 %v4040_v0 }
 0x28c   :  { %3602 = vmatpush3.bf16.msra.mxu1 %v3950_v42  ;;  %v3974_v42 = vld [vmem:[%s4874_s5 + $0x18] sm:$0xff]  }
 0x28d   :  { %3633 = vmatprep.subr.bf16.mxu1 %v4040_v0 }
 0x31f   :  { %v630_v43 = vpop.f32.mrf.mxu0 }
 0x320   :  { %v636_v44 = vadd.f32 %v630_v43, %v4300_v11  ;;  %v3960_v11 = vld [vmem:[%s4873_s2 + $0x220] sm:$0xff]   ;;  %v3976_v43 = vld [vmem:[%s4874_s5 + $0x10] sm:$0xff]  }
 0x321   :  { %v3527_v45 = vpop.f32.mrf.mxu0 }
 0x322   :  { %v3980_v45 = vld [vmem:[%s4874_s5] sm:$0xff]  }
 0x323   :  { %v633_v46 = vpop.f32.mrf.mxu0 }
 0x325   :  { %v3528_v47 = vpop.f32.mrf.mxu0 }
 0x327   :  { %v782_v48 = vpop.f32.mrf.mxu1  ;;  %v828_v49 = vpop.f32.mrf.mxu0 }
 0x328   :  { %v4387_v50 = vadd.f32 %v782_v48, %v636_v44  ;;  %v834_v51 = vpack.c.bf16 %v828_v49, %v828_v49  ;;  %v3978_v44 = vld [vmem:[%s4874_s5 + $0x8] sm:$0xff]  }
 0x329   :  { %v3553_v52 = vpop.f32.mrf.mxu1  ;;  %v3559_v53 = vpop.f32.mrf.mxu0 }
 0x32a   :  { %3578 = vmatmul.mubr.bf16.vlgmr.msra.gmra.mxu0 %v834_v51  ;;  %v3008_v52 = vld [vmem:[%s4875_s3] ss:$0 sm:$0xff] }
 0x32b   :  { %v785_v54 = vpop.f32.mrf.mxu1  ;;  %v831_v55 = vpop.f32.mrf.mxu0  ;;  %3608 = vmatpush3.bf16.msra.mxu0 %v4094_v4  ;;  %3609 = vmatprep.mubr.msk.bf16.mxu0 %vm4041_vm1, %v4040_v0 }
 0x32c   :  { %3613 = vmatprep.subr.bf16.mxu0 %v4040_v0 }
 0x32d   :  { %v3554_v56 = vpop.f32.mrf.mxu1  ;;  %v3560_v57 = vpop.f32.mrf.mxu0 }
 0x32f   :  { %v980_v58 = vpop.f32.mrf.mxu1 }
 0x330   :  { %v986_v60 = vpack.c.bf16 %v980_v58, %v980_v58 }
 0x331   :  { %v3585_v62 = vpop.f32.mrf.mxu1 }
 0x332   :  { %3604 = vmatmul.mubr.bf16.vlgmr.msra.gmra.mxu1 %v986_v60  ;;  %3610 = vmatmul.mubr.msk.bf16.vlgmr.msra.gmra.mxu0 %vm29_vm2, %v2956_v59  ;;  %v3010_v62 = vld [vmem:[%s4876_s4 + $0x4] sm:$0xf] }
 0x333   :  { %v983_v63 = vpop.f32.mrf.mxu1  ;;  %3634 = vmatpush3.bf16.msra.mxu1 %v4094_v4  ;;  %3635 = vmatprep.mubr.msk.bf16.mxu1 %vm4041_vm1, %v4040_v0  ;;  %v2982_v4 = vld [vmem:[%s4872_s1 + $0x20] sm:$0xf] }
 0x334   :  { %3614 = vmatpush3.bf16.msra.mxu0 %v3951_v61  ;;  %3639 = vmatprep.subr.bf16.mxu1 %v4040_v0  ;;  %v1408_v61 = vld [vmem:[%s4876_s4] sm:$0xf]  ;;  %v3969_v63 = vld [vmem:[%s4874_s5 + $0x78] sm:$0xff]  }
 0x335   :  { %v3586_v2 = vpop.f32.mrf.mxu1  ;;  %3615 = vmatprep.subr.bf16.mxu0 %v4040_v0  ;;  %3629 = vmatprep.mubr.msk.bf16.mxu0 %vm4041_vm1, %v4040_v0 }
 0x336   :  { %v3973_v2 = vld [vmem:[%s4874_s5 + $0x68] sm:$0xff]  }
 0x338   :  { %3616 = vmatpush3.bf16.msra.mxu0 %v3952_v1  ;;  %v3971_v1 = vld [vmem:[%s4874_s5 + $0x70] sm:$0xff]  }
 0x339   :  { %3617 = vmatprep.subr.bf16.mxu0 %v4040_v0 }
 0x33a   :  { %3636 = vmatmul.mubr.msk.bf16.vlgmr.msra.gmra.mxu1 %vm29_vm2, %v2982_v4  ;;  %v3975_v4 = vld [vmem:[%s4874_s5 + $0x60] sm:$0xff]  }
 0x33b   :  { %3640 = vmatpush3.bf16.msra.mxu1 %v3954_v3  ;;  %3655 = vmatprep.mubr.msk.bf16.mxu1 %vm4041_vm1, %v4040_v0  ;;  %v3977_v3 = vld [vmem:[%s4874_s5 + $0x58] sm:$0xff]  }
 0x33c   :  { %3618 = vmatpush3.bf16.msra.mxu0 %v3953_v5  ;;  %3641 = vmatprep.subr.bf16.mxu1 %v4040_v0  ;;  %v3979_v5 = vld [vmem:[%s4874_s5 + $0x50] sm:$0xff]  }
 0x33d   :  { %3619 = vmatprep.subr.bf16.mxu0 %v4040_v0 }
 0x33f   :  { %3642 = vmatpush3.bf16.msra.mxu1 %v3956_v6  ;;  %v3981_v6 = vld [vmem:[%s4874_s5 + $0x48] sm:$0xff]  }
 0x340   :  { %3620 = vmatpush3.bf16.msra.mxu0 %v3955_v7  ;;  %3643 = vmatprep.subr.bf16.mxu1 %v4040_v0  ;;  %v3982_v7 = vld [vmem:[%s4874_s5 + $0x40] sm:$0xff]  }
 0x341   :  { %3621 = vmatprep.subr.bf16.mxu0 %v4040_v0 }
 0x343   :  { %3644 = vmatpush3.bf16.msra.mxu1 %v3958_v8 }
 0x344   :  { %3622 = vmatpush3.bf16.msra.mxu0 %v3957_v9  ;;  %3645 = vmatprep.subr.bf16.mxu1 %v4040_v0 }
 0x345   :  { %3623 = vmatprep.subr.bf16.mxu0 %v4040_v0 }
 0x347   :  { %3646 = vmatpush3.bf16.msra.mxu1 %v3960_v11 }
 0x348   :  { %3624 = vmatpush3.bf16.msra.mxu0 %v3959_v10  ;;  %3647 = vmatprep.subr.bf16.mxu1 %v4040_v0 }
 0x349   :  { %3625 = vmatprep.subr.bf16.mxu0 %v4040_v0 }
 0x34b   :  { %3648 = vmatpush3.bf16.msra.mxu1 %v3962_v13 }
 0x34c   :  { %3626 = vmatpush3.bf16.msra.mxu0 %v3961_v12  ;;  %3649 = vmatprep.subr.bf16.mxu1 %v4040_v0 }
 0x34d   :  { %3627 = vmatprep.subr.bf16.mxu0 %v4040_v0 }
 0x34f   :  { %3650 = vmatpush3.bf16.msra.mxu1 %v3964_v15 }
 0x350   :  { %3628 = vmatpush3.bf16.msra.mxu0 %v3963_v14  ;;  %3651 = vmatprep.subr.bf16.mxu1 %v4040_v0  ;;  %v3070_v14 = vld [vmem:[%s4876_s4 + $0xc] sm:$0xf] }
 0x351   :  { %3659 = vmatprep.subr.bf16.mxu0 %v4040_v0 }
 0x353   :  { %3652 = vmatpush3.bf16.msra.mxu1 %v3965_v16  ;;  %v3983_v16 = vld [vmem:[%s4874_s5 + $0xf8] sm:$0xff]  }
 0x354   :  { %3653 = vmatprep.subr.bf16.mxu1 %v4040_v0 }
 0x357   :  { %3654 = vmatpush3.bf16.msra.mxu1 %v3966_v17 }
 0x358   :  { %3691 = vmatprep.subr.bf16.mxu1 %v4040_v0 }
 0x3ea   :  { %v934_v18 = vpop.f32.mrf.mxu0 }
 0x3eb   :  { %v940_v19 = vadd.f32 %v934_v18, %v4387_v50 }
 0x3ec   :  { %v3579_v20 = vpop.f32.mrf.mxu0 }
 0x3ee   :  { %v937_v21 = vpop.f32.mrf.mxu0 }
 0x3ef   :  { %v3044_v21 = vld [vmem:[%s4876_s4 + $0x8] sm:$0xf] }
 0x3f0   :  { %v3580_v22 = vpop.f32.mrf.mxu0 }
 0x3f1   :  { %v3985_v22 = vld [vmem:[%s4874_s5 + $0xb8] sm:$0xff]  }
 0x3f2   :  { %v1086_v23 = vpop.f32.mrf.mxu1  ;;  %v1132_v24 = vpop.f32.mrf.mxu0 }
 0x3f3   :  { %v1092_v25 = vadd.f32 %v1086_v23, %v940_v19  ;;  %v1138_v26 = vpack.c.bf16 %v1132_v24, %v1132_v24  ;;  %v3984_v19 = vld [vmem:[%s4874_s5 + $0xf0] sm:$0xff]   ;;  %v3986_v23 = vld [vmem:[%s4874_s5 + $0xe8] sm:$0xff]  }
 0x3f4   :  { %v3605_v27 = vpop.f32.mrf.mxu1  ;;  %v3611_v28 = vpop.f32.mrf.mxu0  ;;  %v3987_v24 = vld [vmem:[%s4874_s5 + $0xb0] sm:$0xff]  }
 0x3f5   :  { %3630 = vmatmul.mubr.bf16.vlgmr.msra.gmra.mxu0 %v1138_v26  ;;  %v3989_v26 = vld [vmem:[%s4874_s5 + $0xa8] sm:$0xff]   ;;  %v3990_v27 = vld [vmem:[%s4874_s5 + $0xd8] sm:$0xff]   ;;  %v3991_v28 = vld [vmem:[%s4874_s5 + $0xa0] sm:$0xff]  }
 0x3f6   :  { %v1089_v29 = vpop.f32.mrf.mxu1  ;;  %v1135_v30 = vpop.f32.mrf.mxu0  ;;  %3661 = vmatprep.mubr.msk.bf16.mxu0 %vm4041_vm1, %v4040_v0 }
 0x3f7   :  { %v3992_v29 = vld [vmem:[%s4874_s5 + $0xd0] sm:$0xff]   ;;  %v3993_v30 = vld [vmem:[%s4874_s5 + $0x98] sm:$0xff]  }
 0x3f8   :  { %v3606_v31 = vpop.f32.mrf.mxu1  ;;  %v3612_v32 = vpop.f32.mrf.mxu0 }
 0x3f9   :  { %v3994_v31 = vld [vmem:[%s4874_s5 + $0xc8] sm:$0xff]   ;;  %v3995_v32 = vld [vmem:[%s4874_s5 + $0x90] sm:$0xff]  }
 0x3fa   :  { %v1284_v33 = vpop.f32.mrf.mxu1 }
 0x3fb   :  { %v1290_v34 = vpack.c.bf16 %v1284_v33, %v1284_v33  ;;  %v3996_v33 = vld [vmem:[%s4874_s5 + $0xc0] sm:$0xff]  }
 0x3fc   :  { %v3637_v35 = vpop.f32.mrf.mxu1 }
 0x3fd   :  { %3656 = vmatmul.mubr.bf16.vlgmr.msra.gmra.mxu1 %v1290_v34  ;;  %v3997_v34 = vld [vmem:[%s4874_s5 + $0x88] sm:$0xff]   ;;  %v3998_v35 = vld [vmem:[%s4874_s5 + $0x80] sm:$0xff]  }
 0x3fe   :  { %v1287_v36 = vpop.f32.mrf.mxu1  ;;  %3707 = vmatprep.mubr.msk.bf16.mxu1 %vm4041_vm1, %v4040_v0  ;;  %3692 = vmatpush3.bf16.msra.mxu1 %v3967_v38 }
 0x3ff   :  { %3693 = vmatprep.subr.bf16.mxu1 %v4040_v0 }
 0x400   :  { %v3638_v37 = vpop.f32.mrf.mxu1 }
 0x402   :  { %3694 = vmatpush3.bf16.msra.mxu1 %v3968_v39 }
 0x403   :  { %3695 = vmatprep.subr.bf16.mxu1 %v4040_v0 }
 0x406   :  { %3696 = vmatpush3.bf16.msra.mxu1 %v3970_v40 }
 0x407   :  { %3697 = vmatprep.subr.bf16.mxu1 %v4040_v0 }
 0x40a   :  { %3698 = vmatpush3.bf16.msra.mxu1 %v3972_v41 }
 0x40b   :  { %3699 = vmatprep.subr.bf16.mxu1 %v4040_v0 }
 0x40e   :  { %3700 = vmatpush3.bf16.msra.mxu1 %v3974_v42 }
 0x40f   :  { %3701 = vmatprep.subr.bf16.mxu1 %v4040_v0 }
 0x412   :  { %3702 = vmatpush3.bf16.msra.mxu1 %v3976_v43 }
 0x413   :  { %3703 = vmatprep.subr.bf16.mxu1 %v4040_v0 }
 0x416   :  { %3704 = vmatpush3.bf16.msra.mxu1 %v3978_v44 }
 0x417   :  { %3705 = vmatprep.subr.bf16.mxu1 %v4040_v0 }
 0x41a   :  { %3706 = vmatpush3.bf16.msra.mxu1 %v3980_v45 }
 0x41b   :  { %3737 = vmatprep.subr.bf16.mxu1 %v4040_v0 }
 0x4b5   :  { %v1238_v46 = vpop.f32.mrf.mxu0 }
 0x4b6   :  { %v1244_v50 = vadd.f32 %v1238_v46, %v1092_v25  ;;  %v3988_v25 = vld [vmem:[%s4874_s5 + $0xe0] sm:$0xff]  }
 0x4b7   :  { %v3631_v47 = vpop.f32.mrf.mxu0 }
 0x4b9   :  { %v1241_v48 = vpop.f32.mrf.mxu0 }
 0x4bb   :  { %v3632_v49 = vpop.f32.mrf.mxu0 }
 0x4bd   :  { %v1390_v51 = vpop.f32.mrf.mxu1 }
 0x4be   :  { %v1396_v53 = vadd.f32 %v1390_v51, %v1244_v50  ;;  %v3122_v51 = vld [vmem:[%s4876_s4 + $0x14] sm:$0xf] }
 0x4bf   :  { %v3657_v54 = vpop.f32.mrf.mxu1 }
 0x4c0   :  { %v1404_v55 = vadd.f32 %v3008_v52, %v1396_v53  ;;  %v3999_v53 = vld [vmem:[%s4874_s5 + $0x178] sm:$0xff]  }
 0x4c1   :  { %v1393_v56 = vpop.f32.mrf.mxu1 }
 0x4c2   :  { %v1405_v57 = vmax.f32 %v1404_v55, 0.0  ;;  %v4000_v56 = vld [vmem:[%s4874_s5 + $0x170] sm:$0xff]  }
 0x4c3   :  { %v3658_v58 = vpop.f32.mrf.mxu1 }
 0x4c4   :  { %v1406_v59 = vpack.c.bf16 %v1405_v57, %v1405_v57  ;;  %v3096_v58 = vld [vmem:[%s4876_s4 + $0x10] sm:$0xf] }
 0x4c6   :  { %v4514_v60 = vsel %vm33_vm0, %v1406_v59, 0  ;;  %v4001_v59 = vld [vmem:[%s4874_s5 + $0x138] sm:$0xff]  }
 0x4c7   :  { %3660 = vmatpush3.bf16.msra.mxu0 %v4514_v60 }
 0x4c8   :  { %3665 = vmatprep.subr.bf16.mxu0 %v4040_v0 }
 0x4ca   :  { %3662 = vmatmul.mubr.msk.bf16.vlgmr.msra.gmra.mxu0 %vm29_vm2, %v1408_v61  ;;  %v4002_v61 = vld [vmem:[%s4874_s5 + $0x168] sm:$0xff]  }
 0x4cb   :  { %3666 = vmatpush3.bf16.msra.mxu0 %v4514_v60  ;;  %3667 = vmatprep.mubr.msk.bf16.mxu0 %vm4041_vm1, %v4040_v0 }
 0x4cc   :  { %3671 = vmatprep.subr.bf16.mxu0 %v4040_v0 }
 0x4d2   :  { %3668 = vmatmul.mubr.msk.bf16.vlgmr.msra.gmra.mxu0 %vm29_vm2, %v3010_v62  ;;  %v4003_v62 = vld [vmem:[%s4874_s5 + $0x130] sm:$0xff]  }
 0x4d3   :  { %3672 = vmatpush3.bf16.msra.mxu0 %v3969_v63  ;;  %3687 = vmatprep.mubr.msk.bf16.mxu0 %vm4041_vm1, %v4040_v0  ;;  %v4004_v63 = vld [vmem:[%s4874_s5 + $0x160] sm:$0xff]  }
 0x4d4   :  { %3673 = vmatprep.subr.bf16.mxu0 %v4040_v0 }
 0x4d7   :  { %3674 = vmatpush3.bf16.msra.mxu0 %v3971_v1  ;;  %v4005_v1 = vld [vmem:[%s4874_s5 + $0x128] sm:$0xff]  }
 0x4d8   :  { %3675 = vmatprep.subr.bf16.mxu0 %v4040_v0 }
 0x4db   :  { %3676 = vmatpush3.bf16.msra.mxu0 %v3973_v2  ;;  %v4006_v2 = vld [vmem:[%s4874_s5 + $0x158] sm:$0xff]  }
 0x4dc   :  { %3677 = vmatprep.subr.bf16.mxu0 %v4040_v0 }
 0x4df   :  { %3678 = vmatpush3.bf16.msra.mxu0 %v3975_v4  ;;  %v4007_v4 = vld [vmem:[%s4874_s5 + $0x120] sm:$0xff]  }
 0x4e0   :  { %3679 = vmatprep.subr.bf16.mxu0 %v4040_v0 }
 0x4e3   :  { %3680 = vmatpush3.bf16.msra.mxu0 %v3977_v3  ;;  %v4008_v3 = vld [vmem:[%s4874_s5 + $0x150] sm:$0xff]  }
 0x4e4   :  { %3681 = vmatprep.subr.bf16.mxu0 %v4040_v0 }
 0x4e7   :  { %3682 = vmatpush3.bf16.msra.mxu0 %v3979_v5  ;;  %v4009_v5 = vld [vmem:[%s4874_s5 + $0x118] sm:$0xff]  }
 0x4e8   :  { %3683 = vmatprep.subr.bf16.mxu0 %v4040_v0 }
 0x4eb   :  { %3684 = vmatpush3.bf16.msra.mxu0 %v3981_v6  ;;  %v4010_v6 = vld [vmem:[%s4874_s5 + $0x148] sm:$0xff]  }
 0x4ec   :  { %3685 = vmatprep.subr.bf16.mxu0 %v4040_v0 }
 0x4ef   :  { %3686 = vmatpush3.bf16.msra.mxu0 %v3982_v7  ;;  %v4011_v7 = vld [vmem:[%s4874_s5 + $0x110] sm:$0xff]  }
 0x4f0   :  { %3711 = vmatprep.subr.bf16.mxu0 %v4040_v0 }
 0x58a   :  { %v1449_v8 = vpop.f32.mrf.mxu0 }
 0x58b   :  { %v1455_v9 = vpack.c.bf16 %v1449_v8, %v1449_v8  ;;  %v4012_v8 = vld [vmem:[%s4874_s5 + $0x140] sm:$0xff]  }
 0x58c   :  { %v3663_v10 = vpop.f32.mrf.mxu0 }
 0x58d   :  { %3708 = vmatmul.mubr.bf16.vlgmr.msra.gmra.mxu1 %v1455_v9  ;;  %v4013_v9 = vld [vmem:[%s4874_s5 + $0x108] sm:$0xff]   ;;  %v4014_v10 = vld [vmem:[%s4874_s5 + $0x100] sm:$0xff]  }
 0x58e   :  { %3738 = vmatpush3.bf16.msra.mxu1 %v4514_v60  ;;  %v1452_v11 = vpop.f32.mrf.mxu0  ;;  %3739 = vmatprep.mubr.msk.bf16.mxu1 %vm4041_vm1, %v4040_v0 }
 0x58f   :  { %3743 = vmatprep.subr.bf16.mxu1 %v4040_v0 }
 0x590   :  { %v3664_v12 = vpop.f32.mrf.mxu0 }
 0x592   :  { %v1511_v13 = vpop.f32.mrf.mxu0 }
 0x593   :  { %v1517_v15 = vpack.c.bf16 %v1511_v13, %v1511_v13 }
 0x594   :  { %v3669_v17 = vpop.f32.mrf.mxu0 }
 0x595   :  { %3688 = vmatmul.mubr.bf16.vlgmr.msra.gmra.mxu0 %v1517_v15  ;;  %3740 = vmatmul.mubr.msk.bf16.vlgmr.msra.gmra.mxu1 %vm29_vm2, %v3070_v14 }
 0x596   :  { %3712 = vmatpush3.bf16.msra.mxu0 %v4514_v60  ;;  %v1514_v18 = vpop.f32.mrf.mxu0  ;;  %3713 = vmatprep.mubr.msk.bf16.mxu0 %vm4041_vm1, %v4040_v0 }
 0x597   :  { %3744 = vmatpush3.bf16.msra.mxu1 %v3983_v16  ;;  %3717 = vmatprep.subr.bf16.mxu0 %v4040_v0 }
 0x598   :  { %v3670_v20 = vpop.f32.mrf.mxu0  ;;  %3745 = vmatprep.subr.bf16.mxu1 %v4040_v0  ;;  %3759 = vmatprep.mubr.msk.bf16.mxu1 %vm4041_vm1, %v4040_v0 }
 0x59b   :  { %3746 = vmatpush3.bf16.msra.mxu1 %v3984_v19 }
 0x59c   :  { %3747 = vmatprep.subr.bf16.mxu1 %v4040_v0 }
 0x59d   :  { %3714 = vmatmul.mubr.msk.bf16.vlgmr.msra.gmra.mxu0 %vm29_vm2, %v3044_v21 }
 0x59e   :  { %3718 = vmatpush3.bf16.msra.mxu0 %v3985_v22  ;;  %3733 = vmatprep.mubr.msk.bf16.mxu0 %vm4041_vm1, %v4040_v0 }
 0x59f   :  { %3748 = vmatpush3.bf16.msra.mxu1 %v3986_v23  ;;  %3719 = vmatprep.subr.bf16.mxu0 %v4040_v0 }
 0x5a0   :  { %3749 = vmatprep.subr.bf16.mxu1 %v4040_v0 }
 0x5a2   :  { %3720 = vmatpush3.bf16.msra.mxu0 %v3987_v24 }
 0x5a3   :  { %3750 = vmatpush3.bf16.msra.mxu1 %v3988_v25  ;;  %3721 = vmatprep.subr.bf16.mxu0 %v4040_v0 }
 0x5a4   :  { %3751 = vmatprep.subr.bf16.mxu1 %v4040_v0 }
 0x5a6   :  { %3722 = vmatpush3.bf16.msra.mxu0 %v3989_v26 }
 0x5a7   :  { %3752 = vmatpush3.bf16.msra.mxu1 %v3990_v27  ;;  %3723 = vmatprep.subr.bf16.mxu0 %v4040_v0  ;;  %v3174_v27 = vld [vmem:[%s4876_s4 + $0x1c] sm:$0xf] }
 0x5a8   :  { %3753 = vmatprep.subr.bf16.mxu1 %v4040_v0 }
 0x5aa   :  { %3724 = vmatpush3.bf16.msra.mxu0 %v3991_v28 }
 0x5ab   :  { %3754 = vmatpush3.bf16.msra.mxu1 %v3992_v29  ;;  %3725 = vmatprep.subr.bf16.mxu0 %v4040_v0  ;;  %v4016_v29 = vld [vmem:[%s4874_s5 + $0x1f8] sm:$0xff]  }
 0x5ac   :  { %3755 = vmatprep.subr.bf16.mxu1 %v4040_v0 }
 0x5ae   :  { %3726 = vmatpush3.bf16.msra.mxu0 %v3993_v30 }
 0x5af   :  { %3756 = vmatpush3.bf16.msra.mxu1 %v3994_v31  ;;  %3727 = vmatprep.subr.bf16.mxu0 %v4040_v0 }
 0x5b0   :  { %3757 = vmatprep.subr.bf16.mxu1 %v4040_v0 }
 0x5b2   :  { %3728 = vmatpush3.bf16.msra.mxu0 %v3995_v32  ;;  %v4018_v32 = vld [vmem:[%s4874_s5 + $0x1f0] sm:$0xff]  }
 0x5b3   :  { %3758 = vmatpush3.bf16.msra.mxu1 %v3996_v33  ;;  %3729 = vmatprep.subr.bf16.mxu0 %v4040_v0 }
 0x5b4   :  { %3789 = vmatprep.subr.bf16.mxu1 %v4040_v0 }
 0x5b6   :  { %3730 = vmatpush3.bf16.msra.mxu0 %v3997_v34  ;;  %v3148_v34 = vld [vmem:[%s4876_s4 + $0x18] sm:$0xf] }
 0x5b7   :  { %3731 = vmatprep.subr.bf16.mxu0 %v4040_v0 }
 0x5ba   :  { %3732 = vmatpush3.bf16.msra.mxu0 %v3998_v35  ;;  %v4015_v35 = vld [vmem:[%s4874_s5 + $0x1b8] sm:$0xff]  }
 0x5bb   :  { %3763 = vmatprep.subr.bf16.mxu0 %v4040_v0 }
 0x64d   :  { %v1705_v36 = vpop.f32.mrf.mxu1 }
 0x64f   :  { %v3709_v37 = vpop.f32.mrf.mxu1 }
 0x650   :  { %v4017_v37 = vld [vmem:[%s4874_s5 + $0x1b0] sm:$0xff]  }
 0x651   :  { %v1708_v38 = vpop.f32.mrf.mxu1 }
 0x652   :  { %v4022_v38 = vld [vmem:[%s4874_s5 + $0x1e0] sm:$0xff]  }
 0x653   :  { %v3710_v39 = vpop.f32.mrf.mxu1 }
 0x654   :  { %v4019_v39 = vld [vmem:[%s4874_s5 + $0x1a8] sm:$0xff]  }
 0x655   :  { %v1617_v40 = vpop.f32.mrf.mxu0  ;;  %v1902_v41 = vpop.f32.mrf.mxu1 }
 0x656   :  { %v4648_v42 = vadd.f32 %v1705_v36, %v1617_v40  ;;  %v1908_v43 = vpack.c.bf16 %v1902_v41, %v1902_v41  ;;  %v4020_v36 = vld [vmem:[%s4874_s5 + $0x1e8] sm:$0xff]   ;;  %v4024_v40 = vld [vmem:[%s4874_s5 + $0x1d8] sm:$0xff]   ;;  %v4021_v41 = vld [vmem:[%s4874_s5 + $0x1a0] sm:$0xff]  }
 0x657   :  { %v3689_v44 = vpop.f32.mrf.mxu0  ;;  %v3741_v45 = vpop.f32.mrf.mxu1 }
 0x658   :  { %3760 = vmatmul.mubr.bf16.vlgmr.msra.gmra.mxu1 %v1908_v43  ;;  %v4025_v43 = vld [vmem:[%s4874_s5 + $0x190] sm:$0xff]   ;;  %v4027_v45 = vld [vmem:[%s4874_s5 + $0x188] sm:$0xff]  }
 0x659   :  { %3790 = vmatpush3.bf16.msra.mxu1 %v4514_v60  ;;  %v1620_v46 = vpop.f32.mrf.mxu0  ;;  %3791 = vmatprep.mubr.msk.bf16.mxu1 %vm4041_vm1, %v4040_v0  ;;  %v1905_v47 = vpop.f32.mrf.mxu1  ;;  %v4026_v44 = vld [vmem:[%s4874_s5 + $0x1d0] sm:$0xff]  }
 0x65a   :  { %3795 = vmatprep.subr.bf16.mxu1 %v4040_v0  ;;  %v4028_v46 = vld [vmem:[%s4874_s5 + $0x1c8] sm:$0xff]   ;;  %v4029_v47 = vld [vmem:[%s4874_s5 + $0x180] sm:$0xff]  }
 0x65b   :  { %v3690_v48 = vpop.f32.mrf.mxu0  ;;  %v3742_v49 = vpop.f32.mrf.mxu1 }
 0x65c   :  { %v4030_v48 = vld [vmem:[%s4874_s5 + $0x1c0] sm:$0xff]  }
 0x65d   :  { %v1750_v50 = vpop.f32.mrf.mxu0 }
 0x65e   :  { %v1756_v52 = vpack.c.bf16 %v1750_v50, %v1750_v50 }
 0x65f   :  { %v3715_v54 = vpop.f32.mrf.mxu0 }
 0x660   :  { %3734 = vmatmul.mubr.bf16.vlgmr.msra.gmra.mxu0 %v1756_v52  ;;  %3792 = vmatmul.mubr.msk.bf16.vlgmr.msra.gmra.mxu1 %vm29_vm2, %v3122_v51 }
 0x661   :  { %3764 = vmatpush3.bf16.msra.mxu0 %v4514_v60  ;;  %v1753_v55 = vpop.f32.mrf.mxu0  ;;  %3765 = vmatprep.mubr.msk.bf16.mxu0 %vm4041_vm1, %v4040_v0 }
 0x662   :  { %3796 = vmatpush3.bf16.msra.mxu1 %v3999_v53  ;;  %3769 = vmatprep.subr.bf16.mxu0 %v4040_v0 }
 0x663   :  { %v3716_v57 = vpop.f32.mrf.mxu0  ;;  %3797 = vmatprep.subr.bf16.mxu1 %v4040_v0  ;;  %3811 = vmatprep.mubr.msk.bf16.mxu1 %vm4041_vm1, %v4040_v0 }
 0x666   :  { %3798 = vmatpush3.bf16.msra.mxu1 %v4000_v56 }
 0x667   :  { %3799 = vmatprep.subr.bf16.mxu1 %v4040_v0 }
 0x668   :  { %3766 = vmatmul.mubr.msk.bf16.vlgmr.msra.gmra.mxu0 %vm29_vm2, %v3096_v58 }
 0x669   :  { %3770 = vmatpush3.bf16.msra.mxu0 %v4001_v59  ;;  %3785 = vmatprep.mubr.msk.bf16.mxu0 %vm4041_vm1, %v4040_v0 }
 0x66a   :  { %3800 = vmatpush3.bf16.msra.mxu1 %v4002_v61  ;;  %3771 = vmatprep.subr.bf16.mxu0 %v4040_v0 }
 0x66b   :  { %3801 = vmatprep.subr.bf16.mxu1 %v4040_v0 }
 0x66d   :  { %3772 = vmatpush3.bf16.msra.mxu0 %v4003_v62 }
 0x66e   :  { %3802 = vmatpush3.bf16.msra.mxu1 %v4004_v63  ;;  %3773 = vmatprep.subr.bf16.mxu0 %v4040_v0 }
 0x66f   :  { %3803 = vmatprep.subr.bf16.mxu1 %v4040_v0 }
 0x671   :  { %3774 = vmatpush3.bf16.msra.mxu0 %v4005_v1 }
 0x672   :  { %3804 = vmatpush3.bf16.msra.mxu1 %v4006_v2  ;;  %3775 = vmatprep.subr.bf16.mxu0 %v4040_v0 }
 0x673   :  { %3805 = vmatprep.subr.bf16.mxu1 %v4040_v0 }
 0x675   :  { %3776 = vmatpush3.bf16.msra.mxu0 %v4007_v4 }
 0x676   :  { %3806 = vmatpush3.bf16.msra.mxu1 %v4008_v3  ;;  %3777 = vmatprep.subr.bf16.mxu0 %v4040_v0 }
 0x677   :  { %3807 = vmatprep.subr.bf16.mxu1 %v4040_v0 }
 0x679   :  { %3778 = vmatpush3.bf16.msra.mxu0 %v4009_v5 }
 0x67a   :  { %3808 = vmatpush3.bf16.msra.mxu1 %v4010_v6  ;;  %3779 = vmatprep.subr.bf16.mxu0 %v4040_v0 }
 0x67b   :  { %3809 = vmatprep.subr.bf16.mxu1 %v4040_v0 }
 0x67d   :  { %3780 = vmatpush3.bf16.msra.mxu0 %v4011_v7  ;;  %v3200_v7 = vld [vmem:[%s4876_s4 + $0x20] sm:$0xf] }
 0x67e   :  { %3810 = vmatpush3.bf16.msra.mxu1 %v4012_v8  ;;  %3781 = vmatprep.subr.bf16.mxu0 %v4040_v0  ;;  %v4031_v8 = vld [vmem:[%s4874_s5 + $0x238] sm:$0xff]  }
 0x67f   :  { %3841 = vmatprep.subr.bf16.mxu1 %v4040_v0 }
 0x681   :  { %3782 = vmatpush3.bf16.msra.mxu0 %v4013_v9  ;;  %v4033_v9 = vld [vmem:[%s4874_s5 + $0x228] sm:$0xff]  }
 0x682   :  { %3783 = vmatprep.subr.bf16.mxu0 %v4040_v0 }
 0x685   :  { %3784 = vmatpush3.bf16.msra.mxu0 %v4014_v10  ;;  %v4034_v10 = vld [vmem:[%s4874_s5 + $0x220] sm:$0xff]  }
 0x686   :  { %3815 = vmatprep.subr.bf16.mxu0 %v4040_v0 }
 0x718   :  { %v2008_v11 = vpop.f32.mrf.mxu1 }
 0x71a   :  { %v3761_v12 = vpop.f32.mrf.mxu1 }
 0x71b   :  { %v4036_v12 = vld [vmem:[%s4874_s5 + $0x210] sm:$0xff]  }
 0x71c   :  { %v2011_v13 = vpop.f32.mrf.mxu1 }
 0x71d   :  { %v4037_v13 = vld [vmem:[%s4874_s5 + $0x208] sm:$0xff]  }
 0x71e   :  { %v3762_v14 = vpop.f32.mrf.mxu1 }
 0x71f   :  { %v4038_v14 = vld [vmem:[%s4874_s5 + $0x200] sm:$0xff]  }
 0x720   :  { %v1856_v15 = vpop.f32.mrf.mxu0  ;;  %v2206_v16 = vpop.f32.mrf.mxu1 }
 0x721   :  { %v1862_v17 = vadd.f32 %v1856_v15, %v4648_v42  ;;  %v2212_v18 = vpack.c.bf16 %v2206_v16, %v2206_v16  ;;  %v4023_v42 = vld [vmem:[%s4874_s5 + $0x198] sm:$0xff]  }
 0x722   :  { %v3735_v19 = vpop.f32.mrf.mxu0  ;;  %v3793_v20 = vpop.f32.mrf.mxu1 }
 0x723   :  { %3812 = vmatmul.mubr.bf16.vlgmr.msra.gmra.mxu1 %v2212_v18  ;;  %v4735_v21 = vadd.f32 %v2008_v11, %v1862_v17  ;;  %v4035_v11 = vld [vmem:[%s4874_s5 + $0x218] sm:$0xff]  }
 0x724   :  { %3842 = vmatpush3.bf16.msra.mxu1 %v4514_v60  ;;  %v1859_v22 = vpop.f32.mrf.mxu0  ;;  %3843 = vmatprep.mubr.msk.bf16.mxu1 %vm4041_vm1, %v4040_v0  ;;  %v2209_v23 = vpop.f32.mrf.mxu1 }
 0x725   :  { %3847 = vmatprep.subr.bf16.mxu1 %v4040_v0 }
 0x726   :  { %v3736_v24 = vpop.f32.mrf.mxu0  ;;  %v3794_v25 = vpop.f32.mrf.mxu1 }
 0x728   :  { %v2054_v26 = vpop.f32.mrf.mxu0 }
 0x729   :  { %v2060_v28 = vpack.c.bf16 %v2054_v26, %v2054_v26 }
 0x72a   :  { %v3767_v30 = vpop.f32.mrf.mxu0 }
 0x72b   :  { %3786 = vmatmul.mubr.bf16.vlgmr.msra.gmra.mxu0 %v2060_v28  ;;  %3844 = vmatmul.mubr.msk.bf16.vlgmr.msra.gmra.mxu1 %vm29_vm2, %v3174_v27  ;;  %v3226_v30 = vld [vmem:[%s4877_s6] ss:$0 sm:$0xff] }
 0x72c   :  { %3816 = vmatpush3.bf16.msra.mxu0 %v4514_v60  ;;  %v2057_v31 = vpop.f32.mrf.mxu0  ;;  %3817 = vmatprep.mubr.msk.bf16.mxu0 %vm4041_vm1, %v4040_v0 }
 0x72d   :  { %3821 = vmatprep.subr.bf16.mxu0 %v4040_v0  ;;  %3848 = vmatpush3.bf16.msra.mxu1 %v4016_v29  ;;  %v4039_v31 = vld [vmem:[%s4871_s0] sm:$0xf] }
 0x72e   :  { %v3768_v33 = vpop.f32.mrf.mxu0  ;;  %3849 = vmatprep.subr.bf16.mxu1 %v4040_v0  ;;  %3863 = vmatprep.mubr.msk.bf16.mxu1 %vm4041_vm1, %v4040_v0 }
 0x731   :  { %3850 = vmatpush3.bf16.msra.mxu1 %v4018_v32  ;;  %v1407_v32 = vunpack.c.l.bf16 %v4039_v31 }
 0x732   :  { %3851 = vmatprep.subr.bf16.mxu1 %v4040_v0 }
 0x733   :  { %3818 = vmatmul.mubr.msk.bf16.vlgmr.msra.gmra.mxu0 %vm29_vm2, %v3148_v34 }
 0x734   :  { %3822 = vmatpush3.bf16.msra.mxu0 %v4015_v35  ;;  %3837 = vmatprep.mubr.msk.bf16.mxu0 %vm4041_vm1, %v4040_v0 }
 0x735   :  { %3823 = vmatprep.subr.bf16.mxu0 %v4040_v0  ;;  %3852 = vmatpush3.bf16.msra.mxu1 %v4020_v36 }
 0x736   :  { %3853 = vmatprep.subr.bf16.mxu1 %v4040_v0 }
 0x738   :  { %3824 = vmatpush3.bf16.msra.mxu0 %v4017_v37 }
 0x739   :  { %3825 = vmatprep.subr.bf16.mxu0 %v4040_v0  ;;  %3854 = vmatpush3.bf16.msra.mxu1 %v4022_v38 }
 0x73a   :  { %3855 = vmatprep.subr.bf16.mxu1 %v4040_v0 }
 0x73c   :  { %3826 = vmatpush3.bf16.msra.mxu0 %v4019_v39 }
 0x73d   :  { %3827 = vmatprep.subr.bf16.mxu0 %v4040_v0  ;;  %3856 = vmatpush3.bf16.msra.mxu1 %v4024_v40 }
 0x73e   :  { %3857 = vmatprep.subr.bf16.mxu1 %v4040_v0 }
 0x740   :  { %3828 = vmatpush3.bf16.msra.mxu0 %v4021_v41 }
 0x741   :  { %3829 = vmatprep.subr.bf16.mxu0 %v4040_v0  ;;  %3858 = vmatpush3.bf16.msra.mxu1 %v4026_v44 }
 0x742   :  { %3859 = vmatprep.subr.bf16.mxu1 %v4040_v0 }
 0x744   :  { %3830 = vmatpush3.bf16.msra.mxu0 %v4023_v42 }
 0x745   :  { %3831 = vmatprep.subr.bf16.mxu0 %v4040_v0  ;;  %3860 = vmatpush3.bf16.msra.mxu1 %v4028_v46 }
 0x746   :  { %3861 = vmatprep.subr.bf16.mxu1 %v4040_v0 }
 0x748   :  { %3832 = vmatpush3.bf16.msra.mxu0 %v4025_v43 }
 0x749   :  { %3833 = vmatprep.subr.bf16.mxu0 %v4040_v0  ;;  %3862 = vmatpush3.bf16.msra.mxu1 %v4030_v48 }
 0x74c   :  { %3834 = vmatpush3.bf16.msra.mxu0 %v4027_v45 }
 0x74d   :  { %3835 = vmatprep.subr.bf16.mxu0 %v4040_v0 }
 0x750   :  { %3836 = vmatpush3.bf16.msra.mxu0 %v4029_v47 }
 0x751   :  { %3867 = vmatprep.subr.bf16.mxu0 %v4040_v0 }
 0x7e3   :  { %v2312_v49 = vpop.f32.mrf.mxu1 }
 0x7e5   :  { %v3813_v50 = vpop.f32.mrf.mxu1 }
 0x7e7   :  { %v2315_v51 = vpop.f32.mrf.mxu1 }
 0x7e9   :  { %v3814_v52 = vpop.f32.mrf.mxu1 }
 0x7eb   :  { %v2160_v53 = vpop.f32.mrf.mxu0  ;;  %v2510_v54 = vpop.f32.mrf.mxu1 }
 0x7ec   :  { %v2166_v55 = vadd.f32 %v2160_v53, %v4735_v21  ;;  %v2516_v56 = vpack.c.bf16 %v2510_v54, %v2510_v54 }
 0x7ed   :  { %v3787_v57 = vpop.f32.mrf.mxu0  ;;  %v3845_v58 = vpop.f32.mrf.mxu1 }
 0x7ee   :  { %v2318_v59 = vadd.f32 %v2312_v49, %v2166_v55  ;;  %3864 = vmatmul.mubr.bf16.vlgmr.msra.gmra.mxu1 %v2516_v56 }
 0x7ef   :  { %v2163_v61 = vpop.f32.mrf.mxu0  ;;  %v2513_v62 = vpop.f32.mrf.mxu1 }
 0x7f1   :  { %v3788_v63 = vpop.f32.mrf.mxu0  ;;  %v3846_v1 = vpop.f32.mrf.mxu1 }
 0x7f3   :  { %v2358_v2 = vpop.f32.mrf.mxu0 }
 0x7f4   :  { %v2364_v4 = vpack.c.bf16 %v2358_v2, %v2358_v2 }
 0x7f5   :  { %v3819_v3 = vpop.f32.mrf.mxu0 }
 0x7f6   :  { %3838 = vmatmul.mubr.bf16.vlgmr.msra.gmra.mxu0 %v2364_v4 }
 0x7f7   :  { %3868 = vmatpush3.bf16.msra.mxu0 %v4514_v60  ;;  %v2361_v5 = vpop.f32.mrf.mxu0  ;;  %3869 = vmatprep.mubr.msk.bf16.mxu0 %vm4041_vm1, %v4040_v0  ;;  %v4032_v60 = vld [vmem:[%s4874_s5 + $0x230] sm:$0xff]  }
 0x7f8   :  { %3873 = vmatprep.subr.bf16.mxu0 %v4040_v0 }
 0x7f9   :  { %v3820_v6 = vpop.f32.mrf.mxu0 }
 0x7fe   :  { %3870 = vmatmul.mubr.msk.bf16.vlgmr.msra.gmra.mxu0 %vm29_vm2, %v3200_v7 }
 0x7ff   :  { %3874 = vmatpush3.bf16.msra.mxu0 %v4031_v8  ;;  %3889 = vmatprep.mubr.msk.bf16.mxu0 %vm4041_vm1, %v4040_v0 }
 0x800   :  { %3875 = vmatprep.subr.bf16.mxu0 %v4040_v0 }
 0x803   :  { %3876 = vmatpush3.bf16.msra.mxu0 %v4032_v60 }
 0x804   :  { %3877 = vmatprep.subr.bf16.mxu0 %v4040_v0 }
 0x807   :  { %3878 = vmatpush3.bf16.msra.mxu0 %v4033_v9 }
 0x808   :  { %3879 = vmatprep.subr.bf16.mxu0 %v4040_v0 }
 0x80b   :  { %3880 = vmatpush3.bf16.msra.mxu0 %v4034_v10 }
 0x80c   :  { %3881 = vmatprep.subr.bf16.mxu0 %v4040_v0 }
 0x80f   :  { %3882 = vmatpush3.bf16.msra.mxu0 %v4035_v11 }
 0x810   :  { %3883 = vmatprep.subr.bf16.mxu0 %v4040_v0 }
 0x813   :  { %3884 = vmatpush3.bf16.msra.mxu0 %v4036_v12 }
 0x814   :  { %3885 = vmatprep.subr.bf16.mxu0 %v4040_v0 }
 0x817   :  { %3886 = vmatpush3.bf16.msra.mxu0 %v4037_v13 }
 0x818   :  { %3887 = vmatprep.subr.bf16.mxu0 %v4040_v0 }
 0x81b   :  { %3888 = vmatpush3.bf16.msra.mxu0 %v4038_v14 }
 0x8ae   :  { %v2616_v15 = vpop.f32.mrf.mxu1 }
 0x8b0   :  { %v3865_v16 = vpop.f32.mrf.mxu1 }
 0x8b2   :  { %v2619_v17 = vpop.f32.mrf.mxu1 }
 0x8b4   :  { %v3866_v18 = vpop.f32.mrf.mxu1 }
 0x8b6   :  { %v2464_v19 = vpop.f32.mrf.mxu0 }
 0x8b7   :  { %v2470_v20 = vadd.f32 %v2464_v19, %v2318_v59 }
 0x8b8   :  { %v3839_v21 = vpop.f32.mrf.mxu0 }
 0x8b9   :  { %v2622_v22 = vadd.f32 %v2616_v15, %v2470_v20 }
 0x8ba   :  { %v2467_v23 = vpop.f32.mrf.mxu0 }
 0x8bc   :  { %v3840_v24 = vpop.f32.mrf.mxu0 }
 0x8be   :  { %v2662_v25 = vpop.f32.mrf.mxu0 }
 0x8bf   :  { %v2668_v26 = vpack.c.bf16 %v2662_v25, %v2662_v25 }
 0x8c0   :  { %v3871_v27 = vpop.f32.mrf.mxu0 }
 0x8c1   :  { %3890 = vmatmul.mubr.bf16.vlgmr.msra.gmra.mxu0 %v2668_v26 }
 0x8c2   :  { %v2665_v0 = vpop.f32.mrf.mxu0 }
 0x8c4   :  { %v3872_v28 = vpop.f32.mrf.mxu0 }
 0x981   :  { %v2768_v29 = vpop.f32.mrf.mxu0 }
 0x982   :  { %v2774_v33 = vadd.f32 %v2768_v29, %v2622_v22 }
 0x983   :  { %v3891_v34 = vpop.f32.mrf.mxu0 }
 0x984   :  { %v2782_v35 = vadd.f32 %v3226_v30, %v2774_v33 }
 0x985   :  { %v2771_v36 = vpop.f32.mrf.mxu0 }
 0x986   :  { %v2783_v37 = vadd.f32 %v2782_v35, %v1407_v32 }
 0x987   :  { %v3892_v38 = vpop.f32.mrf.mxu0 }
 0x988   :  { %v2784_v39 = vmax.f32 %v2783_v37, 0.0 }
 0x98a   :  { %v2785_v40 = vpack.c.bf16 %v2784_v39, %v2784_v39 }
 0x98c   :  { %2786 = vst [vmem:[%s4878_s7] sm:$0xf] %v2785_v40 }

// kernel: resnet18_forward.15
= control target key start
LH: loop header
LB: loop body
LE: loop exit
PB: predicated region body
PF: predicated region fallthrough
CT: control target
= control target key end

     0   :  { %v4680_v0 = vmov 0.0   ;;  %vm4681_vm0 = vmmov 0   ;;  %vm53_vm1 = vcmask 64512   ;;  %vm391_vm3 = vcmask 1043456   ;;  %s5743_s0 = inlined_call_operand.vmem [shape: bf16[8,128], index: 0, kind: input, shape index: {}]   ;;  %s5744_s1 = inlined_call_operand.vmem [shape: f32[8,8], index: 1, kind: input, shape index: {}]   ;;  %s5745_s3 = inlined_call_operand.vmem [shape: f32[128,128], index: 3, kind: input, shape index: {}]   ;;  %s5746_s5 = inlined_call_operand.<no memory space> [shape: f32[1,1], index: 5, kind: input, shape index: {}]   ;;  %s5747_s4 = inlined_call_operand.vmem [shape: f32[128,128], index: 4, kind: input, shape index: {}]   ;;  %s5748_s2 = inlined_call_operand.vmem [shape: f32[8,8], index: 2, kind: input, shape index: {}]   ;;  %s5749_s7 = inlined_call_operand.vmem [shape: bf16[9,128,128], index: 7, kind: input, shape index: {}]   ;;  %s5750_s6 = inlined_call_operand.vmem [shape: bf16[9,8,8], index: 6, kind: input, shape index: {}]   ;;  %s5751_s12 = inlined_call_operand.vmem [shape: bf16[128,128], index: 12, kind: input, shape index: {}]   ;;  %s5752_s10 = inlined_call_operand.vmem [shape: bf16[9,128,128], index: 10, kind: input, shape index: {}]   ;;  %s5753_s8 = inlined_call_operand.vmem [shape: f32[1,128], index: 8, kind: input, shape index: {}, may-alias: {8,11,13}]   ;;  %s5754_s9 = inlined_call_operand.vmem [shape: bf16[9,8,8], index: 9, kind: input, shape index: {}]   ;;  %s5755_s13 = inlined_call_operand.vmem [shape: f32[1,128], index: 13, kind: input, shape index: {}, may-alias: {8,11,13}]   ;;  %s5756_s11 = inlined_call_operand.vmem [shape: f32[1,128], index: 11, kind: input, shape index: {}, may-alias: {8,11,13}]   ;;  %s5757_s14 = inlined_call_operand.vmem [shape: bf16[8,128], index: 14, kind: output, shape index: {}]  }
   0x1   :  { %3952 = vmatprep.subr.mxu0 %v4680_v0  ;;  %v4761_v1 = vld [vmem:[%s5743_s0] sm:$0xf]  ;;  %3954 = vmatprep.mubr.msk.f32.mxu0 %vm4681_vm0, %v4680_v0  ;;  %v142_v2 = vld [vmem:[%s5745_s3 + $0x78] sm:$0xff]  ;;  %v141_v5 = vld [vmem:[%s5745_s3 + $0x70] sm:$0xff]  ;;  %v19_v20 = vstv %s5746_s5 }
   0x2   :  { %v51_v3 = vunpack.c.l.bf16 %v4761_v1  ;;  %v52_v4 = vld [vmem:[%s5744_s1] sm:$0xff]  ;;  %3957 = vmatprep.subr.mxu1 %v4680_v0  ;;  %3989 = vmatprep.mubr.msk.f32.mxu1 %vm4681_vm0, %v4680_v0  ;;  %v140_v6 = vld [vmem:[%s5745_s3 + $0x68] sm:$0xff]  ;;  %v138_v8 = vld [vmem:[%s5745_s3 + $0x58] sm:$0xff]  ;;  %20 = vst [vmem:[#allocation2] sm:$0x1] %v19_v20 }
   0x3   :  { %3958 = vmatpush3.msra.mxu1 %v142_v2  ;;  %v139_v7 = vld [vmem:[%s5745_s3 + $0x60] sm:$0xff]  ;;  %v137_v9 = vld [vmem:[%s5745_s3 + $0x50] sm:$0xff]  ;;  %v136_v10 = vld [vmem:[%s5745_s3 + $0x48] sm:$0xff] }
   0x4   :  { %3953 = vmatpush3.msra.mxu0 %v51_v3  ;;  %3959 = vmatprep.subr.mxu1 %v4680_v0  ;;  %v135_v11 = vld [vmem:[%s5745_s3 + $0x40] sm:$0xff]  ;;  %v134_v12 = vld [vmem:[%s5745_s3 + $0x38] sm:$0xff]  ;;  %v133_v13 = vld [vmem:[%s5745_s3 + $0x30] sm:$0xff] }
   0x5   :  { %3955 = vmatmul.mubr.msk.f32.vlgmr.msra.gmra.mxu0 %vm53_vm1, %v52_v4  ;;  %3960 = vmatpush3.msra.mxu1 %v141_v5  ;;  %v132_v14 = vld [vmem:[%s5745_s3 + $0x28] sm:$0xff]  ;;  %v131_v15 = vld [vmem:[%s5745_s3 + $0x20] sm:$0xff]  ;;  %v130_v16 = vld [vmem:[%s5745_s3 + $0x18] sm:$0xff] }
   0x6   :  { %3961 = vmatprep.subr.mxu1 %v4680_v0  ;;  %3992 = vmatprep.subr.mxu0 %v4680_v0  ;;  %v129_v17 = vld [vmem:[%s5745_s3 + $0x10] sm:$0xff]  ;;  %v128_v18 = vld [vmem:[%s5745_s3 + $0x8] sm:$0xff]  ;;  %v127_v19 = vld [vmem:[%s5745_s3] sm:$0xff] }
   0x7   :  { %3962 = vmatpush3.msra.mxu1 %v140_v6  ;;  %4024 = vmatprep.mubr.msk.f32.mxu0 %vm4681_vm0, %v4680_v0  ;;  %v234_v21 = vld [vmem:[%s5747_s4 + $0x78] sm:$0xff]  ;;  %v233_v22 = vld [vmem:[%s5747_s4 + $0x70] sm:$0xff]  ;;  %v232_v23 = vld [vmem:[%s5747_s4 + $0x68] sm:$0xff] }
   0x8   :  { %3963 = vmatprep.subr.mxu1 %v4680_v0  ;;  %3993 = vmatpush3.msra.mxu0 %v234_v21  ;;  %v231_v24 = vld [vmem:[%s5747_s4 + $0x60] sm:$0xff]  ;;  %v230_v25 = vld [vmem:[%s5747_s4 + $0x58] sm:$0xff]  ;;  %v229_v27 = vld [vmem:[%s5747_s4 + $0x50] sm:$0xff] }
   0x9   :  { %3964 = vmatpush3.msra.mxu1 %v139_v7  ;;  %3994 = vmatprep.subr.mxu0 %v4680_v0  ;;  %v213_v26 = vld [vmem:[#allocation2] sm:$0x1]  ;;  %v228_v28 = vld [vmem:[%s5747_s4 + $0x48] sm:$0xff]  ;;  %v226_v30 = vld [vmem:[%s5747_s4 + $0x38] sm:$0xff] }
   0xa   :  { %3965 = vmatprep.subr.mxu1 %v4680_v0  ;;  %3995 = vmatpush3.msra.mxu0 %v233_v22  ;;  %4520 = vpush %v213_v26  ;;  %v227_v29 = vld [vmem:[%s5747_s4 + $0x40] sm:$0xff]  ;;  %v225_v31 = vld [vmem:[%s5747_s4 + $0x30] sm:$0xff]  ;;  %v224_v32 = vld [vmem:[%s5747_s4 + $0x28] sm:$0xff] }
   0xb   :  { %3966 = vmatpush3.msra.mxu1 %v138_v8  ;;  %3996 = vmatprep.subr.mxu0 %v4680_v0  ;;  %v223_v33 = vld [vmem:[%s5747_s4 + $0x20] sm:$0xff]  ;;  %v222_v34 = vld [vmem:[%s5747_s4 + $0x18] sm:$0xff]  ;;  %v221_v35 = vld [vmem:[%s5747_s4 + $0x10] sm:$0xff] }
   0xc   :  { %3967 = vmatprep.subr.mxu1 %v4680_v0  ;;  %3997 = vmatpush3.msra.mxu0 %v232_v23  ;;  %v220_v38 = vld [vmem:[%s5747_s4 + $0x8] sm:$0xff]  ;;  %v219_v39 = vld [vmem:[%s5747_s4] sm:$0xff]  ;;  %v4524_v59 = vld [vmem:[%s5749_s7 + $0x38] sm:$0xff]  }
   0xd   :  { %3968 = vmatpush3.msra.mxu1 %v137_v9  ;;  %3998 = vmatprep.subr.mxu0 %v4680_v0  ;;  %v311_v50 = vld [vmem:[%s5748_s2] sm:$0xff]  ;;  %v4525_v60 = vld [vmem:[%s5749_s7 + $0x78] sm:$0xff]   ;;  %v4526_v61 = vld [vmem:[%s5749_s7 + $0x30] sm:$0xff]  }
   0xe   :  { %3969 = vmatprep.subr.mxu1 %v4680_v0  ;;  %3999 = vmatpush3.msra.mxu0 %v231_v24  ;;  %v387_v57 = vld [vmem:[%s5750_s6] sm:$0xf]  ;;  %v3263_v58 = vld [vmem:[%s5750_s6 + $0x4] sm:$0xf]  ;;  %v4527_v62 = vld [vmem:[%s5749_s7 + $0x70] sm:$0xff]  }
   0xf   :  { %3970 = vmatpush3.msra.mxu1 %v136_v10  ;;  %4000 = vmatprep.subr.mxu0 %v4680_v0  ;;  %v4528_v63 = vld [vmem:[%s5749_s7 + $0x28] sm:$0xff]   ;;  %v4530_v2 = vld [vmem:[%s5749_s7 + $0x20] sm:$0xff]   ;;  %v4532_v4 = vld [vmem:[%s5749_s7 + $0x18] sm:$0xff]  }
  0x10   :  { %3971 = vmatprep.subr.mxu1 %v4680_v0  ;;  %4001 = vmatpush3.msra.mxu0 %v230_v25  ;;  %v4529_v1 = vld [vmem:[%s5749_s7 + $0x68] sm:$0xff]   ;;  %v4533_v5 = vld [vmem:[%s5749_s7 + $0x58] sm:$0xff]   ;;  %v4534_v6 = vld [vmem:[%s5749_s7 + $0x10] sm:$0xff]  }
  0x11   :  { %3972 = vmatpush3.msra.mxu1 %v135_v11  ;;  %4002 = vmatprep.subr.mxu0 %v4680_v0  ;;  %v4535_v7 = vld [vmem:[%s5749_s7 + $0x50] sm:$0xff]   ;;  %v4536_v8 = vld [vmem:[%s5749_s7 + $0x8] sm:$0xff]   ;;  %v4538_v10 = vld [vmem:[%s5749_s7] sm:$0xff]  }
  0x12   :  { %3973 = vmatprep.subr.mxu1 %v4680_v0  ;;  %4003 = vmatpush3.msra.mxu0 %v229_v27  ;;  %v4537_v9 = vld [vmem:[%s5749_s7 + $0x48] sm:$0xff]   ;;  %v4539_v11 = vld [vmem:[%s5749_s7 + $0x40] sm:$0xff]   ;;  %v4540_v23 = vld [vmem:[%s5749_s7 + $0xb8] sm:$0xff]  }
  0x13   :  { %3974 = vmatpush3.msra.mxu1 %v134_v12  ;;  %4004 = vmatprep.subr.mxu0 %v4680_v0  ;;  %v3297_v22 = vld [vmem:[%s5750_s6 + $0x8] sm:$0xf]  ;;  %v4541_v24 = vld [vmem:[%s5749_s7 + $0xb0] sm:$0xff]   ;;  %v4543_v26 = vld [vmem:[%s5749_s7 + $0xa0] sm:$0xff]  }
  0x14   :  { %3975 = vmatprep.subr.mxu1 %v4680_v0  ;;  %4005 = vmatpush3.msra.mxu0 %v228_v28  ;;  %v4542_v25 = vld [vmem:[%s5749_s7 + $0xa8] sm:$0xff]   ;;  %v4544_v27 = vld [vmem:[%s5749_s7 + $0x98] sm:$0xff]   ;;  %v4545_v28 = vld [vmem:[%s5749_s7 + $0x90] sm:$0xff]  }
  0x15   :  { %3976 = vmatpush3.msra.mxu1 %v133_v13  ;;  %4006 = vmatprep.subr.mxu0 %v4680_v0 }
  0x16   :  { %3977 = vmatprep.subr.mxu1 %v4680_v0  ;;  %4007 = vmatpush3.msra.mxu0 %v227_v29  ;;  %v4546_v29 = vld [vmem:[%s5749_s7 + $0x88] sm:$0xff]  }
  0x17   :  { %3978 = vmatpush3.msra.mxu1 %v132_v14  ;;  %4008 = vmatprep.subr.mxu0 %v4680_v0 }
  0x18   :  { %3979 = vmatprep.subr.mxu1 %v4680_v0  ;;  %4009 = vmatpush3.msra.mxu0 %v226_v30  ;;  %v4547_v30 = vld [vmem:[%s5749_s7 + $0x80] sm:$0xff]  }
  0x19   :  { %3980 = vmatpush3.msra.mxu1 %v131_v15  ;;  %4010 = vmatprep.subr.mxu0 %v4680_v0 }
  0x1a   :  { %3981 = vmatprep.subr.mxu1 %v4680_v0  ;;  %4011 = vmatpush3.msra.mxu0 %v225_v31  ;;  %v4548_v31 = vld [vmem:[%s5749_s7 + $0xf8] sm:$0xff]  }
  0x1b   :  { %3982 = vmatpush3.msra.mxu1 %v130_v16  ;;  %4012 = vmatprep.subr.mxu0 %v4680_v0 }
  0x1c   :  { %3983 = vmatprep.subr.mxu1 %v4680_v0  ;;  %4013 = vmatpush3.msra.mxu0 %v224_v32  ;;  %v4549_v32 = vld [vmem:[%s5749_s7 + $0xf0] sm:$0xff]  }
  0x1d   :  { %3984 = vmatpush3.msra.mxu1 %v129_v17  ;;  %4014 = vmatprep.subr.mxu0 %v4680_v0 }
  0x1e   :  { %3985 = vmatprep.subr.mxu1 %v4680_v0  ;;  %4015 = vmatpush3.msra.mxu0 %v223_v33  ;;  %v4550_v33 = vld [vmem:[%s5749_s7 + $0xe8] sm:$0xff]  }
  0x1f   :  { %3986 = vmatpush3.msra.mxu1 %v128_v18  ;;  %4016 = vmatprep.subr.mxu0 %v4680_v0 }
  0x20   :  { %3987 = vmatprep.subr.mxu1 %v4680_v0  ;;  %4017 = vmatpush3.msra.mxu0 %v222_v34  ;;  %v4552_v34 = vld [vmem:[%s5749_s7 + $0xe0] sm:$0xff]  }
  0x21   :  { %3988 = vmatpush3.msra.mxu1 %v127_v19  ;;  %4018 = vmatprep.subr.mxu0 %v4680_v0 }
  0x22   :  { %4027 = vmatprep.subr.mxu1 %v4680_v0  ;;  %4019 = vmatpush3.msra.mxu0 %v221_v35  ;;  %v4554_v35 = vld [vmem:[%s5749_s7 + $0xd8] sm:$0xff]  }
  0x23   :  { %4020 = vmatprep.subr.mxu0 %v4680_v0 }
  0x24   :  { %4021 = vmatpush3.msra.mxu0 %v220_v38 }
  0x25   :  { %4022 = vmatprep.subr.mxu0 %v4680_v0 }
  0x26   :  { %4023 = vmatpush3.msra.mxu0 %v219_v39 }
  0x27   :  { %4032 = vmatprep.subr.bf16.mxu0 %v4680_v0 }
  0x3b   :  { %s4521_s23 = spop %4520 }
  0x3c   :  { %v216_v40 = vstv %s4521_s23 }
  0xc5   :  { %v123_v36 = vpop.f32.mrf.mxu0 }
  0xc6   :  { %3990 = vmatmul.mubr.f32.vlgmr.msra.gmra.mxu1 %v123_v36  ;;  %v4556_v36 = vld [vmem:[%s5749_s7 + $0xd0] sm:$0xff]  }
  0xc7   :  { %v3956_v37 = vpop.f32.mrf.mxu0  ;;  %4029 = vmatprep.mubr.msk.f32.mxu1 %vm4681_vm0, %v4680_v0 }
 0x186   :  { %v209_v41 = vpop.f32.mrf.mxu1 }
 0x187   :  { %vm215_vm2 = vcmp.gt.f32.partialorder %v209_v41, 0.0  ;;  %v217_v42 = vmul.f32 %v216_v40, %v209_v41 }
 0x188   :  { %v3991_v43 = vpop.f32.mrf.mxu1 }
 0x189   :  { %v218_v44 = vsel %vm215_vm2, %v209_v41, %v217_v42 }
 0x18a   :  { %4025 = vmatmul.mubr.f32.vlgmr.msra.gmra.mxu0 %v218_v44 }
 0x18b   :  { %4034 = vmatprep.mubr.msk.bf16.mxu0 %vm4681_vm0, %v4680_v0 }
 0x24a   :  { %v301_v45 = vpop.f32.mrf.mxu0 }
 0x24b   :  { %v3260_v46 = vmul.f32 -1.442695, %v301_v45 }
 0x24c   :  { %v4026_v47 = vpop.f32.mrf.mxu0 }
 0x24d   :  { %4676 = vpow2.f32 %v3260_v46 }
 0x25a   :  { %v4677_v48 = vpop.eup %4676 }
 0x25b   :  { %v308_v49 = vadd.f32 1.0, %v4677_v48 }
 0x25d   :  { %4678 = vrcp.f32 %v308_v49 }
 0x26a   :  { %v4679_v51 = vpop.eup %4678 }
 0x26b   :  { %4028 = vmatpush3.msra.mxu1 %v4679_v51  ;;  %v3323_v51 = vld [vmem:[%s5750_s6 + $0xc] sm:$0xf] }
 0x26c   :  { %4030 = vmatmul.mubr.msk.f32.vlgmr.msra.gmra.mxu1 %vm53_vm1, %v311_v50  ;;  %4038 = vmatprep.subr.bf16.mxu1 %v4680_v0 }
 0x26d   :  { %4040 = vmatprep.mubr.msk.bf16.mxu1 %vm4681_vm0, %v4680_v0 }
 0x32c   :  { %v381_v52 = vpop.f32.mrf.mxu1 }
 0x32d   :  { %v385_v53 = vmul.f32 %v381_v52, %v51_v3  ;;  %v4531_v3 = vld [vmem:[%s5749_s7 + $0x60] sm:$0xff]   ;;  %v3349_v52 = vld [vmem:[%s5750_s6 + $0x10] sm:$0xf] }
 0x32e   :  { %v4031_v54 = vpop.f32.mrf.mxu1 }
 0x32f   :  { %v386_v55 = vpack.c.bf16 %v385_v53, %v385_v53  ;;  %v4551_v53 = vld [vmem:[%s5749_s7 + $0x138] sm:$0xff]   ;;  %v4553_v54 = vld [vmem:[%s5749_s7 + $0x130] sm:$0xff]  }
 0x331   :  { %v4923_v56 = vsel %vm391_vm3, %v386_v55, 0  ;;  %v4555_v55 = vld [vmem:[%s5749_s7 + $0x128] sm:$0xff]  }
 0x332   :  { %4033 = vmatpush3.bf16.msra.mxu0 %v4923_v56  ;;  %4039 = vmatpush3.bf16.msra.mxu1 %v4923_v56 }
 0x333   :  { %4064 = vmatprep.subr.bf16.mxu1 %v4680_v0  ;;  %4044 = vmatprep.subr.bf16.mxu0 %v4680_v0 }
 0x335   :  { %4035 = vmatmul.mubr.msk.bf16.vlgmr.msra.gmra.mxu0 %vm53_vm1, %v387_v57  ;;  %4041 = vmatmul.mubr.msk.bf16.vlgmr.msra.gmra.mxu1 %vm53_vm1, %v3263_v58  ;;  %v4557_v57 = vld [vmem:[%s5749_s7 + $0x120] sm:$0xff]   ;;  %v4558_v58 = vld [vmem:[%s5749_s7 + $0xc8] sm:$0xff]  }
 0x336   :  { %4065 = vmatpush3.bf16.msra.mxu1 %v4524_v59  ;;  %4045 = vmatpush3.bf16.msra.mxu0 %v4525_v60  ;;  %v4559_v59 = vld [vmem:[%s5749_s7 + $0x118] sm:$0xff]   ;;  %v4560_v60 = vld [vmem:[%s5749_s7 + $0xc0] sm:$0xff]  }
 0x337   :  { %4066 = vmatprep.subr.bf16.mxu1 %v4680_v0  ;;  %4046 = vmatprep.subr.bf16.mxu0 %v4680_v0 }
 0x338   :  { %4060 = vmatprep.mubr.msk.bf16.mxu0 %vm4681_vm0, %v4680_v0  ;;  %4080 = vmatprep.mubr.msk.bf16.mxu1 %vm4681_vm0, %v4680_v0 }
 0x33a   :  { %4067 = vmatpush3.bf16.msra.mxu1 %v4526_v61  ;;  %4047 = vmatpush3.bf16.msra.mxu0 %v4527_v62  ;;  %v4561_v61 = vld [vmem:[%s5749_s7 + $0x110] sm:$0xff]   ;;  %v4562_v62 = vld [vmem:[%s5749_s7 + $0x108] sm:$0xff]  }
 0x33b   :  { %4068 = vmatprep.subr.bf16.mxu1 %v4680_v0  ;;  %4048 = vmatprep.subr.bf16.mxu0 %v4680_v0 }
 0x33e   :  { %4069 = vmatpush3.bf16.msra.mxu1 %v4528_v63  ;;  %4049 = vmatpush3.bf16.msra.mxu0 %v4529_v1  ;;  %v4563_v63 = vld [vmem:[%s5749_s7 + $0x100] sm:$0xff]  }
 0x33f   :  { %4070 = vmatprep.subr.bf16.mxu1 %v4680_v0  ;;  %4050 = vmatprep.subr.bf16.mxu0 %v4680_v0 }
 0x342   :  { %4071 = vmatpush3.bf16.msra.mxu1 %v4530_v2  ;;  %4051 = vmatpush3.bf16.msra.mxu0 %v4531_v3 }
 0x343   :  { %4072 = vmatprep.subr.bf16.mxu1 %v4680_v0  ;;  %4052 = vmatprep.subr.bf16.mxu0 %v4680_v0 }
 0x346   :  { %4073 = vmatpush3.bf16.msra.mxu1 %v4532_v4  ;;  %4053 = vmatpush3.bf16.msra.mxu0 %v4533_v5 }
 0x347   :  { %4074 = vmatprep.subr.bf16.mxu1 %v4680_v0  ;;  %4054 = vmatprep.subr.bf16.mxu0 %v4680_v0 }
 0x34a   :  { %4075 = vmatpush3.bf16.msra.mxu1 %v4534_v6  ;;  %4055 = vmatpush3.bf16.msra.mxu0 %v4535_v7 }
 0x34b   :  { %4076 = vmatprep.subr.bf16.mxu1 %v4680_v0  ;;  %4056 = vmatprep.subr.bf16.mxu0 %v4680_v0 }
 0x34e   :  { %4077 = vmatpush3.bf16.msra.mxu1 %v4536_v8  ;;  %4057 = vmatpush3.bf16.msra.mxu0 %v4537_v9 }
 0x34f   :  { %4078 = vmatprep.subr.bf16.mxu1 %v4680_v0  ;;  %4058 = vmatprep.subr.bf16.mxu0 %v4680_v0 }
 0x352   :  { %4079 = vmatpush3.bf16.msra.mxu1 %v4538_v10  ;;  %4059 = vmatpush3.bf16.msra.mxu0 %v4539_v11 }
 0x353   :  { %4084 = vmatprep.subr.bf16.mxu1 %v4680_v0  ;;  %4116 = vmatprep.subr.bf16.mxu0 %v4680_v0 }
 0x3f5   :  { %v429_v12 = vpop.f32.mrf.mxu0  ;;  %v491_v13 = vpop.f32.mrf.mxu1 }
 0x3f6   :  { %v435_v14 = vpack.c.bf16 %v429_v12, %v429_v12  ;;  %v497_v15 = vpack.c.bf16 %v491_v13, %v491_v13  ;;  %v3375_v12 = vld [vmem:[%s5750_s6 + $0x14] sm:$0xf] }
 0x3f7   :  { %v4036_v16 = vpop.f32.mrf.mxu0  ;;  %v4042_v17 = vpop.f32.mrf.mxu1 }
 0x3f8   :  { %4061 = vmatmul.mubr.bf16.vlgmr.msra.gmra.mxu0 %v497_v15  ;;  %4081 = vmatmul.mubr.bf16.vlgmr.msra.gmra.mxu1 %v435_v14  ;;  %v4564_v14 = vld [vmem:[%s5749_s7 + $0x178] sm:$0xff]   ;;  %v4565_v17 = vld [vmem:[%s5749_s7 + $0x170] sm:$0xff]  }
 0x3f9   :  { %4085 = vmatpush3.bf16.msra.mxu1 %v4923_v56  ;;  %v432_v18 = vpop.f32.mrf.mxu0  ;;  %4086 = vmatprep.mubr.msk.bf16.mxu1 %vm4681_vm0, %v4680_v0  ;;  %v494_v19 = vpop.f32.mrf.mxu1 }
 0x3fa   :  { %4090 = vmatprep.subr.bf16.mxu1 %v4680_v0  ;;  %4132 = vmatprep.mubr.msk.bf16.mxu0 %vm4681_vm0, %v4680_v0  ;;  %v3401_v19 = vld [vmem:[%s5750_s6 + $0x18] sm:$0xf] }
 0x3fb   :  { %v4037_v20 = vpop.f32.mrf.mxu0  ;;  %v4043_v21 = vpop.f32.mrf.mxu1  ;;  %4117 = vmatpush3.bf16.msra.mxu0 %v4548_v31  ;;  %v4577_v31 = vld [vmem:[%s5749_s7 + $0x190] sm:$0xff]  }
 0x3fc   :  { %4118 = vmatprep.subr.bf16.mxu0 %v4680_v0  ;;  %v4567_v20 = vld [vmem:[%s5749_s7 + $0x1b8] sm:$0xff]   ;;  %v4566_v21 = vld [vmem:[%s5749_s7 + $0x168] sm:$0xff]  }
 0x3ff   :  { %4119 = vmatpush3.bf16.msra.mxu0 %v4549_v32  ;;  %v4578_v32 = vld [vmem:[%s5749_s7 + $0x188] sm:$0xff]  }
 0x400   :  { %4087 = vmatmul.mubr.msk.bf16.vlgmr.msra.gmra.mxu1 %vm53_vm1, %v3297_v22  ;;  %4120 = vmatprep.subr.bf16.mxu0 %v4680_v0  ;;  %v4569_v22 = vld [vmem:[%s5749_s7 + $0x1b0] sm:$0xff]  }
 0x401   :  { %4091 = vmatpush3.bf16.msra.mxu1 %v4540_v23  ;;  %4106 = vmatprep.mubr.msk.bf16.mxu1 %vm4681_vm0, %v4680_v0  ;;  %v4568_v23 = vld [vmem:[%s5749_s7 + $0x160] sm:$0xff]  }
 0x402   :  { %4092 = vmatprep.subr.bf16.mxu1 %v4680_v0 }
 0x403   :  { %4121 = vmatpush3.bf16.msra.mxu0 %v4550_v33  ;;  %v4579_v33 = vld [vmem:[%s5749_s7 + $0x180] sm:$0xff]  }
 0x404   :  { %4122 = vmatprep.subr.bf16.mxu0 %v4680_v0 }
 0x405   :  { %4093 = vmatpush3.bf16.msra.mxu1 %v4541_v24  ;;  %v4571_v24 = vld [vmem:[%s5749_s7 + $0x1a8] sm:$0xff]  }
 0x406   :  { %4094 = vmatprep.subr.bf16.mxu1 %v4680_v0 }
 0x407   :  { %4123 = vmatpush3.bf16.msra.mxu0 %v4552_v34 }
 0x408   :  { %4124 = vmatprep.subr.bf16.mxu0 %v4680_v0 }
 0x409   :  { %4095 = vmatpush3.bf16.msra.mxu1 %v4542_v25  ;;  %v4570_v25 = vld [vmem:[%s5749_s7 + $0x158] sm:$0xff]  }
 0x40a   :  { %4096 = vmatprep.subr.bf16.mxu1 %v4680_v0 }
 0x40b   :  { %4125 = vmatpush3.bf16.msra.mxu0 %v4554_v35 }
 0x40c   :  { %4126 = vmatprep.subr.bf16.mxu0 %v4680_v0 }
 0x40d   :  { %4097 = vmatpush3.bf16.msra.mxu1 %v4543_v26  ;;  %v4573_v26 = vld [vmem:[%s5749_s7 + $0x1a0] sm:$0xff]  }
 0x40e   :  { %4098 = vmatprep.subr.bf16.mxu1 %v4680_v0 }
 0x40f   :  { %4127 = vmatpush3.bf16.msra.mxu0 %v4556_v36 }
 0x410   :  { %4128 = vmatprep.subr.bf16.mxu0 %v4680_v0 }
 0x411   :  { %4099 = vmatpush3.bf16.msra.mxu1 %v4544_v27  ;;  %v4572_v27 = vld [vmem:[%s5749_s7 + $0x150] sm:$0xff]  }
 0x412   :  { %4100 = vmatprep.subr.bf16.mxu1 %v4680_v0 }
 0x413   :  { %4129 = vmatpush3.bf16.msra.mxu0 %v4558_v58  ;;  %v4583_v58 = vld [vmem:[%s5749_s7 + $0x238] sm:$0xff]  }
 0x414   :  { %4130 = vmatprep.subr.bf16.mxu0 %v4680_v0 }
 0x415   :  { %4101 = vmatpush3.bf16.msra.mxu1 %v4545_v28  ;;  %v4574_v28 = vld [vmem:[%s5749_s7 + $0x148] sm:$0xff]  }
 0x416   :  { %4102 = vmatprep.subr.bf16.mxu1 %v4680_v0 }
 0x417   :  { %4131 = vmatpush3.bf16.msra.mxu0 %v4560_v60  ;;  %v4585_v60 = vld [vmem:[%s5749_s7 + $0x230] sm:$0xff]  }
 0x418   :  { %4162 = vmatprep.subr.bf16.mxu0 %v4680_v0 }
 0x419   :  { %4103 = vmatpush3.bf16.msra.mxu1 %v4546_v29  ;;  %v4575_v29 = vld [vmem:[%s5749_s7 + $0x198] sm:$0xff]  }
 0x41a   :  { %4104 = vmatprep.subr.bf16.mxu1 %v4680_v0 }
 0x41d   :  { %4105 = vmatpush3.bf16.msra.mxu1 %v4547_v30  ;;  %v4576_v30 = vld [vmem:[%s5749_s7 + $0x140] sm:$0xff]  }
 0x41e   :  { %4110 = vmatprep.subr.bf16.mxu1 %v4680_v0 }
 0x4b8   :  { %v597_v37 = vpop.f32.mrf.mxu0  ;;  %v685_v38 = vpop.f32.mrf.mxu1 }
 0x4b9   :  { %v686_v39 = vadd.f32 %v685_v38, %v597_v37 }
 0x4ba   :  { %v4082_v40 = vpop.f32.mrf.mxu1  ;;  %v4062_v41 = vpop.f32.mrf.mxu0 }
 0x4bc   :  { %v688_v42 = vpop.f32.mrf.mxu1  ;;  %v600_v43 = vpop.f32.mrf.mxu0 }
 0x4be   :  { %v4083_v44 = vpop.f32.mrf.mxu1  ;;  %v4063_v45 = vpop.f32.mrf.mxu0 }
 0x4c0   :  { %v730_v46 = vpop.f32.mrf.mxu1 }
 0x4c1   :  { %v736_v47 = vpack.c.bf16 %v730_v46, %v730_v46 }
 0x4c2   :  { %v4088_v48 = vpop.f32.mrf.mxu1 }
 0x4c3   :  { %4107 = vmatmul.mubr.bf16.vlgmr.msra.gmra.mxu1 %v736_v47 }
 0x4c4   :  { %4111 = vmatpush3.bf16.msra.mxu1 %v4923_v56  ;;  %v733_v49 = vpop.f32.mrf.mxu1  ;;  %4112 = vmatprep.mubr.msk.bf16.mxu1 %vm4681_vm0, %v4680_v0 }
 0x4c5   :  { %4136 = vmatprep.subr.bf16.mxu1 %v4680_v0 }
 0x4c6   :  { %v4089_v50 = vpop.f32.mrf.mxu1 }
 0x4c7   :  { %v3427_v50 = vld [vmem:[%s5750_s6 + $0x1c] sm:$0xf] }
 0x4cb   :  { %4113 = vmatmul.mubr.msk.bf16.vlgmr.msra.gmra.mxu1 %vm53_vm1, %v3323_v51 }
 0x4cc   :  { %4137 = vmatpush3.bf16.msra.mxu1 %v4923_v56  ;;  %4138 = vmatprep.mubr.msk.bf16.mxu1 %vm4681_vm0, %v4680_v0 }
 0x4cd   :  { %4142 = vmatprep.subr.bf16.mxu1 %v4680_v0 }
 0x4d3   :  { %4139 = vmatmul.mubr.msk.bf16.vlgmr.msra.gmra.mxu1 %vm53_vm1, %v3349_v52  ;;  %v4580_v52 = vld [vmem:[%s5749_s7 + $0x1f8] sm:$0xff]  }
 0x4d4   :  { %4143 = vmatpush3.bf16.msra.mxu1 %v4551_v53  ;;  %4158 = vmatprep.mubr.msk.bf16.mxu1 %vm4681_vm0, %v4680_v0 }
 0x4d5   :  { %4144 = vmatprep.subr.bf16.mxu1 %v4680_v0 }
 0x4d8   :  { %4145 = vmatpush3.bf16.msra.mxu1 %v4553_v54 }
 0x4d9   :  { %4146 = vmatprep.subr.bf16.mxu1 %v4680_v0 }
 0x4dc   :  { %4147 = vmatpush3.bf16.msra.mxu1 %v4555_v55  ;;  %v4581_v55 = vld [vmem:[%s5749_s7 + $0x1f0] sm:$0xff]  }
 0x4dd   :  { %4148 = vmatprep.subr.bf16.mxu1 %v4680_v0 }
 0x4e0   :  { %4149 = vmatpush3.bf16.msra.mxu1 %v4557_v57 }
 0x4e1   :  { %4150 = vmatprep.subr.bf16.mxu1 %v4680_v0 }
 0x4e4   :  { %4151 = vmatpush3.bf16.msra.mxu1 %v4559_v59  ;;  %v4582_v59 = vld [vmem:[%s5749_s7 + $0x1e8] sm:$0xff]  }
 0x4e5   :  { %4152 = vmatprep.subr.bf16.mxu1 %v4680_v0 }
 0x4e8   :  { %4153 = vmatpush3.bf16.msra.mxu1 %v4561_v61  ;;  %v4584_v61 = vld [vmem:[%s5749_s7 + $0x1e0] sm:$0xff]  }
 0x4e9   :  { %4154 = vmatprep.subr.bf16.mxu1 %v4680_v0 }
 0x4ec   :  { %4155 = vmatpush3.bf16.msra.mxu1 %v4562_v62  ;;  %v4587_v62 = vld [vmem:[%s5749_s7 + $0x228] sm:$0xff]  }
 0x4ed   :  { %4156 = vmatprep.subr.bf16.mxu1 %v4680_v0 }
 0x4f0   :  { %4157 = vmatpush3.bf16.msra.mxu1 %v4563_v63  ;;  %v4586_v63 = vld [vmem:[%s5749_s7 + $0x1d8] sm:$0xff]  }
 0x4f1   :  { %4188 = vmatprep.subr.bf16.mxu1 %v4680_v0 }
 0x583   :  { %v836_v1 = vpop.f32.mrf.mxu1 }
 0x584   :  { %v5131_v2 = vadd.f32 %v836_v1, %v686_v39  ;;  %v4588_v1 = vld [vmem:[%s5749_s7 + $0x1d0] sm:$0xff]  }
 0x585   :  { %v4108_v3 = vpop.f32.mrf.mxu1 }
 0x586   :  { %v4590_v3 = vld [vmem:[%s5749_s7 + $0x1c8] sm:$0xff]  }
 0x587   :  { %v839_v4 = vpop.f32.mrf.mxu1 }
 0x588   :  { %v4591_v4 = vld [vmem:[%s5749_s7 + $0x218] sm:$0xff]  }
 0x589   :  { %v4109_v5 = vpop.f32.mrf.mxu1 }
 0x58a   :  { %v4592_v5 = vld [vmem:[%s5749_s7 + $0x1c0] sm:$0xff]  }
 0x58b   :  { %v882_v6 = vpop.f32.mrf.mxu1 }
 0x58c   :  { %v888_v7 = vpack.c.bf16 %v882_v6, %v882_v6  ;;  %v4593_v6 = vld [vmem:[%s5749_s7 + $0x210] sm:$0xff]  }
 0x58d   :  { %v4114_v8 = vpop.f32.mrf.mxu1 }
 0x58e   :  { %4133 = vmatmul.mubr.bf16.vlgmr.msra.gmra.mxu0 %v888_v7  ;;  %v4595_v7 = vld [vmem:[%s5749_s7 + $0x208] sm:$0xff]   ;;  %v4597_v8 = vld [vmem:[%s5749_s7 + $0x200] sm:$0xff]  }
 0x58f   :  { %4163 = vmatpush3.bf16.msra.mxu0 %v4923_v56  ;;  %v885_v9 = vpop.f32.mrf.mxu1  ;;  %4164 = vmatprep.mubr.msk.bf16.mxu0 %vm4681_vm0, %v4680_v0 }
 0x590   :  { %4168 = vmatprep.subr.bf16.mxu0 %v4680_v0 }
 0x591   :  { %v4115_v10 = vpop.f32.mrf.mxu1 }
 0x593   :  { %v1034_v11 = vpop.f32.mrf.mxu1 }
 0x594   :  { %v5140_v13 = vpack.c.bf16 %v1034_v11, %v1034_v11 }
 0x595   :  { %v4140_v15 = vpop.f32.mrf.mxu1 }
 0x596   :  { %4159 = vmatmul.mubr.bf16.vlgmr.msra.gmra.mxu1 %v5140_v13  ;;  %4165 = vmatmul.mubr.msk.bf16.vlgmr.msra.gmra.mxu0 %vm53_vm1, %v3375_v12 }
 0x597   :  { %4189 = vmatpush3.bf16.msra.mxu1 %v4923_v56  ;;  %v1037_v16 = vpop.f32.mrf.mxu1  ;;  %4190 = vmatprep.mubr.msk.bf16.mxu1 %vm4681_vm0, %v4680_v0 }
 0x598   :  { %4169 = vmatpush3.bf16.msra.mxu0 %v4564_v14  ;;  %4194 = vmatprep.subr.bf16.mxu1 %v4680_v0 }
 0x599   :  { %v4141_v18 = vpop.f32.mrf.mxu1  ;;  %4170 = vmatprep.subr.bf16.mxu0 %v4680_v0  ;;  %4184 = vmatprep.mubr.msk.bf16.mxu0 %vm4681_vm0, %v4680_v0 }
 0x59c   :  { %4171 = vmatpush3.bf16.msra.mxu0 %v4565_v17  ;;  %v4594_v17 = vld [vmem:[%s5751_s12 + $0x38] sm:$0xff]  }
 0x59d   :  { %4172 = vmatprep.subr.bf16.mxu0 %v4680_v0 }
 0x59e   :  { %4191 = vmatmul.mubr.msk.bf16.vlgmr.msra.gmra.mxu1 %vm53_vm1, %v3401_v19 }
 0x59f   :  { %4195 = vmatpush3.bf16.msra.mxu1 %v4567_v20  ;;  %4210 = vmatprep.mubr.msk.bf16.mxu1 %vm4681_vm0, %v4680_v0 }
 0x5a0   :  { %4173 = vmatpush3.bf16.msra.mxu0 %v4566_v21  ;;  %4196 = vmatprep.subr.bf16.mxu1 %v4680_v0 }
 0x5a1   :  { %4174 = vmatprep.subr.bf16.mxu0 %v4680_v0 }
 0x5a3   :  { %4197 = vmatpush3.bf16.msra.mxu1 %v4569_v22 }
 0x5a4   :  { %4175 = vmatpush3.bf16.msra.mxu0 %v4568_v23  ;;  %4198 = vmatprep.subr.bf16.mxu1 %v4680_v0 }
 0x5a5   :  { %4176 = vmatprep.subr.bf16.mxu0 %v4680_v0 }
 0x5a7   :  { %4199 = vmatpush3.bf16.msra.mxu1 %v4571_v24  ;;  %v4596_v24 = vld [vmem:[%s5751_s12 + $0x30] sm:$0xff]  }
 0x5a8   :  { %4177 = vmatpush3.bf16.msra.mxu0 %v4570_v25  ;;  %4200 = vmatprep.subr.bf16.mxu1 %v4680_v0 }
 0x5a9   :  { %4178 = vmatprep.subr.bf16.mxu0 %v4680_v0 }
 0x5ab   :  { %4201 = vmatpush3.bf16.msra.mxu1 %v4573_v26 }
 0x5ac   :  { %4179 = vmatpush3.bf16.msra.mxu0 %v4572_v27  ;;  %4202 = vmatprep.subr.bf16.mxu1 %v4680_v0 }
 0x5ad   :  { %4180 = vmatprep.subr.bf16.mxu0 %v4680_v0 }
 0x5af   :  { %4203 = vmatpush3.bf16.msra.mxu1 %v4575_v29 }
 0x5b0   :  { %4181 = vmatpush3.bf16.msra.mxu0 %v4574_v28  ;;  %4204 = vmatprep.subr.bf16.mxu1 %v4680_v0  ;;  %v4598_v28 = vld [vmem:[%s5751_s12 + $0x28] sm:$0xff]  }
 0x5b1   :  { %4182 = vmatprep.subr.bf16.mxu0 %v4680_v0 }
 0x5b3   :  { %4205 = vmatpush3.bf16.msra.mxu1 %v4577_v31 }
 0x5b4   :  { %4183 = vmatpush3.bf16.msra.mxu0 %v4576_v30  ;;  %4206 = vmatprep.subr.bf16.mxu1 %v4680_v0 }
 0x5b5   :  { %4214 = vmatprep.subr.bf16.mxu0 %v4680_v0 }
 0x5b7   :  { %4207 = vmatpush3.bf16.msra.mxu1 %v4578_v32  ;;  %v4599_v32 = vld [vmem:[%s5751_s12 + $0x20] sm:$0xff]  }
 0x5b8   :  { %4208 = vmatprep.subr.bf16.mxu1 %v4680_v0 }
 0x5bb   :  { %4209 = vmatpush3.bf16.msra.mxu1 %v4579_v33 }
 0x5bc   :  { %4240 = vmatprep.subr.bf16.mxu1 %v4680_v0 }
 0x64e   :  { %v988_v34 = vpop.f32.mrf.mxu0 }
 0x64f   :  { %v994_v35 = vadd.f32 %v988_v34, %v5131_v2  ;;  %v4589_v2 = vld [vmem:[%s5749_s7 + $0x220] sm:$0xff]   ;;  %v4600_v34 = vld [vmem:[%s5751_s12 + $0x18] sm:$0xff]  }
 0x650   :  { %v4134_v36 = vpop.f32.mrf.mxu0 }
 0x651   :  { %v4602_v36 = vld [vmem:[%s5751_s12 + $0x8] sm:$0xff]  }
 0x652   :  { %v991_v37 = vpop.f32.mrf.mxu0 }
 0x653   :  { %v4603_v37 = vld [vmem:[%s5751_s12] sm:$0xff]  }
 0x654   :  { %v4135_v38 = vpop.f32.mrf.mxu0 }
 0x656   :  { %v1140_v39 = vpop.f32.mrf.mxu1  ;;  %v1186_v40 = vpop.f32.mrf.mxu0 }
 0x657   :  { %v5221_v41 = vadd.f32 %v1140_v39, %v994_v35  ;;  %v1192_v42 = vpack.c.bf16 %v1186_v40, %v1186_v40  ;;  %v4601_v35 = vld [vmem:[%s5751_s12 + $0x10] sm:$0xff]  }
 0x658   :  { %v4160_v43 = vpop.f32.mrf.mxu1  ;;  %v4166_v44 = vpop.f32.mrf.mxu0 }
 0x659   :  { %4185 = vmatmul.mubr.bf16.vlgmr.msra.gmra.mxu0 %v1192_v42  ;;  %v3479_v44 = vld [vmem:[%s5753_s8] ss:$0 sm:$0xff] }
 0x65a   :  { %4215 = vmatpush3.bf16.msra.mxu0 %v4923_v56  ;;  %v1143_v45 = vpop.f32.mrf.mxu1  ;;  %v1189_v46 = vpop.f32.mrf.mxu0  ;;  %4216 = vmatprep.mubr.msk.bf16.mxu0 %vm4681_vm0, %v4680_v0 }
 0x65b   :  { %4220 = vmatprep.subr.bf16.mxu0 %v4680_v0 }
 0x65c   :  { %v4161_v47 = vpop.f32.mrf.mxu1  ;;  %v4167_v48 = vpop.f32.mrf.mxu0 }
 0x65e   :  { %v1338_v49 = vpop.f32.mrf.mxu1 }
 0x65f   :  { %v1344_v51 = vpack.c.bf16 %v1338_v49, %v1338_v49 }
 0x660   :  { %v4192_v53 = vpop.f32.mrf.mxu1 }
 0x661   :  { %4211 = vmatmul.mubr.bf16.vlgmr.msra.gmra.mxu1 %v1344_v51  ;;  %4217 = vmatmul.mubr.msk.bf16.vlgmr.msra.gmra.mxu0 %vm53_vm1, %v3427_v50  ;;  %v1876_v53 = vld [vmem:[%s5754_s9] sm:$0xf] }
 0x662   :  { %4241 = vmatpush3.bf16.msra.mxu1 %v4923_v56  ;;  %v1341_v54 = vpop.f32.mrf.mxu1  ;;  %4242 = vmatprep.mubr.msk.bf16.mxu1 %vm4681_vm0, %v4680_v0  ;;  %v3453_v56 = vld [vmem:[%s5750_s6 + $0x20] sm:$0xf] }
 0x663   :  { %4221 = vmatpush3.bf16.msra.mxu0 %v4580_v52  ;;  %4246 = vmatprep.subr.bf16.mxu1 %v4680_v0  ;;  %v3490_v52 = vld [vmem:[%s5754_s9 + $0x4] sm:$0xf]  ;;  %v4604_v54 = vld [vmem:[%s5752_s10 + $0x78] sm:$0xff]  }
 0x664   :  { %v4193_v57 = vpop.f32.mrf.mxu1  ;;  %4222 = vmatprep.subr.bf16.mxu0 %v4680_v0  ;;  %4236 = vmatprep.mubr.msk.bf16.mxu0 %vm4681_vm0, %v4680_v0 }
 0x665   :  { %v4605_v57 = vld [vmem:[%s5752_s10 + $0x70] sm:$0xff]  }
 0x667   :  { %4223 = vmatpush3.bf16.msra.mxu0 %v4581_v55  ;;  %v4606_v55 = vld [vmem:[%s5752_s10 + $0x38] sm:$0xff]  }
 0x668   :  { %4224 = vmatprep.subr.bf16.mxu0 %v4680_v0 }
 0x669   :  { %4243 = vmatmul.mubr.msk.bf16.vlgmr.msra.gmra.mxu1 %vm53_vm1, %v3453_v56  ;;  %v4608_v56 = vld [vmem:[%s5752_s10 + $0x30] sm:$0xff]  }
 0x66a   :  { %4247 = vmatpush3.bf16.msra.mxu1 %v4583_v58  ;;  %4262 = vmatprep.mubr.msk.bf16.mxu1 %vm4681_vm0, %v4680_v0  ;;  %v4607_v58 = vld [vmem:[%s5752_s10 + $0x68] sm:$0xff]  }
 0x66b   :  { %4225 = vmatpush3.bf16.msra.mxu0 %v4582_v59  ;;  %4248 = vmatprep.subr.bf16.mxu1 %v4680_v0  ;;  %v4610_v59 = vld [vmem:[%s5752_s10 + $0x28] sm:$0xff]  }
 0x66c   :  { %4226 = vmatprep.subr.bf16.mxu0 %v4680_v0 }
 0x66e   :  { %4249 = vmatpush3.bf16.msra.mxu1 %v4585_v60  ;;  %v4609_v60 = vld [vmem:[%s5752_s10 + $0x60] sm:$0xff]  }
 0x66f   :  { %4227 = vmatpush3.bf16.msra.mxu0 %v4584_v61  ;;  %4250 = vmatprep.subr.bf16.mxu1 %v4680_v0  ;;  %v4612_v61 = vld [vmem:[%s5752_s10 + $0x20] sm:$0xff]  }
 0x670   :  { %4228 = vmatprep.subr.bf16.mxu0 %v4680_v0 }
 0x672   :  { %4251 = vmatpush3.bf16.msra.mxu1 %v4587_v62 }
 0x673   :  { %4229 = vmatpush3.bf16.msra.mxu0 %v4586_v63  ;;  %4252 = vmatprep.subr.bf16.mxu1 %v4680_v0 }
 0x674   :  { %4230 = vmatprep.subr.bf16.mxu0 %v4680_v0 }
 0x676   :  { %4253 = vmatpush3.bf16.msra.mxu1 %v4589_v2  ;;  %v4614_v2 = vld [vmem:[%s5752_s10 + $0x18] sm:$0xff]  }
 0x677   :  { %4231 = vmatpush3.bf16.msra.mxu0 %v4588_v1  ;;  %4254 = vmatprep.subr.bf16.mxu1 %v4680_v0  ;;  %v4611_v1 = vld [vmem:[%s5752_s10 + $0x58] sm:$0xff]  }
 0x678   :  { %4232 = vmatprep.subr.bf16.mxu0 %v4680_v0 }
 0x67a   :  { %4255 = vmatpush3.bf16.msra.mxu1 %v4591_v4 }
 0x67b   :  { %4233 = vmatpush3.bf16.msra.mxu0 %v4590_v3  ;;  %4256 = vmatprep.subr.bf16.mxu1 %v4680_v0 }
 0x67c   :  { %4234 = vmatprep.subr.bf16.mxu0 %v4680_v0 }
 0x67e   :  { %4257 = vmatpush3.bf16.msra.mxu1 %v4593_v6  ;;  %v4616_v6 = vld [vmem:[%s5752_s10 + $0x10] sm:$0xff]  }
 0x67f   :  { %4235 = vmatpush3.bf16.msra.mxu0 %v4592_v5  ;;  %4258 = vmatprep.subr.bf16.mxu1 %v4680_v0  ;;  %v4613_v5 = vld [vmem:[%s5752_s10 + $0x50] sm:$0xff]  }
 0x680   :  { %4266 = vmatprep.subr.bf16.mxu0 %v4680_v0 }
 0x682   :  { %4259 = vmatpush3.bf16.msra.mxu1 %v4595_v7  ;;  %v4615_v7 = vld [vmem:[%s5752_s10 + $0x48] sm:$0xff]  }
 0x683   :  { %4260 = vmatprep.subr.bf16.mxu1 %v4680_v0 }
 0x686   :  { %4261 = vmatpush3.bf16.msra.mxu1 %v4597_v8  ;;  %v4617_v8 = vld [vmem:[%s5752_s10 + $0x40] sm:$0xff]  }
 0x687   :  { %4286 = vmatprep.subr.bf16.mxu1 %v4680_v0 }
 0x719   :  { %v1292_v9 = vpop.f32.mrf.mxu0 }
 0x71a   :  { %v1298_v10 = vadd.f32 %v1292_v9, %v5221_v41  ;;  %v4618_v9 = vld [vmem:[%s5752_s10 + $0x8] sm:$0xff]  }
 0x71b   :  { %v4186_v11 = vpop.f32.mrf.mxu0 }
 0x71d   :  { %v1295_v12 = vpop.f32.mrf.mxu0 }
 0x71f   :  { %v4187_v14 = vpop.f32.mrf.mxu0 }
 0x721   :  { %v1444_v15 = vpop.f32.mrf.mxu1  ;;  %v1490_v16 = vpop.f32.mrf.mxu0 }
 0x722   :  { %v1450_v18 = vadd.f32 %v1444_v15, %v1298_v10  ;;  %v1496_v19 = vpack.c.bf16 %v1490_v16, %v1490_v16  ;;  %v4619_v10 = vld [vmem:[%s5752_s10] sm:$0xff]   ;;  %v4620_v16 = vld [vmem:[%s5752_s10 + $0xb8] sm:$0xff]  }
 0x723   :  { %v4212_v20 = vpop.f32.mrf.mxu1  ;;  %v4218_v21 = vpop.f32.mrf.mxu0 }
 0x724   :  { %4237 = vmatmul.mubr.bf16.vlgmr.msra.gmra.mxu0 %v1496_v19  ;;  %v4621_v21 = vld [vmem:[%s5752_s10 + $0xb0] sm:$0xff]  }
 0x725   :  { %4267 = vmatpush3.bf16.msra.mxu0 %v4594_v17  ;;  %v1447_v22 = vpop.f32.mrf.mxu1  ;;  %v1493_v23 = vpop.f32.mrf.mxu0  ;;  %4282 = vmatprep.mubr.msk.bf16.mxu0 %vm4681_vm0, %v4680_v0 }
 0x726   :  { %4268 = vmatprep.subr.bf16.mxu0 %v4680_v0 }
 0x727   :  { %v4213_v25 = vpop.f32.mrf.mxu1  ;;  %v4219_v26 = vpop.f32.mrf.mxu0 }
 0x728   :  { %v4622_v25 = vld [vmem:[%s5752_s10 + $0xa8] sm:$0xff]   ;;  %v4624_v26 = vld [vmem:[%s5752_s10 + $0xa0] sm:$0xff]  }
 0x729   :  { %4269 = vmatpush3.bf16.msra.mxu0 %v4596_v24  ;;  %v1642_v27 = vpop.f32.mrf.mxu1  ;;  %v3524_v24 = vld [vmem:[%s5754_s9 + $0x8] sm:$0xf] }
 0x72a   :  { %v1648_v29 = vpack.c.bf16 %v1642_v27, %v1642_v27  ;;  %4270 = vmatprep.subr.bf16.mxu0 %v4680_v0  ;;  %v3550_v27 = vld [vmem:[%s5754_s9 + $0xc] sm:$0xf] }
 0x72b   :  { %v4244_v30 = vpop.f32.mrf.mxu1 }
 0x72c   :  { %4263 = vmatmul.mubr.bf16.vlgmr.msra.gmra.mxu1 %v1648_v29  ;;  %v4626_v29 = vld [vmem:[%s5752_s10 + $0x98] sm:$0xff]   ;;  %v4625_v30 = vld [vmem:[%s5752_s10 + $0xf0] sm:$0xff]  }
 0x72d   :  { %4271 = vmatpush3.bf16.msra.mxu0 %v4598_v28  ;;  %v1645_v31 = vpop.f32.mrf.mxu1  ;;  %4288 = vmatprep.mubr.msk.bf16.mxu1 %vm4681_vm0, %v4680_v0  ;;  %v4623_v28 = vld [vmem:[%s5752_s10 + $0xf8] sm:$0xff]  }
 0x72e   :  { %4272 = vmatprep.subr.bf16.mxu0 %v4680_v0  ;;  %v4628_v31 = vld [vmem:[%s5752_s10 + $0x90] sm:$0xff]  }
 0x72f   :  { %v4245_v33 = vpop.f32.mrf.mxu1 }
 0x730   :  { %v4629_v33 = vld [vmem:[%s5752_s10 + $0xe0] sm:$0xff]  }
 0x731   :  { %4273 = vmatpush3.bf16.msra.mxu0 %v4599_v32  ;;  %v4627_v32 = vld [vmem:[%s5752_s10 + $0xe8] sm:$0xff]  }
 0x732   :  { %4274 = vmatprep.subr.bf16.mxu0 %v4680_v0 }
 0x735   :  { %4275 = vmatpush3.bf16.msra.mxu0 %v4600_v34  ;;  %v4630_v34 = vld [vmem:[%s5752_s10 + $0x88] sm:$0xff]  }
 0x736   :  { %4276 = vmatprep.subr.bf16.mxu0 %v4680_v0 }
 0x739   :  { %4277 = vmatpush3.bf16.msra.mxu0 %v4601_v35  ;;  %v4631_v35 = vld [vmem:[%s5752_s10 + $0xd8] sm:$0xff]  }
 0x73a   :  { %4278 = vmatprep.subr.bf16.mxu0 %v4680_v0 }
 0x73d   :  { %4279 = vmatpush3.bf16.msra.mxu0 %v4602_v36  ;;  %v4632_v36 = vld [vmem:[%s5752_s10 + $0x80] sm:$0xff]  }
 0x73e   :  { %4280 = vmatprep.subr.bf16.mxu0 %v4680_v0 }
 0x741   :  { %4281 = vmatpush3.bf16.msra.mxu0 %v4603_v37  ;;  %v4633_v37 = vld [vmem:[%s5752_s10 + $0xd0] sm:$0xff]  }
 0x742   :  { %4292 = vmatprep.subr.bf16.mxu0 %v4680_v0 }
 0x744   :  { %4283 = vmatmul.mubr.bf16.vlgmr.msra.gmra.mxu0 %v5140_v13 }
 0x745   :  { %4294 = vmatprep.mubr.msk.bf16.mxu0 %vm4681_vm0, %v4680_v0 }
 0x7e4   :  { %v1596_v38 = vpop.f32.mrf.mxu0 }
 0x7e5   :  { %v1602_v42 = vadd.f32 %v1596_v38, %v1450_v18  ;;  %v4634_v38 = vld [vmem:[%s5752_s10 + $0xc8] sm:$0xff]  }
 0x7e6   :  { %v4238_v39 = vpop.f32.mrf.mxu0 }
 0x7e7   :  { %v4635_v39 = vld [vmem:[%s5752_s10 + $0xc0] sm:$0xff]  }
 0x7e8   :  { %v1599_v40 = vpop.f32.mrf.mxu0 }
 0x7ea   :  { %v4239_v41 = vpop.f32.mrf.mxu0 }
 0x7ec   :  { %v1748_v43 = vpop.f32.mrf.mxu1 }
 0x7ed   :  { %v1754_v45 = vadd.f32 %v1748_v43, %v1602_v42 }
 0x7ee   :  { %v4264_v46 = vpop.f32.mrf.mxu1 }
 0x7ef   :  { %v1762_v47 = vadd.f32 %v3479_v44, %v1754_v45 }
 0x7f0   :  { %v1751_v48 = vpop.f32.mrf.mxu1 }
 0x7f1   :  { %v1763_v49 = vmax.f32 %v1762_v47, 0.0 }
 0x7f2   :  { %v4265_v50 = vpop.f32.mrf.mxu1 }
 0x7f3   :  { %v1764_v13 = vpack.c.bf16 %v1763_v49, %v1763_v49 }
 0x7f5   :  { %v5351_v51 = vsel %vm391_vm3, %v1764_v13, 0 }
 0x7f6   :  { %4287 = vmatpush3.bf16.msra.mxu1 %v5351_v51  ;;  %4293 = vmatpush3.bf16.msra.mxu0 %v5351_v51 }
 0x7f7   :  { %4298 = vmatprep.subr.bf16.mxu1 %v4680_v0  ;;  %4318 = vmatprep.subr.bf16.mxu0 %v4680_v0 }
 0x7f9   :  { %4295 = vmatmul.mubr.msk.bf16.vlgmr.msra.gmra.mxu0 %vm53_vm1, %v3490_v52  ;;  %4289 = vmatmul.mubr.msk.bf16.vlgmr.msra.gmra.mxu1 %vm53_vm1, %v1876_v53 }
 0x7fa   :  { %4299 = vmatpush3.bf16.msra.mxu1 %v4604_v54  ;;  %4319 = vmatpush3.bf16.msra.mxu0 %v4606_v55  ;;  %v3576_v55 = vld [vmem:[%s5754_s9 + $0x10] sm:$0xf] }
 0x7fb   :  { %4300 = vmatprep.subr.bf16.mxu1 %v4680_v0  ;;  %4320 = vmatprep.subr.bf16.mxu0 %v4680_v0 }
 0x7fc   :  { %4314 = vmatprep.mubr.msk.bf16.mxu1 %vm4681_vm0, %v4680_v0  ;;  %4334 = vmatprep.mubr.msk.bf16.mxu0 %vm4681_vm0, %v4680_v0 }
 0x7fe   :  { %4301 = vmatpush3.bf16.msra.mxu1 %v4605_v57  ;;  %4321 = vmatpush3.bf16.msra.mxu0 %v4608_v56  ;;  %v4636_v56 = vld [vmem:[%s5752_s10 + $0x138] sm:$0xff]  }
 0x7ff   :  { %4302 = vmatprep.subr.bf16.mxu1 %v4680_v0  ;;  %4322 = vmatprep.subr.bf16.mxu0 %v4680_v0 }
 0x802   :  { %4303 = vmatpush3.bf16.msra.mxu1 %v4607_v58  ;;  %4323 = vmatpush3.bf16.msra.mxu0 %v4610_v59 }
 0x803   :  { %4304 = vmatprep.subr.bf16.mxu1 %v4680_v0  ;;  %4324 = vmatprep.subr.bf16.mxu0 %v4680_v0 }
 0x804   :  { %v5399_v62 = vpop.f32.mrf.mxu0 }
 0x806   :  { %v4284_v63 = vpop.f32.mrf.mxu0  ;;  %4305 = vmatpush3.bf16.msra.mxu1 %v4609_v60  ;;  %4325 = vmatpush3.bf16.msra.mxu0 %v4612_v61  ;;  %v4637_v60 = vld [vmem:[%s5752_s10 + $0x130] sm:$0xff]  }
 0x807   :  { %4306 = vmatprep.subr.bf16.mxu1 %v4680_v0  ;;  %4326 = vmatprep.subr.bf16.mxu0 %v4680_v0  ;;  %v3602_v63 = vld [vmem:[%s5754_s9 + $0x14] sm:$0xf] }
 0x808   :  { %v1873_v3 = vpop.f32.mrf.mxu0 }
 0x809   :  { %v4641_v3 = vld [vmem:[%s5752_s10 + $0x170] sm:$0xff]  }
 0x80a   :  { %v4285_v4 = vpop.f32.mrf.mxu0  ;;  %4307 = vmatpush3.bf16.msra.mxu1 %v4611_v1  ;;  %4327 = vmatpush3.bf16.msra.mxu0 %v4614_v2  ;;  %v4639_v1 = vld [vmem:[%s5752_s10 + $0x178] sm:$0xff]   ;;  %v4638_v2 = vld [vmem:[%s5752_s10 + $0x128] sm:$0xff]  }
 0x80b   :  { %4308 = vmatprep.subr.bf16.mxu1 %v4680_v0  ;;  %4328 = vmatprep.subr.bf16.mxu0 %v4680_v0  ;;  %v4640_v4 = vld [vmem:[%s5752_s10 + $0x120] sm:$0xff]  }
 0x80e   :  { %4309 = vmatpush3.bf16.msra.mxu1 %v4613_v5  ;;  %4329 = vmatpush3.bf16.msra.mxu0 %v4616_v6  ;;  %v4643_v5 = vld [vmem:[%s5752_s10 + $0x168] sm:$0xff]   ;;  %v4642_v6 = vld [vmem:[%s5752_s10 + $0x118] sm:$0xff]  }
 0x80f   :  { %4310 = vmatprep.subr.bf16.mxu1 %v4680_v0  ;;  %4330 = vmatprep.subr.bf16.mxu0 %v4680_v0 }
 0x812   :  { %4311 = vmatpush3.bf16.msra.mxu1 %v4615_v7  ;;  %4331 = vmatpush3.bf16.msra.mxu0 %v4618_v9  ;;  %v4645_v7 = vld [vmem:[%s5752_s10 + $0x160] sm:$0xff]   ;;  %v4646_v9 = vld [vmem:[%s5752_s10 + $0x108] sm:$0xff]  }
 0x813   :  { %4312 = vmatprep.subr.bf16.mxu1 %v4680_v0  ;;  %4332 = vmatprep.subr.bf16.mxu0 %v4680_v0 }
 0x816   :  { %4313 = vmatpush3.bf16.msra.mxu1 %v4617_v8  ;;  %4333 = vmatpush3.bf16.msra.mxu0 %v4619_v10  ;;  %v4644_v8 = vld [vmem:[%s5752_s10 + $0x110] sm:$0xff]   ;;  %v4647_v10 = vld [vmem:[%s5752_s10 + $0x158] sm:$0xff]  }
 0x817   :  { %4338 = vmatprep.subr.bf16.mxu1 %v4680_v0  ;;  %4344 = vmatprep.subr.bf16.mxu0 %v4680_v0 }
 0x8b9   :  { %v1979_v11 = vpop.f32.mrf.mxu0  ;;  %v1917_v12 = vpop.f32.mrf.mxu1 }
 0x8ba   :  { %v1985_v14 = vpack.c.bf16 %v1979_v11, %v1979_v11  ;;  %v1923_v15 = vpack.c.bf16 %v1917_v12, %v1917_v12  ;;  %v4648_v11 = vld [vmem:[%s5752_s10 + $0x100] sm:$0xff]   ;;  %v4649_v12 = vld [vmem:[%s5752_s10 + $0x150] sm:$0xff]  }
 0x8bb   :  { %v4296_v17 = vpop.f32.mrf.mxu0  ;;  %v4290_v18 = vpop.f32.mrf.mxu1 }
 0x8bc   :  { %4315 = vmatmul.mubr.bf16.vlgmr.msra.gmra.mxu1 %v1985_v14  ;;  %4335 = vmatmul.mubr.bf16.vlgmr.msra.gmra.mxu0 %v1923_v15  ;;  %v4650_v14 = vld [vmem:[%s5752_s10 + $0x148] sm:$0xff]   ;;  %v4651_v15 = vld [vmem:[%s5752_s10 + $0x140] sm:$0xff]  }
 0x8bd   :  { %4339 = vmatpush3.bf16.msra.mxu1 %v5351_v51  ;;  %v1982_v19 = vpop.f32.mrf.mxu0  ;;  %4340 = vmatprep.mubr.msk.bf16.mxu1 %vm4681_vm0, %v4680_v0  ;;  %v1920_v20 = vpop.f32.mrf.mxu1 }
 0x8be   :  { %4364 = vmatprep.subr.bf16.mxu1 %v4680_v0  ;;  %4345 = vmatpush3.bf16.msra.mxu0 %v4620_v16 }
 0x8bf   :  { %v4297_v22 = vpop.f32.mrf.mxu0  ;;  %v4291_v23 = vpop.f32.mrf.mxu1  ;;  %4346 = vmatprep.subr.bf16.mxu0 %v4680_v0  ;;  %4360 = vmatprep.mubr.msk.bf16.mxu0 %vm4681_vm0, %v4680_v0 }
 0x8c2   :  { %4347 = vmatpush3.bf16.msra.mxu0 %v4621_v21 }
 0x8c3   :  { %4348 = vmatprep.subr.bf16.mxu0 %v4680_v0 }
 0x8c4   :  { %4341 = vmatmul.mubr.msk.bf16.vlgmr.msra.gmra.mxu1 %vm53_vm1, %v3524_v24 }
 0x8c5   :  { %4365 = vmatpush3.bf16.msra.mxu1 %v5351_v51  ;;  %4366 = vmatprep.mubr.msk.bf16.mxu1 %vm4681_vm0, %v4680_v0 }
 0x8c6   :  { %4370 = vmatprep.subr.bf16.mxu1 %v4680_v0  ;;  %4349 = vmatpush3.bf16.msra.mxu0 %v4622_v25 }
 0x8c7   :  { %4350 = vmatprep.subr.bf16.mxu0 %v4680_v0 }
 0x8ca   :  { %4351 = vmatpush3.bf16.msra.mxu0 %v4624_v26 }
 0x8cb   :  { %4352 = vmatprep.subr.bf16.mxu0 %v4680_v0 }
 0x8cc   :  { %4367 = vmatmul.mubr.msk.bf16.vlgmr.msra.gmra.mxu1 %vm53_vm1, %v3550_v27 }
 0x8cd   :  { %4371 = vmatpush3.bf16.msra.mxu1 %v4623_v28  ;;  %4386 = vmatprep.mubr.msk.bf16.mxu1 %vm4681_vm0, %v4680_v0 }
 0x8ce   :  { %4372 = vmatprep.subr.bf16.mxu1 %v4680_v0  ;;  %4353 = vmatpush3.bf16.msra.mxu0 %v4626_v29 }
 0x8cf   :  { %4354 = vmatprep.subr.bf16.mxu0 %v4680_v0 }
 0x8d1   :  { %4373 = vmatpush3.bf16.msra.mxu1 %v4625_v30 }
 0x8d2   :  { %4374 = vmatprep.subr.bf16.mxu1 %v4680_v0  ;;  %4355 = vmatpush3.bf16.msra.mxu0 %v4628_v31 }
 0x8d3   :  { %4356 = vmatprep.subr.bf16.mxu0 %v4680_v0 }
 0x8d5   :  { %4375 = vmatpush3.bf16.msra.mxu1 %v4627_v32  ;;  %v3628_v32 = vld [vmem:[%s5754_s9 + $0x18] sm:$0xf] }
 0x8d6   :  { %4376 = vmatprep.subr.bf16.mxu1 %v4680_v0  ;;  %4357 = vmatpush3.bf16.msra.mxu0 %v4630_v34  ;;  %v4652_v34 = vld [vmem:[%s5752_s10 + $0x1b8] sm:$0xff]  }
 0x8d7   :  { %4358 = vmatprep.subr.bf16.mxu0 %v4680_v0 }
 0x8d9   :  { %4377 = vmatpush3.bf16.msra.mxu1 %v4629_v33 }
 0x8da   :  { %4378 = vmatprep.subr.bf16.mxu1 %v4680_v0  ;;  %4359 = vmatpush3.bf16.msra.mxu0 %v4632_v36 }
 0x8db   :  { %4390 = vmatprep.subr.bf16.mxu0 %v4680_v0 }
 0x8dd   :  { %4379 = vmatpush3.bf16.msra.mxu1 %v4631_v35 }
 0x8de   :  { %4380 = vmatprep.subr.bf16.mxu1 %v4680_v0 }
 0x8e1   :  { %4381 = vmatpush3.bf16.msra.mxu1 %v4633_v37  ;;  %v4653_v37 = vld [vmem:[%s5752_s10 + $0x1b0] sm:$0xff]  }
 0x8e2   :  { %4382 = vmatprep.subr.bf16.mxu1 %v4680_v0 }
 0x8e5   :  { %4383 = vmatpush3.bf16.msra.mxu1 %v4634_v38 }
 0x8e6   :  { %4384 = vmatprep.subr.bf16.mxu1 %v4680_v0 }
 0x8e9   :  { %4385 = vmatpush3.bf16.msra.mxu1 %v4635_v39  ;;  %v3654_v39 = vld [vmem:[%s5754_s9 + $0x1c] sm:$0xf] }
 0x8ea   :  { %4416 = vmatprep.subr.bf16.mxu1 %v4680_v0 }
 0x97c   :  { %v2085_v40 = vpop.f32.mrf.mxu1  ;;  %v2173_v41 = vpop.f32.mrf.mxu0 }
 0x97d   :  { %v5519_v42 = vadd.f32 %v2173_v41, %v2085_v40  ;;  %v4655_v40 = vld [vmem:[%s5752_s10 + $0x1f8] sm:$0xff]   ;;  %v4654_v41 = vld [vmem:[%s5752_s10 + $0x1a8] sm:$0xff]  }
 0x97e   :  { %v4316_v43 = vpop.f32.mrf.mxu1  ;;  %v4336_v44 = vpop.f32.mrf.mxu0 }
 0x97f   :  { %v4656_v43 = vld [vmem:[%s5752_s10 + $0x1a0] sm:$0xff]   ;;  %v4659_v44 = vld [vmem:[%s5752_s10 + $0x1e8] sm:$0xff]  }
 0x980   :  { %v2088_v45 = vpop.f32.mrf.mxu1  ;;  %v2176_v46 = vpop.f32.mrf.mxu0 }
 0x981   :  { %v4658_v45 = vld [vmem:[%s5752_s10 + $0x198] sm:$0xff]   ;;  %v4660_v46 = vld [vmem:[%s5752_s10 + $0x190] sm:$0xff]  }
 0x982   :  { %v4317_v47 = vpop.f32.mrf.mxu1  ;;  %v4337_v48 = vpop.f32.mrf.mxu0 }
 0x983   :  { %v4661_v47 = vld [vmem:[%s5752_s10 + $0x1e0] sm:$0xff]   ;;  %v4662_v48 = vld [vmem:[%s5752_s10 + $0x188] sm:$0xff]  }
 0x984   :  { %v2218_v49 = vpop.f32.mrf.mxu1 }
 0x985   :  { %v2224_v50 = vpack.c.bf16 %v2218_v49, %v2218_v49  ;;  %v4663_v49 = vld [vmem:[%s5752_s10 + $0x1d8] sm:$0xff]  }
 0x986   :  { %v4342_v13 = vpop.f32.mrf.mxu1 }
 0x987   :  { %4361 = vmatmul.mubr.bf16.vlgmr.msra.gmra.mxu0 %v2224_v50  ;;  %v4664_v50 = vld [vmem:[%s5752_s10 + $0x180] sm:$0xff]   ;;  %v4665_v13 = vld [vmem:[%s5752_s10 + $0x1d0] sm:$0xff]  }
 0x988   :  { %4391 = vmatpush3.bf16.msra.mxu0 %v5351_v51  ;;  %v2221_v52 = vpop.f32.mrf.mxu1  ;;  %4392 = vmatprep.mubr.msk.bf16.mxu0 %vm4681_vm0, %v4680_v0 }
 0x989   :  { %4396 = vmatprep.subr.bf16.mxu0 %v4680_v0  ;;  %v4666_v52 = vld [vmem:[%s5752_s10 + $0x1c8] sm:$0xff]  }
 0x98a   :  { %v4343_v53 = vpop.f32.mrf.mxu1 }
 0x98b   :  { %v4667_v53 = vld [vmem:[%s5752_s10 + $0x1c0] sm:$0xff]  }
 0x98c   :  { %v2370_v54 = vpop.f32.mrf.mxu1 }
 0x98d   :  { %v2376_v57 = vpack.c.bf16 %v2370_v54, %v2370_v54 }
 0x98e   :  { %v4368_v58 = vpop.f32.mrf.mxu1 }
 0x98f   :  { %4387 = vmatmul.mubr.bf16.vlgmr.msra.gmra.mxu1 %v2376_v57  ;;  %4393 = vmatmul.mubr.msk.bf16.vlgmr.msra.gmra.mxu0 %vm53_vm1, %v3576_v55 }
 0x990   :  { %4417 = vmatpush3.bf16.msra.mxu1 %v5351_v51  ;;  %4418 = vmatprep.mubr.msk.bf16.mxu1 %vm4681_vm0, %v4680_v0  ;;  %v2373_v59 = vpop.f32.mrf.mxu1 }
 0x991   :  { %4397 = vmatpush3.bf16.msra.mxu0 %v4636_v56  ;;  %4422 = vmatprep.subr.bf16.mxu1 %v4680_v0 }
 0x992   :  { %4398 = vmatprep.subr.bf16.mxu0 %v4680_v0  ;;  %v4369_v61 = vpop.f32.mrf.mxu1  ;;  %4412 = vmatprep.mubr.msk.bf16.mxu0 %vm4681_vm0, %v4680_v0 }
 0x995   :  { %4399 = vmatpush3.bf16.msra.mxu0 %v4637_v60 }
 0x996   :  { %4400 = vmatprep.subr.bf16.mxu0 %v4680_v0 }
 0x997   :  { %4419 = vmatmul.mubr.msk.bf16.vlgmr.msra.gmra.mxu1 %vm53_vm1, %v3602_v63 }
 0x998   :  { %4423 = vmatpush3.bf16.msra.mxu1 %v4639_v1  ;;  %4438 = vmatprep.mubr.msk.bf16.mxu1 %vm4681_vm0, %v4680_v0 }
 0x999   :  { %4401 = vmatpush3.bf16.msra.mxu0 %v4638_v2  ;;  %4424 = vmatprep.subr.bf16.mxu1 %v4680_v0 }
 0x99a   :  { %4402 = vmatprep.subr.bf16.mxu0 %v4680_v0 }
 0x99c   :  { %4425 = vmatpush3.bf16.msra.mxu1 %v4641_v3 }
 0x99d   :  { %4403 = vmatpush3.bf16.msra.mxu0 %v4640_v4  ;;  %4426 = vmatprep.subr.bf16.mxu1 %v4680_v0 }
 0x99e   :  { %4404 = vmatprep.subr.bf16.mxu0 %v4680_v0 }
 0x9a0   :  { %4427 = vmatpush3.bf16.msra.mxu1 %v4643_v5 }
 0x9a1   :  { %4405 = vmatpush3.bf16.msra.mxu0 %v4642_v6  ;;  %4428 = vmatprep.subr.bf16.mxu1 %v4680_v0 }
 0x9a2   :  { %4406 = vmatprep.subr.bf16.mxu0 %v4680_v0 }
 0x9a4   :  { %4429 = vmatpush3.bf16.msra.mxu1 %v4645_v7 }
 0x9a5   :  { %4407 = vmatpush3.bf16.msra.mxu0 %v4644_v8  ;;  %4430 = vmatprep.subr.bf16.mxu1 %v4680_v0  ;;  %v3680_v8 = vld [vmem:[%s5754_s9 + $0x20] sm:$0xf] }
 0x9a6   :  { %4408 = vmatprep.subr.bf16.mxu0 %v4680_v0 }
 0x9a8   :  { %4431 = vmatpush3.bf16.msra.mxu1 %v4647_v10 }
 0x9a9   :  { %4409 = vmatpush3.bf16.msra.mxu0 %v4646_v9  ;;  %4432 = vmatprep.subr.bf16.mxu1 %v4680_v0  ;;  %v4668_v9 = vld [vmem:[%s5752_s10 + $0x238] sm:$0xff]  }
 0x9aa   :  { %4410 = vmatprep.subr.bf16.mxu0 %v4680_v0 }
 0x9ac   :  { %4433 = vmatpush3.bf16.msra.mxu1 %v4649_v12 }
 0x9ad   :  { %4411 = vmatpush3.bf16.msra.mxu0 %v4648_v11  ;;  %4434 = vmatprep.subr.bf16.mxu1 %v4680_v0  ;;  %v4669_v11 = vld [vmem:[%s5752_s10 + $0x230] sm:$0xff]  }
 0x9ae   :  { %4442 = vmatprep.subr.bf16.mxu0 %v4680_v0 }
 0x9b0   :  { %4435 = vmatpush3.bf16.msra.mxu1 %v4650_v14 }
 0x9b1   :  { %4436 = vmatprep.subr.bf16.mxu1 %v4680_v0 }
 0x9b4   :  { %4437 = vmatpush3.bf16.msra.mxu1 %v4651_v15  ;;  %v4670_v15 = vld [vmem:[%s5752_s10 + $0x228] sm:$0xff]  }
 0x9b5   :  { %4468 = vmatprep.subr.bf16.mxu1 %v4680_v0 }
 0xa47   :  { %v2324_v16 = vpop.f32.mrf.mxu0 }
 0xa48   :  { %v2330_v17 = vadd.f32 %v2324_v16, %v5519_v42  ;;  %v4657_v42 = vld [vmem:[%s5752_s10 + $0x1f0] sm:$0xff]   ;;  %v4671_v16 = vld [vmem:[%s5752_s10 + $0x220] sm:$0xff]  }
 0xa49   :  { %v4362_v18 = vpop.f32.mrf.mxu0 }
 0xa4a   :  { %v4673_v18 = vld [vmem:[%s5752_s10 + $0x210] sm:$0xff]  }
 0xa4b   :  { %v2327_v19 = vpop.f32.mrf.mxu0 }
 0xa4c   :  { %v4674_v19 = vld [vmem:[%s5752_s10 + $0x208] sm:$0xff]  }
 0xa4d   :  { %v4363_v20 = vpop.f32.mrf.mxu0 }
 0xa4e   :  { %v4675_v20 = vld [vmem:[%s5752_s10 + $0x200] sm:$0xff]  }
 0xa4f   :  { %v2476_v21 = vpop.f32.mrf.mxu1  ;;  %v2522_v22 = vpop.f32.mrf.mxu0 }
 0xa50   :  { %v5606_v23 = vadd.f32 %v2476_v21, %v2330_v17  ;;  %v2528_v24 = vpack.c.bf16 %v2522_v22, %v2522_v22  ;;  %v4672_v17 = vld [vmem:[%s5752_s10 + $0x218] sm:$0xff]  }
 0xa51   :  { %v4388_v25 = vpop.f32.mrf.mxu1  ;;  %v4394_v26 = vpop.f32.mrf.mxu0 }
 0xa52   :  { %4413 = vmatmul.mubr.bf16.vlgmr.msra.gmra.mxu0 %v2528_v24 }
 0xa53   :  { %4443 = vmatpush3.bf16.msra.mxu0 %v5351_v51  ;;  %v2479_v27 = vpop.f32.mrf.mxu1  ;;  %v2525_v28 = vpop.f32.mrf.mxu0  ;;  %4444 = vmatprep.mubr.msk.bf16.mxu0 %vm4681_vm0, %v4680_v0 }
 0xa54   :  { %4448 = vmatprep.subr.bf16.mxu0 %v4680_v0 }
 0xa55   :  { %v4389_v29 = vpop.f32.mrf.mxu1  ;;  %v4395_v30 = vpop.f32.mrf.mxu0 }
 0xa57   :  { %v2674_v31 = vpop.f32.mrf.mxu1 }
 0xa58   :  { %v2680_v33 = vpack.c.bf16 %v2674_v31, %v2674_v31 }
 0xa59   :  { %v4420_v35 = vpop.f32.mrf.mxu1 }
 0xa5a   :  { %4439 = vmatmul.mubr.bf16.vlgmr.msra.gmra.mxu1 %v2680_v33  ;;  %4445 = vmatmul.mubr.msk.bf16.vlgmr.msra.gmra.mxu0 %vm53_vm1, %v3628_v32  ;;  %v3480_v35 = vld [vmem:[%s5755_s13] ss:$0 sm:$0xff] }
 0xa5b   :  { %4469 = vmatpush3.bf16.msra.mxu1 %v5351_v51  ;;  %4470 = vmatprep.mubr.msk.bf16.mxu1 %vm4681_vm0, %v4680_v0  ;;  %v2677_v36 = vpop.f32.mrf.mxu1 }
 0xa5c   :  { %4449 = vmatpush3.bf16.msra.mxu0 %v4652_v34  ;;  %4474 = vmatprep.subr.bf16.mxu1 %v4680_v0 }
 0xa5d   :  { %4450 = vmatprep.subr.bf16.mxu0 %v4680_v0  ;;  %v4421_v38 = vpop.f32.mrf.mxu1  ;;  %4464 = vmatprep.mubr.msk.bf16.mxu0 %vm4681_vm0, %v4680_v0 }
 0xa60   :  { %4451 = vmatpush3.bf16.msra.mxu0 %v4653_v37  ;;  %v3706_v37 = vld [vmem:[%s5756_s11] ss:$0 sm:$0xff] }
 0xa61   :  { %4452 = vmatprep.subr.bf16.mxu0 %v4680_v0 }
 0xa62   :  { %4471 = vmatmul.mubr.msk.bf16.vlgmr.msra.gmra.mxu1 %vm53_vm1, %v3654_v39 }
 0xa63   :  { %4475 = vmatpush3.bf16.msra.mxu1 %v4655_v40  ;;  %4490 = vmatprep.mubr.msk.bf16.mxu1 %vm4681_vm0, %v4680_v0  ;;  %v1871_v40 = vadd.f32 %v3480_v35, %v5399_v62 }
 0xa64   :  { %4453 = vmatpush3.bf16.msra.mxu0 %v4654_v41  ;;  %4476 = vmatprep.subr.bf16.mxu1 %v4680_v0 }
 0xa65   :  { %4454 = vmatprep.subr.bf16.mxu0 %v4680_v0 }
 0xa67   :  { %4477 = vmatpush3.bf16.msra.mxu1 %v4657_v42 }
 0xa68   :  { %4455 = vmatpush3.bf16.msra.mxu0 %v4656_v43  ;;  %4478 = vmatprep.subr.bf16.mxu1 %v4680_v0 }
 0xa69   :  { %4456 = vmatprep.subr.bf16.mxu0 %v4680_v0 }
 0xa6b   :  { %4479 = vmatpush3.bf16.msra.mxu1 %v4659_v44 }
 0xa6c   :  { %4457 = vmatpush3.bf16.msra.mxu0 %v4658_v45  ;;  %4480 = vmatprep.subr.bf16.mxu1 %v4680_v0 }
 0xa6d   :  { %4458 = vmatprep.subr.bf16.mxu0 %v4680_v0 }
 0xa6f   :  { %4481 = vmatpush3.bf16.msra.mxu1 %v4661_v47 }
 0xa70   :  { %4459 = vmatpush3.bf16.msra.mxu0 %v4660_v46  ;;  %4482 = vmatprep.subr.bf16.mxu1 %v4680_v0 }
 0xa71   :  { %4460 = vmatprep.subr.bf16.mxu0 %v4680_v0 }
 0xa73   :  { %4483 = vmatpush3.bf16.msra.mxu1 %v4663_v49 }
 0xa74   :  { %4461 = vmatpush3.bf16.msra.mxu0 %v4662_v48  ;;  %4484 = vmatprep.subr.bf16.mxu1 %v4680_v0 }
 0xa75   :  { %4462 = vmatprep.subr.bf16.mxu0 %v4680_v0 }
 0xa77   :  { %4485 = vmatpush3.bf16.msra.mxu1 %v4665_v13 }
 0xa78   :  { %4463 = vmatpush3.bf16.msra.mxu0 %v4664_v50  ;;  %4486 = vmatprep.subr.bf16.mxu1 %v4680_v0 }
 0xa79   :  { %4494 = vmatprep.subr.bf16.mxu0 %v4680_v0 }
 0xa7b   :  { %4487 = vmatpush3.bf16.msra.mxu1 %v4666_v52 }
 0xa7c   :  { %4488 = vmatprep.subr.bf16.mxu1 %v4680_v0 }
 0xa7f   :  { %4489 = vmatpush3.bf16.msra.mxu1 %v4667_v53 }
 0xb12   :  { %v2628_v54 = vpop.f32.mrf.mxu0 }
 0xb13   :  { %v2634_v55 = vadd.f32 %v2628_v54, %v5606_v23 }
 0xb14   :  { %v4414_v57 = vpop.f32.mrf.mxu0 }
 0xb16   :  { %v2631_v56 = vpop.f32.mrf.mxu0 }
 0xb18   :  { %v4415_v58 = vpop.f32.mrf.mxu0 }
 0xb1a   :  { %v2780_v59 = vpop.f32.mrf.mxu1  ;;  %v2826_v60 = vpop.f32.mrf.mxu0 }
 0xb1b   :  { %v2786_v61 = vadd.f32 %v2780_v59, %v2634_v55  ;;  %v2832_v63 = vpack.c.bf16 %v2826_v60, %v2826_v60 }
 0xb1c   :  { %v4440_v1 = vpop.f32.mrf.mxu1  ;;  %v4446_v2 = vpop.f32.mrf.mxu0 }
 0xb1d   :  { %4465 = vmatmul.mubr.bf16.vlgmr.msra.gmra.mxu0 %v2832_v63 }
 0xb1e   :  { %4495 = vmatpush3.bf16.msra.mxu0 %v5351_v51  ;;  %v2783_v3 = vpop.f32.mrf.mxu1  ;;  %v2829_v4 = vpop.f32.mrf.mxu0  ;;  %4496 = vmatprep.mubr.msk.bf16.mxu0 %vm4681_vm0, %v4680_v0 }
 0xb1f   :  { %4500 = vmatprep.subr.bf16.mxu0 %v4680_v0 }
 0xb20   :  { %v4441_v5 = vpop.f32.mrf.mxu1  ;;  %v4447_v6 = vpop.f32.mrf.mxu0 }
 0xb22   :  { %v2978_v7 = vpop.f32.mrf.mxu1 }
 0xb23   :  { %v2984_v10 = vpack.c.bf16 %v2978_v7, %v2978_v7 }
 0xb24   :  { %v4472_v51 = vpop.f32.mrf.mxu1 }
 0xb25   :  { %4491 = vmatmul.mubr.bf16.vlgmr.msra.gmra.mxu1 %v2984_v10  ;;  %4497 = vmatmul.mubr.msk.bf16.vlgmr.msra.gmra.mxu0 %vm53_vm1, %v3680_v8 }
 0xb26   :  { %4501 = vmatpush3.bf16.msra.mxu0 %v4668_v9  ;;  %v2981_v12 = vpop.f32.mrf.mxu1  ;;  %4516 = vmatprep.mubr.msk.bf16.mxu0 %vm4681_vm0, %v4680_v0 }
 0xb27   :  { %4502 = vmatprep.subr.bf16.mxu0 %v4680_v0 }
 0xb28   :  { %v4473_v14 = vpop.f32.mrf.mxu1 }
 0xb2a   :  { %4503 = vmatpush3.bf16.msra.mxu0 %v4669_v11 }
 0xb2b   :  { %4504 = vmatprep.subr.bf16.mxu0 %v4680_v0 }
 0xb2e   :  { %4505 = vmatpush3.bf16.msra.mxu0 %v4670_v15 }
 0xb2f   :  { %4506 = vmatprep.subr.bf16.mxu0 %v4680_v0 }
 0xb32   :  { %4507 = vmatpush3.bf16.msra.mxu0 %v4671_v16 }
 0xb33   :  { %4508 = vmatprep.subr.bf16.mxu0 %v4680_v0 }
 0xb36   :  { %4509 = vmatpush3.bf16.msra.mxu0 %v4672_v17 }
 0xb37   :  { %4510 = vmatprep.subr.bf16.mxu0 %v4680_v0 }
 0xb3a   :  { %4511 = vmatpush3.bf16.msra.mxu0 %v4673_v18 }
 0xb3b   :  { %4512 = vmatprep.subr.bf16.mxu0 %v4680_v0 }
 0xb3e   :  { %4513 = vmatpush3.bf16.msra.mxu0 %v4674_v19 }
 0xb3f   :  { %4514 = vmatprep.subr.bf16.mxu0 %v4680_v0 }
 0xb42   :  { %4515 = vmatpush3.bf16.msra.mxu0 %v4675_v20 }
 0xbdd   :  { %v2932_v21 = vpop.f32.mrf.mxu0 }
 0xbde   :  { %v2938_v22 = vadd.f32 %v2932_v21, %v2786_v61 }
 0xbdf   :  { %v4466_v23 = vpop.f32.mrf.mxu0 }
 0xbe1   :  { %v2935_v24 = vpop.f32.mrf.mxu0 }
 0xbe3   :  { %v4467_v25 = vpop.f32.mrf.mxu0 }
 0xbe5   :  { %v3084_v26 = vpop.f32.mrf.mxu1  ;;  %v3130_v27 = vpop.f32.mrf.mxu0 }
 0xbe6   :  { %v3090_v28 = vadd.f32 %v3084_v26, %v2938_v22  ;;  %v3136_v29 = vpack.c.bf16 %v3130_v27, %v3130_v27 }
 0xbe7   :  { %v4498_v30 = vpop.f32.mrf.mxu0  ;;  %v4492_v31 = vpop.f32.mrf.mxu1 }
 0xbe8   :  { %4517 = vmatmul.mubr.bf16.vlgmr.msra.gmra.mxu0 %v3136_v29 }
 0xbe9   :  { %v3133_v32 = vpop.f32.mrf.mxu0  ;;  %v3087_v33 = vpop.f32.mrf.mxu1 }
 0xbeb   :  { %v4499_v0 = vpop.f32.mrf.mxu0  ;;  %v4493_v34 = vpop.f32.mrf.mxu1 }
 0xca8   :  { %v3236_v36 = vpop.f32.mrf.mxu0 }
 0xca9   :  { %v3242_v38 = vadd.f32 %v3236_v36, %v3090_v28 }
 0xcaa   :  { %v4518_v39 = vpop.f32.mrf.mxu0 }
 0xcab   :  { %v3250_v41 = vadd.f32 %v3706_v37, %v3242_v38 }
 0xcac   :  { %v3239_v42 = vpop.f32.mrf.mxu0 }
 0xcad   :  { %v3251_v43 = vadd.f32 %v3250_v41, %v1871_v40 }
 0xcae   :  { %v4519_v44 = vpop.f32.mrf.mxu0 }
 0xcaf   :  { %v3252_v45 = vmax.f32 %v3251_v43, 0.0 }
 0xcb1   :  { %v3253_v46 = vpack.c.bf16 %v3252_v45, %v3252_v45 }
 0xcb3   :  { %3254 = vst [vmem:[%s5757_s14] sm:$0xf] %v3253_v46 }

// kernel: resnet18_forward.17
= control target key start
LH: loop header
LB: loop body
LE: loop exit
PB: predicated region body
PF: predicated region fallthrough
CT: control target
= control target key end

     0   :  { %v439_v0 = vmov 0.0   ;;  %vm440_vm0 = vmmov 0   ;;  %vm29_vm1 = vcmask 64512   ;;  %s547_s0 = inlined_call_operand.vmem [shape: bf16[8,128], index: 0, kind: input, shape index: {}]   ;;  %s548_s1 = inlined_call_operand.vmem [shape: f32[8,8], index: 1, kind: input, shape index: {}]   ;;  %s549_s2 = inlined_call_operand.vmem [shape: bf16[128,128], index: 2, kind: input, shape index: {}]   ;;  %s550_s4 = inlined_call_operand.vmem [shape: bf16[128,128], index: 4, kind: input, shape index: {}]   ;;  %s551_s3 = inlined_call_operand.vmem [shape: f32[1,128], index: 3, kind: input, shape index: {}]   ;;  %s552_s6 = inlined_call_operand.vmem [shape: f32[8,128], index: 6, kind: output, shape index: {0}]   ;;  %s553_s5 = inlined_call_operand.vmem [shape: f32[1,128], index: 5, kind: input, shape index: {}]   ;;  %s554_s7 = inlined_call_operand.vmem [shape: f32[8,128], index: 7, kind: output, shape index: {1}]  }
   0x1   :  { %376 = vmatprep.subr.mxu0 %v439_v0  ;;  %v27_v1 = vld [vmem:[%s547_s0] sm:$0xf]  ;;  %378 = vmatprep.mubr.msk.f32.mxu0 %vm440_vm0, %v439_v0  ;;  %v423_v4 = vld [vmem:[%s549_s2 + $0x38] sm:$0xff]   ;;  %v424_v5 = vld [vmem:[%s549_s2 + $0x30] sm:$0xff]  }
   0x2   :  { %v26_v2 = vld [vmem:[%s548_s1] sm:$0xff]  ;;  %v28_v3 = vunpack.c.l.bf16 %v27_v1  ;;  %381 = vmatprep.subr.bf16.mxu1 %v439_v0  ;;  %397 = vmatprep.mubr.msk.bf16.mxu1 %vm440_vm0, %v439_v0  ;;  %v425_v6 = vld [vmem:[%s549_s2 + $0x28] sm:$0xff]   ;;  %v427_v8 = vld [vmem:[%s549_s2 + $0x18] sm:$0xff]  }
   0x3   :  { %382 = vmatpush3.bf16.msra.mxu1 %v423_v4  ;;  %v426_v7 = vld [vmem:[%s549_s2 + $0x20] sm:$0xff]   ;;  %v428_v9 = vld [vmem:[%s549_s2 + $0x10] sm:$0xff]   ;;  %v429_v10 = vld [vmem:[%s549_s2 + $0x8] sm:$0xff]  }
   0x4   :  { %377 = vmatpush3.msra.mxu0 %v28_v3  ;;  %383 = vmatprep.subr.bf16.mxu1 %v439_v0  ;;  %v430_v11 = vld [vmem:[%s549_s2] sm:$0xff]   ;;  %v431_v12 = vld [vmem:[%s550_s4 + $0x38] sm:$0xff]   ;;  %v432_v13 = vld [vmem:[%s550_s4 + $0x30] sm:$0xff]  }
   0x5   :  { %379 = vmatmul.mubr.msk.f32.vlgmr.msra.gmra.mxu0 %vm29_vm1, %v26_v2  ;;  %401 = vmatprep.subr.bf16.mxu0 %v439_v0  ;;  %v433_v14 = vld [vmem:[%s550_s4 + $0x28] sm:$0xff]   ;;  %v434_v15 = vld [vmem:[%s550_s4 + $0x20] sm:$0xff]   ;;  %v435_v16 = vld [vmem:[%s550_s4 + $0x18] sm:$0xff]  }
   0x6   :  { %417 = vmatprep.mubr.msk.bf16.mxu0 %vm440_vm0, %v439_v0  ;;  %402 = vmatpush3.bf16.msra.mxu0 %v431_v12  ;;  %v436_v17 = vld [vmem:[%s550_s4 + $0x10] sm:$0xff]   ;;  %v437_v18 = vld [vmem:[%s550_s4 + $0x8] sm:$0xff]   ;;  %v438_v22 = vld [vmem:[%s550_s4] sm:$0xff]  }
   0x7   :  { %384 = vmatpush3.bf16.msra.mxu1 %v424_v5  ;;  %403 = vmatprep.subr.bf16.mxu0 %v439_v0  ;;  %v338_v23 = vld [vmem:[%s551_s3] ss:$0 sm:$0xff] }
   0x8   :  { %385 = vmatprep.subr.bf16.mxu1 %v439_v0  ;;  %v347_v30 = vld [vmem:[%s553_s5] ss:$0 sm:$0xff] }
   0xa   :  { %404 = vmatpush3.bf16.msra.mxu0 %v432_v13 }
   0xb   :  { %386 = vmatpush3.bf16.msra.mxu1 %v425_v6  ;;  %405 = vmatprep.subr.bf16.mxu0 %v439_v0 }
   0xc   :  { %387 = vmatprep.subr.bf16.mxu1 %v439_v0 }
   0xe   :  { %406 = vmatpush3.bf16.msra.mxu0 %v433_v14 }
   0xf   :  { %388 = vmatpush3.bf16.msra.mxu1 %v426_v7  ;;  %407 = vmatprep.subr.bf16.mxu0 %v439_v0 }
  0x10   :  { %389 = vmatprep.subr.bf16.mxu1 %v439_v0 }
  0x12   :  { %408 = vmatpush3.bf16.msra.mxu0 %v434_v15 }
  0x13   :  { %390 = vmatpush3.bf16.msra.mxu1 %v427_v8  ;;  %409 = vmatprep.subr.bf16.mxu0 %v439_v0 }
  0x14   :  { %391 = vmatprep.subr.bf16.mxu1 %v439_v0 }
  0x16   :  { %410 = vmatpush3.bf16.msra.mxu0 %v435_v16 }
  0x17   :  { %392 = vmatpush3.bf16.msra.mxu1 %v428_v9  ;;  %411 = vmatprep.subr.bf16.mxu0 %v439_v0 }
  0x18   :  { %393 = vmatprep.subr.bf16.mxu1 %v439_v0 }
  0x1a   :  { %412 = vmatpush3.bf16.msra.mxu0 %v436_v17 }
  0x1b   :  { %394 = vmatpush3.bf16.msra.mxu1 %v429_v10  ;;  %413 = vmatprep.subr.bf16.mxu0 %v439_v0 }
  0x1c   :  { %395 = vmatprep.subr.bf16.mxu1 %v439_v0 }
  0x1e   :  { %414 = vmatpush3.bf16.msra.mxu0 %v437_v18 }
  0x1f   :  { %396 = vmatpush3.bf16.msra.mxu1 %v430_v11  ;;  %415 = vmatprep.subr.bf16.mxu0 %v439_v0 }
  0x22   :  { %416 = vmatpush3.bf16.msra.mxu0 %v438_v22 }
  0xc5   :  { %v99_v19 = vpop.f32.mrf.mxu0 }
  0xc6   :  { %v103_v20 = vpack.c.bf16 %v99_v19, %v99_v19 }
  0xc7   :  { %v380_v21 = vpop.f32.mrf.mxu0 }
  0xc8   :  { %398 = vmatmul.mubr.bf16.vlgmr.msra.gmra.mxu1 %v103_v20 }
 0x188   :  { %v209_v24 = vpop.f32.mrf.mxu1 }
 0x189   :  { %v210_v25 = vadd.f32 %v338_v23, %v209_v24 }
 0x18a   :  { %v399_v26 = vpop.f32.mrf.mxu1 }
 0x18b   :  { %215 = vst [vmem:[%s552_s6] sm:$0xff] %v210_v25  ;;  %v216_v27 = vpack.c.bf16 %v210_v25, %v210_v25 }
 0x18c   :  { %v212_v28 = vpop.f32.mrf.mxu1 }
 0x18d   :  { %418 = vmatmul.mubr.bf16.vlgmr.msra.gmra.mxu0 %v216_v27 }
 0x18e   :  { %v400_v29 = vpop.f32.mrf.mxu1 }
 0x24d   :  { %v322_v31 = vpop.f32.mrf.mxu0 }
 0x24e   :  { %v323_v32 = vadd.f32 %v347_v30, %v322_v31 }
 0x24f   :  { %v419_v33 = vpop.f32.mrf.mxu0 }
 0x250   :  { %328 = vst [vmem:[%s554_s7] sm:$0xff] %v323_v32 }
 0x251   :  { %v325_v34 = vpop.f32.mrf.mxu0 }
 0x253   :  { %v420_v35 = vpop.f32.mrf.mxu0 }

</bundles_post_ra>
